<compile_context>
chip_gen: v7x
topology: tpu7x:2x2x1
jax: 0.10.0
libtpu: 0.0.40
codegen_flags: <defaults>
</compile_context>

<pallas_src>
import functools

import jax
import jax.numpy as jnp
from jax.experimental import pallas as pl
from jax.experimental.pallas import tpu as pltpu

GEN_OUT_LINEAR = 100
_VMEM_LIMIT = 32 * 1024 * 1024


def _round_up(x, m):
    return (x + m - 1) // m * m


# ---------------------------------------------------------------------------
# Generic row-tiled matmul (+ optional activation) kernel
# ---------------------------------------------------------------------------
def _matmul_act_kernel(x_ref, w_ref, o_ref, *, activation):
    acc = jnp.dot(x_ref[...], w_ref[...], preferred_element_type=jnp.float32)
    if activation == "relu":
        acc = jnp.maximum(acc, 0.0)
    elif activation == "tanh":
        acc = jnp.tanh(acc)
    o_ref[...] = acc.astype(o_ref.dtype)


def matmul_act(x, w, activation="none", out_dtype=jnp.bfloat16):
    """out = act(x @ w); bf16 MXU operands, f32 accumulation, row-tiled over M."""
    M, K = x.shape
    K2, N = w.shape
    assert K == K2
    x = x.astype(jnp.bfloat16)
    w = w.astype(jnp.bfloat16)

    if M <= 1024:                       # latency-bound small case: one block, no splitting
        tm = _round_up(M, 16)
    else:                               # large M: pipelined 512-row tiles
        tm = 512
    Mp = _round_up(M, tm)
    if Mp != M:
        x = jnp.pad(x, ((0, Mp - M), (0, 0)))

    out = pl.pallas_call(
        functools.partial(_matmul_act_kernel, activation=activation),
        out_shape=jax.ShapeDtypeStruct((Mp, N), out_dtype),
        grid_spec=pltpu.PrefetchScalarGridSpec(
            num_scalar_prefetch=0,
            grid=(Mp // tm,),
            in_specs=[pl.BlockSpec((tm, K), lambda i: (i, 0)),
                      pl.BlockSpec((K, N), lambda i: (0, 0))],
            out_specs=pl.BlockSpec((tm, N), lambda i: (i, 0))),
        compiler_params=pltpu.CompilerParams(
            dimension_semantics=("parallel",),
            vmem_limit_bytes=_VMEM_LIMIT),
    )(x, w)
    return out[:M] if Mp != M else out


# ---------------------------------------------------------------------------
# Fused "head": Linear(10->100)+ReLU, concat([z, y]), ConvT(200->256, 4, 1, 0)
# ---------------------------------------------------------------------------
def _head_kernel(y_ref, z_ref, lw_ref, lb_ref, wt_ref, wb_ref, o_ref):
    # Linear + ReLU (bias add / ReLU in f32)
    y100 = jnp.dot(y_ref[...], lw_ref[...], preferred_element_type=jnp.float32)
    y100 = jnp.maximum(y100 + lb_ref[...], 0.0)
    # concat([z, y100]) @ w1  ==  z @ w1_top + y100 @ w1_bot
    acc = jnp.dot(z_ref[...], wt_ref[...], preferred_element_type=jnp.float32)
    acc = acc + jnp.dot(y100.astype(jnp.bfloat16), wb_ref[...],
                        preferred_element_type=jnp.float32)
    o_ref[...] = acc.astype(o_ref.dtype)


def head_linear_concat_convt1(y, z, lin_w_t, lin_b, w1_top, w1_bot):
    """y: (B, 10), z: (B, 100) -> (B, 16*256) bf16, column order (kh, kw, cout)."""
    B = y.shape[0]
    N = w1_top.shape[1]
    y = y.astype(jnp.bfloat16)
    z = z.astype(jnp.bfloat16)
    tm = _round_up(B, 16) if B <= 256 else 256
    Bp = _round_up(B, tm)
    if Bp != B:
        y = jnp.pad(y, ((0, Bp - B), (0, 0)))
        z = jnp.pad(z, ((0, Bp - B), (0, 0)))

    out = pl.pallas_call(
        _head_kernel,
        out_shape=jax.ShapeDtypeStruct((Bp, N), jnp.bfloat16),
        grid_spec=pltpu.PrefetchScalarGridSpec(
            num_scalar_prefetch=0,
            grid=(Bp // tm,),
            in_specs=[pl.BlockSpec((tm, 10), lambda i: (i, 0)),
                      pl.BlockSpec((tm, 100), lambda i: (i, 0)),
                      pl.BlockSpec((10, 100), lambda i: (0, 0)),
                      pl.BlockSpec((1, 100), lambda i: (0, 0)),
                      pl.BlockSpec((100, N), lambda i: (0, 0)),
                      pl.BlockSpec((100, N), lambda i: (0, 0))],
            out_specs=pl.BlockSpec((tm, N), lambda i: (i, 0))),
        compiler_params=pltpu.CompilerParams(
            dimension_semantics=("parallel",),
            vmem_limit_bytes=_VMEM_LIMIT),
    )(y, z, lin_w_t, lin_b, w1_top, w1_bot)
    return out[:B] if Bp != B else out


# ---------------------------------------------------------------------------
# Training-mode BatchNorm2d + ReLU (per-channel over rows = B*H*W)
# ---------------------------------------------------------------------------
def _bn_relu_fused_kernel(x_ref, g_ref, b_ref, o_ref):
    x = x_ref[...].astype(jnp.float32)
    mean = jnp.mean(x, axis=0, keepdims=True)
    var = jnp.mean(jnp.square(x - mean), axis=0, keepdims=True)
    scale = g_ref[...] * jax.lax.rsqrt(var + 1e-5)
    o_ref[...] = jnp.maximum((x - mean) * scale + b_ref[...], 0.0).astype(o_ref.dtype)


def _bn_stats_kernel(x_ref, g_ref, b_ref, scale_ref, shift_ref, sum_sc, sq_sc,
                     *, rows_total, tr):
    i = pl.program_id(0)

    @pl.when(i == 0)
    def _():
        sum_sc[...] = jnp.zeros_like(sum_sc)
        sq_sc[...] = jnp.zeros_like(sq_sc)

    x = x_ref[...].astype(jnp.float32)
    row = i * tr + jax.lax.broadcasted_iota(jnp.int32, x.shape, 0)
    x = jnp.where(row < rows_total, x, 0.0)           # mask padded tail rows
    sum_sc[...] += jnp.sum(x, axis=0, keepdims=True)
    sq_sc[...] += jnp.sum(x * x, axis=0, keepdims=True)

    @pl.when(i == pl.num_programs(0) - 1)
    def _():
        inv_n = jnp.float32(1.0 / rows_total)
        mean = sum_sc[...] * inv_n
        var = sq_sc[...] * inv_n - mean * mean
        scale = g_ref[...] * jax.lax.rsqrt(var + 1e-5)
        scale_ref[...] = scale
        shift_ref[...] = b_ref[...] - mean * scale


def _bn_apply_kernel(x_ref, scale_ref, shift_ref, o_ref):
    x = x_ref[...].astype(jnp.float32)
    o_ref[...] = jnp.maximum(x * scale_ref[...] + shift_ref[...], 0.0).astype(o_ref.dtype)


def batchnorm_relu(x_rows, gamma, beta, out_dtype=jnp.bfloat16, force_two_pass=False):
    """Training-mode BatchNorm (batch stats, biased var, eps=1e-5) + ReLU on (R, C)."""
    R, C = x_rows.shape
    gamma = gamma.reshape(1, C).astype(jnp.float32)
    beta = beta.reshape(1, C).astype(jnp.float32)

    small = R * C * 8 <= 8 * 1024 * 1024
    if small and not force_two_pass:
        return pl.pallas_call(
            _bn_relu_fused_kernel,
            out_shape=jax.ShapeDtypeStruct((R, C), out_dtype),
            in_specs=[pl.BlockSpec(memory_space=pltpu.MemorySpace.VMEM)] * 3,
            out_specs=pl.BlockSpec(memory_space=pltpu.MemorySpace.VMEM),
            compiler_params=pltpu.CompilerParams(vmem_limit_bytes=_VMEM_LIMIT),
        )(x_rows, gamma, beta)

    # Gridded two-pass path for large activations.
    tr = 512
    Rp = _round_up(R, tr)
    x_p = jnp.pad(x_rows, ((0, Rp - R), (0, 0))) if Rp != R else x_rows
    nsteps = Rp // tr

    scale, shift = pl.pallas_call(
        functools.partial(_bn_stats_kernel, rows_total=R, tr=tr),
        out_shape=(jax.ShapeDtypeStruct((1, C), jnp.float32),
                   jax.ShapeDtypeStruct((1, C), jnp.float32)),
        grid_spec=pltpu.PrefetchScalarGridSpec(
            num_scalar_prefetch=0,
            grid=(nsteps,),
            in_specs=[pl.BlockSpec((tr, C), lambda i: (i, 0)),
                      pl.BlockSpec((1, C), lambda i: (0, 0)),
                      pl.BlockSpec((1, C), lambda i: (0, 0))],
            out_specs=(pl.BlockSpec((1, C), lambda i: (0, 0)),
                       pl.BlockSpec((1, C), lambda i: (0, 0))),
            scratch_shapes=[pltpu.VMEM((1, C), jnp.float32),
                            pltpu.VMEM((1, C), jnp.float32)]),
        compiler_params=pltpu.CompilerParams(
            dimension_semantics=("arbitrary",),
            vmem_limit_bytes=_VMEM_LIMIT),
    )(x_p, gamma, beta)

    out = pl.pallas_call(
        _bn_apply_kernel,
        out_shape=jax.ShapeDtypeStruct((Rp, C), out_dtype),
        grid_spec=pltpu.PrefetchScalarGridSpec(
            num_scalar_prefetch=0,
            grid=(nsteps,),
            in_specs=[pl.BlockSpec((tr, C), lambda i: (i, 0)),
                      pl.BlockSpec((1, C), lambda i: (0, 0)),
                      pl.BlockSpec((1, C), lambda i: (0, 0))],
            out_specs=pl.BlockSpec((tr, C), lambda i: (i, 0))),
        compiler_params=pltpu.CompilerParams(
            dimension_semantics=("parallel",),
            vmem_limit_bytes=_VMEM_LIMIT),
    )(x_p, scale, shift)
    return out[:R] if Rp != R else out


# ---------------------------------------------------------------------------
# ConvTranspose2d(k=4, s=2, p=1, bias=False) via 2x2-patch decomposition
#   - patch/interleave layout glue stays in XLA, matmul runs in Pallas.
# ---------------------------------------------------------------------------
def _extract_patches_s2(h):
    """NHWC (B,H,W,C) -> 2x2 patch matrix (B*(H+1)*(W+1), 4*C), K order (pr, pc, cin)."""
    B, H, W, C = h.shape
    xp = jnp.pad(h, ((0, 0), (1, 1), (1, 1), (0, 0)))
    p = jnp.stack([xp[:, 0:H + 1, 0:W + 1, :],
                   xp[:, 0:H + 1, 1:W + 2, :],
                   xp[:, 1:H + 2, 0:W + 1, :],
                   xp[:, 1:H + 2, 1:W + 2, :]], axis=3)
    return p.reshape(B * (H + 1) * (W + 1), 4 * C)


def _assemble_convt_output(o, B, H, W, cout):
    """(B*(H+1)*(W+1), 4*cout) with N order (dr, dc, cout) -> NHWC (B, 2H, 2W, cout)."""
    o = o.reshape(B, H + 1, W + 1, 2, 2, cout)
    o = o.transpose(0, 1, 3, 2, 4, 5).reshape(B, 2 * (H + 1), 2 * (W + 1), cout)
    return o[:, 1:2 * H + 1, 1:2 * W + 1, :]


def convt_s2_block(h, w_mat, cout, activation="none", out_dtype=jnp.bfloat16):
    B, H, W, _ = h.shape
    p = _extract_patches_s2(h)
    o = matmul_act(p, w_mat, activation=activation, out_dtype=out_dtype)
    return _assemble_convt_output(o, B, H, W, cout)


def convt_s2_weight_to_patch_matmul(w):
    """PyTorch ConvTranspose2d weight (Cin, Cout, 4, 4) -> (4*Cin, 4*Cout):
    W[(pr,pc,cin),(dr,dc,cout)] = w[cin, cout, 2*(1-pr)+dr, 2*(1-pc)+dc]."""
    cin, cout = w.shape[0], w.shape[1]
    wr = w.reshape(cin, cout, 2, 2, 2, 2)     # (cin, cout, kh_hi, dr, kw_hi, dc)
    wr = wr[:, :, ::-1, :, ::-1, :]           # kh_hi -> pr, kw_hi -> pc
    return wr.transpose(2, 4, 0, 3, 5, 1).reshape(4 * cin, 4 * cout)


# ---------------------------------------------------------------------------
# Parameters (PyTorch-layout synthetic init) and one-time matmul-layout prep
# ---------------------------------------------------------------------------
def init_params(key):
    ks = jax.random.split(key, 12)

    def n(k, shape, scale=0.05):
        return scale * jax.random.normal(k, shape, jnp.float32)

    p = {}
    p["lin_w"] = n(ks[0], (GEN_OUT_LINEAR, 10))     # nn.Linear(10, 100): (out, in)
    p["lin_b"] = n(ks[1], (GEN_OUT_LINEAR,))
    p["w1"] = n(ks[2], (200, 256, 4, 4))            # ConvT(200->256, 4, 1, 0, bias=False)
    p["g1"] = 1.0 + n(ks[3], (256,)); p["b1"] = n(ks[4], (256,))
    p["w2"] = n(ks[5], (256, 128, 4, 4))            # ConvT(256->128, 4, 2, 1, bias=False)
    p["g2"] = 1.0 + n(ks[6], (128,)); p["b2"] = n(ks[7], (128,))
    p["w3"] = n(ks[8], (128, 64, 4, 4))             # ConvT(128->64, 4, 2, 1, bias=False)
    p["g3"] = 1.0 + n(ks[9], (64,)); p["b3"] = n(ks[10], (64,))
    p["w4"] = n(ks[11], (64, 1, 4, 4))              # ConvT(64->1, 4, 2, 1, bias=False)
    return p


def prepare_params(p):
    """Run once outside jit: convert PyTorch-layout params to matmul-ready bf16 weights."""
    w1m = p["w1"].transpose(0, 2, 3, 1).reshape(200, 16 * 256)   # cols (kh, kw, cout)
    return {
        "lin_w_t": p["lin_w"].T.astype(jnp.bfloat16),            # (10, 100)
        "lin_b": p["lin_b"].reshape(1, -1).astype(jnp.float32),
        "w1_top": w1m[:100].astype(jnp.bfloat16),
        "w1_bot": w1m[100:].astype(jnp.bfloat16),
        "w2m": convt_s2_weight_to_patch_matmul(p["w2"]).astype(jnp.bfloat16),
        "w3m": convt_s2_weight_to_patch_matmul(p["w3"]).astype(jnp.bfloat16),
        "w4m": convt_s2_weight_to_patch_matmul(p["w4"]).astype(jnp.bfloat16),
        "g1": p["g1"], "b1": p["b1"],
        "g2": p["g2"], "b2": p["b2"],
        "g3": p["g3"], "b3": p["b3"],
    }


# ---------------------------------------------------------------------------
# Forward pass (external interface matches PyTorch NCHW)
# ---------------------------------------------------------------------------
def mnist_generator_forward(mp, x, y):
    B = x.shape[0]
    z = x.reshape(B, 100)
    y = y.reshape(-1, 10)

    # ylabel Linear+ReLU, concat, layer1 ConvT(200->256, 4, 1, 0): fused kernel
    h = head_linear_concat_convt1(y, z, mp["lin_w_t"], mp["lin_b"],
                                  mp["w1_top"], mp["w1_bot"])          # (B, 16*256)
    h = batchnorm_relu(h.reshape(B * 16, 256), mp["g1"], mp["b1"])
    h = h.reshape(B, 4, 4, 256)                                        # NHWC

    # layer2: ConvT(256->128) + BN + ReLU : 4x4 -> 8x8
    h = convt_s2_block(h, mp["w2m"], 128)
    h = batchnorm_relu(h.reshape(B * 64, 128), mp["g2"], mp["b2"]).reshape(B, 8, 8, 128)

    # layer3: ConvT(128->64) + BN + ReLU : 8x8 -> 16x16
    h = convt_s2_block(h, mp["w3m"], 64)
    h = batchnorm_relu(h.reshape(B * 256, 64), mp["g3"], mp["b3"]).reshape(B, 16, 16, 64)

    # layer4: ConvT(64->1) + Tanh : 16x16 -> 32x32
    out = convt_s2_block(h, mp["w4m"], 1, activation="tanh", out_dtype=jnp.float32)
    return out.transpose(0, 3, 1, 2)                                   # (B, 1, 32, 32)


# ---------------------------------------------------------------------------
# Reference ConvTranspose (for self-check only)
# ---------------------------------------------------------------------------
def _convt_ref_nhwc(x, w):
    """ConvTranspose2d(k=4, s=2, p=1, bias=False), NHWC in/out, f32."""
    B, H, W, _ = x.shape
    cout = w.shape[1]
    buf = jnp.zeros((B, 2 * H + 2, 2 * W + 2, cout), jnp.float32)
    for kh in range(4):
        for kw in range(4):
            contrib = jnp.einsum("bhwc,cd->bhwd", x, w[:, :, kh, kw])
            buf = buf.at[:, kh:kh + 2 * H:2, kw:kw + 2 * W:2, :].add(contrib)
    return buf[:, 1:2 * H + 1, 1:2 * W + 1, :]


if __name__ == "__main__":
    key = jax.random.PRNGKey(0)
    kp, kx, ky, kt1, kt2, kt3 = jax.random.split(key, 6)
    params = init_params(kp)
    mp = prepare_params(params)

    B = 2
    x = jax.random.normal(kx, (B, 100, 1, 1), jnp.float32)   # z latent (NCHW)
    y = jax.random.normal(ky, (B, 10), jnp.float32)          # label input

    out = jax.jit(mnist_generator_forward)(mp, x, y)
    out = jax.block_until_ready(out)
    assert out.shape == (B, 1, 32, 32), out.shape
    assert bool(jnp.all(jnp.isfinite(out)))
    assert bool(jnp.all(jnp.abs(out) <= 1.0))                # tanh output range

    # Self-check 1: patch-decomposed ConvTranspose matches a direct reference.
    h_test = jax.random.normal(kt1, (2, 8, 8, 128), jnp.float32)
    h_bf = h_test.astype(jnp.bfloat16).astype(jnp.float32)
    w_bf = params["w3"].astype(jnp.bfloat16).astype(jnp.float32)
    got = convt_s2_block(h_bf, convt_s2_weight_to_patch_matmul(w_bf), 64,
                         out_dtype=jnp.float32)
    ref = jax.block_until_ready(_convt_ref_nhwc(h_bf, w_bf))
    assert got.shape == ref.shape
    assert bool(jnp.max(jnp.abs(got - ref)) <= 5e-2), float(jnp.max(jnp.abs(got - ref)))

    # Self-check 2: gridded two-pass BatchNorm+ReLU path (masked padded tail).
    xb = jax.random.normal(kt2, (1000, 128), jnp.float32)
    g = 1.0 + 0.05 * jax.random.normal(kt3, (128,), jnp.float32)
    b = 0.05 * jax.random.normal(kt3, (128,), jnp.float32)
    got_bn = batchnorm_relu(xb, g, b, out_dtype=jnp.float32, force_two_pass=True)
    mean = jnp.mean(xb, axis=0)
    var = jnp.mean((xb - mean) ** 2, axis=0)
    ref_bn = jnp.maximum((xb - mean) * (g * jax.lax.rsqrt(var + 1e-5)) + b, 0.0)
    got_bn = jax.block_until_ready(got_bn)
    assert bool(jnp.max(jnp.abs(got_bn - ref_bn)) <= 5e-2), \
        float(jnp.max(jnp.abs(got_bn - ref_bn)))

    print("KERNEL_OK")
</pallas_src>

<mosaic_0001>
module attributes {stable_mosaic.version = 11 : i64} {
  func.func @_bn_relu_fused_kernel(%arg0: memref<32x256xbf16, #tpu.memory_space<vmem>>, %arg1: memref<1x256xf32, #tpu.memory_space<vmem>>, %arg2: memref<1x256xf32, #tpu.memory_space<vmem>>, %arg3: memref<32x256xbf16, #tpu.memory_space<vmem>>) attributes {dimension_semantics = [], scalar_prefetch = 0 : i64, scratch_operands = 0 : i64, tpu.core_type = #tpu.core_type<tc>} {
    %c0 = arith.constant 0 : index
    %c0_0 = arith.constant 0 : index
    %0 = vector.load %arg0[%c0, %c0_0] : memref<32x256xbf16, #tpu.memory_space<vmem>>, vector<32x256xbf16>
    %1 = arith.extf %0 : vector<32x256xbf16> to vector<32x256xf32>
    %cst = arith.constant dense<0.000000e+00> : vector<256xf32>
    %2 = vector.multi_reduction <add>, %1, %cst [0] : vector<32x256xf32> to vector<256xf32>
    %3 = vector.shape_cast %2 : vector<256xf32> to vector<1x256xf32>
    %cst_1 = arith.constant 3.200000e+01 : f32
    %4 = vector.broadcast %cst_1 : f32 to vector<1x256xf32>
    %5 = arith.divf %3, %4 : vector<1x256xf32>
    %6 = vector.broadcast %5 : vector<1x256xf32> to vector<32x256xf32>
    %7 = arith.subf %1, %6 : vector<32x256xf32>
    %8 = arith.mulf %7, %7 : vector<32x256xf32>
    %cst_2 = arith.constant dense<0.000000e+00> : vector<256xf32>
    %9 = vector.multi_reduction <add>, %8, %cst_2 [0] : vector<32x256xf32> to vector<256xf32>
    %10 = vector.shape_cast %9 : vector<256xf32> to vector<1x256xf32>
    %cst_3 = arith.constant 3.200000e+01 : f32
    %11 = vector.broadcast %cst_3 : f32 to vector<1x256xf32>
    %12 = arith.divf %10, %11 : vector<1x256xf32>
    %c0_4 = arith.constant 0 : index
    %c0_5 = arith.constant 0 : index
    %13 = vector.load %arg1[%c0_4, %c0_5] : memref<1x256xf32, #tpu.memory_space<vmem>>, vector<1x256xf32>
    %cst_6 = arith.constant 9.99999974E-6 : f32
    %14 = vector.broadcast %cst_6 : f32 to vector<1x256xf32>
    %15 = arith.addf %12, %14 : vector<1x256xf32>
    %16 = math.rsqrt %15 : vector<1x256xf32>
    %17 = arith.mulf %13, %16 : vector<1x256xf32>
    %18 = vector.broadcast %5 : vector<1x256xf32> to vector<32x256xf32>
    %19 = arith.subf %1, %18 : vector<32x256xf32>
    %20 = vector.broadcast %17 : vector<1x256xf32> to vector<32x256xf32>
    %21 = arith.mulf %19, %20 : vector<32x256xf32>
    %c0_7 = arith.constant 0 : index
    %c0_8 = arith.constant 0 : index
    %22 = vector.load %arg2[%c0_7, %c0_8] : memref<1x256xf32, #tpu.memory_space<vmem>>, vector<1x256xf32>
    %23 = vector.broadcast %22 : vector<1x256xf32> to vector<32x256xf32>
    %24 = arith.addf %21, %23 : vector<32x256xf32>
    %cst_9 = arith.constant 0.000000e+00 : f32
    %25 = vector.broadcast %cst_9 : f32 to vector<32x256xf32>
    %26 = arith.maximumf %24, %25 : vector<32x256xf32>
    %27 = arith.truncf %26 : vector<32x256xf32> to vector<32x256xbf16>
    %c0_10 = arith.constant 0 : index
    %c0_11 = arith.constant 0 : index
    %28 = vector.load %arg3[%c0_10, %c0_11] : memref<32x256xbf16, #tpu.memory_space<vmem>>, vector<32x256xbf16>
    tpu.vector_store %arg3[%c0_10, %c0_11], %27 {strides = array<i32>} : memref<32x256xbf16, #tpu.memory_space<vmem>>, vector<32x256xbf16>,
    return
  }
}

module attributes {stable_mosaic.version = 11 : i64} {
  func.func @_head_kernel(%arg0: i32, %arg1: memref<16x10xbf16, #tpu.memory_space<vmem>>, %arg2: memref<16x100xbf16, #tpu.memory_space<vmem>>, %arg3: memref<10x100xbf16, #tpu.memory_space<vmem>>, %arg4: memref<1x100xf32, #tpu.memory_space<vmem>>, %arg5: memref<100x4096xbf16, #tpu.memory_space<vmem>>, %arg6: memref<100x4096xbf16, #tpu.memory_space<vmem>>, %arg7: memref<16x4096xbf16, #tpu.memory_space<vmem>>) attributes {dimension_semantics = [#tpu.dimension_semantics<parallel>], iteration_bounds = array<i64: 1>, scalar_prefetch = 0 : i64, scratch_operands = 0 : i64, tpu.core_type = #tpu.core_type<tc>, window_params = [{transform_indices = @transform_0, window_bounds = array<i64: 16, 10>}, {transform_indices = @transform_1, window_bounds = array<i64: 16, 100>}, {pipeline_mode = #tpu.pipeline_mode<synchronous>, transform_indices = @transform_2, window_bounds = array<i64: 10, 100>}, {pipeline_mode = #tpu.pipeline_mode<synchronous>, transform_indices = @transform_3, window_bounds = array<i64: 1, 100>}, {pipeline_mode = #tpu.pipeline_mode<synchronous>, transform_indices = @transform_4, window_bounds = array<i64: 100, 4096>}, {pipeline_mode = #tpu.pipeline_mode<synchronous>, transform_indices = @transform_5, window_bounds = array<i64: 100, 4096>}, {transform_indices = @transform_6, window_bounds = array<i64: 16, 4096>}]} {
    %c0 = arith.constant 0 : index
    %c0_0 = arith.constant 0 : index
    %0 = vector.load %arg1[%c0, %c0_0] : memref<16x10xbf16, #tpu.memory_space<vmem>>, vector<16x10xbf16>
    %c0_1 = arith.constant 0 : index
    %c0_2 = arith.constant 0 : index
    %1 = vector.load %arg3[%c0_1, %c0_2] : memref<10x100xbf16, #tpu.memory_space<vmem>>, vector<10x100xbf16>
    %cst = arith.constant dense<0.000000e+00> : vector<16x100xf32>
    %2 = tpu.matmul %0, %1, %cst {dimension_numbers = #tpu.dot_dimension_numbers<[1], [0], [0], [1], [0, 0, 1, 1], [], []>} : vector<16x10xbf16>, vector<10x100xbf16>, vector<16x100xf32> -> vector<16x100xf32>
    %c0_3 = arith.constant 0 : index
    %c0_4 = arith.constant 0 : index
    %3 = vector.load %arg4[%c0_3, %c0_4] : memref<1x100xf32, #tpu.memory_space<vmem>>, vector<1x100xf32>
    %4 = vector.broadcast %3 : vector<1x100xf32> to vector<16x100xf32>
    %5 = arith.addf %2, %4 : vector<16x100xf32>
    %cst_5 = arith.constant 0.000000e+00 : f32
    %6 = vector.broadcast %cst_5 : f32 to vector<16x100xf32>
    %7 = arith.maximumf %5, %6 : vector<16x100xf32>
    %c0_6 = arith.constant 0 : index
    %c0_7 = arith.constant 0 : index
    %8 = vector.load %arg2[%c0_6, %c0_7] : memref<16x100xbf16, #tpu.memory_space<vmem>>, vector<16x100xbf16>
    %c0_8 = arith.constant 0 : index
    %c0_9 = arith.constant 0 : index
    %9 = vector.load %arg5[%c0_8, %c0_9] : memref<100x4096xbf16, #tpu.memory_space<vmem>>, vector<100x4096xbf16>
    %cst_10 = arith.constant dense<0.000000e+00> : vector<16x4096xf32>
    %10 = tpu.matmul %8, %9, %cst_10 {dimension_numbers = #tpu.dot_dimension_numbers<[1], [0], [0], [1], [0, 0, 1, 1], [], []>} : vector<16x100xbf16>, vector<100x4096xbf16>, vector<16x4096xf32> -> vector<16x4096xf32>
    %11 = arith.truncf %7 : vector<16x100xf32> to vector<16x100xbf16>
    %c0_11 = arith.constant 0 : index
    %c0_12 = arith.constant 0 : index
    %12 = vector.load %arg6[%c0_11, %c0_12] : memref<100x4096xbf16, #tpu.memory_space<vmem>>, vector<100x4096xbf16>
    %cst_13 = arith.constant dense<0.000000e+00> : vector<16x4096xf32>
    %13 = tpu.matmul %11, %12, %cst_13 {dimension_numbers = #tpu.dot_dimension_numbers<[1], [0], [0], [1], [0, 0, 1, 1], [], []>} : vector<16x100xbf16>, vector<100x4096xbf16>, vector<16x4096xf32> -> vector<16x4096xf32>
    %14 = arith.addf %10, %13 : vector<16x4096xf32>
    %15 = arith.truncf %14 : vector<16x4096xf32> to vector<16x4096xbf16>
    %c0_14 = arith.constant 0 : index
    %c0_15 = arith.constant 0 : index
    %16 = vector.load %arg7[%c0_14, %c0_15] : memref<16x4096xbf16, #tpu.memory_space<vmem>>, vector<16x4096xbf16>
    tpu.vector_store %arg7[%c0_14, %c0_15], %15 {strides = array<i32>} : memref<16x4096xbf16, #tpu.memory_space<vmem>>, vector<16x4096xbf16>,
    return
  }
  func.func @transform_0(%arg0: i32) -> (i32, i32) {
    %c0_i32 = arith.constant 0 : i32
    %c0_i32_0 = arith.constant 0 : i32
    return %arg0, %c0_i32 : i32, i32
  }
  func.func @transform_1(%arg0: i32) -> (i32, i32) {
    %c0_i32 = arith.constant 0 : i32
    %c0_i32_0 = arith.constant 0 : i32
    return %arg0, %c0_i32 : i32, i32
  }
  func.func @transform_2(%arg0: i32) -> (i32, i32) {
    %c0_i32 = arith.constant 0 : i32
    %c0_i32_0 = arith.constant 0 : i32
    %c0_i32_1 = arith.constant 0 : i32
    return %c0_i32, %c0_i32_0 : i32, i32
  }
  func.func @transform_3(%arg0: i32) -> (i32, i32) {
    %c0_i32 = arith.constant 0 : i32
    %c0_i32_0 = arith.constant 0 : i32
    %c0_i32_1 = arith.constant 0 : i32
    return %c0_i32, %c0_i32_0 : i32, i32
  }
  func.func @transform_4(%arg0: i32) -> (i32, i32) {
    %c0_i32 = arith.constant 0 : i32
    %c0_i32_0 = arith.constant 0 : i32
    %c0_i32_1 = arith.constant 0 : i32
    return %c0_i32, %c0_i32_0 : i32, i32
  }
  func.func @transform_5(%arg0: i32) -> (i32, i32) {
    %c0_i32 = arith.constant 0 : i32
    %c0_i32_0 = arith.constant 0 : i32
    %c0_i32_1 = arith.constant 0 : i32
    return %c0_i32, %c0_i32_0 : i32, i32
  }
  func.func @transform_6(%arg0: i32) -> (i32, i32) {
    %c0_i32 = arith.constant 0 : i32
    %c0_i32_0 = arith.constant 0 : i32
    return %arg0, %c0_i32 : i32, i32
  }
}

module attributes {stable_mosaic.version = 11 : i64} {
  func.func @_matmul_act_kernel(%arg0: i32, %arg1: memref<64x1024xbf16, #tpu.memory_space<vmem>>, %arg2: memref<1024x512xbf16, #tpu.memory_space<vmem>>, %arg3: memref<64x512xbf16, #tpu.memory_space<vmem>>) attributes {dimension_semantics = [#tpu.dimension_semantics<parallel>], iteration_bounds = array<i64: 1>, scalar_prefetch = 0 : i64, scratch_operands = 0 : i64, tpu.core_type = #tpu.core_type<tc>, window_params = [{transform_indices = @transform_0, window_bounds = array<i64: 64, 1024>}, {pipeline_mode = #tpu.pipeline_mode<synchronous>, transform_indices = @transform_1, window_bounds = array<i64: 1024, 512>}, {transform_indices = @transform_2, window_bounds = array<i64: 64, 512>}]} {
    %c0 = arith.constant 0 : index
    %c0_0 = arith.constant 0 : index
    %0 = vector.load %arg1[%c0, %c0_0] : memref<64x1024xbf16, #tpu.memory_space<vmem>>, vector<64x1024xbf16>
    %c0_1 = arith.constant 0 : index
    %c0_2 = arith.constant 0 : index
    %1 = vector.load %arg2[%c0_1, %c0_2] : memref<1024x512xbf16, #tpu.memory_space<vmem>>, vector<1024x512xbf16>
    %cst = arith.constant dense<0.000000e+00> : vector<64x512xf32>
    %2 = tpu.matmul %0, %1, %cst {dimension_numbers = #tpu.dot_dimension_numbers<[1], [0], [0], [1], [0, 0, 1, 1], [], []>} : vector<64x1024xbf16>, vector<1024x512xbf16>, vector<64x512xf32> -> vector<64x512xf32>
    %3 = arith.truncf %2 : vector<64x512xf32> to vector<64x512xbf16>
    %c0_3 = arith.constant 0 : index
    %c0_4 = arith.constant 0 : index
    %4 = vector.load %arg3[%c0_3, %c0_4] : memref<64x512xbf16, #tpu.memory_space<vmem>>, vector<64x512xbf16>
    tpu.vector_store %arg3[%c0_3, %c0_4], %3 {strides = array<i32>} : memref<64x512xbf16, #tpu.memory_space<vmem>>, vector<64x512xbf16>,
    return
  }
  func.func @transform_0(%arg0: i32) -> (i32, i32) {
    %c0_i32 = arith.constant 0 : i32
    %c0_i32_0 = arith.constant 0 : i32
    return %arg0, %c0_i32 : i32, i32
  }
  func.func @transform_1(%arg0: i32) -> (i32, i32) {
    %c0_i32 = arith.constant 0 : i32
    %c0_i32_0 = arith.constant 0 : i32
    %c0_i32_1 = arith.constant 0 : i32
    return %c0_i32, %c0_i32_0 : i32, i32
  }
  func.func @transform_2(%arg0: i32) -> (i32, i32) {
    %c0_i32 = arith.constant 0 : i32
    %c0_i32_0 = arith.constant 0 : i32
    return %arg0, %c0_i32 : i32, i32
  }
}

module attributes {stable_mosaic.version = 11 : i64} {
  func.func @_bn_relu_fused_kernel(%arg0: memref<128x128xbf16, #tpu.memory_space<vmem>>, %arg1: memref<1x128xf32, #tpu.memory_space<vmem>>, %arg2: memref<1x128xf32, #tpu.memory_space<vmem>>, %arg3: memref<128x128xbf16, #tpu.memory_space<vmem>>) attributes {dimension_semantics = [], scalar_prefetch = 0 : i64, scratch_operands = 0 : i64, tpu.core_type = #tpu.core_type<tc>} {
    %c0 = arith.constant 0 : index
    %c0_0 = arith.constant 0 : index
    %0 = vector.load %arg0[%c0, %c0_0] : memref<128x128xbf16, #tpu.memory_space<vmem>>, vector<128x128xbf16>
    %1 = arith.extf %0 : vector<128x128xbf16> to vector<128x128xf32>
    %cst = arith.constant dense<0.000000e+00> : vector<128xf32>
    %2 = vector.multi_reduction <add>, %1, %cst [0] : vector<128x128xf32> to vector<128xf32>
    %3 = vector.shape_cast %2 : vector<128xf32> to vector<1x128xf32>
    %cst_1 = arith.constant 1.280000e+02 : f32
    %4 = vector.broadcast %cst_1 : f32 to vector<1x128xf32>
    %5 = arith.divf %3, %4 : vector<1x128xf32>
    %6 = vector.broadcast %5 : vector<1x128xf32> to vector<128x128xf32>
    %7 = arith.subf %1, %6 : vector<128x128xf32>
    %8 = arith.mulf %7, %7 : vector<128x128xf32>
    %cst_2 = arith.constant dense<0.000000e+00> : vector<128xf32>
    %9 = vector.multi_reduction <add>, %8, %cst_2 [0] : vector<128x128xf32> to vector<128xf32>
    %10 = vector.shape_cast %9 : vector<128xf32> to vector<1x128xf32>
    %cst_3 = arith.constant 1.280000e+02 : f32
    %11 = vector.broadcast %cst_3 : f32 to vector<1x128xf32>
    %12 = arith.divf %10, %11 : vector<1x128xf32>
    %c0_4 = arith.constant 0 : index
    %c0_5 = arith.constant 0 : index
    %13 = vector.load %arg1[%c0_4, %c0_5] : memref<1x128xf32, #tpu.memory_space<vmem>>, vector<1x128xf32>
    %cst_6 = arith.constant 9.99999974E-6 : f32
    %14 = vector.broadcast %cst_6 : f32 to vector<1x128xf32>
    %15 = arith.addf %12, %14 : vector<1x128xf32>
    %16 = math.rsqrt %15 : vector<1x128xf32>
    %17 = arith.mulf %13, %16 : vector<1x128xf32>
    %18 = vector.broadcast %5 : vector<1x128xf32> to vector<128x128xf32>
    %19 = arith.subf %1, %18 : vector<128x128xf32>
    %20 = vector.broadcast %17 : vector<1x128xf32> to vector<128x128xf32>
    %21 = arith.mulf %19, %20 : vector<128x128xf32>
    %c0_7 = arith.constant 0 : index
    %c0_8 = arith.constant 0 : index
    %22 = vector.load %arg2[%c0_7, %c0_8] : memref<1x128xf32, #tpu.memory_space<vmem>>, vector<1x128xf32>
    %23 = vector.broadcast %22 : vector<1x128xf32> to vector<128x128xf32>
    %24 = arith.addf %21, %23 : vector<128x128xf32>
    %cst_9 = arith.constant 0.000000e+00 : f32
    %25 = vector.broadcast %cst_9 : f32 to vector<128x128xf32>
    %26 = arith.maximumf %24, %25 : vector<128x128xf32>
    %27 = arith.truncf %26 : vector<128x128xf32> to vector<128x128xbf16>
    %c0_10 = arith.constant 0 : index
    %c0_11 = arith.constant 0 : index
    %28 = vector.load %arg3[%c0_10, %c0_11] : memref<128x128xbf16, #tpu.memory_space<vmem>>, vector<128x128xbf16>
    tpu.vector_store %arg3[%c0_10, %c0_11], %27 {strides = array<i32>} : memref<128x128xbf16, #tpu.memory_space<vmem>>, vector<128x128xbf16>,
    return
  }
}

module attributes {stable_mosaic.version = 11 : i64} {
  func.func @_matmul_act_kernel(%arg0: i32, %arg1: memref<176x512xbf16, #tpu.memory_space<vmem>>, %arg2: memref<512x256xbf16, #tpu.memory_space<vmem>>, %arg3: memref<176x256xbf16, #tpu.memory_space<vmem>>) attributes {dimension_semantics = [#tpu.dimension_semantics<parallel>], iteration_bounds = array<i64: 1>, scalar_prefetch = 0 : i64, scratch_operands = 0 : i64, tpu.core_type = #tpu.core_type<tc>, window_params = [{transform_indices = @transform_0, window_bounds = array<i64: 176, 512>}, {pipeline_mode = #tpu.pipeline_mode<synchronous>, transform_indices = @transform_1, window_bounds = array<i64: 512, 256>}, {transform_indices = @transform_2, window_bounds = array<i64: 176, 256>}]} {
    %c0 = arith.constant 0 : index
    %c0_0 = arith.constant 0 : index
    %0 = vector.load %arg1[%c0, %c0_0] : memref<176x512xbf16, #tpu.memory_space<vmem>>, vector<176x512xbf16>
    %c0_1 = arith.constant 0 : index
    %c0_2 = arith.constant 0 : index
    %1 = vector.load %arg2[%c0_1, %c0_2] : memref<512x256xbf16, #tpu.memory_space<vmem>>, vector<512x256xbf16>
    %cst = arith.constant dense<0.000000e+00> : vector<176x256xf32>
    %2 = tpu.matmul %0, %1, %cst {dimension_numbers = #tpu.dot_dimension_numbers<[1], [0], [0], [1], [0, 0, 1, 1], [], []>} : vector<176x512xbf16>, vector<512x256xbf16>, vector<176x256xf32> -> vector<176x256xf32>
    %3 = arith.truncf %2 : vector<176x256xf32> to vector<176x256xbf16>
    %c0_3 = arith.constant 0 : index
    %c0_4 = arith.constant 0 : index
    %4 = vector.load %arg3[%c0_3, %c0_4] : memref<176x256xbf16, #tpu.memory_space<vmem>>, vector<176x256xbf16>
    tpu.vector_store %arg3[%c0_3, %c0_4], %3 {strides = array<i32>} : memref<176x256xbf16, #tpu.memory_space<vmem>>, vector<176x256xbf16>,
    return
  }
  func.func @transform_0(%arg0: i32) -> (i32, i32) {
    %c0_i32 = arith.constant 0 : i32
    %c0_i32_0 = arith.constant 0 : i32
    return %arg0, %c0_i32 : i32, i32
  }
  func.func @transform_1(%arg0: i32) -> (i32, i32) {
    %c0_i32 = arith.constant 0 : i32
    %c0_i32_0 = arith.constant 0 : i32
    %c0_i32_1 = arith.constant 0 : i32
    return %c0_i32, %c0_i32_0 : i32, i32
  }
  func.func @transform_2(%arg0: i32) -> (i32, i32) {
    %c0_i32 = arith.constant 0 : i32
    %c0_i32_0 = arith.constant 0 : i32
    return %arg0, %c0_i32 : i32, i32
  }
}

module attributes {stable_mosaic.version = 11 : i64} {
  func.func @_bn_relu_fused_kernel(%arg0: memref<512x64xbf16, #tpu.memory_space<vmem>>, %arg1: memref<1x64xf32, #tpu.memory_space<vmem>>, %arg2: memref<1x64xf32, #tpu.memory_space<vmem>>, %arg3: memref<512x64xbf16, #tpu.memory_space<vmem>>) attributes {dimension_semantics = [], scalar_prefetch = 0 : i64, scratch_operands = 0 : i64, tpu.core_type = #tpu.core_type<tc>} {
    %c0 = arith.constant 0 : index
    %c0_0 = arith.constant 0 : index
    %0 = vector.load %arg0[%c0, %c0_0] : memref<512x64xbf16, #tpu.memory_space<vmem>>, vector<512x64xbf16>
    %1 = arith.extf %0 : vector<512x64xbf16> to vector<512x64xf32>
    %cst = arith.constant dense<0.000000e+00> : vector<64xf32>
    %2 = vector.multi_reduction <add>, %1, %cst [0] : vector<512x64xf32> to vector<64xf32>
    %3 = vector.shape_cast %2 : vector<64xf32> to vector<1x64xf32>
    %cst_1 = arith.constant 5.120000e+02 : f32
    %4 = vector.broadcast %cst_1 : f32 to vector<1x64xf32>
    %5 = arith.divf %3, %4 : vector<1x64xf32>
    %6 = vector.broadcast %5 : vector<1x64xf32> to vector<512x64xf32>
    %7 = arith.subf %1, %6 : vector<512x64xf32>
    %8 = arith.mulf %7, %7 : vector<512x64xf32>
    %cst_2 = arith.constant dense<0.000000e+00> : vector<64xf32>
    %9 = vector.multi_reduction <add>, %8, %cst_2 [0] : vector<512x64xf32> to vector<64xf32>
    %10 = vector.shape_cast %9 : vector<64xf32> to vector<1x64xf32>
    %cst_3 = arith.constant 5.120000e+02 : f32
    %11 = vector.broadcast %cst_3 : f32 to vector<1x64xf32>
    %12 = arith.divf %10, %11 : vector<1x64xf32>
    %c0_4 = arith.constant 0 : index
    %c0_5 = arith.constant 0 : index
    %13 = vector.load %arg1[%c0_4, %c0_5] : memref<1x64xf32, #tpu.memory_space<vmem>>, vector<1x64xf32>
    %cst_6 = arith.constant 9.99999974E-6 : f32
    %14 = vector.broadcast %cst_6 : f32 to vector<1x64xf32>
    %15 = arith.addf %12, %14 : vector<1x64xf32>
    %16 = math.rsqrt %15 : vector<1x64xf32>
    %17 = arith.mulf %13, %16 : vector<1x64xf32>
    %18 = vector.broadcast %5 : vector<1x64xf32> to vector<512x64xf32>
    %19 = arith.subf %1, %18 : vector<512x64xf32>
    %20 = vector.broadcast %17 : vector<1x64xf32> to vector<512x64xf32>
    %21 = arith.mulf %19, %20 : vector<512x64xf32>
    %c0_7 = arith.constant 0 : index
    %c0_8 = arith.constant 0 : index
    %22 = vector.load %arg2[%c0_7, %c0_8] : memref<1x64xf32, #tpu.memory_space<vmem>>, vector<1x64xf32>
    %23 = vector.broadcast %22 : vector<1x64xf32> to vector<512x64xf32>
    %24 = arith.addf %21, %23 : vector<512x64xf32>
    %cst_9 = arith.constant 0.000000e+00 : f32
    %25 = vector.broadcast %cst_9 : f32 to vector<512x64xf32>
    %26 = arith.maximumf %24, %25 : vector<512x64xf32>
    %27 = arith.truncf %26 : vector<512x64xf32> to vector<512x64xbf16>
    %c0_10 = arith.constant 0 : index
    %c0_11 = arith.constant 0 : index
    %28 = vector.load %arg3[%c0_10, %c0_11] : memref<512x64xbf16, #tpu.memory_space<vmem>>, vector<512x64xbf16>
    tpu.vector_store %arg3[%c0_10, %c0_11], %27 {strides = array<i32>} : memref<512x64xbf16, #tpu.memory_space<vmem>>, vector<512x64xbf16>,
    return
  }
}

module attributes {stable_mosaic.version = 11 : i64} {
  func.func @_matmul_act_kernel(%arg0: i32, %arg1: memref<592x256xbf16, #tpu.memory_space<vmem>>, %arg2: memref<256x4xbf16, #tpu.memory_space<vmem>>, %arg3: memref<592x4xf32, #tpu.memory_space<vmem>>) attributes {dimension_semantics = [#tpu.dimension_semantics<parallel>], iteration_bounds = array<i64: 1>, scalar_prefetch = 0 : i64, scratch_operands = 0 : i64, tpu.core_type = #tpu.core_type<tc>, window_params = [{transform_indices = @transform_0, window_bounds = array<i64: 592, 256>}, {pipeline_mode = #tpu.pipeline_mode<synchronous>, transform_indices = @transform_1, window_bounds = array<i64: 256, 4>}, {transform_indices = @transform_2, window_bounds = array<i64: 592, 4>}]} {
    %c0 = arith.constant 0 : index
    %c0_0 = arith.constant 0 : index
    %0 = vector.load %arg1[%c0, %c0_0] : memref<592x256xbf16, #tpu.memory_space<vmem>>, vector<592x256xbf16>
    %c0_1 = arith.constant 0 : index
    %c0_2 = arith.constant 0 : index
    %1 = vector.load %arg2[%c0_1, %c0_2] : memref<256x4xbf16, #tpu.memory_space<vmem>>, vector<256x4xbf16>
    %cst = arith.constant dense<0.000000e+00> : vector<592x4xf32>
    %2 = tpu.matmul %0, %1, %cst {dimension_numbers = #tpu.dot_dimension_numbers<[1], [0], [0], [1], [0, 0, 1, 1], [], []>} : vector<592x256xbf16>, vector<256x4xbf16>, vector<592x4xf32> -> vector<592x4xf32>
    %3 = math.tanh %2 : vector<592x4xf32>
    %c0_3 = arith.constant 0 : index
    %c0_4 = arith.constant 0 : index
    %4 = vector.load %arg3[%c0_3, %c0_4] : memref<592x4xf32, #tpu.memory_space<vmem>>, vector<592x4xf32>
    tpu.vector_store %arg3[%c0_3, %c0_4], %3 {strides = array<i32>} : memref<592x4xf32, #tpu.memory_space<vmem>>, vector<592x4xf32>,
    return
  }
  func.func @transform_0(%arg0: i32) -> (i32, i32) {
    %c0_i32 = arith.constant 0 : i32
    %c0_i32_0 = arith.constant 0 : i32
    return %arg0, %c0_i32 : i32, i32
  }
  func.func @transform_1(%arg0: i32) -> (i32, i32) {
    %c0_i32 = arith.constant 0 : i32
    %c0_i32_0 = arith.constant 0 : i32
    %c0_i32_1 = arith.constant 0 : i32
    return %c0_i32, %c0_i32_0 : i32, i32
  }
  func.func @transform_2(%arg0: i32) -> (i32, i32) {
    %c0_i32 = arith.constant 0 : i32
    %c0_i32_0 = arith.constant 0 : i32
    return %arg0, %c0_i32 : i32, i32
  }
}

</mosaic_0001>

<bundles_post_ra>
// kernel: mnist_generator_forward.8
= control target key start
LH: loop header
LB: loop body
LE: loop exit
PB: predicated region body
PF: predicated region fallthrough
CT: control target
= control target key end

     0   :  { %s250_s0 = inlined_call_operand.vmem [shape: bf16[32,256], index: 0, kind: input, shape index: {}]   ;;  %s251_s1 = inlined_call_operand.vmem [shape: f32[1,256], index: 1, kind: input, shape index: {}]   ;;  %s252_s2 = inlined_call_operand.vmem [shape: f32[1,256], index: 2, kind: input, shape index: {}]   ;;  %s253_s3 = inlined_call_operand.vmem [shape: bf16[32,256], index: 3, kind: output, shape index: {}]  }
   0x1   :  { %v14_v0 = vld [vmem:[%s250_s0] sm:$0xff]  ;;  %v15_v1 = vld [vmem:[%s250_s0 + $0x8] sm:$0xff]  ;;  %v16_v2 = vld [vmem:[%s250_s0 + $0x10] sm:$0xff] }
   0x2   :  { %v17_v3 = vld [vmem:[%s250_s0 + $0x18] sm:$0xff]  ;;  %v18_v4 = vunpack.c.l.bf16 %v14_v0  ;;  %v19_v5 = vunpack.c.h.bf16 %v14_v0  ;;  %v20_v6 = vunpack.c.l.bf16 %v15_v1  ;;  %v21_v7 = vunpack.c.h.bf16 %v15_v1 }
   0x3   :  { %v22_v8 = vunpack.c.l.bf16 %v16_v2  ;;  %v23_v9 = vunpack.c.h.bf16 %v16_v2  ;;  %v24_v10 = vunpack.c.l.bf16 %v17_v3  ;;  %v25_v11 = vunpack.c.h.bf16 %v17_v3 }
   0x4   :  { %v26_v12 = vadd.f32 %v20_v6, %v18_v4  ;;  %v35_v13 = vadd.f32 %v21_v7, %v19_v5 }
   0x6   :  { %v27_v14 = vadd.f32 %v26_v12, %v22_v8  ;;  %v36_v15 = vadd.f32 %v35_v13, %v23_v9 }
   0x8   :  { %v28_v16 = vadd.f32 %v27_v14, %v24_v10  ;;  %v37_v17 = vadd.f32 %v36_v15, %v25_v11 }
   0xa   :  { %v29_v18 = vrot.slane %v28_v16, 4  ;;  %v38_v19 = vrot.slane %v37_v17, 4 }
   0xc   :  { %v30_v20 = vadd.f32 %v29_v18, %v28_v16  ;;  %v39_v21 = vadd.f32 %v38_v19, %v37_v17  ;;  %v83_v16 = vld [vmem:[%s251_s1] sm:$0x3] }
   0xe   :  { %v31_v22 = vrot.slane %v30_v20, 2  ;;  %v40_v23 = vrot.slane %v39_v21, 2 }
  0x10   :  { %v32_v24 = vadd.f32 %v31_v22, %v30_v20  ;;  %v41_v25 = vadd.f32 %v40_v23, %v39_v21  ;;  %v126_v20 = vld [vmem:[%s252_s2] sm:$0x3] }
  0x12   :  { %v33_v26 = vrot.slane %v32_v24, 1  ;;  %v42_v27 = vrot.slane %v41_v25, 1 }
  0x14   :  { %v34_v28 = vadd.f32 %v33_v26, %v32_v24  ;;  %v43_v29 = vadd.f32 %v42_v27, %v41_v25 }
  0x16   :  { %v45_v30 = vmul.f32 0.03125, %v34_v28  ;;  %v46_v31 = vmul.f32 0.03125, %v43_v29 }
  0x18   :  { %v47_v32 = vsub.f32 %v18_v4, %v45_v30  ;;  %v48_v33 = vsub.f32 %v19_v5, %v46_v31  ;;  %v49_v34 = vsub.f32 %v20_v6, %v45_v30  ;;  %v50_v35 = vsub.f32 %v21_v7, %v46_v31 }
  0x19   :  { %v51_v36 = vsub.f32 %v22_v8, %v45_v30  ;;  %v52_v37 = vsub.f32 %v23_v9, %v46_v31  ;;  %v53_v38 = vsub.f32 %v24_v10, %v45_v30  ;;  %v54_v39 = vsub.f32 %v25_v11, %v46_v31 }
  0x1a   :  { %v55_v40 = vmul.f32 %v47_v32, %v47_v32  ;;  %v56_v41 = vmul.f32 %v48_v33, %v48_v33  ;;  %v57_v42 = vmul.f32 %v49_v34, %v49_v34  ;;  %v58_v43 = vmul.f32 %v50_v35, %v50_v35 }
  0x1b   :  { %v59_v44 = vmul.f32 %v51_v36, %v51_v36  ;;  %v60_v45 = vmul.f32 %v52_v37, %v52_v37  ;;  %v61_v46 = vmul.f32 %v53_v38, %v53_v38  ;;  %v62_v47 = vmul.f32 %v54_v39, %v54_v39 }
  0x1c   :  { %v63_v48 = vadd.f32 %v57_v42, %v55_v40  ;;  %v72_v49 = vadd.f32 %v58_v43, %v56_v41  ;;  %v199_v6 = vmov 1966171168   ;;  %v94_v8 = vlaneseq }
  0x1d   :  { %v92_v7 = vunpack.c.l.s4 %v199_v6 }
  0x1e   :  { %v64_v50 = vadd.f32 %v63_v48, %v59_v44  ;;  %v73_v51 = vadd.f32 %v72_v49, %v60_v45  ;;  %v95_v10 = vshrl.u32 %v94_v8, 7 }
  0x1f   :  { %v93_v9 = vunpack.c.0.s8 %v92_v7 }
  0x20   :  { %v65_v52 = vadd.f32 %v64_v50, %v61_v46  ;;  %v74_v53 = vadd.f32 %v73_v51, %v62_v47  ;;  %v110_v18 = vsub.s32 0, %v95_v10  ;;  %v114_v19 = vsub.s32 1, %v95_v10 }
  0x21   :  { %v96_v12 = vsub.s32 %v93_v9, %v95_v10 }
  0x22   :  { %v66_v54 = vrot.slane %v65_v52, 4  ;;  %v75_v55 = vrot.slane %v74_v53, 4  ;;  %v131_v24 = vrot.slane %v126_v20, %v110_v18  ;;  %v135_v25 = vrot.slane %v126_v20, %v114_v19 }
  0x24   :  { %v67_v56 = vadd.f32 %v66_v54, %v65_v52  ;;  %v76_v57 = vadd.f32 %v75_v55, %v74_v53 }
  0x26   :  { %v68_v58 = vrot.slane %v67_v56, 2  ;;  %v77_v59 = vrot.slane %v76_v57, 2 }
  0x28   :  { %v69_v60 = vadd.f32 %v68_v58, %v67_v56  ;;  %v78_v61 = vadd.f32 %v77_v59, %v76_v57 }
  0x2a   :  { %v70_v62 = vrot.slane %v69_v60, 1  ;;  %v79_v63 = vrot.slane %v78_v61, 1 }
  0x2c   :  { %v71_v0 = vadd.f32 %v70_v62, %v69_v60  ;;  %v80_v1 = vadd.f32 %v79_v63, %v78_v61 }
  0x2e   :  { %v81_v2 = vmul.f32 0.03125, %v71_v0  ;;  %v82_v3 = vmul.f32 0.03125, %v80_v1 }
  0x30   :  { %v84_v4 = vadd.f32 1e-05, %v81_v2  ;;  %v85_v5 = vadd.f32 1e-05, %v82_v3 }
  0x32   :  { %195 = vrsqrt.f32 %v84_v4 }
  0x33   :  { %197 = vrsqrt.f32 %v85_v5 }
  0x3c   :  { %v196_v11 = vpop.eup %195 }
  0x3d   :  { %v198_v13 = vpop.eup %197 }
  0x3e   :  { %v90_v14 = vcombine.low %v196_v11, %v198_v13 }
  0x40   :  { %v97_v15 = vrot.slane %v90_v14, %v96_v12 }
  0x42   :  { %v104_v17 = vrot.slane %v97_v15, %v96_v12 }
  0x44   :  { %v106_v21 = vmul.f32 %v104_v17, %v83_v16 }
  0x46   :  { %v111_v22 = vrot.slane %v106_v21, %v110_v18  ;;  %v115_v23 = vrot.slane %v106_v21, %v114_v19 }
  0x48   :  { %v118_v26 = vmul.f32 %v111_v22, %v47_v32  ;;  %v119_v27 = vmul.f32 %v115_v23, %v48_v33  ;;  %v120_v28 = vmul.f32 %v111_v22, %v49_v34  ;;  %v121_v29 = vmul.f32 %v115_v23, %v50_v35 }
  0x49   :  { %v122_v30 = vmul.f32 %v111_v22, %v51_v36  ;;  %v123_v31 = vmul.f32 %v115_v23, %v52_v37  ;;  %v124_v40 = vmul.f32 %v111_v22, %v53_v38  ;;  %v125_v41 = vmul.f32 %v115_v23, %v54_v39 }
  0x4a   :  { %v138_v42 = vadd.f32 %v131_v24, %v118_v26  ;;  %v139_v43 = vadd.f32 %v135_v25, %v119_v27  ;;  %v140_v44 = vadd.f32 %v131_v24, %v120_v28  ;;  %v141_v45 = vadd.f32 %v135_v25, %v121_v29 }
  0x4b   :  { %v142_v46 = vadd.f32 %v131_v24, %v122_v30  ;;  %v143_v47 = vadd.f32 %v135_v25, %v123_v31  ;;  %v144_v48 = vadd.f32 %v131_v24, %v124_v40  ;;  %v145_v49 = vadd.f32 %v135_v25, %v125_v41 }
  0x4c   :  { %v146_v50 = vmax.f32 %v138_v42, 0.0  ;;  %v147_v51 = vmax.f32 %v139_v43, 0.0  ;;  %v148_v52 = vmax.f32 %v140_v44, 0.0  ;;  %v149_v53 = vmax.f32 %v141_v45, 0.0 }
  0x4d   :  { %v150_v32 = vmax.f32 %v142_v46, 0.0  ;;  %v151_v33 = vmax.f32 %v143_v47, 0.0  ;;  %v152_v34 = vmax.f32 %v144_v48, 0.0  ;;  %v153_v35 = vmax.f32 %v145_v49, 0.0 }
  0x4e   :  { %v190_v36 = vpack.c.bf16 %v147_v51, %v146_v50  ;;  %v191_v37 = vpack.c.bf16 %v149_v53, %v148_v52 }
  0x4f   :  { %v192_v38 = vpack.c.bf16 %v151_v33, %v150_v32  ;;  %v193_v39 = vpack.c.bf16 %v153_v35, %v152_v34 }
  0x50   :  { %178 = vst [vmem:[%s253_s3] sm:$0xff] %v190_v36  ;;  %179 = vst [vmem:[%s253_s3 + $0x8] sm:$0xff] %v191_v37 }
  0x51   :  { %180 = vst [vmem:[%s253_s3 + $0x10] sm:$0xff] %v192_v38  ;;  %181 = vst [vmem:[%s253_s3 + $0x18] sm:$0xff] %v193_v39 }

// kernel: mnist_generator_forward.10
= control target key start
LH: loop header
LB: loop body
LE: loop exit
PB: predicated region body
PF: predicated region fallthrough
CT: control target
= control target key end

     0   :  { %s537_s0 = inlined_call_operand.vmem [shape: bf16[128,128], index: 0, kind: input, shape index: {}]   ;;  %s538_s1 = inlined_call_operand.vmem [shape: f32[1,128], index: 1, kind: input, shape index: {}]   ;;  %s539_s2 = inlined_call_operand.vmem [shape: f32[1,128], index: 2, kind: input, shape index: {}]   ;;  %s540_s3 = inlined_call_operand.vmem [shape: bf16[128,128], index: 3, kind: output, shape index: {}]  }
   0x1   :  { %v306_v0 = vld [vmem:[%s537_s0] sm:$0xff]   ;;  %v377_v1 = vld [vmem:[%s537_s0 + $0x8] sm:$0xff]   ;;  %v378_v5 = vld [vmem:[%s537_s0 + $0x10] sm:$0xff]  }
   0x2   :  { %v307_v2 = vunpack.c.l.bf16 %v306_v0  ;;  %v308_v3 = vunpack.c.h.bf16 %v306_v0  ;;  %v311_v4 = vunpack.c.l.bf16 %v377_v1  ;;  %v312_v6 = vunpack.c.h.bf16 %v377_v1  ;;  %v379_v10 = vld [vmem:[%s537_s0 + $0x18] sm:$0xff]   ;;  %v380_v15 = vld [vmem:[%s537_s0 + $0x20] sm:$0xff]   ;;  %v381_v20 = vld [vmem:[%s537_s0 + $0x28] sm:$0xff]  }
   0x3   :  { %v315_v8 = vunpack.c.l.bf16 %v378_v5  ;;  %v316_v11 = vunpack.c.h.bf16 %v378_v5  ;;  %v319_v13 = vunpack.c.l.bf16 %v379_v10  ;;  %v320_v16 = vunpack.c.h.bf16 %v379_v10  ;;  %v382_v25 = vld [vmem:[%s537_s0 + $0x30] sm:$0xff]   ;;  %v383_v30 = vld [vmem:[%s537_s0 + $0x38] sm:$0xff]  }
   0x4   :  { %v46_v7 = vadd.f32 %v308_v3, %v307_v2  ;;  %v323_v18 = vunpack.c.l.bf16 %v380_v15  ;;  %v324_v21 = vunpack.c.h.bf16 %v380_v15  ;;  %v327_v23 = vunpack.c.l.bf16 %v381_v20 }
   0x5   :  { %v328_v26 = vunpack.c.h.bf16 %v381_v20  ;;  %v331_v28 = vunpack.c.l.bf16 %v382_v25  ;;  %v332_v31 = vunpack.c.h.bf16 %v382_v25  ;;  %v335_v33 = vunpack.c.l.bf16 %v383_v30 }
   0x6   :  { %v47_v9 = vadd.f32 %v311_v4, %v46_v7  ;;  %v336_v35 = vunpack.c.h.bf16 %v383_v30 }
   0x8   :  { %v48_v12 = vadd.f32 %v312_v6, %v47_v9 }
   0xa   :  { %v49_v14 = vadd.f32 %v315_v8, %v48_v12 }
   0xc   :  { %v50_v17 = vadd.f32 %v316_v11, %v49_v14 }
   0xe   :  { %v51_v19 = vadd.f32 %v319_v13, %v50_v17 }
  0x10   :  { %v52_v22 = vadd.f32 %v320_v16, %v51_v19 }
  0x12   :  { %v53_v24 = vadd.f32 %v323_v18, %v52_v22 }
  0x14   :  { %v54_v27 = vadd.f32 %v324_v21, %v53_v24 }
  0x16   :  { %v55_v29 = vadd.f32 %v327_v23, %v54_v27 }
  0x18   :  { %v56_v32 = vadd.f32 %v328_v26, %v55_v29 }
  0x1a   :  { %v57_v34 = vadd.f32 %v331_v28, %v56_v32 }
  0x1c   :  { %v58_v36 = vadd.f32 %v332_v31, %v57_v34 }
  0x1e   :  { %v59_v37 = vadd.f32 %v335_v33, %v58_v36 }
  0x20   :  { %v60_v38 = vadd.f32 %v336_v35, %v59_v37  ;;  %v128_v37 = vlaneseq }
  0x22   :  { %v61_v39 = vrot.slane %v60_v38, 4 }
  0x24   :  { %v62_v40 = vadd.f32 %v61_v39, %v60_v38  ;;  %v129_v38 = vshrl.u32 %v128_v37, 7  ;;  %v123_v39 = vld [vmem:[%s538_s1] sm:$0x1] }
  0x26   :  { %v63_v41 = vrot.slane %v62_v40, 2 }
  0x28   :  { %v64_v42 = vadd.f32 %v63_v41, %v62_v40  ;;  %v130_v40 = vsub.s32 0, %v129_v38 }
  0x2a   :  { %v65_v43 = vrot.slane %v64_v42, 1 }
  0x2c   :  { %v66_v44 = vadd.f32 %v65_v43, %v64_v42 }
  0x2e   :  { %v68_v45 = vmul.f32 0.0078125, %v66_v44  ;;  %v272_v44 = vld [vmem:[%s539_s2] ss:$0 sm:$0xff] }
  0x30   :  { %v437_v46 = vsub.f32 %v307_v2, %v68_v45  ;;  %v439_v47 = vsub.f32 %v308_v3, %v68_v45  ;;  %v441_v48 = vsub.f32 %v311_v4, %v68_v45  ;;  %v443_v49 = vsub.f32 %v312_v6, %v68_v45 }
  0x31   :  { %v449_v52 = vsub.f32 %v315_v8, %v68_v45  ;;  %v453_v54 = vsub.f32 %v316_v11, %v68_v45  ;;  %v75_v57 = vsub.f32 %v319_v13, %v68_v45  ;;  %v76_v60 = vsub.f32 %v320_v16, %v68_v45 }
  0x32   :  { %v85_v50 = vmul.f32 %v437_v46, %v437_v46  ;;  %v86_v51 = vmul.f32 %v439_v47, %v439_v47  ;;  %v87_v53 = vmul.f32 %v441_v48, %v441_v48  ;;  %v88_v55 = vmul.f32 %v443_v49, %v443_v49 }
  0x33   :  { %v89_v58 = vmul.f32 %v449_v52, %v449_v52  ;;  %v90_v61 = vmul.f32 %v453_v54, %v453_v54  ;;  %v461_v63 = vsub.f32 %v323_v18, %v68_v45  ;;  %v91_v0 = vmul.f32 %v75_v57, %v75_v57 }
  0x34   :  { %v101_v56 = vadd.f32 %v86_v51, %v85_v50  ;;  %v463_v2 = vsub.f32 %v324_v21, %v68_v45  ;;  %v92_v3 = vmul.f32 %v76_v60, %v76_v60  ;;  %v465_v5 = vsub.f32 %v327_v23, %v68_v45 }
  0x35   :  { %v93_v6 = vmul.f32 %v461_v63, %v461_v63  ;;  %v469_v8 = vsub.f32 %v328_v26, %v68_v45  ;;  %v473_v11 = vsub.f32 %v331_v28, %v68_v45  ;;  %v477_v14 = vsub.f32 %v332_v31, %v68_v45 }
  0x36   :  { %v102_v59 = vadd.f32 %v101_v56, %v87_v53  ;;  %v94_v9 = vmul.f32 %v463_v2, %v463_v2  ;;  %v95_v12 = vmul.f32 %v465_v5, %v465_v5  ;;  %v481_v17 = vsub.f32 %v335_v33, %v68_v45 }
  0x37   :  { %v96_v15 = vmul.f32 %v469_v8, %v469_v8  ;;  %v97_v18 = vmul.f32 %v473_v11, %v473_v11  ;;  %v485_v20 = vsub.f32 %v336_v35, %v68_v45  ;;  %v98_v21 = vmul.f32 %v477_v14, %v477_v14 }
  0x38   :  { %v103_v62 = vadd.f32 %v102_v59, %v88_v55  ;;  %v99_v23 = vmul.f32 %v481_v17, %v481_v17 }
  0x39   :  { %v100_v25 = vmul.f32 %v485_v20, %v485_v20 }
  0x3a   :  { %v104_v1 = vadd.f32 %v103_v62, %v89_v58 }
  0x3c   :  { %v105_v4 = vadd.f32 %v104_v1, %v90_v61 }
  0x3e   :  { %v106_v7 = vadd.f32 %v105_v4, %v91_v0 }
  0x40   :  { %v107_v10 = vadd.f32 %v106_v7, %v92_v3 }
  0x42   :  { %v108_v13 = vadd.f32 %v107_v10, %v93_v6 }
  0x44   :  { %v109_v16 = vadd.f32 %v108_v13, %v94_v9 }
  0x46   :  { %v110_v19 = vadd.f32 %v109_v16, %v95_v12 }
  0x48   :  { %v111_v22 = vadd.f32 %v110_v19, %v96_v15 }
  0x4a   :  { %v112_v24 = vadd.f32 %v111_v22, %v97_v18 }
  0x4c   :  { %v113_v26 = vadd.f32 %v112_v24, %v98_v21 }
  0x4e   :  { %v114_v27 = vadd.f32 %v113_v26, %v99_v23 }
  0x50   :  { %v115_v28 = vadd.f32 %v114_v27, %v100_v25 }
  0x52   :  { %v116_v29 = vrot.slane %v115_v28, 4 }
  0x54   :  { %v117_v30 = vadd.f32 %v116_v29, %v115_v28 }
  0x56   :  { %v118_v31 = vrot.slane %v117_v30, 2 }
  0x58   :  { %v119_v32 = vadd.f32 %v118_v31, %v117_v30 }
  0x5a   :  { %v120_v33 = vrot.slane %v119_v32, 1 }
  0x5c   :  { %v121_v34 = vadd.f32 %v120_v33, %v119_v32 }
  0x5e   :  { %v122_v35 = vmul.f32 0.0078125, %v121_v34 }
  0x60   :  { %v124_v36 = vadd.f32 1e-05, %v122_v35 }
  0x62   :  { %391 = vrsqrt.f32 %v124_v36 }
  0x6c   :  { %v392_v41 = vpop.eup %391 }
  0x6d   :  { %v126_v42 = vmul.f32 %v392_v41, %v123_v39 }
  0x6f   :  { %v131_v43 = vrot.slane %v126_v42, %v130_v40 }
  0x71   :  { %v133_v45 = vmul.f32 %v131_v43, %v437_v46  ;;  %v134_v50 = vmul.f32 %v131_v43, %v439_v47  ;;  %v135_v51 = vmul.f32 %v131_v43, %v441_v48  ;;  %v136_v53 = vmul.f32 %v131_v43, %v443_v49 }
  0x72   :  { %v137_v55 = vmul.f32 %v131_v43, %v449_v52  ;;  %v138_v56 = vmul.f32 %v131_v43, %v453_v54  ;;  %v139_v58 = vmul.f32 %v131_v43, %v75_v57  ;;  %v140_v59 = vmul.f32 %v131_v43, %v76_v60 }
  0x73   :  { %v156_v61 = vadd.f32 %v272_v44, %v133_v45  ;;  %v157_v62 = vadd.f32 %v272_v44, %v134_v50  ;;  %v158_v0 = vadd.f32 %v272_v44, %v135_v51  ;;  %v159_v1 = vadd.f32 %v272_v44, %v136_v53 }
  0x74   :  { %v160_v3 = vadd.f32 %v272_v44, %v137_v55  ;;  %v161_v4 = vadd.f32 %v272_v44, %v138_v56  ;;  %v162_v6 = vadd.f32 %v272_v44, %v139_v58  ;;  %v163_v46 = vadd.f32 %v272_v44, %v140_v59 }
  0x75   :  { %v172_v7 = vmax.f32 %v156_v61, 0.0  ;;  %v173_v47 = vmax.f32 %v157_v62, 0.0  ;;  %v174_v9 = vmax.f32 %v158_v0, 0.0  ;;  %v175_v48 = vmax.f32 %v159_v1, 0.0 }
  0x76   :  { %v176_v10 = vmax.f32 %v160_v3, 0.0  ;;  %v177_v49 = vmax.f32 %v161_v4, 0.0  ;;  %v178_v12 = vmax.f32 %v162_v6, 0.0  ;;  %v179_v52 = vmax.f32 %v163_v46, 0.0 }
  0x77   :  { %v340_v13 = vpack.c.bf16 %v173_v47, %v172_v7  ;;  %v345_v54 = vpack.c.bf16 %v175_v48, %v174_v9  ;;  %v141_v57 = vmul.f32 %v131_v43, %v461_v63  ;;  %v142_v60 = vmul.f32 %v131_v43, %v463_v2 }
  0x78   :  { %v350_v15 = vpack.c.bf16 %v177_v49, %v176_v10  ;;  %v355_v16 = vpack.c.bf16 %v179_v52, %v178_v12  ;;  %v143_v18 = vmul.f32 %v131_v43, %v465_v5  ;;  %v144_v19 = vmul.f32 %v131_v43, %v469_v8 }
  0x79   :  { %341 = vst [vmem:[%s540_s3] sm:$0xff] %v340_v13   ;;  %384 = vst [vmem:[%s540_s3 + $0x8] sm:$0xff] %v345_v54   ;;  %v164_v21 = vadd.f32 %v272_v44, %v141_v57  ;;  %v165_v22 = vadd.f32 %v272_v44, %v142_v60  ;;  %v145_v63 = vmul.f32 %v131_v43, %v473_v11 }
  0x7a   :  { %v146_v2 = vmul.f32 %v131_v43, %v477_v14  ;;  %385 = vst [vmem:[%s540_s3 + $0x10] sm:$0xff] %v350_v15   ;;  %386 = vst [vmem:[%s540_s3 + $0x18] sm:$0xff] %v355_v16   ;;  %v166_v5 = vadd.f32 %v272_v44, %v143_v18  ;;  %v167_v8 = vadd.f32 %v272_v44, %v144_v19 }
  0x7b   :  { %v147_v23 = vmul.f32 %v131_v43, %v481_v17  ;;  %v148_v24 = vmul.f32 %v131_v43, %v485_v20  ;;  %v180_v25 = vmax.f32 %v164_v21, 0.0  ;;  %v181_v26 = vmax.f32 %v165_v22, 0.0 }
  0x7c   :  { %v168_v27 = vadd.f32 %v272_v44, %v145_v63  ;;  %v169_v11 = vadd.f32 %v272_v44, %v146_v2  ;;  %v182_v28 = vmax.f32 %v166_v5, 0.0  ;;  %v183_v14 = vmax.f32 %v167_v8, 0.0 }
  0x7d   :  { %v170_v29 = vadd.f32 %v272_v44, %v147_v23  ;;  %v171_v30 = vadd.f32 %v272_v44, %v148_v24  ;;  %v360_v31 = vpack.c.bf16 %v181_v26, %v180_v25 }
  0x7e   :  { %v184_v32 = vmax.f32 %v168_v27, 0.0  ;;  %v185_v33 = vmax.f32 %v169_v11, 0.0  ;;  %v365_v34 = vpack.c.bf16 %v183_v14, %v182_v28 }
  0x7f   :  { %v186_v35 = vmax.f32 %v170_v29, 0.0  ;;  %v187_v36 = vmax.f32 %v171_v30, 0.0  ;;  %387 = vst [vmem:[%s540_s3 + $0x20] sm:$0xff] %v360_v31  }
  0x80   :  { %v370_v17 = vpack.c.bf16 %v185_v33, %v184_v32  ;;  %388 = vst [vmem:[%s540_s3 + $0x28] sm:$0xff] %v365_v34  }
  0x81   :  { %v375_v20 = vpack.c.bf16 %v187_v36, %v186_v35 }
  0x82   :  { %389 = vst [vmem:[%s540_s3 + $0x30] sm:$0xff] %v370_v17  }
  0x83   :  { %390 = vst [vmem:[%s540_s3 + $0x38] sm:$0xff] %v375_v20  }

// kernel: mnist_generator_forward.9
= control target key start
LH: loop header
LB: loop body
LE: loop exit
PB: predicated region body
PF: predicated region fallthrough
CT: control target
= control target key end

     0   :  { %s4190_s1 = inlined_call_operand.vmem [shape: bf16[1024,512], index: 1, kind: input, shape index: {}]   ;;  %s4191_s0 = inlined_call_operand.vmem [shape: bf16[64,1024], index: 0, kind: input, shape index: {}]   ;;  %s4192_s2 = inlined_call_operand.vmem [shape: bf16[64,512], index: 2, kind: output, shape index: {}]  }
   0x1   :  { %v2855_v0 = vld [vmem:[%s4190_s1 + $0x4] ss:$16 sps:$4 sm:$0xff]   ;;  %v2857_v1 = vld [vmem:[%s4190_s1 + $0xc] ss:$16 sps:$4 sm:$0xff]   ;;  %v2859_v2 = vld [vmem:[%s4190_s1] ss:$16 sps:$4 sm:$0xff]  }
   0x2   :  { %1739 = vmatprep.subr.bf16.mxu0 %v2855_v0  ;;  %v2860_v3 = vld [vmem:[%s4190_s1 + $0x8] ss:$16 sps:$4 sm:$0xff]   ;;  %2031 = vmatprep.subr.bf16.mxu1 %v2857_v1  ;;  %v2861_v4 = vld [vmem:[%s4190_s1 + $0x24] ss:$16 sps:$4 sm:$0xff]   ;;  %v2863_v5 = vld [vmem:[%s4190_s1 + $0x2c] ss:$16 sps:$4 sm:$0xff]  }
   0x3   :  { %1740 = vmatpush1.bf16.msra.mxu0 %v2859_v2  ;;  %2032 = vmatpush1.bf16.msra.mxu1 %v2860_v3  ;;  %v2865_v6 = vld [vmem:[%s4190_s1 + $0x20] ss:$16 sps:$4 sm:$0xff]   ;;  %v2866_v7 = vld [vmem:[%s4190_s1 + $0x28] ss:$16 sps:$4 sm:$0xff]   ;;  %v2867_v8 = vld [vmem:[%s4190_s1 + $0x44] ss:$16 sps:$4 sm:$0xff]  }
   0x4   :  { %1741 = vmatprep.subr.bf16.mxu0 %v2861_v4  ;;  %2033 = vmatprep.subr.bf16.mxu1 %v2863_v5  ;;  %v2869_v9 = vld [vmem:[%s4190_s1 + $0x4c] ss:$16 sps:$4 sm:$0xff]   ;;  %v2871_v10 = vld [vmem:[%s4190_s1 + $0x40] ss:$16 sps:$4 sm:$0xff]   ;;  %v2872_v11 = vld [vmem:[%s4190_s1 + $0x48] ss:$16 sps:$4 sm:$0xff]  }
   0x5   :  { %v2873_v12 = vld [vmem:[%s4190_s1 + $0x64] ss:$16 sps:$4 sm:$0xff]   ;;  %v2875_v13 = vld [vmem:[%s4190_s1 + $0x6c] ss:$16 sps:$4 sm:$0xff]   ;;  %v2877_v14 = vld [vmem:[%s4190_s1 + $0x60] ss:$16 sps:$4 sm:$0xff]  }
   0x6   :  { %v2878_v15 = vld [vmem:[%s4190_s1 + $0x68] ss:$16 sps:$4 sm:$0xff]   ;;  %v2879_v16 = vld [vmem:[%s4190_s1 + $0x84] ss:$16 sps:$4 sm:$0xff]   ;;  %v2881_v17 = vld [vmem:[%s4190_s1 + $0x8c] ss:$16 sps:$4 sm:$0xff]  }
   0x7   :  { %1742 = vmatpush1.bf16.msra.mxu0 %v2865_v6  ;;  %2034 = vmatpush1.bf16.msra.mxu1 %v2866_v7  ;;  %v2883_v18 = vld [vmem:[%s4190_s1 + $0x80] ss:$16 sps:$4 sm:$0xff]   ;;  %v2884_v19 = vld [vmem:[%s4190_s1 + $0x88] ss:$16 sps:$4 sm:$0xff]   ;;  %v2885_v20 = vld [vmem:[%s4190_s1 + $0xa4] ss:$16 sps:$4 sm:$0xff]  }
   0x8   :  { %1743 = vmatprep.subr.bf16.mxu0 %v2867_v8  ;;  %2035 = vmatprep.subr.bf16.mxu1 %v2869_v9  ;;  %v2887_v21 = vld [vmem:[%s4190_s1 + $0xac] ss:$16 sps:$4 sm:$0xff]   ;;  %v2889_v22 = vld [vmem:[%s4190_s1 + $0xa0] ss:$16 sps:$4 sm:$0xff]   ;;  %v2890_v23 = vld [vmem:[%s4190_s1 + $0xa8] ss:$16 sps:$4 sm:$0xff]  }
   0x9   :  { %v2891_v24 = vld [vmem:[%s4190_s1 + $0xc4] ss:$16 sps:$4 sm:$0xff]   ;;  %v2893_v25 = vld [vmem:[%s4190_s1 + $0xcc] ss:$16 sps:$4 sm:$0xff]   ;;  %v2895_v26 = vld [vmem:[%s4190_s1 + $0xc0] ss:$16 sps:$4 sm:$0xff]  }
   0xa   :  { %v2896_v27 = vld [vmem:[%s4190_s1 + $0xc8] ss:$16 sps:$4 sm:$0xff]   ;;  %v2897_v28 = vld [vmem:[%s4190_s1 + $0xe4] ss:$16 sps:$4 sm:$0xff]   ;;  %v2899_v29 = vld [vmem:[%s4190_s1 + $0xec] ss:$16 sps:$4 sm:$0xff]  }
   0xb   :  { %1744 = vmatpush1.bf16.msra.mxu0 %v2871_v10  ;;  %2036 = vmatpush1.bf16.msra.mxu1 %v2872_v11  ;;  %v2901_v30 = vld [vmem:[%s4190_s1 + $0xe0] ss:$16 sps:$4 sm:$0xff]   ;;  %v2902_v31 = vld [vmem:[%s4190_s1 + $0xe8] ss:$16 sps:$4 sm:$0xff]   ;;  %v2903_v32 = vld [vmem:[%s4190_s1 + $0x104] ss:$16 sps:$4 sm:$0xff]  }
   0xc   :  { %1745 = vmatprep.subr.bf16.mxu0 %v2873_v12  ;;  %2037 = vmatprep.subr.bf16.mxu1 %v2875_v13  ;;  %v2905_v33 = vld [vmem:[%s4190_s1 + $0x10c] ss:$16 sps:$4 sm:$0xff]   ;;  %v2907_v34 = vld [vmem:[%s4190_s1 + $0x100] ss:$16 sps:$4 sm:$0xff]   ;;  %v2908_v35 = vld [vmem:[%s4190_s1 + $0x108] ss:$16 sps:$4 sm:$0xff]  }
   0xd   :  { %v2909_v36 = vld [vmem:[%s4190_s1 + $0x124] ss:$16 sps:$4 sm:$0xff]   ;;  %v2911_v37 = vld [vmem:[%s4190_s1 + $0x12c] ss:$16 sps:$4 sm:$0xff]   ;;  %v2913_v38 = vld [vmem:[%s4190_s1 + $0x120] ss:$16 sps:$4 sm:$0xff]  }
   0xe   :  { %v2914_v39 = vld [vmem:[%s4190_s1 + $0x128] ss:$16 sps:$4 sm:$0xff]   ;;  %v2915_v40 = vld [vmem:[%s4190_s1 + $0x144] ss:$16 sps:$4 sm:$0xff]   ;;  %v2917_v41 = vld [vmem:[%s4190_s1 + $0x14c] ss:$16 sps:$4 sm:$0xff]  }
   0xf   :  { %1746 = vmatpush1.bf16.msra.mxu0 %v2877_v14  ;;  %2038 = vmatpush1.bf16.msra.mxu1 %v2878_v15  ;;  %v2919_v42 = vld [vmem:[%s4190_s1 + $0x140] ss:$16 sps:$4 sm:$0xff]   ;;  %v2920_v43 = vld [vmem:[%s4190_s1 + $0x148] ss:$16 sps:$4 sm:$0xff]   ;;  %v2921_v44 = vld [vmem:[%s4190_s1 + $0x164] ss:$16 sps:$4 sm:$0xff]  }
  0x10   :  { %1747 = vmatprep.subr.bf16.mxu0 %v2879_v16  ;;  %2039 = vmatprep.subr.bf16.mxu1 %v2881_v17  ;;  %v2923_v45 = vld [vmem:[%s4190_s1 + $0x16c] ss:$16 sps:$4 sm:$0xff]   ;;  %v11_v46 = vld [vmem:[%s4191_s0] sm:$0xff]  ;;  %v2926_v49 = vld [vmem:[%s4190_s1 + $0x168] ss:$16 sps:$4 sm:$0xff]  }
  0x11   :  { %v15_v47 = vld [vmem:[%s4191_s0 + $0x20] sm:$0xff]  ;;  %v2929_v52 = vld [vmem:[%s4190_s1 + $0x18c] ss:$16 sps:$4 sm:$0xff]   ;;  %v2932_v54 = vld [vmem:[%s4190_s1 + $0x188] ss:$16 sps:$4 sm:$0xff]  }
  0x12   :  { %v2925_v48 = vld [vmem:[%s4190_s1 + $0x160] ss:$16 sps:$4 sm:$0xff]   ;;  %v2440_v50 = vcombine.high %v11_v46, %v15_v47  ;;  %v2927_v51 = vld [vmem:[%s4190_s1 + $0x184] ss:$16 sps:$4 sm:$0xff]   ;;  %v2935_v56 = vld [vmem:[%s4190_s1 + $0x1ac] ss:$16 sps:$4 sm:$0xff]   ;;  %v2439_v5 = vcombine.low %v11_v46, %v15_v47 }
  0x13   :  { %1748 = vmatpush1.bf16.msra.mxu0 %v2883_v18  ;;  %2040 = vmatpush1.bf16.msra.mxu1 %v2884_v19  ;;  %v2931_v53 = vld [vmem:[%s4190_s1 + $0x180] ss:$16 sps:$4 sm:$0xff]   ;;  %v2933_v55 = vld [vmem:[%s4190_s1 + $0x1a4] ss:$16 sps:$4 sm:$0xff]   ;;  %v2938_v58 = vld [vmem:[%s4190_s1 + $0x1a8] ss:$16 sps:$4 sm:$0xff]  }
  0x14   :  { %1749 = vmatprep.subr.bf16.mxu0 %v2885_v20  ;;  %2041 = vmatprep.subr.bf16.mxu1 %v2887_v21  ;;  %v2937_v57 = vld [vmem:[%s4190_s1 + $0x1a0] ss:$16 sps:$4 sm:$0xff]   ;;  %v2939_v59 = vld [vmem:[%s4190_s1 + $0x1c4] ss:$16 sps:$4 sm:$0xff]   ;;  %v2941_v60 = vld [vmem:[%s4190_s1 + $0x1cc] ss:$16 sps:$4 sm:$0xff]  }
  0x15   :  { %1771 = vmatprep.mubr.bf16.mxu0 %v2440_v50  ;;  %2063 = vmatprep.mubr.bf16.mxu1 %v2440_v50  ;;  %v2943_v61 = vld [vmem:[%s4190_s1 + $0x1c0] ss:$16 sps:$4 sm:$0xff]   ;;  %v2944_v62 = vld [vmem:[%s4190_s1 + $0x1c8] ss:$16 sps:$4 sm:$0xff]   ;;  %v2945_v63 = vld [vmem:[%s4190_s1 + $0x1e4] ss:$16 sps:$4 sm:$0xff]  }
  0x16   :  { %v2947_v0 = vld [vmem:[%s4190_s1 + $0x1ec] ss:$16 sps:$4 sm:$0xff]   ;;  %v2949_v1 = vld [vmem:[%s4190_s1 + $0x1e0] ss:$16 sps:$4 sm:$0xff]   ;;  %v2950_v2 = vld [vmem:[%s4190_s1 + $0x1e8] ss:$16 sps:$4 sm:$0xff]  }
  0x17   :  { %1750 = vmatpush1.bf16.msra.mxu0 %v2889_v22  ;;  %2042 = vmatpush1.bf16.msra.mxu1 %v2890_v23  ;;  %v2953_v3 = vld [vmem:[%s4190_s1 + $0x204] ss:$16 sps:$4 sm:$0xff]   ;;  %v2956_v4 = vld [vmem:[%s4190_s1 + $0x20c] ss:$16 sps:$4 sm:$0xff]   ;;  %v2951_v6 = vld [vmem:[%s4190_s1 + $0x200] ss:$16 sps:$4 sm:$0xff]  }
  0x18   :  { %1751 = vmatprep.subr.bf16.mxu0 %v2891_v24  ;;  %2043 = vmatprep.subr.bf16.mxu1 %v2893_v25  ;;  %v2954_v7 = vld [vmem:[%s4190_s1 + $0x208] ss:$16 sps:$4 sm:$0xff]   ;;  %v2959_v8 = vld [vmem:[%s4190_s1 + $0x224] ss:$16 sps:$4 sm:$0xff]   ;;  %v2962_v9 = vld [vmem:[%s4190_s1 + $0x22c] ss:$16 sps:$4 sm:$0xff]  }
  0x19   :  { %v2957_v10 = vld [vmem:[%s4190_s1 + $0x220] ss:$16 sps:$4 sm:$0xff]   ;;  %v2960_v11 = vld [vmem:[%s4190_s1 + $0x228] ss:$16 sps:$4 sm:$0xff]   ;;  %v2965_v12 = vld [vmem:[%s4190_s1 + $0x244] ss:$16 sps:$4 sm:$0xff]  }
  0x1a   :  { %v2968_v13 = vld [vmem:[%s4190_s1 + $0x24c] ss:$16 sps:$4 sm:$0xff]   ;;  %v19_v14 = vld [vmem:[%s4191_s0 + $0x40] sm:$0xff]  ;;  %v2966_v17 = vld [vmem:[%s4190_s1 + $0x248] ss:$16 sps:$4 sm:$0xff]  }
  0x1b   :  { %1752 = vmatpush1.bf16.msra.mxu0 %v2895_v26  ;;  %2044 = vmatpush1.bf16.msra.mxu1 %v2896_v27  ;;  %v23_v15 = vld [vmem:[%s4191_s0 + $0x60] sm:$0xff]  ;;  %v2974_v21 = vld [vmem:[%s4190_s1 + $0x26c] ss:$16 sps:$4 sm:$0xff]   ;;  %v2972_v23 = vld [vmem:[%s4190_s1 + $0x268] ss:$16 sps:$4 sm:$0xff]  }
  0x1c   :  { %1753 = vmatprep.subr.bf16.mxu0 %v2897_v28  ;;  %2045 = vmatprep.subr.bf16.mxu1 %v2899_v29  ;;  %v2963_v16 = vld [vmem:[%s4190_s1 + $0x240] ss:$16 sps:$4 sm:$0xff]   ;;  %v2448_v18 = vcombine.high %v19_v14, %v23_v15  ;;  %v2447_v19 = vcombine.low %v19_v14, %v23_v15  ;;  %v2971_v20 = vld [vmem:[%s4190_s1 + $0x264] ss:$16 sps:$4 sm:$0xff]   ;;  %v2980_v27 = vld [vmem:[%s4190_s1 + $0x28c] ss:$16 sps:$4 sm:$0xff]  }
  0x1d   :  { %v2969_v22 = vld [vmem:[%s4190_s1 + $0x260] ss:$16 sps:$4 sm:$0xff]   ;;  %v2977_v26 = vld [vmem:[%s4190_s1 + $0x284] ss:$16 sps:$4 sm:$0xff]   ;;  %v2998_v47 = vld [vmem:[%s4190_s1 + $0x2ec] ss:$16 sps:$4 sm:$0xff]  }
  0x1e   :  { %v27_v24 = vld [vmem:[%s4191_s0 + $0x80] sm:$0xff]  ;;  %v2996_v50 = vld [vmem:[%s4190_s1 + $0x2e8] ss:$16 sps:$4 sm:$0xff]  }
  0x1f   :  { %1754 = vmatpush1.bf16.msra.mxu0 %v2901_v30  ;;  %2046 = vmatpush1.bf16.msra.mxu1 %v2902_v31  ;;  %v31_v25 = vld [vmem:[%s4191_s0 + $0xa0] sm:$0xff]  ;;  %v2978_v31 = vld [vmem:[%s4190_s1 + $0x288] ss:$16 sps:$4 sm:$0xff]  }
  0x20   :  { %1755 = vmatprep.subr.bf16.mxu0 %v2903_v32  ;;  %2047 = vmatprep.subr.bf16.mxu1 %v2905_v33  ;;  %v2456_v28 = vcombine.high %v27_v24, %v31_v25  ;;  %v2455_v29 = vcombine.low %v27_v24, %v31_v25  ;;  %v2975_v30 = vld [vmem:[%s4190_s1 + $0x280] ss:$16 sps:$4 sm:$0xff]   ;;  %v2983_v32 = vld [vmem:[%s4190_s1 + $0x2a4] ss:$16 sps:$4 sm:$0xff]   ;;  %v2986_v33 = vld [vmem:[%s4190_s1 + $0x2ac] ss:$16 sps:$4 sm:$0xff]  }
  0x21   :  { %v2995_v46 = vld [vmem:[%s4190_s1 + $0x2e4] ss:$16 sps:$4 sm:$0xff]   ;;  %v3038_v14 = vld [vmem:[%s4190_s1 + $0x3c8] ss:$16 sps:$4 sm:$0xff]  }
  0x22   :  { %v3043_v15 = vld [vmem:[%s4190_s1 + $0x3e4] ss:$16 sps:$4 sm:$0xff]   ;;  %v20_v24 = vld [vmem:[%s4191_s0 + $0x48] sm:$0xff] }
  0x23   :  { %1756 = vmatpush1.bf16.msra.mxu0 %v2907_v34  ;;  %2048 = vmatpush1.bf16.msra.mxu1 %v2908_v35  ;;  %v35_v34 = vld [vmem:[%s4191_s0 + $0xc0] sm:$0xff]  ;;  %v24_v25 = vld [vmem:[%s4191_s0 + $0x68] sm:$0xff] }
  0x24   :  { %1757 = vmatprep.subr.bf16.mxu0 %v2909_v36  ;;  %2049 = vmatprep.subr.bf16.mxu1 %v2911_v37  ;;  %v39_v35 = vld [vmem:[%s4191_s0 + $0xe0] sm:$0xff]  ;;  %v2984_v37 = vld [vmem:[%s4190_s1 + $0x2a8] ss:$16 sps:$4 sm:$0xff]  }
  0x25   :  { %v2981_v36 = vld [vmem:[%s4190_s1 + $0x2a0] ss:$16 sps:$4 sm:$0xff]  }
  0x27   :  { %1758 = vmatpush1.bf16.msra.mxu0 %v2913_v38  ;;  %2050 = vmatpush1.bf16.msra.mxu1 %v2914_v39  ;;  %v2464_v38 = vcombine.high %v35_v34, %v39_v35  ;;  %v2989_v39 = vld [vmem:[%s4190_s1 + $0x2c4] ss:$16 sps:$4 sm:$0xff]  }
  0x28   :  { %1759 = vmatprep.subr.bf16.mxu0 %v2915_v40  ;;  %2051 = vmatprep.subr.bf16.mxu1 %v2917_v41  ;;  %v2992_v40 = vld [vmem:[%s4190_s1 + $0x2cc] ss:$16 sps:$4 sm:$0xff]   ;;  %v2987_v41 = vld [vmem:[%s4190_s1 + $0x2c0] ss:$16 sps:$4 sm:$0xff]  }
  0x2b   :  { %1760 = vmatpush1.bf16.msra.mxu0 %v2919_v42  ;;  %2052 = vmatpush1.bf16.msra.mxu1 %v2920_v43  ;;  %v2990_v42 = vld [vmem:[%s4190_s1 + $0x2c8] ss:$16 sps:$4 sm:$0xff]   ;;  %v2463_v43 = vcombine.low %v35_v34, %v39_v35  ;;  %v2449_v34 = vcombine.low %v20_v24, %v24_v25 }
  0x2c   :  { %1761 = vmatprep.subr.bf16.mxu0 %v2921_v44  ;;  %2053 = vmatprep.subr.bf16.mxu1 %v2923_v45  ;;  %v3557_v44 = vld [vmem:[%s4191_s0 + $0x8] sm:$0xff] }
  0x2d   :  { %v3562_v45 = vld [vmem:[%s4191_s0 + $0x28] sm:$0xff] }
  0x2e   :  { %v32_v35 = vld [vmem:[%s4191_s0 + $0xa8] sm:$0xff] }
  0x2f   :  { %1762 = vmatpush1.bf16.msra.mxu0 %v2925_v48  ;;  %2054 = vmatpush1.bf16.msra.mxu1 %v2926_v49  ;;  %v2442_v48 = vcombine.high %v3557_v44, %v3562_v45  ;;  %v2993_v49 = vld [vmem:[%s4190_s1 + $0x2e0] ss:$16 sps:$4 sm:$0xff]  }
  0x30   :  { %1763 = vmatprep.subr.bf16.mxu0 %v2927_v51  ;;  %2055 = vmatprep.subr.bf16.mxu1 %v2929_v52  ;;  %v3001_v51 = vld [vmem:[%s4190_s1 + $0x304] ss:$16 sps:$4 sm:$0xff]   ;;  %v3004_v52 = vld [vmem:[%s4190_s1 + $0x30c] ss:$16 sps:$4 sm:$0xff]  }
  0x33   :  { %1764 = vmatpush1.bf16.msra.mxu0 %v2931_v53  ;;  %2056 = vmatpush1.bf16.msra.mxu1 %v2932_v54  ;;  %v2999_v53 = vld [vmem:[%s4190_s1 + $0x300] ss:$16 sps:$4 sm:$0xff]   ;;  %v3002_v54 = vld [vmem:[%s4190_s1 + $0x308] ss:$16 sps:$4 sm:$0xff]  }
  0x34   :  { %1765 = vmatprep.subr.bf16.mxu0 %v2933_v55  ;;  %2057 = vmatprep.subr.bf16.mxu1 %v2935_v56  ;;  %v3007_v55 = vld [vmem:[%s4190_s1 + $0x324] ss:$16 sps:$4 sm:$0xff]   ;;  %v3010_v56 = vld [vmem:[%s4190_s1 + $0x32c] ss:$16 sps:$4 sm:$0xff]  }
  0x37   :  { %1766 = vmatpush1.bf16.msra.mxu0 %v2937_v57  ;;  %2058 = vmatpush1.bf16.msra.mxu1 %v2938_v58  ;;  %v3005_v57 = vld [vmem:[%s4190_s1 + $0x320] ss:$16 sps:$4 sm:$0xff]   ;;  %v3008_v58 = vld [vmem:[%s4190_s1 + $0x328] ss:$16 sps:$4 sm:$0xff]  }
  0x38   :  { %1767 = vmatprep.subr.bf16.mxu0 %v2939_v59  ;;  %2059 = vmatprep.subr.bf16.mxu1 %v2941_v60  ;;  %v3013_v59 = vld [vmem:[%s4190_s1 + $0x344] ss:$16 sps:$4 sm:$0xff]   ;;  %v3016_v60 = vld [vmem:[%s4190_s1 + $0x34c] ss:$16 sps:$4 sm:$0xff]  }
  0x3b   :  { %1768 = vmatpush1.bf16.msra.mxu0 %v2943_v61  ;;  %2060 = vmatpush1.bf16.msra.mxu1 %v2944_v62  ;;  %v3011_v61 = vld [vmem:[%s4190_s1 + $0x340] ss:$16 sps:$4 sm:$0xff]   ;;  %v3014_v62 = vld [vmem:[%s4190_s1 + $0x348] ss:$16 sps:$4 sm:$0xff]  }
  0x3c   :  { %1769 = vmatprep.subr.bf16.mxu0 %v2945_v63  ;;  %2061 = vmatprep.subr.bf16.mxu1 %v2947_v0  ;;  %v3019_v63 = vld [vmem:[%s4190_s1 + $0x364] ss:$16 sps:$4 sm:$0xff]   ;;  %v3022_v0 = vld [vmem:[%s4190_s1 + $0x36c] ss:$16 sps:$4 sm:$0xff]  }
  0x3f   :  { %1770 = vmatpush1.bf16.msra.mxu0 %v2949_v1  ;;  %2062 = vmatpush1.bf16.msra.mxu1 %v2950_v2  ;;  %v3017_v1 = vld [vmem:[%s4190_s1 + $0x360] ss:$16 sps:$4 sm:$0xff]   ;;  %v3020_v2 = vld [vmem:[%s4190_s1 + $0x368] ss:$16 sps:$4 sm:$0xff]  }
  0x40   :  { %1812 = vmatprep.subr.bf16.mxu0 %v2953_v3  ;;  %2104 = vmatprep.subr.bf16.mxu1 %v2956_v4  ;;  %v3025_v3 = vld [vmem:[%s4190_s1 + $0x384] ss:$16 sps:$4 sm:$0xff]   ;;  %v3028_v4 = vld [vmem:[%s4190_s1 + $0x38c] ss:$16 sps:$4 sm:$0xff]  }
  0x42   :  { %1772 = vmatmul.mubr.bf16.vlgmr.msra.gmra.mrb[0].mxu0 %v2439_v5  ;;  %2064 = vmatmul.mubr.bf16.vlgmr.msra.gmra.mrb[0].mxu1 %v2439_v5  ;;  %v3023_v5 = vld [vmem:[%s4190_s1 + $0x380] ss:$16 sps:$4 sm:$0xff]  }
  0x43   :  { %1813 = vmatpush1.bf16.msra.mxu0 %v2951_v6  ;;  %2105 = vmatpush1.bf16.msra.mxu1 %v2954_v7  ;;  %v3026_v6 = vld [vmem:[%s4190_s1 + $0x388] ss:$16 sps:$4 sm:$0xff]   ;;  %v3031_v7 = vld [vmem:[%s4190_s1 + $0x3a4] ss:$16 sps:$4 sm:$0xff]  }
  0x44   :  { %1814 = vmatprep.subr.bf16.mxu0 %v2959_v8  ;;  %2106 = vmatprep.subr.bf16.mxu1 %v2962_v9  ;;  %v3034_v8 = vld [vmem:[%s4190_s1 + $0x3ac] ss:$16 sps:$4 sm:$0xff]   ;;  %v3029_v9 = vld [vmem:[%s4190_s1 + $0x3a0] ss:$16 sps:$4 sm:$0xff]  }
  0x45   :  { %1781 = vmatprep.mubr.bf16.mxu0 %v2448_v18  ;;  %2073 = vmatprep.mubr.bf16.mxu1 %v2448_v18  ;;  %v3044_v18 = vld [vmem:[%s4190_s1 + $0x3e8] ss:$16 sps:$4 sm:$0xff]  }
  0x47   :  { %1815 = vmatpush1.bf16.msra.mxu0 %v2957_v10  ;;  %2107 = vmatpush1.bf16.msra.mxu1 %v2960_v11  ;;  %v3032_v10 = vld [vmem:[%s4190_s1 + $0x3a8] ss:$16 sps:$4 sm:$0xff]   ;;  %v3037_v11 = vld [vmem:[%s4190_s1 + $0x3c4] ss:$16 sps:$4 sm:$0xff]  }
  0x48   :  { %1816 = vmatprep.subr.bf16.mxu0 %v2965_v12  ;;  %2108 = vmatprep.subr.bf16.mxu1 %v2968_v13  ;;  %v3040_v12 = vld [vmem:[%s4190_s1 + $0x3cc] ss:$16 sps:$4 sm:$0xff]   ;;  %v3035_v13 = vld [vmem:[%s4190_s1 + $0x3c0] ss:$16 sps:$4 sm:$0xff]  }
  0x4a   :  { %1782 = vmatmul.mubr.bf16.gmra.mrb[4].mxu0 %v2447_v19  ;;  %2074 = vmatmul.mubr.bf16.gmra.mrb[4].mxu1 %v2447_v19  ;;  %v3049_v19 = vld [vmem:[%s4190_s1 + $0x404] ss:$16 sps:$4 sm:$0xff]  }
  0x4b   :  { %1817 = vmatpush1.bf16.msra.mxu0 %v2963_v16  ;;  %2109 = vmatpush1.bf16.msra.mxu1 %v2966_v17  ;;  %v3046_v16 = vld [vmem:[%s4190_s1 + $0x3ec] ss:$16 sps:$4 sm:$0xff]   ;;  %v3041_v17 = vld [vmem:[%s4190_s1 + $0x3e0] ss:$16 sps:$4 sm:$0xff]  }
  0x4c   :  { %1818 = vmatprep.subr.bf16.mxu0 %v2971_v20  ;;  %2110 = vmatprep.subr.bf16.mxu1 %v2974_v21  ;;  %v3052_v20 = vld [vmem:[%s4190_s1 + $0x40c] ss:$16 sps:$4 sm:$0xff]   ;;  %v3047_v21 = vld [vmem:[%s4190_s1 + $0x400] ss:$16 sps:$4 sm:$0xff]  }
  0x4d   :  { %1791 = vmatprep.mubr.bf16.mxu0 %v2456_v28  ;;  %2083 = vmatprep.mubr.bf16.mxu1 %v2456_v28  ;;  %v2450_v28 = vcombine.high %v20_v24, %v24_v25  ;;  %v3130_v24 = vld [vmem:[%s4190_s1 + $0x5ac] ss:$16 sps:$4 sm:$0xff]   ;;  %v3125_v25 = vld [vmem:[%s4190_s1 + $0x5a0] ss:$16 sps:$4 sm:$0xff]  }
  0x4f   :  { %1819 = vmatpush1.bf16.msra.mxu0 %v2969_v22  ;;  %2111 = vmatpush1.bf16.msra.mxu1 %v2972_v23  ;;  %v2441_v22 = vcombine.low %v3557_v44, %v3562_v45  ;;  %v3050_v23 = vld [vmem:[%s4190_s1 + $0x408] ss:$16 sps:$4 sm:$0xff]   ;;  %v3076_v44 = vld [vmem:[%s4190_s1 + $0x48c] ss:$16 sps:$4 sm:$0xff]  }
  0x50   :  { %1820 = vmatprep.subr.bf16.mxu0 %v2977_v26  ;;  %2112 = vmatprep.subr.bf16.mxu1 %v2980_v27  ;;  %v3055_v26 = vld [vmem:[%s4190_s1 + $0x424] ss:$16 sps:$4 sm:$0xff]   ;;  %v3058_v27 = vld [vmem:[%s4190_s1 + $0x42c] ss:$16 sps:$4 sm:$0xff]  }
  0x51   :  { %v36_v45 = vld [vmem:[%s4191_s0 + $0xc8] sm:$0xff] }
  0x52   :  { %1792 = vmatmul.mubr.bf16.gmra.mrb[8].mxu0 %v2455_v29  ;;  %2084 = vmatmul.mubr.bf16.gmra.mrb[8].mxu1 %v2455_v29  ;;  %v3053_v29 = vld [vmem:[%s4190_s1 + $0x420] ss:$16 sps:$4 sm:$0xff]  }
  0x53   :  { %1821 = vmatpush1.bf16.msra.mxu0 %v2975_v30  ;;  %2113 = vmatpush1.bf16.msra.mxu1 %v2978_v31  ;;  %v3056_v30 = vld [vmem:[%s4190_s1 + $0x428] ss:$16 sps:$4 sm:$0xff]   ;;  %v3061_v31 = vld [vmem:[%s4190_s1 + $0x444] ss:$16 sps:$4 sm:$0xff]  }
  0x54   :  { %1822 = vmatprep.subr.bf16.mxu0 %v2983_v32  ;;  %2114 = vmatprep.subr.bf16.mxu1 %v2986_v33  ;;  %v3064_v32 = vld [vmem:[%s4190_s1 + $0x44c] ss:$16 sps:$4 sm:$0xff]  }
  0x55   :  { %1801 = vmatprep.mubr.bf16.mxu0 %v2464_v38  ;;  %2093 = vmatprep.mubr.bf16.mxu1 %v2464_v38  ;;  %v28_v33 = vld [vmem:[%s4191_s0 + $0x88] sm:$0xff]  ;;  %v3067_v38 = vld [vmem:[%s4190_s1 + $0x464] ss:$16 sps:$4 sm:$0xff]  }
  0x57   :  { %1823 = vmatpush1.bf16.msra.mxu0 %v2981_v36  ;;  %2115 = vmatpush1.bf16.msra.mxu1 %v2984_v37  ;;  %v3059_v36 = vld [vmem:[%s4190_s1 + $0x440] ss:$16 sps:$4 sm:$0xff]   ;;  %v3062_v37 = vld [vmem:[%s4190_s1 + $0x448] ss:$16 sps:$4 sm:$0xff]  }
  0x58   :  { %1824 = vmatprep.subr.bf16.mxu0 %v2989_v39  ;;  %2116 = vmatprep.subr.bf16.mxu1 %v2992_v40  ;;  %v3070_v39 = vld [vmem:[%s4190_s1 + $0x46c] ss:$16 sps:$4 sm:$0xff]   ;;  %v2458_v40 = vcombine.high %v28_v33, %v32_v35 }
  0x5a   :  { %1802 = vmatmul.mubr.bf16.gmra.mrb[12].mxu0 %v2463_v43  ;;  %2094 = vmatmul.mubr.bf16.gmra.mrb[12].mxu1 %v2463_v43  ;;  %v3073_v43 = vld [vmem:[%s4190_s1 + $0x484] ss:$16 sps:$4 sm:$0xff]  }
  0x5b   :  { %1825 = vmatpush1.bf16.msra.mxu0 %v2987_v41  ;;  %2117 = vmatpush1.bf16.msra.mxu1 %v2990_v42  ;;  %v3065_v41 = vld [vmem:[%s4190_s1 + $0x460] ss:$16 sps:$4 sm:$0xff]   ;;  %v3068_v42 = vld [vmem:[%s4190_s1 + $0x468] ss:$16 sps:$4 sm:$0xff]  }
  0x5c   :  { %1826 = vmatprep.subr.bf16.mxu0 %v2995_v46  ;;  %2118 = vmatprep.subr.bf16.mxu1 %v2998_v47  ;;  %v2457_v46 = vcombine.low %v28_v33, %v32_v35  ;;  %v40_v47 = vld [vmem:[%s4191_s0 + $0xe8] sm:$0xff]  ;;  %v3137_v33 = vld [vmem:[%s4190_s1 + $0x5e0] ss:$16 sps:$4 sm:$0xff]   ;;  %v3145_v35 = vld [vmem:[%s4190_s1 + $0x604] ss:$16 sps:$4 sm:$0xff]  }
  0x5d   :  { %1844 = vmatprep.mubr.bf16.mxu0 %v2442_v48  ;;  %2136 = vmatprep.mubr.bf16.mxu1 %v2442_v48  ;;  %v3071_v48 = vld [vmem:[%s4190_s1 + $0x480] ss:$16 sps:$4 sm:$0xff]  }
  0x5f   :  { %1827 = vmatpush1.bf16.msra.mxu0 %v2993_v49  ;;  %2119 = vmatpush1.bf16.msra.mxu1 %v2996_v50  ;;  %v3074_v49 = vld [vmem:[%s4190_s1 + $0x488] ss:$16 sps:$4 sm:$0xff]   ;;  %v3079_v50 = vld [vmem:[%s4190_s1 + $0x4a4] ss:$16 sps:$4 sm:$0xff]  }
  0x60   :  { %1828 = vmatprep.subr.bf16.mxu0 %v3001_v51  ;;  %2120 = vmatprep.subr.bf16.mxu1 %v3004_v52  ;;  %v3082_v51 = vld [vmem:[%s4190_s1 + $0x4ac] ss:$16 sps:$4 sm:$0xff]   ;;  %v2466_v52 = vcombine.high %v36_v45, %v40_v47 }
  0x63   :  { %1829 = vmatpush1.bf16.msra.mxu0 %v2999_v53  ;;  %2121 = vmatpush1.bf16.msra.mxu1 %v3002_v54  ;;  %v3077_v53 = vld [vmem:[%s4190_s1 + $0x4a0] ss:$16 sps:$4 sm:$0xff]   ;;  %v3080_v54 = vld [vmem:[%s4190_s1 + $0x4a8] ss:$16 sps:$4 sm:$0xff]  }
  0x64   :  { %1830 = vmatprep.subr.bf16.mxu0 %v3007_v55  ;;  %2122 = vmatprep.subr.bf16.mxu1 %v3010_v56  ;;  %v3085_v55 = vld [vmem:[%s4190_s1 + $0x4c4] ss:$16 sps:$4 sm:$0xff]   ;;  %v3088_v56 = vld [vmem:[%s4190_s1 + $0x4cc] ss:$16 sps:$4 sm:$0xff]  }
  0x67   :  { %1831 = vmatpush1.bf16.msra.mxu0 %v3005_v57  ;;  %2123 = vmatpush1.bf16.msra.mxu1 %v3008_v58  ;;  %v3775_v57 = vld [vmem:[%s4191_s0 + $0x10] sm:$0xff]  ;;  %v2465_v58 = vcombine.low %v36_v45, %v40_v47 }
  0x68   :  { %1832 = vmatprep.subr.bf16.mxu0 %v3013_v59  ;;  %2124 = vmatprep.subr.bf16.mxu1 %v3016_v60  ;;  %v3780_v59 = vld [vmem:[%s4191_s0 + $0x30] sm:$0xff] }
  0x69   :  { %v3083_v60 = vld [vmem:[%s4190_s1 + $0x4c0] ss:$16 sps:$4 sm:$0xff]   ;;  %v3157_v47 = vld [vmem:[%s4190_s1 + $0x644] ss:$16 sps:$4 sm:$0xff]  }
  0x6a   :  { %v3149_v45 = vld [vmem:[%s4190_s1 + $0x620] ss:$16 sps:$4 sm:$0xff]  }
  0x6b   :  { %1833 = vmatpush1.bf16.msra.mxu0 %v3011_v61  ;;  %2125 = vmatpush1.bf16.msra.mxu1 %v3014_v62  ;;  %v3086_v61 = vld [vmem:[%s4190_s1 + $0x4c8] ss:$16 sps:$4 sm:$0xff]   ;;  %v3091_v62 = vld [vmem:[%s4190_s1 + $0x4e4] ss:$16 sps:$4 sm:$0xff]  }
  0x6c   :  { %1834 = vmatprep.subr.bf16.mxu0 %v3019_v63  ;;  %2126 = vmatprep.subr.bf16.mxu1 %v3022_v0  ;;  %v3094_v63 = vld [vmem:[%s4190_s1 + $0x4ec] ss:$16 sps:$4 sm:$0xff]   ;;  %v2444_v0 = vcombine.high %v3775_v57, %v3780_v59 }
  0x6f   :  { %1835 = vmatpush1.bf16.msra.mxu0 %v3017_v1  ;;  %2127 = vmatpush1.bf16.msra.mxu1 %v3020_v2  ;;  %v3089_v1 = vld [vmem:[%s4190_s1 + $0x4e0] ss:$16 sps:$4 sm:$0xff]   ;;  %v3092_v2 = vld [vmem:[%s4190_s1 + $0x4e8] ss:$16 sps:$4 sm:$0xff]  }
  0x70   :  { %1836 = vmatprep.subr.bf16.mxu0 %v3025_v3  ;;  %2128 = vmatprep.subr.bf16.mxu1 %v3028_v4  ;;  %v3097_v3 = vld [vmem:[%s4190_s1 + $0x504] ss:$16 sps:$4 sm:$0xff]   ;;  %v3100_v4 = vld [vmem:[%s4190_s1 + $0x50c] ss:$16 sps:$4 sm:$0xff]  }
  0x73   :  { %1837 = vmatpush1.bf16.msra.mxu0 %v3023_v5  ;;  %2129 = vmatpush1.bf16.msra.mxu1 %v3026_v6  ;;  %v3095_v5 = vld [vmem:[%s4190_s1 + $0x500] ss:$16 sps:$4 sm:$0xff]   ;;  %v3098_v6 = vld [vmem:[%s4190_s1 + $0x508] ss:$16 sps:$4 sm:$0xff]  }
  0x74   :  { %1838 = vmatprep.subr.bf16.mxu0 %v3031_v7  ;;  %2130 = vmatprep.subr.bf16.mxu1 %v3034_v8  ;;  %v3103_v7 = vld [vmem:[%s4190_s1 + $0x524] ss:$16 sps:$4 sm:$0xff]   ;;  %v3106_v8 = vld [vmem:[%s4190_s1 + $0x52c] ss:$16 sps:$4 sm:$0xff]  }
  0x77   :  { %1839 = vmatpush1.bf16.msra.mxu0 %v3029_v9  ;;  %2131 = vmatpush1.bf16.msra.mxu1 %v3032_v10  ;;  %v3101_v9 = vld [vmem:[%s4190_s1 + $0x520] ss:$16 sps:$4 sm:$0xff]   ;;  %v3104_v10 = vld [vmem:[%s4190_s1 + $0x528] ss:$16 sps:$4 sm:$0xff]  }
  0x78   :  { %1840 = vmatprep.subr.bf16.mxu0 %v3037_v11  ;;  %2132 = vmatprep.subr.bf16.mxu1 %v3040_v12  ;;  %v3109_v11 = vld [vmem:[%s4190_s1 + $0x544] ss:$16 sps:$4 sm:$0xff]   ;;  %v3112_v12 = vld [vmem:[%s4190_s1 + $0x54c] ss:$16 sps:$4 sm:$0xff]  }
  0x7b   :  { %1841 = vmatpush1.bf16.msra.mxu0 %v3035_v13  ;;  %2133 = vmatpush1.bf16.msra.mxu1 %v3038_v14  ;;  %v3107_v13 = vld [vmem:[%s4190_s1 + $0x540] ss:$16 sps:$4 sm:$0xff]   ;;  %v3110_v14 = vld [vmem:[%s4190_s1 + $0x548] ss:$16 sps:$4 sm:$0xff]  }
  0x7c   :  { %1842 = vmatprep.subr.bf16.mxu0 %v3043_v15  ;;  %2134 = vmatprep.subr.bf16.mxu1 %v3046_v16  ;;  %v3115_v15 = vld [vmem:[%s4190_s1 + $0x564] ss:$16 sps:$4 sm:$0xff]   ;;  %v3118_v16 = vld [vmem:[%s4190_s1 + $0x56c] ss:$16 sps:$4 sm:$0xff]  }
  0x7f   :  { %1843 = vmatpush1.bf16.msra.mxu0 %v3041_v17  ;;  %2135 = vmatpush1.bf16.msra.mxu1 %v3044_v18  ;;  %v3113_v17 = vld [vmem:[%s4190_s1 + $0x560] ss:$16 sps:$4 sm:$0xff]   ;;  %v3116_v18 = vld [vmem:[%s4190_s1 + $0x568] ss:$16 sps:$4 sm:$0xff]  }
  0x80   :  { %1885 = vmatprep.subr.bf16.mxu0 %v3049_v19  ;;  %2177 = vmatprep.subr.bf16.mxu1 %v3052_v20  ;;  %v3121_v19 = vld [vmem:[%s4190_s1 + $0x584] ss:$16 sps:$4 sm:$0xff]   ;;  %v3124_v20 = vld [vmem:[%s4190_s1 + $0x58c] ss:$16 sps:$4 sm:$0xff]  }
  0x82   :  { %1845 = vmatmul.mubr.bf16.vlgmr.msra.gmra.mrb[0].mxu0 %v2441_v22  ;;  %2137 = vmatmul.mubr.bf16.vlgmr.msra.gmra.mrb[0].mxu1 %v2441_v22  ;;  %v3122_v22 = vld [vmem:[%s4190_s1 + $0x588] ss:$16 sps:$4 sm:$0xff]  }
  0x83   :  { %1886 = vmatpush1.bf16.msra.mxu0 %v3047_v21  ;;  %2178 = vmatpush1.bf16.msra.mxu1 %v3050_v23  ;;  %v3119_v21 = vld [vmem:[%s4190_s1 + $0x580] ss:$16 sps:$4 sm:$0xff]   ;;  %v3127_v23 = vld [vmem:[%s4190_s1 + $0x5a4] ss:$16 sps:$4 sm:$0xff]  }
  0x84   :  { %1887 = vmatprep.subr.bf16.mxu0 %v3055_v26  ;;  %2179 = vmatprep.subr.bf16.mxu1 %v3058_v27  ;;  %v3128_v26 = vld [vmem:[%s4190_s1 + $0x5a8] ss:$16 sps:$4 sm:$0xff]   ;;  %v3133_v27 = vld [vmem:[%s4190_s1 + $0x5c4] ss:$16 sps:$4 sm:$0xff]  }
  0x85   :  { %1854 = vmatprep.mubr.bf16.mxu0 %v2450_v28  ;;  %2146 = vmatprep.mubr.bf16.mxu1 %v2450_v28  ;;  %v3136_v28 = vld [vmem:[%s4190_s1 + $0x5cc] ss:$16 sps:$4 sm:$0xff]  }
  0x87   :  { %1888 = vmatpush1.bf16.msra.mxu0 %v3053_v29  ;;  %2180 = vmatpush1.bf16.msra.mxu1 %v3056_v30  ;;  %v3131_v29 = vld [vmem:[%s4190_s1 + $0x5c0] ss:$16 sps:$4 sm:$0xff]   ;;  %v3134_v30 = vld [vmem:[%s4190_s1 + $0x5c8] ss:$16 sps:$4 sm:$0xff]  }
  0x88   :  { %1889 = vmatprep.subr.bf16.mxu0 %v3061_v31  ;;  %2181 = vmatprep.subr.bf16.mxu1 %v3064_v32  ;;  %v3139_v31 = vld [vmem:[%s4190_s1 + $0x5e4] ss:$16 sps:$4 sm:$0xff]   ;;  %v3142_v32 = vld [vmem:[%s4190_s1 + $0x5ec] ss:$16 sps:$4 sm:$0xff]  }
  0x8a   :  { %1855 = vmatmul.mubr.bf16.gmra.mrb[4].mxu0 %v2449_v34  ;;  %2147 = vmatmul.mubr.bf16.gmra.mrb[4].mxu1 %v2449_v34  ;;  %v3140_v34 = vld [vmem:[%s4190_s1 + $0x5e8] ss:$16 sps:$4 sm:$0xff]  }
  0x8b   :  { %1890 = vmatpush1.bf16.msra.mxu0 %v3059_v36  ;;  %2182 = vmatpush1.bf16.msra.mxu1 %v3062_v37  ;;  %v3148_v36 = vld [vmem:[%s4190_s1 + $0x60c] ss:$16 sps:$4 sm:$0xff]   ;;  %v2443_v37 = vcombine.low %v3775_v57, %v3780_v59  ;;  %v3161_v57 = vld [vmem:[%s4190_s1 + $0x660] ss:$16 sps:$4 sm:$0xff]   ;;  %v3169_v59 = vld [vmem:[%s4190_s1 + $0x684] ss:$16 sps:$4 sm:$0xff]  }
  0x8c   :  { %1891 = vmatprep.subr.bf16.mxu0 %v3067_v38  ;;  %2183 = vmatprep.subr.bf16.mxu1 %v3070_v39  ;;  %v21_v38 = vld [vmem:[%s4191_s0 + $0x50] sm:$0xff] }
  0x8d   :  { %1864 = vmatprep.mubr.bf16.mxu0 %v2458_v40  ;;  %2156 = vmatprep.mubr.bf16.mxu1 %v2458_v40  ;;  %v25_v39 = vld [vmem:[%s4191_s0 + $0x70] sm:$0xff] }
  0x8e   :  { %v3143_v40 = vld [vmem:[%s4190_s1 + $0x600] ss:$16 sps:$4 sm:$0xff]  }
  0x8f   :  { %1892 = vmatpush1.bf16.msra.mxu0 %v3065_v41  ;;  %2184 = vmatpush1.bf16.msra.mxu1 %v3068_v42  ;;  %v3146_v41 = vld [vmem:[%s4190_s1 + $0x608] ss:$16 sps:$4 sm:$0xff]   ;;  %v3151_v42 = vld [vmem:[%s4190_s1 + $0x624] ss:$16 sps:$4 sm:$0xff]  }
  0x90   :  { %1893 = vmatprep.subr.bf16.mxu0 %v3073_v43  ;;  %2185 = vmatprep.subr.bf16.mxu1 %v3076_v44  ;;  %v3154_v43 = vld [vmem:[%s4190_s1 + $0x62c] ss:$16 sps:$4 sm:$0xff]   ;;  %v2452_v44 = vcombine.high %v21_v38, %v25_v39 }
  0x92   :  { %1865 = vmatmul.mubr.bf16.gmra.mrb[8].mxu0 %v2457_v46  ;;  %2157 = vmatmul.mubr.bf16.gmra.mrb[8].mxu1 %v2457_v46  ;;  %v3152_v46 = vld [vmem:[%s4190_s1 + $0x628] ss:$16 sps:$4 sm:$0xff]  }
  0x93   :  { %1894 = vmatpush1.bf16.msra.mxu0 %v3071_v48  ;;  %2186 = vmatpush1.bf16.msra.mxu1 %v3074_v49  ;;  %v3160_v48 = vld [vmem:[%s4190_s1 + $0x64c] ss:$16 sps:$4 sm:$0xff]   ;;  %v2451_v49 = vcombine.low %v21_v38, %v25_v39  ;;  %v3218_v38 = vld [vmem:[%s4190_s1 + $0x788] ss:$16 sps:$4 sm:$0xff]   ;;  %v3223_v39 = vld [vmem:[%s4190_s1 + $0x7a4] ss:$16 sps:$4 sm:$0xff]  }
  0x94   :  { %1895 = vmatprep.subr.bf16.mxu0 %v3079_v50  ;;  %2187 = vmatprep.subr.bf16.mxu1 %v3082_v51  ;;  %v29_v50 = vld [vmem:[%s4191_s0 + $0x90] sm:$0xff] }
  0x95   :  { %1874 = vmatprep.mubr.bf16.mxu0 %v2466_v52  ;;  %2166 = vmatprep.mubr.bf16.mxu1 %v2466_v52  ;;  %v33_v51 = vld [vmem:[%s4191_s0 + $0xb0] sm:$0xff] }
  0x96   :  { %v3155_v52 = vld [vmem:[%s4190_s1 + $0x640] ss:$16 sps:$4 sm:$0xff]  }
  0x97   :  { %1896 = vmatpush1.bf16.msra.mxu0 %v3077_v53  ;;  %2188 = vmatpush1.bf16.msra.mxu1 %v3080_v54  ;;  %v3158_v53 = vld [vmem:[%s4190_s1 + $0x648] ss:$16 sps:$4 sm:$0xff]   ;;  %v3163_v54 = vld [vmem:[%s4190_s1 + $0x664] ss:$16 sps:$4 sm:$0xff]  }
  0x98   :  { %1897 = vmatprep.subr.bf16.mxu0 %v3085_v55  ;;  %2189 = vmatprep.subr.bf16.mxu1 %v3088_v56  ;;  %v3166_v55 = vld [vmem:[%s4190_s1 + $0x66c] ss:$16 sps:$4 sm:$0xff]   ;;  %v2460_v56 = vcombine.high %v29_v50, %v33_v51 }
  0x9a   :  { %1875 = vmatmul.mubr.bf16.gmra.mrb[12].mxu0 %v2465_v58  ;;  %2167 = vmatmul.mubr.bf16.gmra.mrb[12].mxu1 %v2465_v58  ;;  %v3164_v58 = vld [vmem:[%s4190_s1 + $0x668] ss:$16 sps:$4 sm:$0xff]  }
  0x9b   :  { %1898 = vmatpush1.bf16.msra.mxu0 %v3083_v60  ;;  %2190 = vmatpush1.bf16.msra.mxu1 %v3086_v61  ;;  %v3172_v60 = vld [vmem:[%s4190_s1 + $0x68c] ss:$16 sps:$4 sm:$0xff]   ;;  %v2459_v61 = vcombine.low %v29_v50, %v33_v51  ;;  %v3236_v50 = vld [vmem:[%s4190_s1 + $0x7e8] ss:$16 sps:$4 sm:$0xff]  }
  0x9c   :  { %1899 = vmatprep.subr.bf16.mxu0 %v3091_v62  ;;  %2191 = vmatprep.subr.bf16.mxu1 %v3094_v63  ;;  %v37_v62 = vld [vmem:[%s4191_s0 + $0xd0] sm:$0xff]  ;;  %v22_v51 = vld [vmem:[%s4191_s0 + $0x58] sm:$0xff] }
  0x9d   :  { %1917 = vmatprep.mubr.bf16.mxu0 %v2444_v0  ;;  %2209 = vmatprep.mubr.bf16.mxu1 %v2444_v0  ;;  %v41_v63 = vld [vmem:[%s4191_s0 + $0xf0] sm:$0xff] }
  0x9e   :  { %v3167_v0 = vld [vmem:[%s4190_s1 + $0x680] ss:$16 sps:$4 sm:$0xff]  }
  0x9f   :  { %1900 = vmatpush1.bf16.msra.mxu0 %v3089_v1  ;;  %2192 = vmatpush1.bf16.msra.mxu1 %v3092_v2  ;;  %v3170_v1 = vld [vmem:[%s4190_s1 + $0x688] ss:$16 sps:$4 sm:$0xff]   ;;  %v3175_v2 = vld [vmem:[%s4190_s1 + $0x6a4] ss:$16 sps:$4 sm:$0xff]  }
  0xa0   :  { %1901 = vmatprep.subr.bf16.mxu0 %v3097_v3  ;;  %2193 = vmatprep.subr.bf16.mxu1 %v3100_v4  ;;  %v3178_v3 = vld [vmem:[%s4190_s1 + $0x6ac] ss:$16 sps:$4 sm:$0xff]   ;;  %v2468_v4 = vcombine.high %v37_v62, %v41_v63 }
  0xa3   :  { %1902 = vmatpush1.bf16.msra.mxu0 %v3095_v5  ;;  %2194 = vmatpush1.bf16.msra.mxu1 %v3098_v6  ;;  %v3173_v5 = vld [vmem:[%s4190_s1 + $0x6a0] ss:$16 sps:$4 sm:$0xff]   ;;  %v3176_v6 = vld [vmem:[%s4190_s1 + $0x6a8] ss:$16 sps:$4 sm:$0xff]  }
  0xa4   :  { %1903 = vmatprep.subr.bf16.mxu0 %v3103_v7  ;;  %2195 = vmatprep.subr.bf16.mxu1 %v3106_v8  ;;  %v3181_v7 = vld [vmem:[%s4190_s1 + $0x6c4] ss:$16 sps:$4 sm:$0xff]   ;;  %v3184_v8 = vld [vmem:[%s4190_s1 + $0x6cc] ss:$16 sps:$4 sm:$0xff]  }
  0xa7   :  { %1904 = vmatpush1.bf16.msra.mxu0 %v3101_v9  ;;  %2196 = vmatpush1.bf16.msra.mxu1 %v3104_v10  ;;  %v2467_v9 = vcombine.low %v37_v62, %v41_v63  ;;  %v3999_v10 = vld [vmem:[%s4191_s0 + $0x18] sm:$0xff] }
  0xa8   :  { %1905 = vmatprep.subr.bf16.mxu0 %v3109_v11  ;;  %2197 = vmatprep.subr.bf16.mxu1 %v3112_v12  ;;  %v4004_v11 = vld [vmem:[%s4191_s0 + $0x38] sm:$0xff]  ;;  %v3179_v12 = vld [vmem:[%s4190_s1 + $0x6c0] ss:$16 sps:$4 sm:$0xff]  }
  0xab   :  { %1906 = vmatpush1.bf16.msra.mxu0 %v3107_v13  ;;  %2198 = vmatpush1.bf16.msra.mxu1 %v3110_v14  ;;  %v3182_v13 = vld [vmem:[%s4190_s1 + $0x6c8] ss:$16 sps:$4 sm:$0xff]   ;;  %v3187_v14 = vld [vmem:[%s4190_s1 + $0x6e4] ss:$16 sps:$4 sm:$0xff]  }
  0xac   :  { %1907 = vmatprep.subr.bf16.mxu0 %v3115_v15  ;;  %2199 = vmatprep.subr.bf16.mxu1 %v3118_v16  ;;  %v3190_v15 = vld [vmem:[%s4190_s1 + $0x6ec] ss:$16 sps:$4 sm:$0xff]   ;;  %v2446_v16 = vcombine.high %v3999_v10, %v4004_v11 }
  0xaf   :  { %1908 = vmatpush1.bf16.msra.mxu0 %v3113_v17  ;;  %2200 = vmatpush1.bf16.msra.mxu1 %v3116_v18  ;;  %v3185_v17 = vld [vmem:[%s4190_s1 + $0x6e0] ss:$16 sps:$4 sm:$0xff]   ;;  %v3188_v18 = vld [vmem:[%s4190_s1 + $0x6e8] ss:$16 sps:$4 sm:$0xff]  }
  0xb0   :  { %1909 = vmatprep.subr.bf16.mxu0 %v3121_v19  ;;  %2201 = vmatprep.subr.bf16.mxu1 %v3124_v20  ;;  %v3193_v19 = vld [vmem:[%s4190_s1 + $0x704] ss:$16 sps:$4 sm:$0xff]   ;;  %v3196_v20 = vld [vmem:[%s4190_s1 + $0x70c] ss:$16 sps:$4 sm:$0xff]  }
  0xb3   :  { %1910 = vmatpush1.bf16.msra.mxu0 %v3119_v21  ;;  %2202 = vmatpush1.bf16.msra.mxu1 %v3122_v22  ;;  %v3191_v21 = vld [vmem:[%s4190_s1 + $0x700] ss:$16 sps:$4 sm:$0xff]   ;;  %v3194_v22 = vld [vmem:[%s4190_s1 + $0x708] ss:$16 sps:$4 sm:$0xff]  }
  0xb4   :  { %1911 = vmatprep.subr.bf16.mxu0 %v3127_v23  ;;  %2203 = vmatprep.subr.bf16.mxu1 %v3130_v24  ;;  %v3199_v23 = vld [vmem:[%s4190_s1 + $0x724] ss:$16 sps:$4 sm:$0xff]   ;;  %v3202_v24 = vld [vmem:[%s4190_s1 + $0x72c] ss:$16 sps:$4 sm:$0xff]  }
  0xb7   :  { %1912 = vmatpush1.bf16.msra.mxu0 %v3125_v25  ;;  %2204 = vmatpush1.bf16.msra.mxu1 %v3128_v26  ;;  %v3197_v25 = vld [vmem:[%s4190_s1 + $0x720] ss:$16 sps:$4 sm:$0xff]   ;;  %v3200_v26 = vld [vmem:[%s4190_s1 + $0x728] ss:$16 sps:$4 sm:$0xff]  }
  0xb8   :  { %1913 = vmatprep.subr.bf16.mxu0 %v3133_v27  ;;  %2205 = vmatprep.subr.bf16.mxu1 %v3136_v28  ;;  %v3205_v27 = vld [vmem:[%s4190_s1 + $0x744] ss:$16 sps:$4 sm:$0xff]   ;;  %v3208_v28 = vld [vmem:[%s4190_s1 + $0x74c] ss:$16 sps:$4 sm:$0xff]  }
  0xbb   :  { %1914 = vmatpush1.bf16.msra.mxu0 %v3131_v29  ;;  %2206 = vmatpush1.bf16.msra.mxu1 %v3134_v30  ;;  %v3203_v29 = vld [vmem:[%s4190_s1 + $0x740] ss:$16 sps:$4 sm:$0xff]   ;;  %v3206_v30 = vld [vmem:[%s4190_s1 + $0x748] ss:$16 sps:$4 sm:$0xff]  }
  0xbc   :  { %1915 = vmatprep.subr.bf16.mxu0 %v3139_v31  ;;  %2207 = vmatprep.subr.bf16.mxu1 %v3142_v32  ;;  %v3211_v31 = vld [vmem:[%s4190_s1 + $0x764] ss:$16 sps:$4 sm:$0xff]   ;;  %v3214_v32 = vld [vmem:[%s4190_s1 + $0x76c] ss:$16 sps:$4 sm:$0xff]  }
  0xbf   :  { %1916 = vmatpush1.bf16.msra.mxu0 %v3137_v33  ;;  %2208 = vmatpush1.bf16.msra.mxu1 %v3140_v34  ;;  %v3209_v33 = vld [vmem:[%s4190_s1 + $0x760] ss:$16 sps:$4 sm:$0xff]   ;;  %v3212_v34 = vld [vmem:[%s4190_s1 + $0x768] ss:$16 sps:$4 sm:$0xff]  }
  0xc0   :  { %1958 = vmatprep.subr.bf16.mxu0 %v3145_v35  ;;  %2250 = vmatprep.subr.bf16.mxu1 %v3148_v36  ;;  %v3217_v35 = vld [vmem:[%s4190_s1 + $0x784] ss:$16 sps:$4 sm:$0xff]   ;;  %v3220_v36 = vld [vmem:[%s4190_s1 + $0x78c] ss:$16 sps:$4 sm:$0xff]  }
  0xc2   :  { %1918 = vmatmul.mubr.bf16.vlgmr.msra.gmra.mrb[0].mxu0 %v2443_v37  ;;  %2210 = vmatmul.mubr.bf16.vlgmr.msra.gmra.mrb[0].mxu1 %v2443_v37  ;;  %v3215_v37 = vld [vmem:[%s4190_s1 + $0x780] ss:$16 sps:$4 sm:$0xff]  }
  0xc3   :  { %1959 = vmatpush1.bf16.msra.mxu0 %v3143_v40  ;;  %2251 = vmatpush1.bf16.msra.mxu1 %v3146_v41  ;;  %v3226_v40 = vld [vmem:[%s4190_s1 + $0x7ac] ss:$16 sps:$4 sm:$0xff]   ;;  %v3221_v41 = vld [vmem:[%s4190_s1 + $0x7a0] ss:$16 sps:$4 sm:$0xff]  }
  0xc4   :  { %1960 = vmatprep.subr.bf16.mxu0 %v3151_v42  ;;  %2252 = vmatprep.subr.bf16.mxu1 %v3154_v43  ;;  %v3224_v42 = vld [vmem:[%s4190_s1 + $0x7a8] ss:$16 sps:$4 sm:$0xff]   ;;  %v3229_v43 = vld [vmem:[%s4190_s1 + $0x7c4] ss:$16 sps:$4 sm:$0xff]  }
  0xc5   :  { %1927 = vmatprep.mubr.bf16.mxu0 %v2452_v44  ;;  %2219 = vmatprep.mubr.bf16.mxu1 %v2452_v44  ;;  %v3232_v44 = vld [vmem:[%s4190_s1 + $0x7cc] ss:$16 sps:$4 sm:$0xff]  }
  0xc7   :  { %1961 = vmatpush1.bf16.msra.mxu0 %v3149_v45  ;;  %2253 = vmatpush1.bf16.msra.mxu1 %v3152_v46  ;;  %v3227_v45 = vld [vmem:[%s4190_s1 + $0x7c0] ss:$16 sps:$4 sm:$0xff]   ;;  %v3230_v46 = vld [vmem:[%s4190_s1 + $0x7c8] ss:$16 sps:$4 sm:$0xff]  }
  0xc8   :  { %1962 = vmatprep.subr.bf16.mxu0 %v3157_v47  ;;  %2254 = vmatprep.subr.bf16.mxu1 %v3160_v48  ;;  %v3235_v47 = vld [vmem:[%s4190_s1 + $0x7e4] ss:$16 sps:$4 sm:$0xff]   ;;  %v3238_v48 = vld [vmem:[%s4190_s1 + $0x7ec] ss:$16 sps:$4 sm:$0xff]  }
  0xca   :  { %1928 = vmatmul.mubr.bf16.gmra.mrb[4].mxu0 %v2451_v49  ;;  %2220 = vmatmul.mubr.bf16.gmra.mrb[4].mxu1 %v2451_v49  ;;  %v3233_v49 = vld [vmem:[%s4190_s1 + $0x7e0] ss:$16 sps:$4 sm:$0xff]  }
  0xcb   :  { %1963 = vmatpush1.bf16.msra.mxu0 %v3155_v52  ;;  %2255 = vmatpush1.bf16.msra.mxu1 %v3158_v53  ;;  %v26_v52 = vld [vmem:[%s4191_s0 + $0x78] sm:$0xff]  ;;  %v2445_v53 = vcombine.low %v3999_v10, %v4004_v11 }
  0xcc   :  { %1964 = vmatprep.subr.bf16.mxu0 %v3163_v54  ;;  %2256 = vmatprep.subr.bf16.mxu1 %v3166_v55  ;;  %v2454_v54 = vcombine.high %v22_v51, %v26_v52  ;;  %v30_v55 = vld [vmem:[%s4191_s0 + $0x98] sm:$0xff] }
  0xcd   :  { %1937 = vmatprep.mubr.bf16.mxu0 %v2460_v56  ;;  %2229 = vmatprep.mubr.bf16.mxu1 %v2460_v56  ;;  %v34_v56 = vld [vmem:[%s4191_s0 + $0xb8] sm:$0xff] }
  0xcf   :  { %1965 = vmatpush1.bf16.msra.mxu0 %v3161_v57  ;;  %2257 = vmatpush1.bf16.msra.mxu1 %v3164_v58  ;;  %v2453_v57 = vcombine.low %v22_v51, %v26_v52  ;;  %v2462_v58 = vcombine.high %v30_v55, %v34_v56 }
  0xd0   :  { %1966 = vmatprep.subr.bf16.mxu0 %v3169_v59  ;;  %2258 = vmatprep.subr.bf16.mxu1 %v3172_v60  ;;  %v38_v59 = vld [vmem:[%s4191_s0 + $0xd8] sm:$0xff] }
  0xd1   :  { %v42_v60 = vld [vmem:[%s4191_s0 + $0xf8] sm:$0xff] }
  0xd2   :  { %1938 = vmatmul.mubr.bf16.gmra.mrb[8].mxu0 %v2459_v61  ;;  %2230 = vmatmul.mubr.bf16.gmra.mrb[8].mxu1 %v2459_v61  ;;  %v2461_v61 = vcombine.low %v30_v55, %v34_v56  ;;  %v2470_v62 = vcombine.high %v38_v59, %v42_v60  ;;  %v2469_v63 = vcombine.low %v38_v59, %v42_v60 }
  0xd3   :  { %1967 = vmatpush1.bf16.msra.mxu0 %v3167_v0  ;;  %2259 = vmatpush1.bf16.msra.mxu1 %v3170_v1 }
  0xd4   :  { %1968 = vmatprep.subr.bf16.mxu0 %v3175_v2  ;;  %2260 = vmatprep.subr.bf16.mxu1 %v3178_v3 }
  0xd5   :  { %1947 = vmatprep.mubr.bf16.mxu0 %v2468_v4  ;;  %2239 = vmatprep.mubr.bf16.mxu1 %v2468_v4 }
  0xd7   :  { %1969 = vmatpush1.bf16.msra.mxu0 %v3173_v5  ;;  %2261 = vmatpush1.bf16.msra.mxu1 %v3176_v6 }
  0xd8   :  { %1970 = vmatprep.subr.bf16.mxu0 %v3181_v7  ;;  %2262 = vmatprep.subr.bf16.mxu1 %v3184_v8 }
  0xda   :  { %1948 = vmatmul.mubr.bf16.gmra.mrb[12].mxu0 %v2467_v9  ;;  %2240 = vmatmul.mubr.bf16.gmra.mrb[12].mxu1 %v2467_v9 }
  0xdb   :  { %1971 = vmatpush1.bf16.msra.mxu0 %v3179_v12  ;;  %2263 = vmatpush1.bf16.msra.mxu1 %v3182_v13 }
  0xdc   :  { %1972 = vmatprep.subr.bf16.mxu0 %v3187_v14  ;;  %2264 = vmatprep.subr.bf16.mxu1 %v3190_v15 }
  0xdd   :  { %1990 = vmatprep.mubr.bf16.mxu0 %v2446_v16  ;;  %2282 = vmatprep.mubr.bf16.mxu1 %v2446_v16 }
  0xdf   :  { %1973 = vmatpush1.bf16.msra.mxu0 %v3185_v17  ;;  %2265 = vmatpush1.bf16.msra.mxu1 %v3188_v18 }
  0xe0   :  { %1974 = vmatprep.subr.bf16.mxu0 %v3193_v19  ;;  %2266 = vmatprep.subr.bf16.mxu1 %v3196_v20 }
  0xe3   :  { %1975 = vmatpush1.bf16.msra.mxu0 %v3191_v21  ;;  %2267 = vmatpush1.bf16.msra.mxu1 %v3194_v22 }
  0xe4   :  { %1976 = vmatprep.subr.bf16.mxu0 %v3199_v23  ;;  %2268 = vmatprep.subr.bf16.mxu1 %v3202_v24 }
  0xe7   :  { %1977 = vmatpush1.bf16.msra.mxu0 %v3197_v25  ;;  %2269 = vmatpush1.bf16.msra.mxu1 %v3200_v26 }
  0xe8   :  { %1978 = vmatprep.subr.bf16.mxu0 %v3205_v27  ;;  %2270 = vmatprep.subr.bf16.mxu1 %v3208_v28 }
  0xeb   :  { %1979 = vmatpush1.bf16.msra.mxu0 %v3203_v29  ;;  %2271 = vmatpush1.bf16.msra.mxu1 %v3206_v30 }
  0xec   :  { %1980 = vmatprep.subr.bf16.mxu0 %v3211_v31  ;;  %2272 = vmatprep.subr.bf16.mxu1 %v3214_v32 }
  0xef   :  { %1981 = vmatpush1.bf16.msra.mxu0 %v3209_v33  ;;  %2273 = vmatpush1.bf16.msra.mxu1 %v3212_v34 }
  0xf0   :  { %1982 = vmatprep.subr.bf16.mxu0 %v3217_v35  ;;  %2274 = vmatprep.subr.bf16.mxu1 %v3220_v36 }
  0xf3   :  { %1983 = vmatpush1.bf16.msra.mxu0 %v3215_v37  ;;  %2275 = vmatpush1.bf16.msra.mxu1 %v3218_v38 }
  0xf4   :  { %1984 = vmatprep.subr.bf16.mxu0 %v3223_v39  ;;  %2276 = vmatprep.subr.bf16.mxu1 %v3226_v40 }
  0xf7   :  { %1985 = vmatpush1.bf16.msra.mxu0 %v3221_v41  ;;  %2277 = vmatpush1.bf16.msra.mxu1 %v3224_v42 }
  0xf8   :  { %1986 = vmatprep.subr.bf16.mxu0 %v3229_v43  ;;  %2278 = vmatprep.subr.bf16.mxu1 %v3232_v44 }
  0xfb   :  { %1987 = vmatpush1.bf16.msra.mxu0 %v3227_v45  ;;  %2279 = vmatpush1.bf16.msra.mxu1 %v3230_v46 }
  0xfc   :  { %1988 = vmatprep.subr.bf16.mxu0 %v3235_v47  ;;  %2280 = vmatprep.subr.bf16.mxu1 %v3238_v48 }
  0xff   :  { %1989 = vmatpush1.bf16.msra.mxu0 %v3233_v49  ;;  %2281 = vmatpush1.bf16.msra.mxu1 %v3236_v50 }
 0x102   :  { %1991 = vmatmul.mubr.bf16.vlgmr.msra.gmra.mrb[0].mxu0 %v2445_v53  ;;  %2283 = vmatmul.mubr.bf16.vlgmr.msra.gmra.mrb[0].mxu1 %v2445_v53 }
 0x103   :  { %2000 = vmatprep.mubr.bf16.mxu0 %v2454_v54  ;;  %2292 = vmatprep.mubr.bf16.mxu1 %v2454_v54 }
 0x10a   :  { %2001 = vmatmul.mubr.bf16.gmra.mrb[4].mxu0 %v2453_v57  ;;  %2293 = vmatmul.mubr.bf16.gmra.mrb[4].mxu1 %v2453_v57 }
 0x10b   :  { %2010 = vmatprep.mubr.bf16.mxu0 %v2462_v58  ;;  %2302 = vmatprep.mubr.bf16.mxu1 %v2462_v58 }
 0x112   :  { %2011 = vmatmul.mubr.bf16.gmra.mrb[8].mxu0 %v2461_v61  ;;  %2303 = vmatmul.mubr.bf16.gmra.mrb[8].mxu1 %v2461_v61 }
 0x113   :  { %2020 = vmatprep.mubr.bf16.mxu0 %v2470_v62  ;;  %2312 = vmatprep.mubr.bf16.mxu1 %v2470_v62 }
 0x11a   :  { %2021 = vmatmul.mubr.bf16.gmra.mrb[12].mxu0 %v2469_v63  ;;  %2313 = vmatmul.mubr.bf16.gmra.mrb[12].mxu1 %v2469_v63 }
 0x1d5   :  { %v1992_v0 = vpop.f32.mrb[0].mxu0  ;;  %v2284_v1 = vpop.f32.mrb[0].mxu1 }
 0x1d6   :  { %v1994_v2 = vpop.f32.mrb[1].mxu0  ;;  %v2286_v3 = vpop.f32.mrb[1].mxu1 }
 0x1d7   :  { %v2743_v4 = vpack.c.bf16 %v1994_v2, %v1992_v0  ;;  %v2744_v5 = vpack.c.bf16 %v2286_v3, %v2284_v1  ;;  %v1996_v6 = vpop.f32.mrb[2].mxu0  ;;  %v2288_v7 = vpop.f32.mrb[2].mxu1 }
 0x1d8   :  { %v1998_v8 = vpop.f32.mrb[3].mxu0  ;;  %v2290_v9 = vpop.f32.mrb[3].mxu1 }
 0x1d9   :  { %2419 = vst [vmem:[%s4192_s2] sm:$0xff] %v2743_v4  ;;  %2420 = vst [vmem:[%s4192_s2 + $0x8] sm:$0xff] %v2744_v5  ;;  %v2745_v10 = vpack.c.bf16 %v1998_v8, %v1996_v6  ;;  %v2746_v11 = vpack.c.bf16 %v2290_v9, %v2288_v7 }
 0x1db   :  { %2421 = vst [vmem:[%s4192_s2 + $0x10] sm:$0xff] %v2745_v10  ;;  %2422 = vst [vmem:[%s4192_s2 + $0x18] sm:$0xff] %v2746_v11 }
 0x1dd   :  { %v2002_v12 = vpop.f32.mrb[4].mxu0  ;;  %v2294_v13 = vpop.f32.mrb[4].mxu1 }
 0x1de   :  { %v2004_v14 = vpop.f32.mrb[5].mxu0  ;;  %v2296_v15 = vpop.f32.mrb[5].mxu1 }
 0x1df   :  { %v2747_v16 = vpack.c.bf16 %v2004_v14, %v2002_v12  ;;  %v2748_v17 = vpack.c.bf16 %v2296_v15, %v2294_v13  ;;  %v2006_v18 = vpop.f32.mrb[6].mxu0  ;;  %v2298_v19 = vpop.f32.mrb[6].mxu1 }
 0x1e0   :  { %v2008_v20 = vpop.f32.mrb[7].mxu0  ;;  %v2300_v21 = vpop.f32.mrb[7].mxu1 }
 0x1e1   :  { %2423 = vst [vmem:[%s4192_s2 + $0x20] sm:$0xff] %v2747_v16  ;;  %2424 = vst [vmem:[%s4192_s2 + $0x28] sm:$0xff] %v2748_v17  ;;  %v2749_v22 = vpack.c.bf16 %v2008_v20, %v2006_v18  ;;  %v2750_v23 = vpack.c.bf16 %v2300_v21, %v2298_v19 }
 0x1e3   :  { %2425 = vst [vmem:[%s4192_s2 + $0x30] sm:$0xff] %v2749_v22  ;;  %2426 = vst [vmem:[%s4192_s2 + $0x38] sm:$0xff] %v2750_v23 }
 0x1e5   :  { %v2012_v24 = vpop.f32.mrb[8].mxu0  ;;  %v2304_v25 = vpop.f32.mrb[8].mxu1 }
 0x1e6   :  { %v2014_v26 = vpop.f32.mrb[9].mxu0  ;;  %v2306_v27 = vpop.f32.mrb[9].mxu1 }
 0x1e7   :  { %v2751_v28 = vpack.c.bf16 %v2014_v26, %v2012_v24  ;;  %v2752_v29 = vpack.c.bf16 %v2306_v27, %v2304_v25  ;;  %v2016_v30 = vpop.f32.mrb[10].mxu0  ;;  %v2308_v31 = vpop.f32.mrb[10].mxu1 }
 0x1e8   :  { %v2018_v32 = vpop.f32.mrb[11].mxu0  ;;  %v2310_v33 = vpop.f32.mrb[11].mxu1 }
 0x1e9   :  { %2427 = vst [vmem:[%s4192_s2 + $0x40] sm:$0xff] %v2751_v28  ;;  %2428 = vst [vmem:[%s4192_s2 + $0x48] sm:$0xff] %v2752_v29  ;;  %v2753_v34 = vpack.c.bf16 %v2018_v32, %v2016_v30  ;;  %v2754_v35 = vpack.c.bf16 %v2310_v33, %v2308_v31 }
 0x1eb   :  { %2429 = vst [vmem:[%s4192_s2 + $0x50] sm:$0xff] %v2753_v34  ;;  %2430 = vst [vmem:[%s4192_s2 + $0x58] sm:$0xff] %v2754_v35 }
 0x1ed   :  { %v2022_v36 = vpop.f32.mrb[12].mxu0  ;;  %v2314_v37 = vpop.f32.mrb[12].mxu1 }
 0x1ee   :  { %v2024_v38 = vpop.f32.mrb[13].mxu0  ;;  %v2316_v39 = vpop.f32.mrb[13].mxu1 }
 0x1ef   :  { %v2755_v40 = vpack.c.bf16 %v2024_v38, %v2022_v36  ;;  %v2756_v41 = vpack.c.bf16 %v2316_v39, %v2314_v37  ;;  %v2026_v42 = vpop.f32.mrb[14].mxu0  ;;  %v2318_v43 = vpop.f32.mrb[14].mxu1 }
 0x1f0   :  { %v2028_v44 = vpop.f32.mrb[15].mxu0  ;;  %v2320_v45 = vpop.f32.mrb[15].mxu1 }
 0x1f1   :  { %2431 = vst [vmem:[%s4192_s2 + $0x60] sm:$0xff] %v2755_v40  ;;  %2432 = vst [vmem:[%s4192_s2 + $0x68] sm:$0xff] %v2756_v41  ;;  %v2757_v46 = vpack.c.bf16 %v2028_v44, %v2026_v42  ;;  %v2758_v47 = vpack.c.bf16 %v2320_v45, %v2318_v43 }
 0x1f3   :  { %2433 = vst [vmem:[%s4192_s2 + $0x70] sm:$0xff] %v2757_v46  ;;  %2434 = vst [vmem:[%s4192_s2 + $0x78] sm:$0xff] %v2758_v47 }

// kernel: mnist_generator_forward.7
= control target key start
LH: loop header
LB: loop body
LE: loop exit
PB: predicated region body
PF: predicated region fallthrough
CT: control target
= control target key end

     0   :  { %11 = vsyncpa [#allocation3], 0  ;;  %s5554_s0 = inlined_call_operand.vmem [shape: bf16[16,10], index: 0, kind: input, shape index: {}]   ;;  %s5555_s1 = inlined_call_operand.vmem [shape: bf16[16,100], index: 1, kind: input, shape index: {}]   ;;  %s5556_s2 = inlined_call_operand.vmem [shape: bf16[10,100], index: 2, kind: input, shape index: {}]   ;;  %s5557_s3 = inlined_call_operand.vmem [shape: f32[1,100], index: 3, kind: input, shape index: {}]   ;;  %s5558_s4 = inlined_call_operand.hbm [shape: bf16[100,4096], index: 4, kind: input, shape index: {}]   ;;  %s5559_s5 = inlined_call_operand.hbm [shape: bf16[100,4096], index: 5, kind: input, shape index: {}]   ;;  %s5560_s6 = inlined_call_operand.vmem [shape: bf16[16,4096], index: 6, kind: output, shape index: {}]  }
   0x1   :  { %12 = vsyncpa [#allocation5], 0  ;;  %s5210_s21 = smov [#allocation2]   ;;  %s5162_s25 = scalar_lea.hbm %s5558_s4, 26624 }
   0x2   :  { %s26_s22 = sshll.u32 %s5210_s21, 4  ;;  %p5163_p0 = scmp.ne.s32.totalorder %s5558_s4, %s5162_s25  ;;  %s27_s22 = int_to_ptr.vmem [resolvable:$true] %s26_s22 }
   0x3   :  { %p5166_p1 = scmp.lt.u32.totalorder %s5162_s25, %s5558_s4 }
   0x5   :  { %p5168_p2 = pnand %p5166_p1, %p5163_p0 }
   0x7   :  { %5171 = shalt.err (!%p5168_p2)
}
   0x8   :  { %s5172_s30 = scalar_lea.vmem %s27_s22, 26624  ;;  %p5177_p4 = scmp.lt.s32.totalorder %s27_s22, %s27_s22 }
   0x9   :  { %p5173_p3 = scmp.ne.s32.totalorder %s27_s22, %s5172_s30  ;;  %p5178_p5 = scmp.lt.s32.totalorder %s5172_s30, %s5172_s30 }
   0xb   :  { %p5179_p6 = por %p5178_p5, %p5177_p4 }
   0xd   :  { %p5180_p7 = pnand %p5179_p6, %p5173_p3 }
   0xf   :  { %5183 = shalt.err (!%p5180_p7)
}
  0x10   :  { %s5211_s7 = smov 2048   ;;  %s5212_s8 = smov 128  }
  0x11   :  { %32 = dma.hbm_to_vmem [thread:$0]  %s5558_s4, 26624, %s27_s22, [#allocation3], %s5211_s7, %s5211_s7, %s5212_s8  }
  0x12   :  { %s5213_s11 = smov [#allocation4]   ;;  %s5184_s15 = scalar_lea.hbm %s5559_s5, 26624 }
  0x13   :  { %s38_s12 = sshll.u32 %s5213_s11, 4  ;;  %p5185_p8 = scmp.ne.s32.totalorder %s5559_s5, %s5184_s15  ;;  %s39_s12 = int_to_ptr.vmem [resolvable:$true] %s38_s12 }
  0x14   :  { %p5188_p9 = scmp.lt.u32.totalorder %s5184_s15, %s5559_s5 }
  0x16   :  { %p5190_p10 = pnand %p5188_p9, %p5185_p8 }
  0x18   :  { %5193 = shalt.err (!%p5190_p10)
}
  0x19   :  { %s5194_s20 = scalar_lea.vmem %s39_s12, 26624  ;;  %p5199_p12 = scmp.lt.s32.totalorder %s39_s12, %s39_s12 }
  0x1a   :  { %p5195_p11 = scmp.ne.s32.totalorder %s39_s12, %s5194_s20  ;;  %p5200_p13 = scmp.lt.s32.totalorder %s5194_s20, %s5194_s20 }
  0x1c   :  { %p5201_p0 = por %p5200_p13, %p5199_p12 }
  0x1e   :  { %p5202_p1 = pnand %p5201_p0, %p5195_p11 }
  0x20   :  { %5205 = shalt.err (!%p5202_p1)
}
  0x21   :  { %44 = dma.hbm_to_vmem [thread:$0]  %s5559_s5, 26624, %s39_s12, [#allocation5], %s5211_s7, %s5211_s7, %s5212_s8  }
  0x22   :  { %5206 = dma.done.wait [#allocation3], 26624  }
  0x23   :  { %5207 = vsyncadd [#allocation3], 4294940672 }
  0x24   :  { %5208 = dma.done.wait [#allocation5], 26624  }
  0x25   :  { %5209 = vsyncadd [#allocation5], 4294940672  ;;  %v5214_v0 = vmov 0.0   ;;  %vm5215_vm0 = vmmov 0   ;;  %vm77_vm1 = vcmask 1044480   ;;  %v5095_v2 = vld [vmem:[%s5554_s0] sm:$0xff]  }
  0x26   :  { %5017 = vmatprep.subr.bf16.mxu0 %v5214_v0  ;;  %5019 = vmatprep.mubr.msk.bf16.mxu0 %vm5215_vm0, %v5214_v0  ;;  %v5094_v1 = vld [vmem:[%s5556_s2] sm:$0x1f]   ;;  %v336_v6 = vld [vmem:[#allocation4 + $0x8] sm:$0xff]  ;;  %vm73_vm2 = vcmask 80896   ;;  %vm1587_vm3 = vcmask 1041408   ;;  %v337_v60 = vld [vmem:[#allocation4 + $0x10] sm:$0xff] }
  0x27   :  { %v79_v3 = vsel %vm77_vm1, %v5094_v1, 0  ;;  %v335_v4 = vld [vmem:[#allocation4] sm:$0xff]  ;;  %v352_v8 = vld [vmem:[#allocation4 + $0x88] sm:$0xff]  ;;  %v353_v61 = vld [vmem:[#allocation4 + $0x90] sm:$0xff]  ;;  %vm1583_vm4 = vcmask 818176  }
  0x28   :  { %v351_v5 = vld [vmem:[#allocation4 + $0x80] sm:$0xff]  ;;  %5018 = vmatpush3.bf16.msra.mxu0 %v79_v3  ;;  %v4440_v12 = vcombine.low %v336_v6, %v352_v8  ;;  %v4441_v13 = vcombine.high %v336_v6, %v352_v8  ;;  %v368_v15 = vld [vmem:[#allocation4 + $0x108] sm:$0xff]  ;;  %v338_v62 = vld [vmem:[#allocation4 + $0x18] sm:$0xff]  ;;  %v4443_v63 = vcombine.high %v337_v60, %v353_v61  ;;  %v4442_v1 = vcombine.low %v337_v60, %v353_v61 }
  0x29   :  { %v4439_v7 = vcombine.high %v335_v4, %v351_v5  ;;  %v4438_v9 = vcombine.low %v335_v4, %v351_v5  ;;  %v367_v10 = vld [vmem:[#allocation4 + $0x100] sm:$0xff]  ;;  %v384_v16 = vld [vmem:[#allocation4 + $0x188] sm:$0xff]  ;;  %v354_v0 = vld [vmem:[#allocation4 + $0x98] sm:$0xff]  ;;  %v5216_v4 = vmov 0  }
  0x2a   :  { %v383_v11 = vld [vmem:[#allocation4 + $0x180] sm:$0xff]  ;;  %v4473_v18 = vcombine.high %v368_v15, %v384_v16  ;;  %v400_v20 = vld [vmem:[#allocation4 + $0x208] sm:$0xff]  ;;  %1727 = vmatprep.subr.bf16.mxu0 %v4441_v13  ;;  %v4472_v22 = vcombine.low %v368_v15, %v384_v16  ;;  %v4445_v3 = vcombine.high %v338_v62, %v354_v0  ;;  %1716 = vmatprep.mubr.bf16.mxu1 %v5216_v4  ;;  %v385_v13 = vld [vmem:[#allocation4 + $0x190] sm:$0xff] }
  0x2b   :  { %v4471_v14 = vcombine.high %v367_v10, %v383_v11  ;;  %v399_v17 = vld [vmem:[#allocation4 + $0x200] sm:$0xff]  ;;  %1684 = vmatprep.subr.bf16.mxu1 %v4439_v7  ;;  %v416_v21 = vld [vmem:[#allocation4 + $0x288] sm:$0xff]  ;;  %5020 = vmatmul.mubr.msk.bf16.vlgmr.msra.gmra.mrb[0].mxu0 %vm73_vm2, %v5095_v2  ;;  %v4470_v23 = vcombine.low %v367_v10, %v383_v11  ;;  %v4444_v2 = vcombine.low %v338_v62, %v354_v0  ;;  %v386_v15 = vld [vmem:[#allocation4 + $0x198] sm:$0xff] }
  0x2c   :  { %v415_v19 = vld [vmem:[#allocation4 + $0x280] sm:$0xff]  ;;  %1685 = vmatpush1.bf16.msra.mxu1 %v4438_v9  ;;  %1728 = vmatpush1.bf16.msra.mxu0 %v4440_v12  ;;  %v4505_v25 = vcombine.high %v400_v20, %v416_v21  ;;  %v432_v28 = vld [vmem:[#allocation4 + $0x308] sm:$0xff]  ;;  %v4504_v30 = vcombine.low %v400_v20, %v416_v21  ;;  %v369_v12 = vld [vmem:[#allocation4 + $0x110] sm:$0xff] }
  0x2d   :  { %1686 = vmatprep.subr.bf16.mxu1 %v4471_v14  ;;  %1729 = vmatprep.subr.bf16.mxu0 %v4473_v18  ;;  %v4503_v24 = vcombine.high %v399_v17, %v415_v19  ;;  %v431_v26 = vld [vmem:[#allocation4 + $0x300] sm:$0xff]  ;;  %v448_v29 = vld [vmem:[#allocation4 + $0x388] sm:$0xff]  ;;  %v4502_v31 = vcombine.low %v399_v17, %v415_v19  ;;  %v370_v14 = vld [vmem:[#allocation4 + $0x118] sm:$0xff]  ;;  %v4475_v19 = vcombine.high %v369_v12, %v385_v13 }
  0x2e   :  { %v447_v27 = vld [vmem:[#allocation4 + $0x380] sm:$0xff]  ;;  %v4537_v33 = vcombine.high %v432_v28, %v448_v29  ;;  %v464_v36 = vld [vmem:[#allocation4 + $0x408] sm:$0xff]  ;;  %v4536_v38 = vcombine.low %v432_v28, %v448_v29  ;;  %1759 = vmatprep.mubr.bf16.mxu0 %v5216_v4  ;;  %v4477_v20 = vcombine.high %v370_v14, %v386_v15  ;;  %v401_v21 = vld [vmem:[#allocation4 + $0x210] sm:$0xff] }
  0x2f   :  { %v4535_v32 = vcombine.high %v431_v26, %v447_v27  ;;  %v463_v34 = vld [vmem:[#allocation4 + $0x400] sm:$0xff]  ;;  %v480_v37 = vld [vmem:[#allocation4 + $0x488] sm:$0xff]  ;;  %v4534_v39 = vcombine.low %v431_v26, %v447_v27  ;;  %v4476_v26 = vcombine.low %v370_v14, %v386_v15  ;;  %v433_v29 = vld [vmem:[#allocation4 + $0x310] sm:$0xff] }
  0x30   :  { %1687 = vmatpush1.bf16.msra.mxu1 %v4470_v23  ;;  %1730 = vmatpush1.bf16.msra.mxu0 %v4472_v22  ;;  %v479_v35 = vld [vmem:[#allocation4 + $0x480] sm:$0xff]  ;;  %v4569_v41 = vcombine.high %v464_v36, %v480_v37  ;;  %v4568_v42 = vcombine.low %v464_v36, %v480_v37  ;;  %v496_v46 = vld [vmem:[#allocation4 + $0x508] sm:$0xff]  ;;  %v417_v22 = vld [vmem:[#allocation4 + $0x290] sm:$0xff] }
  0x31   :  { %1688 = vmatprep.subr.bf16.mxu1 %v4503_v24  ;;  %1731 = vmatprep.subr.bf16.mxu0 %v4505_v25  ;;  %v4567_v40 = vcombine.high %v463_v34, %v479_v35  ;;  %v4566_v43 = vcombine.low %v463_v34, %v479_v35  ;;  %v495_v44 = vld [vmem:[#allocation4 + $0x500] sm:$0xff]  ;;  %v512_v48 = vld [vmem:[#allocation4 + $0x588] sm:$0xff]  ;;  %v402_v23 = vld [vmem:[#allocation4 + $0x218] sm:$0xff]  ;;  %v4474_v25 = vcombine.low %v369_v12, %v385_v13 }
  0x32   :  { %v511_v45 = vld [vmem:[#allocation4 + $0x580] sm:$0xff]  ;;  %v4600_v49 = vcombine.low %v496_v46, %v512_v48  ;;  %v4601_v50 = vcombine.high %v496_v46, %v512_v48  ;;  %v528_v53 = vld [vmem:[#allocation4 + $0x608] sm:$0x33]  ;;  %v418_v24 = vld [vmem:[#allocation4 + $0x298] sm:$0xff]  ;;  %v4507_v27 = vcombine.high %v401_v21, %v417_v22 }
  0x33   :  { %v4599_v47 = vcombine.high %v495_v44, %v511_v45  ;;  %v4598_v51 = vcombine.low %v495_v44, %v511_v45  ;;  %v527_v52 = vld [vmem:[#allocation4 + $0x600] sm:$0x33]  ;;  %v4633_v55 = vcombine.high %v528_v53, %v528_v53  ;;  %v4632_v57 = vcombine.low %v528_v53, %v528_v53  ;;  %v465_v37 = vld [vmem:[#allocation4 + $0x410] sm:$0xff]  ;;  %v514_v48 = vld [vmem:[#allocation4 + $0x598] sm:$0xff] }
  0x34   :  { %1689 = vmatpush1.bf16.msra.mxu1 %v4502_v31  ;;  %1732 = vmatpush1.bf16.msra.mxu0 %v4504_v30  ;;  %v4631_v54 = vcombine.high %v527_v52, %v527_v52  ;;  %v4630_v56 = vcombine.low %v527_v52, %v527_v52  ;;  %v4434_v5 = vld [vmem:[%s5557_s3] ss:$0 sm:$0xff]  ;;  %v4509_v28 = vcombine.high %v402_v23, %v418_v24  ;;  %v449_v30 = vld [vmem:[#allocation4 + $0x390] sm:$0xff]  ;;  %v434_v31 = vld [vmem:[#allocation4 + $0x318] sm:$0xff] }
  0x35   :  { %1690 = vmatprep.subr.bf16.mxu1 %v4535_v32  ;;  %1733 = vmatprep.subr.bf16.mxu0 %v4537_v33  ;;  %v1595_v59 = vsel %vm1587_vm3, %v4632_v57, 0  ;;  %v450_v32 = vld [vmem:[#allocation4 + $0x398] sm:$0xff]  ;;  %v4506_v33 = vcombine.low %v401_v21, %v417_v22  ;;  %v4508_v34 = vcombine.low %v402_v23, %v418_v24  ;;  %v4539_v35 = vcombine.high %v433_v29, %v449_v30  ;;  %v497_v45 = vld [vmem:[#allocation4 + $0x510] sm:$0xff]  ;;  %v339_v61 = vld [vmem:[#allocation4 + $0x20] sm:$0xff] }
  0x36   :  { %v1589_v58 = vsel %vm1587_vm3, %v4630_v56, 0  ;;  %v4541_v36 = vcombine.high %v434_v31, %v450_v32  ;;  %v513_v46 = vld [vmem:[#allocation4 + $0x590] sm:$0xff]  ;;  %v355_v62 = vld [vmem:[#allocation4 + $0xa0] sm:$0xff]  ;;  %v356_v0 = vld [vmem:[#allocation4 + $0xa8] sm:$0xff] }
  0x37   :  { %v529_v53 = vld [vmem:[#allocation4 + $0x610] sm:$0x33]  ;;  %v403_v14 = vld [vmem:[#allocation4 + $0x220] sm:$0xff] }
  0x38   :  { %1691 = vmatpush1.bf16.msra.mxu1 %v4534_v39  ;;  %1734 = vmatpush1.bf16.msra.mxu0 %v4536_v38  ;;  %v481_v38 = vld [vmem:[#allocation4 + $0x490] sm:$0xff]  ;;  %v466_v39 = vld [vmem:[#allocation4 + $0x418] sm:$0xff]  ;;  %v4635_v57 = vcombine.high %v529_v53, %v529_v53  ;;  %v419_v15 = vld [vmem:[#allocation4 + $0x2a0] sm:$0xff] }
  0x39   :  { %1692 = vmatprep.subr.bf16.mxu1 %v4567_v40  ;;  %1735 = vmatprep.subr.bf16.mxu0 %v4569_v41  ;;  %v482_v40 = vld [vmem:[#allocation4 + $0x498] sm:$0xff]  ;;  %v4538_v41 = vcombine.low %v433_v29, %v449_v30  ;;  %v4511_v21 = vcombine.high %v403_v14, %v419_v15  ;;  %v435_v23 = vld [vmem:[#allocation4 + $0x320] sm:$0xff] }
  0x3a   :  { %v4573_v44 = vcombine.high %v466_v39, %v482_v40  ;;  %v451_v24 = vld [vmem:[#allocation4 + $0x3a0] sm:$0xff] }
  0x3b   :  { %v4543_v29 = vcombine.high %v435_v23, %v451_v24 }
  0x3c   :  { %1693 = vmatpush1.bf16.msra.mxu1 %v4566_v43  ;;  %1736 = vmatpush1.bf16.msra.mxu0 %v4568_v42  ;;  %v4540_v42 = vcombine.low %v434_v31, %v450_v32  ;;  %v4571_v43 = vcombine.high %v465_v37, %v481_v38  ;;  %v467_v31 = vld [vmem:[#allocation4 + $0x420] sm:$0xff] }
  0x3d   :  { %1694 = vmatprep.subr.bf16.mxu1 %v4599_v47  ;;  %1737 = vmatprep.subr.bf16.mxu0 %v4601_v50  ;;  %v498_v47 = vld [vmem:[#allocation4 + $0x518] sm:$0xff]  ;;  %v4572_v50 = vcombine.low %v466_v39, %v482_v40  ;;  %v483_v32 = vld [vmem:[#allocation4 + $0x4a0] sm:$0xff] }
  0x3e   :  { %v4605_v52 = vcombine.high %v498_v47, %v514_v48  ;;  %v4604_v56 = vcombine.low %v498_v47, %v514_v48  ;;  %v499_v39 = vld [vmem:[#allocation4 + $0x520] sm:$0xff]  ;;  %v532_v48 = vld [vmem:[#allocation4 + $0x628] sm:$0x33] }
  0x3f   :  { %v515_v40 = vld [vmem:[#allocation4 + $0x5a0] sm:$0xff] }
  0x40   :  { %1695 = vmatpush1.bf16.msra.mxu1 %v4598_v51  ;;  %1738 = vmatpush1.bf16.msra.mxu0 %v4600_v49  ;;  %v4570_v49 = vcombine.low %v465_v37, %v481_v38  ;;  %v4603_v51 = vcombine.high %v497_v45, %v513_v46  ;;  %v4575_v37 = vcombine.high %v467_v31, %v483_v32  ;;  %v531_v47 = vld [vmem:[#allocation4 + $0x620] sm:$0x33] }
  0x41   :  { %4662 = vmatprep.subr.msk.bf16.mxu1 %vm1587_vm3, %v4631_v54  ;;  %4664 = vmatprep.subr.msk.bf16.mxu0 %vm1587_vm3, %v4633_v55  ;;  %v530_v54 = vld [vmem:[#allocation4 + $0x618] sm:$0x33]  ;;  %v4602_v55 = vcombine.low %v497_v45, %v513_v46  ;;  %v4607_v45 = vcombine.high %v499_v39, %v515_v40 }
  0x42   :  { %v4636_v60 = vcombine.low %v530_v54, %v530_v54 }
  0x44   :  { %1697 = vmatpush1.bf16.msra.mxu1 %v1589_v58  ;;  %1740 = vmatpush1.bf16.msra.mxu0 %v1595_v59  ;;  %v4637_v58 = vcombine.high %v530_v54, %v530_v54  ;;  %v4634_v59 = vcombine.low %v529_v53, %v529_v53  ;;  %v4638_v53 = vcombine.low %v531_v47, %v531_v47 }
  0x45   :  { %1770 = vmatprep.subr.bf16.mxu1 %v4443_v63  ;;  %1813 = vmatprep.subr.bf16.mxu0 %v4445_v3  ;;  %v340_v63 = vld [vmem:[#allocation4 + $0x28] sm:$0xff]  ;;  %v4447_v3 = vcombine.high %v339_v61, %v355_v62  ;;  %v4640_v54 = vcombine.low %v532_v48, %v532_v48 }
  0xfe   :  { %v115_v6 = vpop.f32.mrb[0].mxu0 }
  0xff   :  { %v116_v7 = vadd.f32 %v4434_v5, %v115_v6  ;;  %v5021_v8 = vpop.f32.mrb[1].mxu0  ;;  %v371_v6 = vld [vmem:[#allocation4 + $0x120] sm:$0xff] }
 0x100   :  { %v118_v9 = vpop.f32.mrb[2].mxu0  ;;  %v372_v8 = vld [vmem:[#allocation4 + $0x128] sm:$0xff] }
 0x101   :  { %v119_v10 = vadd.f32 %v4434_v5, %v118_v9  ;;  %v5022_v11 = vpop.f32.mrb[3].mxu0  ;;  %v122_v16 = vmax.f32 %v116_v7, 0.0  ;;  %v4449_v5 = vcombine.high %v340_v63, %v356_v0  ;;  %v387_v7 = vld [vmem:[#allocation4 + $0x1a0] sm:$0xff]  ;;  %v388_v9 = vld [vmem:[#allocation4 + $0x1a8] sm:$0xff] }
 0x102   :  { %v4448_v11 = vcombine.low %v340_v63, %v356_v0  ;;  %v4479_v12 = vcombine.high %v371_v6, %v387_v7  ;;  %v4481_v13 = vcombine.high %v372_v8, %v388_v9  ;;  %v373_v63 = vld [vmem:[#allocation4 + $0x130] sm:$0xff] }
 0x103   :  { %v123_v17 = vmax.f32 %v119_v10, 0.0  ;;  %v4446_v10 = vcombine.low %v339_v61, %v355_v62  ;;  %v389_v0 = vld [vmem:[#allocation4 + $0x1b0] sm:$0xff] }
 0x105   :  { %v5292_v18 = vpack.c.bf16 %v123_v17, %v122_v16  ;;  %v404_v16 = vld [vmem:[#allocation4 + $0x228] sm:$0xff] }
 0x106   :  { %v420_v17 = vld [vmem:[#allocation4 + $0x2a8] sm:$0xff] }
 0x107   :  { %4663 = vmatmul.mubr.msk.bf16.vlgmr.msra.gmra.mrb[0].mxu1 %vm1583_vm4, %v5292_v18  ;;  %4665 = vmatmul.mubr.msk.bf16.vlgmr.msra.gmra.mrb[4].mxu0 %vm1583_vm4, %v5292_v18  ;;  %v4513_v22 = vcombine.high %v404_v16, %v420_v17 }
 0x108   :  { %1771 = vmatpush1.bf16.msra.mxu1 %v4442_v1  ;;  %1814 = vmatpush1.bf16.msra.mxu0 %v4444_v2  ;;  %v1601_v1 = vsel %vm1587_vm3, %v4634_v59, 0  ;;  %v1607_v2 = vsel %vm1587_vm3, %v4636_v60, 0  ;;  %v1613_v59 = vsel %vm1587_vm3, %v4638_v53, 0  ;;  %v1619_v60 = vsel %vm1587_vm3, %v4640_v54, 0 }
 0x109   :  { %1772 = vmatprep.subr.bf16.mxu1 %v4475_v19  ;;  %1815 = vmatprep.subr.bf16.mxu0 %v4477_v20  ;;  %v4478_v19 = vcombine.low %v371_v6, %v387_v7  ;;  %v4480_v20 = vcombine.low %v372_v8, %v388_v9  ;;  %v4483_v6 = vcombine.high %v373_v63, %v389_v0  ;;  %v405_v8 = vld [vmem:[#allocation4 + $0x230] sm:$0xff] }
 0x10a   :  { %1802 = vmatprep.mubr.bf16.mxu1 %v5216_v4  ;;  %1845 = vmatprep.mubr.bf16.mxu0 %v5216_v4  ;;  %v421_v9 = vld [vmem:[#allocation4 + $0x2b0] sm:$0xff] }
 0x10c   :  { %1773 = vmatpush1.bf16.msra.mxu1 %v4474_v25  ;;  %1816 = vmatpush1.bf16.msra.mxu0 %v4476_v26  ;;  %v436_v25 = vld [vmem:[#allocation4 + $0x328] sm:$0xff] }
 0x10d   :  { %1774 = vmatprep.subr.bf16.mxu1 %v4507_v27  ;;  %1817 = vmatprep.subr.bf16.mxu0 %v4509_v28  ;;  %v452_v26 = vld [vmem:[#allocation4 + $0x3a8] sm:$0xff]  ;;  %v4510_v27 = vcombine.low %v403_v14, %v419_v15  ;;  %v4512_v28 = vcombine.low %v404_v16, %v420_v17  ;;  %v4515_v14 = vcombine.high %v405_v8, %v421_v9  ;;  %v437_v16 = vld [vmem:[#allocation4 + $0x330] sm:$0xff] }
 0x10e   :  { %v4545_v30 = vcombine.high %v436_v25, %v452_v26  ;;  %v453_v17 = vld [vmem:[#allocation4 + $0x3b0] sm:$0xff] }
 0x110   :  { %1775 = vmatpush1.bf16.msra.mxu1 %v4506_v33  ;;  %1818 = vmatpush1.bf16.msra.mxu0 %v4508_v34  ;;  %v468_v33 = vld [vmem:[#allocation4 + $0x428] sm:$0xff] }
 0x111   :  { %1776 = vmatprep.subr.bf16.mxu1 %v4539_v35  ;;  %1819 = vmatprep.subr.bf16.mxu0 %v4541_v36  ;;  %v484_v34 = vld [vmem:[#allocation4 + $0x4a8] sm:$0xff]  ;;  %v4542_v35 = vcombine.low %v435_v23, %v451_v24  ;;  %v4544_v36 = vcombine.low %v436_v25, %v452_v26  ;;  %v4547_v23 = vcombine.high %v437_v16, %v453_v17  ;;  %v469_v25 = vld [vmem:[#allocation4 + $0x430] sm:$0xff] }
 0x112   :  { %v4577_v38 = vcombine.high %v468_v33, %v484_v34  ;;  %v485_v26 = vld [vmem:[#allocation4 + $0x4b0] sm:$0xff] }
 0x114   :  { %1777 = vmatpush1.bf16.msra.mxu1 %v4538_v41  ;;  %1820 = vmatpush1.bf16.msra.mxu0 %v4540_v42  ;;  %v500_v41 = vld [vmem:[#allocation4 + $0x528] sm:$0xff] }
 0x115   :  { %1778 = vmatprep.subr.bf16.mxu1 %v4571_v43  ;;  %1821 = vmatprep.subr.bf16.mxu0 %v4573_v44  ;;  %v516_v42 = vld [vmem:[#allocation4 + $0x5a8] sm:$0xff]  ;;  %v4574_v43 = vcombine.low %v467_v31, %v483_v32  ;;  %v4576_v44 = vcombine.low %v468_v33, %v484_v34  ;;  %v4579_v31 = vcombine.high %v469_v25, %v485_v26  ;;  %v501_v33 = vld [vmem:[#allocation4 + $0x530] sm:$0xff] }
 0x116   :  { %v4609_v46 = vcombine.high %v500_v41, %v516_v42  ;;  %v517_v34 = vld [vmem:[#allocation4 + $0x5b0] sm:$0xff] }
 0x118   :  { %1779 = vmatpush1.bf16.msra.mxu1 %v4570_v49  ;;  %1822 = vmatpush1.bf16.msra.mxu0 %v4572_v50  ;;  %v4606_v49 = vcombine.low %v499_v39, %v515_v40  ;;  %v4608_v50 = vcombine.low %v500_v41, %v516_v42  ;;  %v4611_v39 = vcombine.high %v501_v33, %v517_v34  ;;  %v533_v41 = vld [vmem:[#allocation4 + $0x630] sm:$0x33]  ;;  %v534_v42 = vld [vmem:[#allocation4 + $0x638] sm:$0x33] }
 0x119   :  { %1780 = vmatprep.subr.bf16.mxu1 %v4603_v51  ;;  %1823 = vmatprep.subr.bf16.mxu0 %v4605_v52  ;;  %v4639_v51 = vcombine.high %v531_v47, %v531_v47  ;;  %v4641_v52 = vcombine.high %v532_v48, %v532_v48  ;;  %v4642_v47 = vcombine.low %v533_v41, %v533_v41 }
 0x11a   :  { %v4644_v48 = vcombine.low %v534_v42, %v534_v42 }
 0x11b   :  { %v1625_v53 = vsel %vm1587_vm3, %v4642_v47, 0 }
 0x11c   :  { %1781 = vmatpush1.bf16.msra.mxu1 %v4602_v55  ;;  %1824 = vmatpush1.bf16.msra.mxu0 %v4604_v56  ;;  %v341_v55 = vld [vmem:[#allocation4 + $0x30] sm:$0xff]  ;;  %v1631_v54 = vsel %vm1587_vm3, %v4644_v48, 0 }
 0x11d   :  { %4666 = vmatprep.subr.msk.bf16.mxu1 %vm1587_vm3, %v4635_v57  ;;  %4668 = vmatprep.subr.msk.bf16.mxu0 %vm1587_vm3, %v4637_v58  ;;  %v357_v56 = vld [vmem:[#allocation4 + $0xb0] sm:$0xff]  ;;  %v342_v57 = vld [vmem:[#allocation4 + $0x38] sm:$0xff] }
 0x11e   :  { %v358_v58 = vld [vmem:[#allocation4 + $0xb8] sm:$0xff]  ;;  %v4451_v61 = vcombine.high %v341_v55, %v357_v56 }
 0x11f   :  { %v4453_v62 = vcombine.high %v342_v57, %v358_v58 }
 0x120   :  { %1783 = vmatpush1.bf16.msra.mxu1 %v1601_v1  ;;  %1826 = vmatpush1.bf16.msra.mxu0 %v1607_v2  ;;  %v374_v1 = vld [vmem:[#allocation4 + $0x138] sm:$0xff] }
 0x121   :  { %1856 = vmatprep.subr.bf16.mxu1 %v4447_v3  ;;  %1899 = vmatprep.subr.bf16.mxu0 %v4449_v5  ;;  %v390_v2 = vld [vmem:[#allocation4 + $0x1b8] sm:$0xff]  ;;  %v4450_v3 = vcombine.low %v341_v55, %v357_v56  ;;  %v4452_v5 = vcombine.low %v342_v57, %v358_v58  ;;  %v375_v57 = vld [vmem:[#allocation4 + $0x140] sm:$0xff] }
 0x122   :  { %v4485_v7 = vcombine.high %v374_v1, %v390_v2  ;;  %v391_v58 = vld [vmem:[#allocation4 + $0x1c0] sm:$0xff] }
 0x123   :  { %4667 = vmatmul.mubr.msk.bf16.vlgmr.msra.gmra.mrb[4].mxu1 %vm1583_vm4, %v5292_v18  ;;  %4669 = vmatmul.mubr.msk.bf16.vlgmr.msra.gmra.mrb[8].mxu0 %vm1583_vm4, %v5292_v18 }
 0x124   :  { %1857 = vmatpush1.bf16.msra.mxu1 %v4446_v10  ;;  %1900 = vmatpush1.bf16.msra.mxu0 %v4448_v11  ;;  %v406_v10 = vld [vmem:[#allocation4 + $0x238] sm:$0xff] }
 0x125   :  { %1858 = vmatprep.subr.bf16.mxu1 %v4479_v12  ;;  %1901 = vmatprep.subr.bf16.mxu0 %v4481_v13  ;;  %v422_v11 = vld [vmem:[#allocation4 + $0x2b8] sm:$0xff]  ;;  %v4482_v12 = vcombine.low %v373_v63, %v389_v0  ;;  %v4484_v13 = vcombine.low %v374_v1, %v390_v2  ;;  %v4487_v63 = vcombine.high %v375_v57, %v391_v58  ;;  %v407_v1 = vld [vmem:[#allocation4 + $0x240] sm:$0xff] }
 0x126   :  { %1888 = vmatprep.mubr.bf16.mxu1 %v5216_v4  ;;  %1931 = vmatprep.mubr.bf16.mxu0 %v5216_v4  ;;  %v4517_v15 = vcombine.high %v406_v10, %v422_v11  ;;  %v423_v2 = vld [vmem:[#allocation4 + $0x2c0] sm:$0xff] }
 0x128   :  { %1859 = vmatpush1.bf16.msra.mxu1 %v4478_v19  ;;  %1902 = vmatpush1.bf16.msra.mxu0 %v4480_v20  ;;  %v438_v19 = vld [vmem:[#allocation4 + $0x338] sm:$0xff] }
 0x129   :  { %1860 = vmatprep.subr.bf16.mxu1 %v4511_v21  ;;  %1903 = vmatprep.subr.bf16.mxu0 %v4513_v22  ;;  %v454_v20 = vld [vmem:[#allocation4 + $0x3b8] sm:$0xff]  ;;  %v4514_v21 = vcombine.low %v405_v8, %v421_v9  ;;  %v4516_v22 = vcombine.low %v406_v10, %v422_v11  ;;  %v4519_v8 = vcombine.high %v407_v1, %v423_v2  ;;  %v439_v10 = vld [vmem:[#allocation4 + $0x340] sm:$0xff] }
 0x12a   :  { %v4549_v24 = vcombine.high %v438_v19, %v454_v20  ;;  %v455_v11 = vld [vmem:[#allocation4 + $0x3c0] sm:$0xff] }
 0x12c   :  { %1861 = vmatpush1.bf16.msra.mxu1 %v4510_v27  ;;  %1904 = vmatpush1.bf16.msra.mxu0 %v4512_v28  ;;  %v470_v27 = vld [vmem:[#allocation4 + $0x438] sm:$0xff] }
 0x12d   :  { %1862 = vmatprep.subr.bf16.mxu1 %v4543_v29  ;;  %1905 = vmatprep.subr.bf16.mxu0 %v4545_v30  ;;  %v486_v28 = vld [vmem:[#allocation4 + $0x4b8] sm:$0xff]  ;;  %v4546_v29 = vcombine.low %v437_v16, %v453_v17  ;;  %v4548_v30 = vcombine.low %v438_v19, %v454_v20  ;;  %v4551_v16 = vcombine.high %v439_v10, %v455_v11  ;;  %v471_v19 = vld [vmem:[#allocation4 + $0x440] sm:$0xff] }
 0x12e   :  { %v4581_v32 = vcombine.high %v470_v27, %v486_v28  ;;  %v487_v20 = vld [vmem:[#allocation4 + $0x4c0] sm:$0xff] }
 0x130   :  { %1863 = vmatpush1.bf16.msra.mxu1 %v4542_v35  ;;  %1906 = vmatpush1.bf16.msra.mxu0 %v4544_v36  ;;  %v502_v35 = vld [vmem:[#allocation4 + $0x538] sm:$0xff] }
 0x131   :  { %1864 = vmatprep.subr.bf16.mxu1 %v4575_v37  ;;  %1907 = vmatprep.subr.bf16.mxu0 %v4577_v38  ;;  %v518_v36 = vld [vmem:[#allocation4 + $0x5b8] sm:$0xff]  ;;  %v4578_v37 = vcombine.low %v469_v25, %v485_v26  ;;  %v4580_v38 = vcombine.low %v470_v27, %v486_v28  ;;  %v4583_v25 = vcombine.high %v471_v19, %v487_v20  ;;  %v503_v27 = vld [vmem:[#allocation4 + $0x540] sm:$0xff] }
 0x132   :  { %v4613_v40 = vcombine.high %v502_v35, %v518_v36  ;;  %v519_v28 = vld [vmem:[#allocation4 + $0x5c0] sm:$0xff] }
 0x134   :  { %1865 = vmatpush1.bf16.msra.mxu1 %v4574_v43  ;;  %1908 = vmatpush1.bf16.msra.mxu0 %v4576_v44  ;;  %v4610_v43 = vcombine.low %v501_v33, %v517_v34  ;;  %v4612_v44 = vcombine.low %v502_v35, %v518_v36  ;;  %v4615_v33 = vcombine.high %v503_v27, %v519_v28  ;;  %v535_v35 = vld [vmem:[#allocation4 + $0x640] sm:$0x33]  ;;  %v536_v36 = vld [vmem:[#allocation4 + $0x648] sm:$0x33] }
 0x135   :  { %1866 = vmatprep.subr.bf16.mxu1 %v4607_v45  ;;  %1909 = vmatprep.subr.bf16.mxu0 %v4609_v46  ;;  %v4643_v45 = vcombine.high %v533_v41, %v533_v41  ;;  %v4645_v46 = vcombine.high %v534_v42, %v534_v42  ;;  %v4646_v41 = vcombine.low %v535_v35, %v535_v35 }
 0x136   :  { %v4648_v42 = vcombine.low %v536_v36, %v536_v36 }
 0x137   :  { %v1637_v47 = vsel %vm1587_vm3, %v4646_v41, 0 }
 0x138   :  { %1867 = vmatpush1.bf16.msra.mxu1 %v4606_v49  ;;  %1910 = vmatpush1.bf16.msra.mxu0 %v4608_v50  ;;  %v343_v49 = vld [vmem:[#allocation4 + $0x40] sm:$0xff]  ;;  %v1643_v48 = vsel %vm1587_vm3, %v4648_v42, 0 }
 0x139   :  { %4670 = vmatprep.subr.msk.bf16.mxu1 %vm1587_vm3, %v4639_v51  ;;  %4672 = vmatprep.subr.msk.bf16.mxu0 %vm1587_vm3, %v4641_v52  ;;  %v359_v50 = vld [vmem:[#allocation4 + $0xc0] sm:$0xff]  ;;  %v344_v51 = vld [vmem:[#allocation4 + $0x48] sm:$0xff] }
 0x13a   :  { %v360_v52 = vld [vmem:[#allocation4 + $0xc8] sm:$0xff]  ;;  %v4455_v55 = vcombine.high %v343_v49, %v359_v50 }
 0x13b   :  { %v4457_v56 = vcombine.high %v344_v51, %v360_v52 }
 0x13c   :  { %1869 = vmatpush1.bf16.msra.mxu1 %v1613_v59  ;;  %1912 = vmatpush1.bf16.msra.mxu0 %v1619_v60  ;;  %v376_v59 = vld [vmem:[#allocation4 + $0x148] sm:$0xff] }
 0x13d   :  { %1942 = vmatprep.subr.bf16.mxu1 %v4451_v61  ;;  %1985 = vmatprep.subr.bf16.mxu0 %v4453_v62  ;;  %v392_v60 = vld [vmem:[#allocation4 + $0x1c8] sm:$0xff]  ;;  %v4454_v61 = vcombine.low %v343_v49, %v359_v50  ;;  %v4456_v62 = vcombine.low %v344_v51, %v360_v52  ;;  %v377_v51 = vld [vmem:[#allocation4 + $0x150] sm:$0xff] }
 0x13e   :  { %v4489_v0 = vcombine.high %v376_v59, %v392_v60  ;;  %v393_v52 = vld [vmem:[#allocation4 + $0x1d0] sm:$0xff] }
 0x13f   :  { %4671 = vmatmul.mubr.msk.bf16.vlgmr.msra.gmra.mrb[8].mxu1 %vm1583_vm4, %v5292_v18  ;;  %4673 = vmatmul.mubr.msk.bf16.vlgmr.msra.gmra.mrb[12].mxu0 %vm1583_vm4, %v5292_v18 }
 0x140   :  { %1943 = vmatpush1.bf16.msra.mxu1 %v4450_v3  ;;  %1986 = vmatpush1.bf16.msra.mxu0 %v4452_v5  ;;  %v408_v3 = vld [vmem:[#allocation4 + $0x248] sm:$0xff] }
 0x141   :  { %1944 = vmatprep.subr.bf16.mxu1 %v4483_v6  ;;  %1987 = vmatprep.subr.bf16.mxu0 %v4485_v7  ;;  %v424_v5 = vld [vmem:[#allocation4 + $0x2c8] sm:$0xff]  ;;  %v4486_v6 = vcombine.low %v375_v57, %v391_v58  ;;  %v4488_v7 = vcombine.low %v376_v59, %v392_v60  ;;  %v4491_v57 = vcombine.high %v377_v51, %v393_v52  ;;  %v409_v59 = vld [vmem:[#allocation4 + $0x250] sm:$0xff] }
 0x142   :  { %1974 = vmatprep.mubr.bf16.mxu1 %v5216_v4  ;;  %2017 = vmatprep.mubr.bf16.mxu0 %v5216_v4  ;;  %v4521_v9 = vcombine.high %v408_v3, %v424_v5  ;;  %v425_v60 = vld [vmem:[#allocation4 + $0x2d0] sm:$0xff] }
 0x144   :  { %1945 = vmatpush1.bf16.msra.mxu1 %v4482_v12  ;;  %1988 = vmatpush1.bf16.msra.mxu0 %v4484_v13  ;;  %v440_v12 = vld [vmem:[#allocation4 + $0x348] sm:$0xff] }
 0x145   :  { %1946 = vmatprep.subr.bf16.mxu1 %v4515_v14  ;;  %1989 = vmatprep.subr.bf16.mxu0 %v4517_v15  ;;  %v456_v13 = vld [vmem:[#allocation4 + $0x3c8] sm:$0xff]  ;;  %v4518_v14 = vcombine.low %v407_v1, %v423_v2  ;;  %v4520_v15 = vcombine.low %v408_v3, %v424_v5  ;;  %v4523_v1 = vcombine.high %v409_v59, %v425_v60  ;;  %v441_v3 = vld [vmem:[#allocation4 + $0x350] sm:$0xff] }
 0x146   :  { %v4553_v17 = vcombine.high %v440_v12, %v456_v13  ;;  %v457_v5 = vld [vmem:[#allocation4 + $0x3d0] sm:$0xff] }
 0x148   :  { %1947 = vmatpush1.bf16.msra.mxu1 %v4514_v21  ;;  %1990 = vmatpush1.bf16.msra.mxu0 %v4516_v22  ;;  %v472_v21 = vld [vmem:[#allocation4 + $0x448] sm:$0xff] }
 0x149   :  { %1948 = vmatprep.subr.bf16.mxu1 %v4547_v23  ;;  %1991 = vmatprep.subr.bf16.mxu0 %v4549_v24  ;;  %v488_v22 = vld [vmem:[#allocation4 + $0x4c8] sm:$0xff]  ;;  %v4550_v23 = vcombine.low %v439_v10, %v455_v11  ;;  %v4552_v24 = vcombine.low %v440_v12, %v456_v13  ;;  %v4555_v10 = vcombine.high %v441_v3, %v457_v5  ;;  %v473_v12 = vld [vmem:[#allocation4 + $0x450] sm:$0xff] }
 0x14a   :  { %v4585_v26 = vcombine.high %v472_v21, %v488_v22  ;;  %v489_v13 = vld [vmem:[#allocation4 + $0x4d0] sm:$0xff] }
 0x14c   :  { %1949 = vmatpush1.bf16.msra.mxu1 %v4546_v29  ;;  %1992 = vmatpush1.bf16.msra.mxu0 %v4548_v30  ;;  %v504_v29 = vld [vmem:[#allocation4 + $0x548] sm:$0xff] }
 0x14d   :  { %1950 = vmatprep.subr.bf16.mxu1 %v4579_v31  ;;  %1993 = vmatprep.subr.bf16.mxu0 %v4581_v32  ;;  %v520_v30 = vld [vmem:[#allocation4 + $0x5c8] sm:$0xff]  ;;  %v4582_v31 = vcombine.low %v471_v19, %v487_v20  ;;  %v4584_v32 = vcombine.low %v472_v21, %v488_v22  ;;  %v4587_v19 = vcombine.high %v473_v12, %v489_v13  ;;  %v505_v21 = vld [vmem:[#allocation4 + $0x550] sm:$0xff] }
 0x14e   :  { %v4617_v34 = vcombine.high %v504_v29, %v520_v30  ;;  %v521_v22 = vld [vmem:[#allocation4 + $0x5d0] sm:$0xff] }
 0x150   :  { %1951 = vmatpush1.bf16.msra.mxu1 %v4578_v37  ;;  %1994 = vmatpush1.bf16.msra.mxu0 %v4580_v38  ;;  %v4614_v37 = vcombine.low %v503_v27, %v519_v28  ;;  %v4616_v38 = vcombine.low %v504_v29, %v520_v30  ;;  %v4619_v27 = vcombine.high %v505_v21, %v521_v22  ;;  %v537_v29 = vld [vmem:[#allocation4 + $0x650] sm:$0x33]  ;;  %v538_v30 = vld [vmem:[#allocation4 + $0x658] sm:$0x33] }
 0x151   :  { %1952 = vmatprep.subr.bf16.mxu1 %v4611_v39  ;;  %1995 = vmatprep.subr.bf16.mxu0 %v4613_v40  ;;  %v4647_v39 = vcombine.high %v535_v35, %v535_v35  ;;  %v4649_v40 = vcombine.high %v536_v36, %v536_v36  ;;  %v4650_v35 = vcombine.low %v537_v29, %v537_v29 }
 0x152   :  { %v4652_v36 = vcombine.low %v538_v30, %v538_v30 }
 0x153   :  { %v1649_v41 = vsel %vm1587_vm3, %v4650_v35, 0 }
 0x154   :  { %1953 = vmatpush1.bf16.msra.mxu1 %v4610_v43  ;;  %1996 = vmatpush1.bf16.msra.mxu0 %v4612_v44  ;;  %v345_v43 = vld [vmem:[#allocation4 + $0x50] sm:$0xff]  ;;  %v1655_v42 = vsel %vm1587_vm3, %v4652_v36, 0 }
 0x155   :  { %4674 = vmatprep.subr.msk.bf16.mxu1 %vm1587_vm3, %v4643_v45  ;;  %4676 = vmatprep.subr.msk.bf16.mxu0 %vm1587_vm3, %v4645_v46  ;;  %v361_v44 = vld [vmem:[#allocation4 + $0xd0] sm:$0xff]  ;;  %v346_v45 = vld [vmem:[#allocation4 + $0x58] sm:$0xff] }
 0x156   :  { %v362_v46 = vld [vmem:[#allocation4 + $0xd8] sm:$0xff]  ;;  %v4459_v49 = vcombine.high %v345_v43, %v361_v44 }
 0x157   :  { %v4461_v50 = vcombine.high %v346_v45, %v362_v46 }
 0x158   :  { %1955 = vmatpush1.bf16.msra.mxu1 %v1625_v53  ;;  %1998 = vmatpush1.bf16.msra.mxu0 %v1631_v54  ;;  %v378_v53 = vld [vmem:[#allocation4 + $0x158] sm:$0xff] }
 0x159   :  { %2028 = vmatprep.subr.bf16.mxu1 %v4455_v55  ;;  %2071 = vmatprep.subr.bf16.mxu0 %v4457_v56  ;;  %v394_v54 = vld [vmem:[#allocation4 + $0x1d8] sm:$0xff]  ;;  %v4458_v55 = vcombine.low %v345_v43, %v361_v44  ;;  %v4460_v56 = vcombine.low %v346_v45, %v362_v46  ;;  %v379_v45 = vld [vmem:[#allocation4 + $0x160] sm:$0xff] }
 0x15a   :  { %v4493_v58 = vcombine.high %v378_v53, %v394_v54  ;;  %v395_v46 = vld [vmem:[#allocation4 + $0x1e0] sm:$0xff] }
 0x15b   :  { %4675 = vmatmul.mubr.msk.bf16.vlgmr.msra.gmra.mrb[12].mxu1 %vm1583_vm4, %v5292_v18  ;;  %4677 = vmatmul.mubr.msk.bf16.vlgmr.msra.gmra.mrb[16].mxu0 %vm1583_vm4, %v5292_v18 }
 0x15c   :  { %2029 = vmatpush1.bf16.msra.mxu1 %v4454_v61  ;;  %2072 = vmatpush1.bf16.msra.mxu0 %v4456_v62  ;;  %v410_v61 = vld [vmem:[#allocation4 + $0x258] sm:$0xff] }
 0x15d   :  { %2030 = vmatprep.subr.bf16.mxu1 %v4487_v63  ;;  %2073 = vmatprep.subr.bf16.mxu0 %v4489_v0  ;;  %v426_v62 = vld [vmem:[#allocation4 + $0x2d8] sm:$0xff]  ;;  %v4490_v63 = vcombine.low %v377_v51, %v393_v52  ;;  %v4492_v0 = vcombine.low %v378_v53, %v394_v54  ;;  %v4495_v51 = vcombine.high %v379_v45, %v395_v46  ;;  %v411_v53 = vld [vmem:[#allocation4 + $0x260] sm:$0xff] }
 0x15e   :  { %2060 = vmatprep.mubr.bf16.mxu1 %v5216_v4  ;;  %2103 = vmatprep.mubr.bf16.mxu0 %v5216_v4  ;;  %v4525_v2 = vcombine.high %v410_v61, %v426_v62  ;;  %v427_v54 = vld [vmem:[#allocation4 + $0x2e0] sm:$0xff] }
 0x160   :  { %2031 = vmatpush1.bf16.msra.mxu1 %v4486_v6  ;;  %2074 = vmatpush1.bf16.msra.mxu0 %v4488_v7  ;;  %v442_v6 = vld [vmem:[#allocation4 + $0x358] sm:$0xff] }
 0x161   :  { %2032 = vmatprep.subr.bf16.mxu1 %v4519_v8  ;;  %2075 = vmatprep.subr.bf16.mxu0 %v4521_v9  ;;  %v458_v7 = vld [vmem:[#allocation4 + $0x3d8] sm:$0xff]  ;;  %v4522_v8 = vcombine.low %v409_v59, %v425_v60  ;;  %v4524_v9 = vcombine.low %v410_v61, %v426_v62  ;;  %v4527_v59 = vcombine.high %v411_v53, %v427_v54  ;;  %v443_v61 = vld [vmem:[#allocation4 + $0x360] sm:$0xff] }
 0x162   :  { %v4557_v11 = vcombine.high %v442_v6, %v458_v7  ;;  %v459_v62 = vld [vmem:[#allocation4 + $0x3e0] sm:$0xff] }
 0x164   :  { %2033 = vmatpush1.bf16.msra.mxu1 %v4518_v14  ;;  %2076 = vmatpush1.bf16.msra.mxu0 %v4520_v15  ;;  %v474_v14 = vld [vmem:[#allocation4 + $0x458] sm:$0xff] }
 0x165   :  { %2034 = vmatprep.subr.bf16.mxu1 %v4551_v16  ;;  %2077 = vmatprep.subr.bf16.mxu0 %v4553_v17  ;;  %v490_v15 = vld [vmem:[#allocation4 + $0x4d8] sm:$0xff]  ;;  %v4554_v16 = vcombine.low %v441_v3, %v457_v5  ;;  %v4556_v17 = vcombine.low %v442_v6, %v458_v7  ;;  %v4559_v3 = vcombine.high %v443_v61, %v459_v62  ;;  %v475_v6 = vld [vmem:[#allocation4 + $0x460] sm:$0xff] }
 0x166   :  { %v4589_v20 = vcombine.high %v474_v14, %v490_v15  ;;  %v491_v7 = vld [vmem:[#allocation4 + $0x4e0] sm:$0xff] }
 0x168   :  { %2035 = vmatpush1.bf16.msra.mxu1 %v4550_v23  ;;  %2078 = vmatpush1.bf16.msra.mxu0 %v4552_v24  ;;  %v506_v23 = vld [vmem:[#allocation4 + $0x558] sm:$0xff] }
 0x169   :  { %2036 = vmatprep.subr.bf16.mxu1 %v4583_v25  ;;  %2079 = vmatprep.subr.bf16.mxu0 %v4585_v26  ;;  %v522_v24 = vld [vmem:[#allocation4 + $0x5d8] sm:$0xff]  ;;  %v4586_v25 = vcombine.low %v473_v12, %v489_v13  ;;  %v4588_v26 = vcombine.low %v474_v14, %v490_v15  ;;  %v4591_v12 = vcombine.high %v475_v6, %v491_v7  ;;  %v507_v14 = vld [vmem:[#allocation4 + $0x560] sm:$0xff] }
 0x16a   :  { %v4621_v28 = vcombine.high %v506_v23, %v522_v24  ;;  %v523_v15 = vld [vmem:[#allocation4 + $0x5e0] sm:$0xff] }
 0x16c   :  { %2037 = vmatpush1.bf16.msra.mxu1 %v4582_v31  ;;  %2080 = vmatpush1.bf16.msra.mxu0 %v4584_v32  ;;  %v4618_v31 = vcombine.low %v505_v21, %v521_v22  ;;  %v4620_v32 = vcombine.low %v506_v23, %v522_v24  ;;  %v4623_v21 = vcombine.high %v507_v14, %v523_v15  ;;  %v539_v23 = vld [vmem:[#allocation4 + $0x660] sm:$0x33]  ;;  %v540_v24 = vld [vmem:[#allocation4 + $0x668] sm:$0x33] }
 0x16d   :  { %2038 = vmatprep.subr.bf16.mxu1 %v4615_v33  ;;  %2081 = vmatprep.subr.bf16.mxu0 %v4617_v34  ;;  %v4651_v33 = vcombine.high %v537_v29, %v537_v29  ;;  %v4653_v34 = vcombine.high %v538_v30, %v538_v30  ;;  %v4654_v29 = vcombine.low %v539_v23, %v539_v23 }
 0x16e   :  { %v4656_v30 = vcombine.low %v540_v24, %v540_v24 }
 0x16f   :  { %v1661_v35 = vsel %vm1587_vm3, %v4654_v29, 0 }
 0x170   :  { %2039 = vmatpush1.bf16.msra.mxu1 %v4614_v37  ;;  %2082 = vmatpush1.bf16.msra.mxu0 %v4616_v38  ;;  %v347_v37 = vld [vmem:[#allocation4 + $0x60] sm:$0xff]  ;;  %v1667_v36 = vsel %vm1587_vm3, %v4656_v30, 0 }
 0x171   :  { %4678 = vmatprep.subr.msk.bf16.mxu1 %vm1587_vm3, %v4647_v39  ;;  %4680 = vmatprep.subr.msk.bf16.mxu0 %vm1587_vm3, %v4649_v40  ;;  %v363_v38 = vld [vmem:[#allocation4 + $0xe0] sm:$0xff]  ;;  %v348_v39 = vld [vmem:[#allocation4 + $0x68] sm:$0xff] }
 0x172   :  { %v364_v40 = vld [vmem:[#allocation4 + $0xe8] sm:$0xff]  ;;  %v4463_v43 = vcombine.high %v347_v37, %v363_v38 }
 0x173   :  { %v4465_v44 = vcombine.high %v348_v39, %v364_v40 }
 0x174   :  { %2041 = vmatpush1.bf16.msra.mxu1 %v1637_v47  ;;  %2084 = vmatpush1.bf16.msra.mxu0 %v1643_v48  ;;  %v380_v47 = vld [vmem:[#allocation4 + $0x168] sm:$0xff] }
 0x175   :  { %2114 = vmatprep.subr.bf16.mxu1 %v4459_v49  ;;  %2157 = vmatprep.subr.bf16.mxu0 %v4461_v50  ;;  %v396_v48 = vld [vmem:[#allocation4 + $0x1e8] sm:$0xff]  ;;  %v4462_v49 = vcombine.low %v347_v37, %v363_v38  ;;  %v4464_v50 = vcombine.low %v348_v39, %v364_v40  ;;  %v381_v39 = vld [vmem:[#allocation4 + $0x170] sm:$0xff] }
 0x176   :  { %v4497_v52 = vcombine.high %v380_v47, %v396_v48  ;;  %v397_v40 = vld [vmem:[#allocation4 + $0x1f0] sm:$0xff] }
 0x177   :  { %4679 = vmatmul.mubr.msk.bf16.vlgmr.msra.gmra.mrb[16].mxu1 %vm1583_vm4, %v5292_v18  ;;  %4681 = vmatmul.mubr.msk.bf16.vlgmr.msra.gmra.mrb[20].mxu0 %vm1583_vm4, %v5292_v18 }
 0x178   :  { %2115 = vmatpush1.bf16.msra.mxu1 %v4458_v55  ;;  %2158 = vmatpush1.bf16.msra.mxu0 %v4460_v56  ;;  %v412_v55 = vld [vmem:[#allocation4 + $0x268] sm:$0xff] }
 0x179   :  { %2116 = vmatprep.subr.bf16.mxu1 %v4491_v57  ;;  %2159 = vmatprep.subr.bf16.mxu0 %v4493_v58  ;;  %v428_v56 = vld [vmem:[#allocation4 + $0x2e8] sm:$0xff]  ;;  %v4494_v57 = vcombine.low %v379_v45, %v395_v46  ;;  %v4496_v58 = vcombine.low %v380_v47, %v396_v48  ;;  %v4499_v45 = vcombine.high %v381_v39, %v397_v40  ;;  %v413_v47 = vld [vmem:[#allocation4 + $0x270] sm:$0xff] }
 0x17a   :  { %2146 = vmatprep.mubr.bf16.mxu1 %v5216_v4  ;;  %2189 = vmatprep.mubr.bf16.mxu0 %v5216_v4  ;;  %v4529_v60 = vcombine.high %v412_v55, %v428_v56  ;;  %v429_v48 = vld [vmem:[#allocation4 + $0x2f0] sm:$0xff] }
 0x17c   :  { %2117 = vmatpush1.bf16.msra.mxu1 %v4490_v63  ;;  %2160 = vmatpush1.bf16.msra.mxu0 %v4492_v0  ;;  %v444_v63 = vld [vmem:[#allocation4 + $0x368] sm:$0xff] }
 0x17d   :  { %2118 = vmatprep.subr.bf16.mxu1 %v4523_v1  ;;  %2161 = vmatprep.subr.bf16.mxu0 %v4525_v2  ;;  %v460_v0 = vld [vmem:[#allocation4 + $0x3e8] sm:$0xff]  ;;  %v4526_v1 = vcombine.low %v411_v53, %v427_v54  ;;  %v4528_v2 = vcombine.low %v412_v55, %v428_v56  ;;  %v4531_v53 = vcombine.high %v413_v47, %v429_v48  ;;  %v445_v55 = vld [vmem:[#allocation4 + $0x370] sm:$0xff] }
 0x17e   :  { %v4561_v5 = vcombine.high %v444_v63, %v460_v0  ;;  %v461_v56 = vld [vmem:[#allocation4 + $0x3f0] sm:$0xff] }
 0x180   :  { %2119 = vmatpush1.bf16.msra.mxu1 %v4522_v8  ;;  %2162 = vmatpush1.bf16.msra.mxu0 %v4524_v9  ;;  %v476_v8 = vld [vmem:[#allocation4 + $0x468] sm:$0xff] }
 0x181   :  { %2120 = vmatprep.subr.bf16.mxu1 %v4555_v10  ;;  %2163 = vmatprep.subr.bf16.mxu0 %v4557_v11  ;;  %v492_v9 = vld [vmem:[#allocation4 + $0x4e8] sm:$0xff]  ;;  %v4558_v10 = vcombine.low %v443_v61, %v459_v62  ;;  %v4560_v11 = vcombine.low %v444_v63, %v460_v0  ;;  %v4563_v61 = vcombine.high %v445_v55, %v461_v56  ;;  %v477_v63 = vld [vmem:[#allocation4 + $0x470] sm:$0xff] }
 0x182   :  { %v4593_v13 = vcombine.high %v476_v8, %v492_v9  ;;  %v493_v0 = vld [vmem:[#allocation4 + $0x4f0] sm:$0xff] }
 0x184   :  { %2121 = vmatpush1.bf16.msra.mxu1 %v4554_v16  ;;  %2164 = vmatpush1.bf16.msra.mxu0 %v4556_v17  ;;  %v508_v16 = vld [vmem:[#allocation4 + $0x568] sm:$0xff] }
 0x185   :  { %2122 = vmatprep.subr.bf16.mxu1 %v4587_v19  ;;  %2165 = vmatprep.subr.bf16.mxu0 %v4589_v20  ;;  %v524_v17 = vld [vmem:[#allocation4 + $0x5e8] sm:$0xff]  ;;  %v4590_v19 = vcombine.low %v475_v6, %v491_v7  ;;  %v4592_v20 = vcombine.low %v476_v8, %v492_v9  ;;  %v4595_v6 = vcombine.high %v477_v63, %v493_v0  ;;  %v509_v8 = vld [vmem:[#allocation4 + $0x570] sm:$0xff] }
 0x186   :  { %v4625_v22 = vcombine.high %v508_v16, %v524_v17  ;;  %v525_v9 = vld [vmem:[#allocation4 + $0x5f0] sm:$0xff] }
 0x188   :  { %2123 = vmatpush1.bf16.msra.mxu1 %v4586_v25  ;;  %2166 = vmatpush1.bf16.msra.mxu0 %v4588_v26  ;;  %v4622_v25 = vcombine.low %v507_v14, %v523_v15  ;;  %v4624_v26 = vcombine.low %v508_v16, %v524_v17  ;;  %v4627_v14 = vcombine.high %v509_v8, %v525_v9  ;;  %v541_v16 = vld [vmem:[#allocation4 + $0x670] sm:$0x33]  ;;  %v542_v17 = vld [vmem:[#allocation4 + $0x678] sm:$0x33] }
 0x189   :  { %2124 = vmatprep.subr.bf16.mxu1 %v4619_v27  ;;  %2167 = vmatprep.subr.bf16.mxu0 %v4621_v28  ;;  %v4655_v27 = vcombine.high %v539_v23, %v539_v23  ;;  %v4657_v28 = vcombine.high %v540_v24, %v540_v24  ;;  %v4658_v23 = vcombine.low %v541_v16, %v541_v16 }
 0x18a   :  { %v4660_v24 = vcombine.low %v542_v17, %v542_v17 }
 0x18b   :  { %v1673_v29 = vsel %vm1587_vm3, %v4658_v23, 0 }
 0x18c   :  { %2125 = vmatpush1.bf16.msra.mxu1 %v4618_v31  ;;  %2168 = vmatpush1.bf16.msra.mxu0 %v4620_v32  ;;  %v349_v31 = vld [vmem:[#allocation4 + $0x70] sm:$0xff]  ;;  %v1679_v30 = vsel %vm1587_vm3, %v4660_v24, 0 }
 0x18d   :  { %4682 = vmatprep.subr.msk.bf16.mxu1 %vm1587_vm3, %v4651_v33  ;;  %4684 = vmatprep.subr.msk.bf16.mxu0 %vm1587_vm3, %v4653_v34  ;;  %v365_v32 = vld [vmem:[#allocation4 + $0xf0] sm:$0xff]  ;;  %v350_v33 = vld [vmem:[#allocation4 + $0x78] sm:$0xff] }
 0x18e   :  { %v366_v34 = vld [vmem:[#allocation4 + $0xf8] sm:$0xff]  ;;  %v4467_v37 = vcombine.high %v349_v31, %v365_v32 }
 0x18f   :  { %v4469_v38 = vcombine.high %v350_v33, %v366_v34 }
 0x190   :  { %2127 = vmatpush1.bf16.msra.mxu1 %v1649_v41  ;;  %2170 = vmatpush1.bf16.msra.mxu0 %v1655_v42  ;;  %v382_v41 = vld [vmem:[#allocation4 + $0x178] sm:$0xff] }
 0x191   :  { %2200 = vmatprep.subr.bf16.mxu1 %v4463_v43  ;;  %2243 = vmatprep.subr.bf16.mxu0 %v4465_v44  ;;  %v398_v42 = vld [vmem:[#allocation4 + $0x1f8] sm:$0xff]  ;;  %v4466_v43 = vcombine.low %v349_v31, %v365_v32  ;;  %v4468_v44 = vcombine.low %v350_v33, %v366_v34  ;;  %v158_v33 = vld [vmem:[#allocation2 + $0x100] sm:$0xff] }
 0x192   :  { %v4501_v46 = vcombine.high %v382_v41, %v398_v42  ;;  %v174_v34 = vld [vmem:[#allocation2 + $0x180] sm:$0xff] }
 0x193   :  { %4683 = vmatmul.mubr.msk.bf16.vlgmr.msra.gmra.mrb[20].mxu1 %vm1583_vm4, %v5292_v18  ;;  %4685 = vmatmul.mubr.msk.bf16.vlgmr.msra.gmra.mrb[24].mxu0 %vm1583_vm4, %v5292_v18 }
 0x194   :  { %2201 = vmatpush1.bf16.msra.mxu1 %v4462_v49  ;;  %2244 = vmatpush1.bf16.msra.mxu0 %v4464_v50  ;;  %v414_v49 = vld [vmem:[#allocation4 + $0x278] sm:$0xff] }
 0x195   :  { %2202 = vmatprep.subr.bf16.mxu1 %v4495_v51  ;;  %2245 = vmatprep.subr.bf16.mxu0 %v4497_v52  ;;  %v430_v50 = vld [vmem:[#allocation4 + $0x2f8] sm:$0xff]  ;;  %v4498_v51 = vcombine.low %v381_v39, %v397_v40  ;;  %v4500_v52 = vcombine.low %v382_v41, %v398_v42  ;;  %v4728_v39 = vcombine.high %v158_v33, %v174_v34  ;;  %v190_v41 = vld [vmem:[#allocation2 + $0x200] sm:$0xff] }
 0x196   :  { %2232 = vmatprep.mubr.bf16.mxu1 %v5216_v4  ;;  %2275 = vmatprep.mubr.bf16.mxu0 %v5216_v4  ;;  %v4533_v54 = vcombine.high %v414_v49, %v430_v50  ;;  %v206_v42 = vld [vmem:[#allocation2 + $0x280] sm:$0xff] }
 0x198   :  { %2203 = vmatpush1.bf16.msra.mxu1 %v4494_v57  ;;  %2246 = vmatpush1.bf16.msra.mxu0 %v4496_v58  ;;  %v446_v57 = vld [vmem:[#allocation4 + $0x378] sm:$0xff] }
 0x199   :  { %2204 = vmatprep.subr.bf16.mxu1 %v4527_v59  ;;  %2247 = vmatprep.subr.bf16.mxu0 %v4529_v60  ;;  %v462_v58 = vld [vmem:[#allocation4 + $0x3f8] sm:$0xff]  ;;  %v4530_v59 = vcombine.low %v413_v47, %v429_v48  ;;  %v4532_v60 = vcombine.low %v414_v49, %v430_v50  ;;  %v4760_v47 = vcombine.high %v190_v41, %v206_v42  ;;  %v222_v49 = vld [vmem:[#allocation2 + $0x300] sm:$0xff] }
 0x19a   :  { %v4565_v62 = vcombine.high %v446_v57, %v462_v58  ;;  %v238_v50 = vld [vmem:[#allocation2 + $0x380] sm:$0xff] }
 0x19c   :  { %2205 = vmatpush1.bf16.msra.mxu1 %v4526_v1  ;;  %2248 = vmatpush1.bf16.msra.mxu0 %v4528_v2  ;;  %v478_v1 = vld [vmem:[#allocation4 + $0x478] sm:$0xff] }
 0x19d   :  { %2206 = vmatprep.subr.bf16.mxu1 %v4559_v3  ;;  %2249 = vmatprep.subr.bf16.mxu0 %v4561_v5  ;;  %v494_v2 = vld [vmem:[#allocation4 + $0x4f8] sm:$0xff]  ;;  %v4562_v3 = vcombine.low %v445_v55, %v461_v56  ;;  %v4564_v5 = vcombine.low %v446_v57, %v462_v58  ;;  %v254_v56 = vld [vmem:[#allocation2 + $0x400] sm:$0xff]  ;;  %v255_v58 = vld [vmem:[#allocation2 + $0x408] sm:$0xff] }
 0x19e   :  { %v4597_v7 = vcombine.high %v478_v1, %v494_v2  ;;  %v270_v57 = vld [vmem:[#allocation2 + $0x480] sm:$0xff] }
 0x1a0   :  { %2207 = vmatpush1.bf16.msra.mxu1 %v4558_v10  ;;  %2250 = vmatpush1.bf16.msra.mxu0 %v4560_v11  ;;  %v510_v10 = vld [vmem:[#allocation4 + $0x578] sm:$0xff] }
 0x1a1   :  { %2208 = vmatprep.subr.bf16.mxu1 %v4591_v12  ;;  %2251 = vmatprep.subr.bf16.mxu0 %v4593_v13  ;;  %v526_v11 = vld [vmem:[#allocation4 + $0x5f8] sm:$0xff]  ;;  %v4594_v12 = vcombine.low %v477_v63, %v493_v0  ;;  %v4596_v13 = vcombine.low %v478_v1, %v494_v2  ;;  %v286_v0 = vld [vmem:[#allocation2 + $0x500] sm:$0xff]  ;;  %v287_v2 = vld [vmem:[#allocation2 + $0x508] sm:$0xff] }
 0x1a2   :  { %v4629_v15 = vcombine.high %v510_v10, %v526_v11  ;;  %v302_v1 = vld [vmem:[#allocation2 + $0x580] sm:$0xff] }
 0x1a4   :  { %2209 = vmatpush1.bf16.msra.mxu1 %v4590_v19  ;;  %2252 = vmatpush1.bf16.msra.mxu0 %v4592_v20  ;;  %v4626_v19 = vcombine.low %v509_v8, %v525_v9  ;;  %v4628_v20 = vcombine.low %v510_v10, %v526_v11  ;;  %v318_v9 = vld [vmem:[#allocation2 + $0x600] sm:$0x33]  ;;  %v319_v10 = vld [vmem:[#allocation2 + $0x608] sm:$0x33]  ;;  %v4855_v11 = vcombine.low %v286_v0, %v302_v1 }
 0x1a5   :  { %2210 = vmatprep.subr.bf16.mxu1 %v4623_v21  ;;  %2253 = vmatprep.subr.bf16.mxu0 %v4625_v22  ;;  %v4659_v21 = vcombine.high %v541_v16, %v541_v16  ;;  %v4661_v22 = vcombine.high %v542_v17, %v542_v17  ;;  %v4889_v16 = vcombine.low %v319_v10, %v319_v10  ;;  %v128_v17 = vld [vmem:[#allocation2 + $0x10] sm:$0xff] }
 0x1a7   :  { %v3427_v23 = vsel %vm1587_vm3, %v4889_v16, 0 }
 0x1a8   :  { %2211 = vmatpush1.bf16.msra.mxu1 %v4622_v25  ;;  %2254 = vmatpush1.bf16.msra.mxu0 %v4624_v26  ;;  %v126_v25 = vld [vmem:[#allocation2] sm:$0xff] }
 0x1a9   :  { %4686 = vmatprep.subr.msk.bf16.mxu1 %vm1587_vm3, %v4655_v27  ;;  %4688 = vmatprep.subr.msk.bf16.mxu0 %vm1587_vm3, %v4657_v28  ;;  %v142_v26 = vld [vmem:[#allocation2 + $0x80] sm:$0xff]  ;;  %v127_v27 = vld [vmem:[#allocation2 + $0x8] sm:$0xff] }
 0x1aa   :  { %v143_v28 = vld [vmem:[#allocation2 + $0x88] sm:$0xff]  ;;  %v4696_v31 = vcombine.high %v126_v25, %v142_v26 }
 0x1ab   :  { %v4698_v32 = vcombine.high %v127_v27, %v143_v28 }
 0x1ac   :  { %2213 = vmatpush1.bf16.msra.mxu1 %v1661_v35  ;;  %2256 = vmatpush1.bf16.msra.mxu0 %v1667_v36  ;;  %v159_v35 = vld [vmem:[#allocation2 + $0x108] sm:$0xff] }
 0x1ad   :  { %2286 = vmatprep.subr.bf16.mxu1 %v4467_v37  ;;  %2329 = vmatprep.subr.bf16.mxu0 %v4469_v38  ;;  %v175_v36 = vld [vmem:[#allocation2 + $0x188] sm:$0xff]  ;;  %v4695_v37 = vcombine.low %v126_v25, %v142_v26  ;;  %v4697_v38 = vcombine.low %v127_v27, %v143_v28  ;;  %v160_v26 = vld [vmem:[#allocation2 + $0x110] sm:$0xff]  ;;  %v161_v28 = vld [vmem:[#allocation2 + $0x118] sm:$0xff] }
 0x1ae   :  { %v4730_v40 = vcombine.high %v159_v35, %v175_v36  ;;  %v176_v27 = vld [vmem:[#allocation2 + $0x190] sm:$0xff] }
 0x1af   :  { %4687 = vmatmul.mubr.msk.bf16.vlgmr.msra.gmra.mrb[24].mxu1 %vm1583_vm4, %v5292_v18  ;;  %4689 = vmatmul.mubr.msk.bf16.vlgmr.msra.gmra.mrb[28].mxu0 %vm1583_vm4, %v5292_v18 }
 0x1b0   :  { %2287 = vmatpush1.bf16.msra.mxu1 %v4466_v43  ;;  %2330 = vmatpush1.bf16.msra.mxu0 %v4468_v44  ;;  %v191_v43 = vld [vmem:[#allocation2 + $0x208] sm:$0xff] }
 0x1b1   :  { %2288 = vmatprep.subr.bf16.mxu1 %v4499_v45  ;;  %2331 = vmatprep.subr.bf16.mxu0 %v4501_v46  ;;  %v207_v44 = vld [vmem:[#allocation2 + $0x288] sm:$0xff]  ;;  %v4727_v45 = vcombine.low %v158_v33, %v174_v34  ;;  %v4729_v46 = vcombine.low %v159_v35, %v175_v36  ;;  %v4732_v33 = vcombine.high %v160_v26, %v176_v27  ;;  %v192_v35 = vld [vmem:[#allocation2 + $0x210] sm:$0xff] }
 0x1b2   :  { %2318 = vmatprep.mubr.bf16.mxu1 %v5216_v4  ;;  %2361 = vmatprep.mubr.bf16.mxu0 %v5216_v4  ;;  %v4762_v48 = vcombine.high %v191_v43, %v207_v44  ;;  %v208_v36 = vld [vmem:[#allocation2 + $0x290] sm:$0xff] }
 0x1b4   :  { %2289 = vmatpush1.bf16.msra.mxu1 %v4498_v51  ;;  %2332 = vmatpush1.bf16.msra.mxu0 %v4500_v52  ;;  %v223_v51 = vld [vmem:[#allocation2 + $0x308] sm:$0xff] }
 0x1b5   :  { %2290 = vmatprep.subr.bf16.mxu1 %v4531_v53  ;;  %2333 = vmatprep.subr.bf16.mxu0 %v4533_v54  ;;  %v239_v52 = vld [vmem:[#allocation2 + $0x388] sm:$0xff]  ;;  %v4759_v53 = vcombine.low %v190_v41, %v206_v42  ;;  %v4792_v54 = vcombine.high %v222_v49, %v238_v50  ;;  %v4764_v41 = vcombine.high %v192_v35, %v208_v36 }
 0x1b6   :  { %v4794_v55 = vcombine.high %v223_v51, %v239_v52 }
 0x1b8   :  { %2291 = vmatpush1.bf16.msra.mxu1 %v4530_v59  ;;  %2334 = vmatpush1.bf16.msra.mxu0 %v4532_v60  ;;  %v271_v59 = vld [vmem:[#allocation2 + $0x488] sm:$0xff]  ;;  %v4791_v60 = vcombine.low %v222_v49, %v238_v50 }
 0x1b9   :  { %2292 = vmatprep.subr.bf16.mxu1 %v4563_v61  ;;  %2335 = vmatprep.subr.bf16.mxu0 %v4565_v62  ;;  %v4793_v61 = vcombine.low %v223_v51, %v239_v52  ;;  %v4824_v62 = vcombine.high %v254_v56, %v270_v57  ;;  %v4826_v63 = vcombine.high %v255_v58, %v271_v59  ;;  %v256_v51 = vld [vmem:[#allocation2 + $0x410] sm:$0xff] }
 0x1ba   :  { %v272_v52 = vld [vmem:[#allocation2 + $0x490] sm:$0xff] }
 0x1bc   :  { %2293 = vmatpush1.bf16.msra.mxu1 %v4562_v3  ;;  %2336 = vmatpush1.bf16.msra.mxu0 %v4564_v5  ;;  %v303_v3 = vld [vmem:[#allocation2 + $0x588] sm:$0xff]  ;;  %v4823_v5 = vcombine.low %v254_v56, %v270_v57  ;;  %v4828_v56 = vcombine.high %v256_v51, %v272_v52 }
 0x1bd   :  { %2294 = vmatprep.subr.bf16.mxu1 %v4595_v6  ;;  %2337 = vmatprep.subr.bf16.mxu0 %v4597_v7  ;;  %v4825_v6 = vcombine.low %v255_v58, %v271_v59  ;;  %v4856_v7 = vcombine.high %v286_v0, %v302_v1  ;;  %v4858_v8 = vcombine.high %v287_v2, %v303_v3  ;;  %v288_v58 = vld [vmem:[#allocation2 + $0x510] sm:$0xff] }
 0x1be   :  { %v304_v59 = vld [vmem:[#allocation2 + $0x590] sm:$0xff] }
 0x1bf   :  { %v4860_v0 = vcombine.high %v288_v58, %v304_v59 }
 0x1c0   :  { %2295 = vmatpush1.bf16.msra.mxu1 %v4594_v12  ;;  %2338 = vmatpush1.bf16.msra.mxu0 %v4596_v13  ;;  %v4857_v12 = vcombine.low %v287_v2, %v303_v3  ;;  %v4888_v13 = vcombine.high %v318_v9, %v318_v9  ;;  %v320_v2 = vld [vmem:[#allocation2 + $0x610] sm:$0x33]  ;;  %v321_v3 = vld [vmem:[#allocation2 + $0x618] sm:$0x33] }
 0x1c1   :  { %2296 = vmatprep.subr.bf16.mxu1 %v4627_v14  ;;  %2339 = vmatprep.subr.bf16.mxu0 %v4629_v15  ;;  %v4890_v14 = vcombine.high %v319_v10, %v319_v10  ;;  %v4887_v15 = vcombine.low %v318_v9, %v318_v9  ;;  %v4891_v9 = vcombine.low %v320_v2, %v320_v2 }
 0x1c2   :  { %v4893_v10 = vcombine.low %v321_v3, %v321_v3 }
 0x1c4   :  { %2297 = vmatpush1.bf16.msra.mxu1 %v4626_v19  ;;  %2340 = vmatpush1.bf16.msra.mxu0 %v4628_v20  ;;  %v144_v19 = vld [vmem:[#allocation2 + $0x90] sm:$0xff]  ;;  %v129_v20 = vld [vmem:[#allocation2 + $0x18] sm:$0xff]  ;;  %v3439_v16 = vsel %vm1587_vm3, %v4893_v10, 0 }
 0x1c5   :  { %4690 = vmatprep.subr.msk.bf16.mxu1 %vm1587_vm3, %v4659_v21  ;;  %4692 = vmatprep.subr.msk.bf16.mxu0 %vm1587_vm3, %v4661_v22  ;;  %v145_v21 = vld [vmem:[#allocation2 + $0x98] sm:$0xff]  ;;  %v3421_v22 = vsel %vm1587_vm3, %v4887_v15, 0  ;;  %v4700_v24 = vcombine.high %v128_v17, %v144_v19  ;;  %v3433_v15 = vsel %vm1587_vm3, %v4891_v9, 0 }
 0x1c6   :  { %v4702_v25 = vcombine.high %v129_v20, %v145_v21 }
 0x1c8   :  { %2299 = vmatpush1.bf16.msra.mxu1 %v1673_v29  ;;  %2342 = vmatpush1.bf16.msra.mxu0 %v1679_v30  ;;  %v177_v29 = vld [vmem:[#allocation2 + $0x198] sm:$0xff]  ;;  %v5377_v30 = vld [vmem:[%s5555_s1] sm:$0xff]  }
 0x1c9   :  { %3516 = vmatprep.subr.bf16.mxu1 %v4696_v31  ;;  %3559 = vmatprep.subr.bf16.mxu0 %v4698_v32  ;;  %v4699_v31 = vcombine.low %v128_v17, %v144_v19  ;;  %v4701_v32 = vcombine.low %v129_v20, %v145_v21  ;;  %v4734_v34 = vcombine.high %v161_v28, %v177_v29  ;;  %v162_v20 = vld [vmem:[#allocation2 + $0x120] sm:$0xff] }
 0x1ca   :  { %v178_v21 = vld [vmem:[#allocation2 + $0x1a0] sm:$0xff] }
 0x1cb   :  { %4691 = vmatmul.mubr.msk.bf16.vlgmr.msra.gmra.mrb[28].mxu1 %vm1583_vm4, %v5292_v18  ;;  %4693 = vmatmul.mubr.msk.bf16.vlgmr.msra.gmra.mrb[32].mxu0 %vm1583_vm4, %v5292_v18  ;;  %v4761_v18 = vcombine.low %v191_v43, %v207_v44  ;;  %v224_v43 = vld [vmem:[#allocation2 + $0x310] sm:$0xff] }
 0x1cc   :  { %3517 = vmatpush1.bf16.msra.mxu1 %v4695_v37  ;;  %3560 = vmatpush1.bf16.msra.mxu0 %v4697_v38  ;;  %v193_v37 = vld [vmem:[#allocation2 + $0x218] sm:$0xff]  ;;  %v240_v44 = vld [vmem:[#allocation2 + $0x390] sm:$0xff] }
 0x1cd   :  { %3518 = vmatprep.subr.bf16.mxu1 %v4728_v39  ;;  %3561 = vmatprep.subr.bf16.mxu0 %v4730_v40  ;;  %v209_v38 = vld [vmem:[#allocation2 + $0x298] sm:$0xff]  ;;  %v4731_v39 = vcombine.low %v160_v26, %v176_v27  ;;  %v4733_v40 = vcombine.low %v161_v28, %v177_v29  ;;  %v4796_v49 = vcombine.high %v224_v43, %v240_v44  ;;  %v194_v28 = vld [vmem:[#allocation2 + $0x220] sm:$0xff] }
 0x1ce   :  { %3548 = vmatprep.mubr.bf16.mxu1 %v5216_v4  ;;  %3591 = vmatprep.mubr.bf16.mxu0 %v5216_v4  ;;  %v4766_v42 = vcombine.high %v193_v37, %v209_v38  ;;  %v4736_v26 = vcombine.high %v162_v20, %v178_v21  ;;  %v210_v29 = vld [vmem:[#allocation2 + $0x2a0] sm:$0xff] }
 0x1d0   :  { %3519 = vmatpush1.bf16.msra.mxu1 %v4727_v45  ;;  %3562 = vmatpush1.bf16.msra.mxu0 %v4729_v46  ;;  %v225_v45 = vld [vmem:[#allocation2 + $0x318] sm:$0xff] }
 0x1d1   :  { %3520 = vmatprep.subr.bf16.mxu1 %v4760_v47  ;;  %3563 = vmatprep.subr.bf16.mxu0 %v4762_v48  ;;  %v241_v46 = vld [vmem:[#allocation2 + $0x398] sm:$0xff]  ;;  %v4763_v47 = vcombine.low %v192_v35, %v208_v36  ;;  %v4765_v48 = vcombine.low %v193_v37, %v209_v38  ;;  %v4768_v35 = vcombine.high %v194_v28, %v210_v29  ;;  %v226_v37 = vld [vmem:[#allocation2 + $0x320] sm:$0xff] }
 0x1d2   :  { %v4798_v50 = vcombine.high %v225_v45, %v241_v46  ;;  %v242_v38 = vld [vmem:[#allocation2 + $0x3a0] sm:$0xff] }
 0x1d4   :  { %3521 = vmatpush1.bf16.msra.mxu1 %v4759_v53  ;;  %3564 = vmatpush1.bf16.msra.mxu0 %v4761_v18  ;;  %v257_v53 = vld [vmem:[#allocation2 + $0x418] sm:$0xff] }
 0x1d5   :  { %3522 = vmatprep.subr.bf16.mxu1 %v4792_v54  ;;  %3565 = vmatprep.subr.bf16.mxu0 %v4794_v55  ;;  %v273_v18 = vld [vmem:[#allocation2 + $0x498] sm:$0xff]  ;;  %v4795_v54 = vcombine.low %v224_v43, %v240_v44  ;;  %v4797_v55 = vcombine.low %v225_v45, %v241_v46  ;;  %v4800_v43 = vcombine.high %v226_v37, %v242_v38  ;;  %v258_v45 = vld [vmem:[#allocation2 + $0x420] sm:$0xff] }
 0x1d6   :  { %v4830_v57 = vcombine.high %v257_v53, %v273_v18  ;;  %v274_v46 = vld [vmem:[#allocation2 + $0x4a0] sm:$0xff] }
 0x1d8   :  { %3523 = vmatpush1.bf16.msra.mxu1 %v4791_v60  ;;  %3566 = vmatpush1.bf16.msra.mxu0 %v4793_v61  ;;  %v289_v60 = vld [vmem:[#allocation2 + $0x518] sm:$0xff] }
 0x1d9   :  { %3524 = vmatprep.subr.bf16.mxu1 %v4824_v62  ;;  %3567 = vmatprep.subr.bf16.mxu0 %v4826_v63  ;;  %v305_v61 = vld [vmem:[#allocation2 + $0x598] sm:$0xff]  ;;  %v4827_v62 = vcombine.low %v256_v51, %v272_v52  ;;  %v4829_v63 = vcombine.low %v257_v53, %v273_v18  ;;  %v4832_v51 = vcombine.high %v258_v45, %v274_v46  ;;  %v290_v53 = vld [vmem:[#allocation2 + $0x520] sm:$0xff] }
 0x1da   :  { %v4862_v1 = vcombine.high %v289_v60, %v305_v61  ;;  %v306_v18 = vld [vmem:[#allocation2 + $0x5a0] sm:$0xff] }
 0x1dc   :  { %3525 = vmatpush1.bf16.msra.mxu1 %v4823_v5  ;;  %3568 = vmatpush1.bf16.msra.mxu0 %v4825_v6  ;;  %v4859_v5 = vcombine.low %v288_v58, %v304_v59  ;;  %v4861_v6 = vcombine.low %v289_v60, %v305_v61  ;;  %v4864_v58 = vcombine.high %v290_v53, %v306_v18  ;;  %v322_v60 = vld [vmem:[#allocation2 + $0x620] sm:$0x33]  ;;  %v323_v61 = vld [vmem:[#allocation2 + $0x628] sm:$0x33] }
 0x1dd   :  { %3526 = vmatprep.subr.bf16.mxu1 %v4856_v7  ;;  %3569 = vmatprep.subr.bf16.mxu0 %v4858_v8  ;;  %v4892_v7 = vcombine.high %v320_v2, %v320_v2  ;;  %v4894_v8 = vcombine.high %v321_v3, %v321_v3  ;;  %v4895_v2 = vcombine.low %v322_v60, %v322_v60 }
 0x1de   :  { %v4897_v3 = vcombine.low %v323_v61, %v323_v61 }
 0x1df   :  { %v3445_v9 = vsel %vm1587_vm3, %v4895_v2, 0 }
 0x1e0   :  { %3527 = vmatpush1.bf16.msra.mxu1 %v4855_v11  ;;  %3570 = vmatpush1.bf16.msra.mxu0 %v4857_v12  ;;  %v130_v11 = vld [vmem:[#allocation2 + $0x20] sm:$0xff]  ;;  %v3451_v10 = vsel %vm1587_vm3, %v4897_v3, 0 }
 0x1e1   :  { %4919 = vmatprep.subr.msk.bf16.mxu1 %vm1587_vm3, %v4888_v13  ;;  %4921 = vmatprep.subr.msk.bf16.mxu0 %vm1587_vm3, %v4890_v14  ;;  %v146_v12 = vld [vmem:[#allocation2 + $0xa0] sm:$0xff]  ;;  %v131_v13 = vld [vmem:[#allocation2 + $0x28] sm:$0xff] }
 0x1e2   :  { %v147_v14 = vld [vmem:[#allocation2 + $0xa8] sm:$0xff]  ;;  %v4704_v17 = vcombine.high %v130_v11, %v146_v12 }
 0x1e3   :  { %v4706_v19 = vcombine.high %v131_v13, %v147_v14 }
 0x1e4   :  { %3529 = vmatpush1.bf16.msra.mxu1 %v3421_v22  ;;  %3572 = vmatpush1.bf16.msra.mxu0 %v3427_v23  ;;  %v163_v22 = vld [vmem:[#allocation2 + $0x128] sm:$0xff] }
 0x1e5   :  { %3602 = vmatprep.subr.bf16.mxu1 %v4700_v24  ;;  %3645 = vmatprep.subr.bf16.mxu0 %v4702_v25  ;;  %v179_v23 = vld [vmem:[#allocation2 + $0x1a8] sm:$0xff]  ;;  %v4703_v24 = vcombine.low %v130_v11, %v146_v12  ;;  %v4705_v25 = vcombine.low %v131_v13, %v147_v14  ;;  %v164_v13 = vld [vmem:[#allocation2 + $0x130] sm:$0xff] }
 0x1e6   :  { %v4738_v27 = vcombine.high %v163_v22, %v179_v23  ;;  %v180_v14 = vld [vmem:[#allocation2 + $0x1b0] sm:$0xff] }
 0x1e7   :  { %4920 = vmatmul.mubr.msk.bf16.vlgmr.msra.gmra.mrb[0].mxu1 %vm1583_vm4, %v5377_v30  ;;  %4922 = vmatmul.mubr.msk.bf16.vlgmr.msra.gmra.mrb[4].mxu0 %vm1583_vm4, %v5377_v30 }
 0x1e8   :  { %3603 = vmatpush1.bf16.msra.mxu1 %v4699_v31  ;;  %3646 = vmatpush1.bf16.msra.mxu0 %v4701_v32  ;;  %v195_v31 = vld [vmem:[#allocation2 + $0x228] sm:$0xff] }
 0x1e9   :  { %3604 = vmatprep.subr.bf16.mxu1 %v4732_v33  ;;  %3647 = vmatprep.subr.bf16.mxu0 %v4734_v34  ;;  %v211_v32 = vld [vmem:[#allocation2 + $0x2a8] sm:$0xff]  ;;  %v4735_v33 = vcombine.low %v162_v20, %v178_v21  ;;  %v4737_v34 = vcombine.low %v163_v22, %v179_v23  ;;  %v4740_v20 = vcombine.high %v164_v13, %v180_v14  ;;  %v196_v22 = vld [vmem:[#allocation2 + $0x230] sm:$0xff] }
 0x1ea   :  { %3634 = vmatprep.mubr.bf16.mxu1 %v5216_v4  ;;  %3677 = vmatprep.mubr.bf16.mxu0 %v5216_v4  ;;  %v4770_v36 = vcombine.high %v195_v31, %v211_v32  ;;  %v212_v23 = vld [vmem:[#allocation2 + $0x2b0] sm:$0xff] }
 0x1ec   :  { %3605 = vmatpush1.bf16.msra.mxu1 %v4731_v39  ;;  %3648 = vmatpush1.bf16.msra.mxu0 %v4733_v40  ;;  %v227_v39 = vld [vmem:[#allocation2 + $0x328] sm:$0xff] }
 0x1ed   :  { %3606 = vmatprep.subr.bf16.mxu1 %v4764_v41  ;;  %3649 = vmatprep.subr.bf16.mxu0 %v4766_v42  ;;  %v243_v40 = vld [vmem:[#allocation2 + $0x3a8] sm:$0xff]  ;;  %v4767_v41 = vcombine.low %v194_v28, %v210_v29  ;;  %v4769_v42 = vcombine.low %v195_v31, %v211_v32  ;;  %v4772_v28 = vcombine.high %v196_v22, %v212_v23  ;;  %v228_v31 = vld [vmem:[#allocation2 + $0x330] sm:$0xff] }
 0x1ee   :  { %v4802_v44 = vcombine.high %v227_v39, %v243_v40  ;;  %v244_v32 = vld [vmem:[#allocation2 + $0x3b0] sm:$0xff] }
 0x1f0   :  { %3607 = vmatpush1.bf16.msra.mxu1 %v4763_v47  ;;  %3650 = vmatpush1.bf16.msra.mxu0 %v4765_v48  ;;  %v259_v47 = vld [vmem:[#allocation2 + $0x428] sm:$0xff] }
 0x1f1   :  { %3608 = vmatprep.subr.bf16.mxu1 %v4796_v49  ;;  %3651 = vmatprep.subr.bf16.mxu0 %v4798_v50  ;;  %v275_v48 = vld [vmem:[#allocation2 + $0x4a8] sm:$0xff]  ;;  %v4799_v49 = vcombine.low %v226_v37, %v242_v38  ;;  %v4801_v50 = vcombine.low %v227_v39, %v243_v40  ;;  %v4804_v37 = vcombine.high %v228_v31, %v244_v32  ;;  %v260_v39 = vld [vmem:[#allocation2 + $0x430] sm:$0xff] }
 0x1f2   :  { %v4834_v52 = vcombine.high %v259_v47, %v275_v48  ;;  %v276_v40 = vld [vmem:[#allocation2 + $0x4b0] sm:$0xff] }
 0x1f4   :  { %3609 = vmatpush1.bf16.msra.mxu1 %v4795_v54  ;;  %3652 = vmatpush1.bf16.msra.mxu0 %v4797_v55  ;;  %v291_v54 = vld [vmem:[#allocation2 + $0x528] sm:$0xff] }
 0x1f5   :  { %3610 = vmatprep.subr.bf16.mxu1 %v4828_v56  ;;  %3653 = vmatprep.subr.bf16.mxu0 %v4830_v57  ;;  %v307_v55 = vld [vmem:[#allocation2 + $0x5a8] sm:$0xff]  ;;  %v4831_v56 = vcombine.low %v258_v45, %v274_v46  ;;  %v4833_v57 = vcombine.low %v259_v47, %v275_v48  ;;  %v4836_v45 = vcombine.high %v260_v39, %v276_v40  ;;  %v292_v47 = vld [vmem:[#allocation2 + $0x530] sm:$0xff] }
 0x1f6   :  { %v4866_v59 = vcombine.high %v291_v54, %v307_v55  ;;  %v308_v48 = vld [vmem:[#allocation2 + $0x5b0] sm:$0xff] }
 0x1f8   :  { %3611 = vmatpush1.bf16.msra.mxu1 %v4827_v62  ;;  %3654 = vmatpush1.bf16.msra.mxu0 %v4829_v63  ;;  %v4863_v62 = vcombine.low %v290_v53, %v306_v18  ;;  %v4865_v63 = vcombine.low %v291_v54, %v307_v55  ;;  %v4868_v53 = vcombine.high %v292_v47, %v308_v48  ;;  %v324_v54 = vld [vmem:[#allocation2 + $0x630] sm:$0x33]  ;;  %v325_v55 = vld [vmem:[#allocation2 + $0x638] sm:$0x33] }
 0x1f9   :  { %3612 = vmatprep.subr.bf16.mxu1 %v4860_v0  ;;  %3655 = vmatprep.subr.bf16.mxu0 %v4862_v1  ;;  %v4896_v0 = vcombine.high %v322_v60, %v322_v60  ;;  %v4898_v1 = vcombine.high %v323_v61, %v323_v61  ;;  %v4899_v60 = vcombine.low %v324_v54, %v324_v54 }
 0x1fa   :  { %v4901_v61 = vcombine.low %v325_v55, %v325_v55 }
 0x1fb   :  { %v3457_v2 = vsel %vm1587_vm3, %v4899_v60, 0 }
 0x1fc   :  { %3613 = vmatpush1.bf16.msra.mxu1 %v4859_v5  ;;  %3656 = vmatpush1.bf16.msra.mxu0 %v4861_v6  ;;  %v132_v5 = vld [vmem:[#allocation2 + $0x30] sm:$0xff]  ;;  %v3463_v3 = vsel %vm1587_vm3, %v4901_v61, 0 }
 0x1fd   :  { %4923 = vmatprep.subr.msk.bf16.mxu1 %vm1587_vm3, %v4892_v7  ;;  %4925 = vmatprep.subr.msk.bf16.mxu0 %vm1587_vm3, %v4894_v8  ;;  %v148_v6 = vld [vmem:[#allocation2 + $0xb0] sm:$0xff]  ;;  %v133_v7 = vld [vmem:[#allocation2 + $0x38] sm:$0xff] }
 0x1fe   :  { %v149_v8 = vld [vmem:[#allocation2 + $0xb8] sm:$0xff]  ;;  %v4708_v11 = vcombine.high %v132_v5, %v148_v6 }
 0x1ff   :  { %v4710_v12 = vcombine.high %v133_v7, %v149_v8 }
 0x200   :  { %3615 = vmatpush1.bf16.msra.mxu1 %v3433_v15  ;;  %3658 = vmatpush1.bf16.msra.mxu0 %v3439_v16  ;;  %v165_v15 = vld [vmem:[#allocation2 + $0x138] sm:$0xff] }
 0x201   :  { %3688 = vmatprep.subr.bf16.mxu1 %v4704_v17  ;;  %3731 = vmatprep.subr.bf16.mxu0 %v4706_v19  ;;  %v181_v16 = vld [vmem:[#allocation2 + $0x1b8] sm:$0xff]  ;;  %v4707_v17 = vcombine.low %v132_v5, %v148_v6  ;;  %v4709_v19 = vcombine.low %v133_v7, %v149_v8  ;;  %v166_v7 = vld [vmem:[#allocation2 + $0x140] sm:$0xff] }
 0x202   :  { %v4742_v21 = vcombine.high %v165_v15, %v181_v16  ;;  %v182_v8 = vld [vmem:[#allocation2 + $0x1c0] sm:$0xff] }
 0x203   :  { %4924 = vmatmul.mubr.msk.bf16.vlgmr.msra.gmra.mrb[4].mxu1 %vm1583_vm4, %v5377_v30  ;;  %4926 = vmatmul.mubr.msk.bf16.vlgmr.msra.gmra.mrb[8].mxu0 %vm1583_vm4, %v5377_v30 }
 0x204   :  { %3689 = vmatpush1.bf16.msra.mxu1 %v4703_v24  ;;  %3732 = vmatpush1.bf16.msra.mxu0 %v4705_v25  ;;  %v197_v24 = vld [vmem:[#allocation2 + $0x238] sm:$0xff] }
 0x205   :  { %3690 = vmatprep.subr.bf16.mxu1 %v4736_v26  ;;  %3733 = vmatprep.subr.bf16.mxu0 %v4738_v27  ;;  %v213_v25 = vld [vmem:[#allocation2 + $0x2b8] sm:$0xff]  ;;  %v4739_v26 = vcombine.low %v164_v13, %v180_v14  ;;  %v4741_v27 = vcombine.low %v165_v15, %v181_v16  ;;  %v4744_v13 = vcombine.high %v166_v7, %v182_v8  ;;  %v198_v15 = vld [vmem:[#allocation2 + $0x240] sm:$0xff] }
 0x206   :  { %3720 = vmatprep.mubr.bf16.mxu1 %v5216_v4  ;;  %3763 = vmatprep.mubr.bf16.mxu0 %v5216_v4  ;;  %v4774_v29 = vcombine.high %v197_v24, %v213_v25  ;;  %v214_v16 = vld [vmem:[#allocation2 + $0x2c0] sm:$0xff] }
 0x208   :  { %3691 = vmatpush1.bf16.msra.mxu1 %v4735_v33  ;;  %3734 = vmatpush1.bf16.msra.mxu0 %v4737_v34  ;;  %v229_v33 = vld [vmem:[#allocation2 + $0x338] sm:$0xff] }
 0x209   :  { %3692 = vmatprep.subr.bf16.mxu1 %v4768_v35  ;;  %3735 = vmatprep.subr.bf16.mxu0 %v4770_v36  ;;  %v245_v34 = vld [vmem:[#allocation2 + $0x3b8] sm:$0xff]  ;;  %v4771_v35 = vcombine.low %v196_v22, %v212_v23  ;;  %v4773_v36 = vcombine.low %v197_v24, %v213_v25  ;;  %v4776_v22 = vcombine.high %v198_v15, %v214_v16  ;;  %v230_v24 = vld [vmem:[#allocation2 + $0x340] sm:$0xff] }
 0x20a   :  { %v4806_v38 = vcombine.high %v229_v33, %v245_v34  ;;  %v246_v25 = vld [vmem:[#allocation2 + $0x3c0] sm:$0xff] }
 0x20c   :  { %3693 = vmatpush1.bf16.msra.mxu1 %v4767_v41  ;;  %3736 = vmatpush1.bf16.msra.mxu0 %v4769_v42  ;;  %v261_v41 = vld [vmem:[#allocation2 + $0x438] sm:$0xff] }
 0x20d   :  { %3694 = vmatprep.subr.bf16.mxu1 %v4800_v43  ;;  %3737 = vmatprep.subr.bf16.mxu0 %v4802_v44  ;;  %v277_v42 = vld [vmem:[#allocation2 + $0x4b8] sm:$0xff]  ;;  %v4803_v43 = vcombine.low %v228_v31, %v244_v32  ;;  %v4805_v44 = vcombine.low %v229_v33, %v245_v34  ;;  %v4808_v31 = vcombine.high %v230_v24, %v246_v25  ;;  %v262_v33 = vld [vmem:[#allocation2 + $0x440] sm:$0xff] }
 0x20e   :  { %v4838_v46 = vcombine.high %v261_v41, %v277_v42  ;;  %v278_v34 = vld [vmem:[#allocation2 + $0x4c0] sm:$0xff] }
 0x210   :  { %3695 = vmatpush1.bf16.msra.mxu1 %v4799_v49  ;;  %3738 = vmatpush1.bf16.msra.mxu0 %v4801_v50  ;;  %v293_v49 = vld [vmem:[#allocation2 + $0x538] sm:$0xff] }
 0x211   :  { %3696 = vmatprep.subr.bf16.mxu1 %v4832_v51  ;;  %3739 = vmatprep.subr.bf16.mxu0 %v4834_v52  ;;  %v309_v50 = vld [vmem:[#allocation2 + $0x5b8] sm:$0xff]  ;;  %v4835_v51 = vcombine.low %v260_v39, %v276_v40  ;;  %v4837_v52 = vcombine.low %v261_v41, %v277_v42  ;;  %v4840_v39 = vcombine.high %v262_v33, %v278_v34  ;;  %v294_v41 = vld [vmem:[#allocation2 + $0x540] sm:$0xff] }
 0x212   :  { %v4870_v18 = vcombine.high %v293_v49, %v309_v50  ;;  %v310_v42 = vld [vmem:[#allocation2 + $0x5c0] sm:$0xff] }
 0x214   :  { %3697 = vmatpush1.bf16.msra.mxu1 %v4831_v56  ;;  %3740 = vmatpush1.bf16.msra.mxu0 %v4833_v57  ;;  %v4867_v56 = vcombine.low %v292_v47, %v308_v48  ;;  %v4869_v57 = vcombine.low %v293_v49, %v309_v50  ;;  %v4872_v47 = vcombine.high %v294_v41, %v310_v42  ;;  %v326_v49 = vld [vmem:[#allocation2 + $0x640] sm:$0x33]  ;;  %v327_v50 = vld [vmem:[#allocation2 + $0x648] sm:$0x33] }
 0x215   :  { %3698 = vmatprep.subr.bf16.mxu1 %v4864_v58  ;;  %3741 = vmatprep.subr.bf16.mxu0 %v4866_v59  ;;  %v4900_v58 = vcombine.high %v324_v54, %v324_v54  ;;  %v4902_v59 = vcombine.high %v325_v55, %v325_v55  ;;  %v4903_v54 = vcombine.low %v326_v49, %v326_v49 }
 0x216   :  { %v4905_v55 = vcombine.low %v327_v50, %v327_v50 }
 0x217   :  { %v3469_v60 = vsel %vm1587_vm3, %v4903_v54, 0 }
 0x218   :  { %3699 = vmatpush1.bf16.msra.mxu1 %v4863_v62  ;;  %3742 = vmatpush1.bf16.msra.mxu0 %v4865_v63  ;;  %v134_v62 = vld [vmem:[#allocation2 + $0x40] sm:$0xff]  ;;  %v3475_v61 = vsel %vm1587_vm3, %v4905_v55, 0 }
 0x219   :  { %4927 = vmatprep.subr.msk.bf16.mxu1 %vm1587_vm3, %v4896_v0  ;;  %4929 = vmatprep.subr.msk.bf16.mxu0 %vm1587_vm3, %v4898_v1  ;;  %v150_v63 = vld [vmem:[#allocation2 + $0xc0] sm:$0xff]  ;;  %v135_v0 = vld [vmem:[#allocation2 + $0x48] sm:$0xff] }
 0x21a   :  { %v151_v1 = vld [vmem:[#allocation2 + $0xc8] sm:$0xff]  ;;  %v4712_v5 = vcombine.high %v134_v62, %v150_v63 }
 0x21b   :  { %v4714_v6 = vcombine.high %v135_v0, %v151_v1 }
 0x21c   :  { %3701 = vmatpush1.bf16.msra.mxu1 %v3445_v9  ;;  %3744 = vmatpush1.bf16.msra.mxu0 %v3451_v10  ;;  %v167_v9 = vld [vmem:[#allocation2 + $0x148] sm:$0xff] }
 0x21d   :  { %3774 = vmatprep.subr.bf16.mxu1 %v4708_v11  ;;  %3817 = vmatprep.subr.bf16.mxu0 %v4710_v12  ;;  %v183_v10 = vld [vmem:[#allocation2 + $0x1c8] sm:$0xff]  ;;  %v4711_v11 = vcombine.low %v134_v62, %v150_v63  ;;  %v4713_v12 = vcombine.low %v135_v0, %v151_v1  ;;  %v168_v0 = vld [vmem:[#allocation2 + $0x150] sm:$0xff] }
 0x21e   :  { %v4746_v14 = vcombine.high %v167_v9, %v183_v10  ;;  %v184_v1 = vld [vmem:[#allocation2 + $0x1d0] sm:$0xff] }
 0x21f   :  { %4928 = vmatmul.mubr.msk.bf16.vlgmr.msra.gmra.mrb[8].mxu1 %vm1583_vm4, %v5377_v30  ;;  %4930 = vmatmul.mubr.msk.bf16.vlgmr.msra.gmra.mrb[12].mxu0 %vm1583_vm4, %v5377_v30 }
 0x220   :  { %3775 = vmatpush1.bf16.msra.mxu1 %v4707_v17  ;;  %3818 = vmatpush1.bf16.msra.mxu0 %v4709_v19  ;;  %v199_v17 = vld [vmem:[#allocation2 + $0x248] sm:$0xff] }
 0x221   :  { %3776 = vmatprep.subr.bf16.mxu1 %v4740_v20  ;;  %3819 = vmatprep.subr.bf16.mxu0 %v4742_v21  ;;  %v215_v19 = vld [vmem:[#allocation2 + $0x2c8] sm:$0xff]  ;;  %v4743_v20 = vcombine.low %v166_v7, %v182_v8  ;;  %v4745_v21 = vcombine.low %v167_v9, %v183_v10  ;;  %v4748_v7 = vcombine.high %v168_v0, %v184_v1  ;;  %v200_v9 = vld [vmem:[#allocation2 + $0x250] sm:$0xff] }
 0x222   :  { %3806 = vmatprep.mubr.bf16.mxu1 %v5216_v4  ;;  %3849 = vmatprep.mubr.bf16.mxu0 %v5216_v4  ;;  %v4778_v23 = vcombine.high %v199_v17, %v215_v19  ;;  %v216_v10 = vld [vmem:[#allocation2 + $0x2d0] sm:$0xff] }
 0x224   :  { %3777 = vmatpush1.bf16.msra.mxu1 %v4739_v26  ;;  %3820 = vmatpush1.bf16.msra.mxu0 %v4741_v27  ;;  %v231_v26 = vld [vmem:[#allocation2 + $0x348] sm:$0xff] }
 0x225   :  { %3778 = vmatprep.subr.bf16.mxu1 %v4772_v28  ;;  %3821 = vmatprep.subr.bf16.mxu0 %v4774_v29  ;;  %v247_v27 = vld [vmem:[#allocation2 + $0x3c8] sm:$0xff]  ;;  %v4775_v28 = vcombine.low %v198_v15, %v214_v16  ;;  %v4777_v29 = vcombine.low %v199_v17, %v215_v19  ;;  %v4780_v15 = vcombine.high %v200_v9, %v216_v10  ;;  %v232_v17 = vld [vmem:[#allocation2 + $0x350] sm:$0xff] }
 0x226   :  { %v4810_v32 = vcombine.high %v231_v26, %v247_v27  ;;  %v248_v19 = vld [vmem:[#allocation2 + $0x3d0] sm:$0xff] }
 0x228   :  { %3779 = vmatpush1.bf16.msra.mxu1 %v4771_v35  ;;  %3822 = vmatpush1.bf16.msra.mxu0 %v4773_v36  ;;  %v263_v35 = vld [vmem:[#allocation2 + $0x448] sm:$0xff] }
 0x229   :  { %3780 = vmatprep.subr.bf16.mxu1 %v4804_v37  ;;  %3823 = vmatprep.subr.bf16.mxu0 %v4806_v38  ;;  %v279_v36 = vld [vmem:[#allocation2 + $0x4c8] sm:$0xff]  ;;  %v4807_v37 = vcombine.low %v230_v24, %v246_v25  ;;  %v4809_v38 = vcombine.low %v231_v26, %v247_v27  ;;  %v4812_v24 = vcombine.high %v232_v17, %v248_v19  ;;  %v264_v26 = vld [vmem:[#allocation2 + $0x450] sm:$0xff] }
 0x22a   :  { %v4842_v40 = vcombine.high %v263_v35, %v279_v36  ;;  %v280_v27 = vld [vmem:[#allocation2 + $0x4d0] sm:$0xff] }
 0x22c   :  { %3781 = vmatpush1.bf16.msra.mxu1 %v4803_v43  ;;  %3824 = vmatpush1.bf16.msra.mxu0 %v4805_v44  ;;  %v295_v43 = vld [vmem:[#allocation2 + $0x548] sm:$0xff] }
 0x22d   :  { %3782 = vmatprep.subr.bf16.mxu1 %v4836_v45  ;;  %3825 = vmatprep.subr.bf16.mxu0 %v4838_v46  ;;  %v311_v44 = vld [vmem:[#allocation2 + $0x5c8] sm:$0xff]  ;;  %v4839_v45 = vcombine.low %v262_v33, %v278_v34  ;;  %v4841_v46 = vcombine.low %v263_v35, %v279_v36  ;;  %v4844_v33 = vcombine.high %v264_v26, %v280_v27  ;;  %v296_v35 = vld [vmem:[#allocation2 + $0x550] sm:$0xff] }
 0x22e   :  { %v4874_v48 = vcombine.high %v295_v43, %v311_v44  ;;  %v312_v36 = vld [vmem:[#allocation2 + $0x5d0] sm:$0xff] }
 0x230   :  { %3783 = vmatpush1.bf16.msra.mxu1 %v4835_v51  ;;  %3826 = vmatpush1.bf16.msra.mxu0 %v4837_v52  ;;  %v4871_v51 = vcombine.low %v294_v41, %v310_v42  ;;  %v4873_v52 = vcombine.low %v295_v43, %v311_v44  ;;  %v4876_v41 = vcombine.high %v296_v35, %v312_v36  ;;  %v328_v43 = vld [vmem:[#allocation2 + $0x650] sm:$0x33]  ;;  %v329_v44 = vld [vmem:[#allocation2 + $0x658] sm:$0x33] }
 0x231   :  { %3784 = vmatprep.subr.bf16.mxu1 %v4868_v53  ;;  %3827 = vmatprep.subr.bf16.mxu0 %v4870_v18  ;;  %v4904_v53 = vcombine.high %v326_v49, %v326_v49  ;;  %v4906_v18 = vcombine.high %v327_v50, %v327_v50  ;;  %v4907_v49 = vcombine.low %v328_v43, %v328_v43 }
 0x232   :  { %v4909_v50 = vcombine.low %v329_v44, %v329_v44 }
 0x233   :  { %v3481_v54 = vsel %vm1587_vm3, %v4907_v49, 0 }
 0x234   :  { %3785 = vmatpush1.bf16.msra.mxu1 %v4867_v56  ;;  %3828 = vmatpush1.bf16.msra.mxu0 %v4869_v57  ;;  %v136_v56 = vld [vmem:[#allocation2 + $0x50] sm:$0xff]  ;;  %v3487_v55 = vsel %vm1587_vm3, %v4909_v50, 0 }
 0x235   :  { %4931 = vmatprep.subr.msk.bf16.mxu1 %vm1587_vm3, %v4900_v58  ;;  %4933 = vmatprep.subr.msk.bf16.mxu0 %vm1587_vm3, %v4902_v59  ;;  %v152_v57 = vld [vmem:[#allocation2 + $0xd0] sm:$0xff]  ;;  %v137_v58 = vld [vmem:[#allocation2 + $0x58] sm:$0xff] }
 0x236   :  { %v153_v59 = vld [vmem:[#allocation2 + $0xd8] sm:$0xff]  ;;  %v4716_v62 = vcombine.high %v136_v56, %v152_v57 }
 0x237   :  { %v4718_v63 = vcombine.high %v137_v58, %v153_v59 }
 0x238   :  { %3787 = vmatpush1.bf16.msra.mxu1 %v3457_v2  ;;  %3830 = vmatpush1.bf16.msra.mxu0 %v3463_v3  ;;  %v169_v2 = vld [vmem:[#allocation2 + $0x158] sm:$0xff] }
 0x239   :  { %3860 = vmatprep.subr.bf16.mxu1 %v4712_v5  ;;  %3903 = vmatprep.subr.bf16.mxu0 %v4714_v6  ;;  %v185_v3 = vld [vmem:[#allocation2 + $0x1d8] sm:$0xff]  ;;  %v4715_v5 = vcombine.low %v136_v56, %v152_v57  ;;  %v4717_v6 = vcombine.low %v137_v58, %v153_v59  ;;  %v170_v58 = vld [vmem:[#allocation2 + $0x160] sm:$0xff] }
 0x23a   :  { %v4750_v8 = vcombine.high %v169_v2, %v185_v3  ;;  %v186_v59 = vld [vmem:[#allocation2 + $0x1e0] sm:$0xff] }
 0x23b   :  { %4932 = vmatmul.mubr.msk.bf16.vlgmr.msra.gmra.mrb[12].mxu1 %vm1583_vm4, %v5377_v30  ;;  %4934 = vmatmul.mubr.msk.bf16.vlgmr.msra.gmra.mrb[16].mxu0 %vm1583_vm4, %v5377_v30 }
 0x23c   :  { %3861 = vmatpush1.bf16.msra.mxu1 %v4711_v11  ;;  %3904 = vmatpush1.bf16.msra.mxu0 %v4713_v12  ;;  %v201_v11 = vld [vmem:[#allocation2 + $0x258] sm:$0xff] }
 0x23d   :  { %3862 = vmatprep.subr.bf16.mxu1 %v4744_v13  ;;  %3905 = vmatprep.subr.bf16.mxu0 %v4746_v14  ;;  %v217_v12 = vld [vmem:[#allocation2 + $0x2d8] sm:$0xff]  ;;  %v4747_v13 = vcombine.low %v168_v0, %v184_v1  ;;  %v4749_v14 = vcombine.low %v169_v2, %v185_v3  ;;  %v4752_v0 = vcombine.high %v170_v58, %v186_v59  ;;  %v202_v2 = vld [vmem:[#allocation2 + $0x260] sm:$0xff] }
 0x23e   :  { %3892 = vmatprep.mubr.bf16.mxu1 %v5216_v4  ;;  %3935 = vmatprep.mubr.bf16.mxu0 %v5216_v4  ;;  %v4782_v16 = vcombine.high %v201_v11, %v217_v12  ;;  %v218_v3 = vld [vmem:[#allocation2 + $0x2e0] sm:$0xff] }
 0x240   :  { %3863 = vmatpush1.bf16.msra.mxu1 %v4743_v20  ;;  %3906 = vmatpush1.bf16.msra.mxu0 %v4745_v21  ;;  %v233_v20 = vld [vmem:[#allocation2 + $0x358] sm:$0xff] }
 0x241   :  { %3864 = vmatprep.subr.bf16.mxu1 %v4776_v22  ;;  %3907 = vmatprep.subr.bf16.mxu0 %v4778_v23  ;;  %v249_v21 = vld [vmem:[#allocation2 + $0x3d8] sm:$0xff]  ;;  %v4779_v22 = vcombine.low %v200_v9, %v216_v10  ;;  %v4781_v23 = vcombine.low %v201_v11, %v217_v12  ;;  %v4784_v9 = vcombine.high %v202_v2, %v218_v3  ;;  %v234_v11 = vld [vmem:[#allocation2 + $0x360] sm:$0xff] }
 0x242   :  { %v4814_v25 = vcombine.high %v233_v20, %v249_v21  ;;  %v250_v12 = vld [vmem:[#allocation2 + $0x3e0] sm:$0xff] }
 0x244   :  { %3865 = vmatpush1.bf16.msra.mxu1 %v4775_v28  ;;  %3908 = vmatpush1.bf16.msra.mxu0 %v4777_v29  ;;  %v265_v28 = vld [vmem:[#allocation2 + $0x458] sm:$0xff] }
 0x245   :  { %3866 = vmatprep.subr.bf16.mxu1 %v4808_v31  ;;  %3909 = vmatprep.subr.bf16.mxu0 %v4810_v32  ;;  %v281_v29 = vld [vmem:[#allocation2 + $0x4d8] sm:$0xff]  ;;  %v4811_v31 = vcombine.low %v232_v17, %v248_v19  ;;  %v4813_v32 = vcombine.low %v233_v20, %v249_v21  ;;  %v266_v19 = vld [vmem:[#allocation2 + $0x460] sm:$0xff]  ;;  %v267_v21 = vld [vmem:[#allocation2 + $0x468] sm:$0xff] }
 0x246   :  { %v4846_v34 = vcombine.high %v265_v28, %v281_v29  ;;  %v282_v20 = vld [vmem:[#allocation2 + $0x4e0] sm:$0xff] }
 0x248   :  { %3867 = vmatpush1.bf16.msra.mxu1 %v4807_v37  ;;  %3910 = vmatpush1.bf16.msra.mxu0 %v4809_v38  ;;  %v297_v37 = vld [vmem:[#allocation2 + $0x558] sm:$0xff] }
 0x249   :  { %3868 = vmatprep.subr.bf16.mxu1 %v4840_v39  ;;  %3911 = vmatprep.subr.bf16.mxu0 %v4842_v40  ;;  %v313_v38 = vld [vmem:[#allocation2 + $0x5d8] sm:$0xff]  ;;  %v4843_v39 = vcombine.low %v264_v26, %v280_v27  ;;  %v4845_v40 = vcombine.low %v265_v28, %v281_v29  ;;  %v298_v27 = vld [vmem:[#allocation2 + $0x560] sm:$0xff]  ;;  %v299_v29 = vld [vmem:[#allocation2 + $0x568] sm:$0xff] }
 0x24a   :  { %v4878_v42 = vcombine.high %v297_v37, %v313_v38  ;;  %v314_v28 = vld [vmem:[#allocation2 + $0x5e0] sm:$0xff] }
 0x24c   :  { %3869 = vmatpush1.bf16.msra.mxu1 %v4839_v45  ;;  %3912 = vmatpush1.bf16.msra.mxu0 %v4841_v46  ;;  %v4875_v45 = vcombine.low %v296_v35, %v312_v36  ;;  %v4877_v46 = vcombine.low %v297_v37, %v313_v38  ;;  %v330_v36 = vld [vmem:[#allocation2 + $0x660] sm:$0x33]  ;;  %v331_v37 = vld [vmem:[#allocation2 + $0x668] sm:$0x33]  ;;  %v4879_v38 = vcombine.low %v298_v27, %v314_v28 }
 0x24d   :  { %3870 = vmatprep.subr.bf16.mxu1 %v4872_v47  ;;  %3913 = vmatprep.subr.bf16.mxu0 %v4874_v48  ;;  %v4908_v47 = vcombine.high %v328_v43, %v328_v43  ;;  %v4910_v48 = vcombine.high %v329_v44, %v329_v44  ;;  %v4913_v43 = vcombine.low %v331_v37, %v331_v37  ;;  %v140_v44 = vld [vmem:[#allocation2 + $0x70] sm:$0xff] }
 0x24f   :  { %v3499_v49 = vsel %vm1587_vm3, %v4913_v43, 0 }
 0x250   :  { %3871 = vmatpush1.bf16.msra.mxu1 %v4871_v51  ;;  %3914 = vmatpush1.bf16.msra.mxu0 %v4873_v52  ;;  %v138_v51 = vld [vmem:[#allocation2 + $0x60] sm:$0xff] }
 0x251   :  { %4935 = vmatprep.subr.msk.bf16.mxu1 %vm1587_vm3, %v4904_v53  ;;  %4937 = vmatprep.subr.msk.bf16.mxu0 %vm1587_vm3, %v4906_v18  ;;  %v154_v52 = vld [vmem:[#allocation2 + $0xe0] sm:$0xff]  ;;  %v139_v53 = vld [vmem:[#allocation2 + $0x68] sm:$0xff] }
 0x252   :  { %v155_v18 = vld [vmem:[#allocation2 + $0xe8] sm:$0xff]  ;;  %v4720_v56 = vcombine.high %v138_v51, %v154_v52 }
 0x253   :  { %v4722_v57 = vcombine.high %v139_v53, %v155_v18 }
 0x254   :  { %3873 = vmatpush1.bf16.msra.mxu1 %v3469_v60  ;;  %3916 = vmatpush1.bf16.msra.mxu0 %v3475_v61  ;;  %v171_v60 = vld [vmem:[#allocation2 + $0x168] sm:$0xff] }
 0x255   :  { %3946 = vmatprep.subr.bf16.mxu1 %v4716_v62  ;;  %3989 = vmatprep.subr.bf16.mxu0 %v4718_v63  ;;  %v187_v61 = vld [vmem:[#allocation2 + $0x1e8] sm:$0xff]  ;;  %v4719_v62 = vcombine.low %v138_v51, %v154_v52  ;;  %v4721_v63 = vcombine.low %v139_v53, %v155_v18  ;;  %v172_v52 = vld [vmem:[#allocation2 + $0x170] sm:$0xff]  ;;  %v173_v18 = vld [vmem:[#allocation2 + $0x178] sm:$0xff] }
 0x256   :  { %v4754_v1 = vcombine.high %v171_v60, %v187_v61  ;;  %v188_v53 = vld [vmem:[#allocation2 + $0x1f0] sm:$0xff] }
 0x257   :  { %4936 = vmatmul.mubr.msk.bf16.vlgmr.msra.gmra.mrb[16].mxu1 %vm1583_vm4, %v5377_v30  ;;  %4938 = vmatmul.mubr.msk.bf16.vlgmr.msra.gmra.mrb[20].mxu0 %vm1583_vm4, %v5377_v30 }
 0x258   :  { %3947 = vmatpush1.bf16.msra.mxu1 %v4715_v5  ;;  %3990 = vmatpush1.bf16.msra.mxu0 %v4717_v6  ;;  %v203_v5 = vld [vmem:[#allocation2 + $0x268] sm:$0xff] }
 0x259   :  { %3948 = vmatprep.subr.bf16.mxu1 %v4748_v7  ;;  %3991 = vmatprep.subr.bf16.mxu0 %v4750_v8  ;;  %v219_v6 = vld [vmem:[#allocation2 + $0x2e8] sm:$0xff]  ;;  %v4751_v7 = vcombine.low %v170_v58, %v186_v59  ;;  %v4753_v8 = vcombine.low %v171_v60, %v187_v61  ;;  %v204_v59 = vld [vmem:[#allocation2 + $0x270] sm:$0xff]  ;;  %v205_v61 = vld [vmem:[#allocation2 + $0x278] sm:$0xff] }
 0x25a   :  { %3978 = vmatprep.mubr.bf16.mxu1 %v5216_v4  ;;  %4021 = vmatprep.mubr.bf16.mxu0 %v5216_v4  ;;  %v4786_v10 = vcombine.high %v203_v5, %v219_v6  ;;  %v220_v60 = vld [vmem:[#allocation2 + $0x2f0] sm:$0xff] }
 0x25c   :  { %3949 = vmatpush1.bf16.msra.mxu1 %v4747_v13  ;;  %3992 = vmatpush1.bf16.msra.mxu0 %v4749_v14  ;;  %v235_v13 = vld [vmem:[#allocation2 + $0x368] sm:$0xff] }
 0x25d   :  { %3950 = vmatprep.subr.bf16.mxu1 %v4780_v15  ;;  %3993 = vmatprep.subr.bf16.mxu0 %v4782_v16  ;;  %v251_v14 = vld [vmem:[#allocation2 + $0x3e8] sm:$0xff]  ;;  %v4783_v15 = vcombine.low %v202_v2, %v218_v3  ;;  %v4816_v16 = vcombine.high %v234_v11, %v250_v12  ;;  %v4788_v2 = vcombine.high %v204_v59, %v220_v60 }
 0x25e   :  { %v4818_v17 = vcombine.high %v235_v13, %v251_v14 }
 0x260   :  { %3951 = vmatpush1.bf16.msra.mxu1 %v4779_v22  ;;  %3994 = vmatpush1.bf16.msra.mxu0 %v4781_v23  ;;  %v283_v22 = vld [vmem:[#allocation2 + $0x4e8] sm:$0xff]  ;;  %v4815_v23 = vcombine.low %v234_v11, %v250_v12 }
 0x261   :  { %3952 = vmatprep.subr.bf16.mxu1 %v4812_v24  ;;  %3995 = vmatprep.subr.bf16.mxu0 %v4814_v25  ;;  %v4817_v24 = vcombine.low %v235_v13, %v251_v14  ;;  %v4848_v25 = vcombine.high %v266_v19, %v282_v20  ;;  %v4850_v26 = vcombine.high %v267_v21, %v283_v22  ;;  %v268_v13 = vld [vmem:[#allocation2 + $0x470] sm:$0xff] }
 0x262   :  { %v284_v14 = vld [vmem:[#allocation2 + $0x4f0] sm:$0xff] }
 0x264   :  { %3953 = vmatpush1.bf16.msra.mxu1 %v4811_v31  ;;  %3996 = vmatpush1.bf16.msra.mxu0 %v4813_v32  ;;  %v315_v31 = vld [vmem:[#allocation2 + $0x5e8] sm:$0xff]  ;;  %v4847_v32 = vcombine.low %v266_v19, %v282_v20  ;;  %v4852_v19 = vcombine.high %v268_v13, %v284_v14  ;;  %v300_v20 = vld [vmem:[#allocation2 + $0x570] sm:$0xff] }
 0x265   :  { %3954 = vmatprep.subr.bf16.mxu1 %v4844_v33  ;;  %3997 = vmatprep.subr.bf16.mxu0 %v4846_v34  ;;  %v4849_v33 = vcombine.low %v267_v21, %v283_v22  ;;  %v4880_v34 = vcombine.high %v298_v27, %v314_v28  ;;  %v4882_v35 = vcombine.high %v299_v29, %v315_v31  ;;  %v316_v21 = vld [vmem:[#allocation2 + $0x5f0] sm:$0xff]  ;;  %v301_v22 = vld [vmem:[#allocation2 + $0x578] sm:$0xff] }
 0x266   :  { %v332_v28 = vld [vmem:[#allocation2 + $0x670] sm:$0x33] }
 0x268   :  { %3955 = vmatpush1.bf16.msra.mxu1 %v4843_v39  ;;  %3998 = vmatpush1.bf16.msra.mxu0 %v4845_v40  ;;  %v4881_v39 = vcombine.low %v299_v29, %v315_v31  ;;  %v4912_v40 = vcombine.high %v330_v36, %v330_v36  ;;  %v333_v29 = vld [vmem:[#allocation2 + $0x678] sm:$0x33]  ;;  %v4883_v31 = vcombine.low %v300_v20, %v316_v21 }
 0x269   :  { %3956 = vmatprep.subr.bf16.mxu1 %v4876_v41  ;;  %3999 = vmatprep.subr.bf16.mxu0 %v4878_v42  ;;  %v4914_v41 = vcombine.high %v331_v37, %v331_v37  ;;  %v4911_v42 = vcombine.low %v330_v36, %v330_v36  ;;  %v4917_v36 = vcombine.low %v333_v29, %v333_v29 }
 0x26c   :  { %3957 = vmatpush1.bf16.msra.mxu1 %v4875_v45  ;;  %4000 = vmatpush1.bf16.msra.mxu0 %v4877_v46  ;;  %v156_v45 = vld [vmem:[#allocation2 + $0xf0] sm:$0xff]  ;;  %v141_v46 = vld [vmem:[#allocation2 + $0x78] sm:$0xff] }
 0x26d   :  { %4939 = vmatprep.subr.msk.bf16.mxu1 %vm1587_vm3, %v4908_v47  ;;  %4941 = vmatprep.subr.msk.bf16.mxu0 %vm1587_vm3, %v4910_v48  ;;  %v157_v47 = vld [vmem:[#allocation2 + $0xf8] sm:$0xff]  ;;  %v3493_v48 = vsel %vm1587_vm3, %v4911_v42, 0  ;;  %v4724_v50 = vcombine.high %v140_v44, %v156_v45 }
 0x26e   :  { %v4726_v51 = vcombine.high %v141_v46, %v157_v47 }
 0x270   :  { %3959 = vmatpush1.bf16.msra.mxu1 %v3481_v54  ;;  %4002 = vmatpush1.bf16.msra.mxu0 %v3487_v55  ;;  %v189_v54 = vld [vmem:[#allocation2 + $0x1f8] sm:$0xff]  ;;  %v4723_v55 = vcombine.low %v140_v44, %v156_v45 }
 0x271   :  { %4032 = vmatprep.subr.bf16.mxu1 %v4720_v56  ;;  %4075 = vmatprep.subr.bf16.mxu0 %v4722_v57  ;;  %v4725_v56 = vcombine.low %v141_v46, %v157_v47  ;;  %v4756_v57 = vcombine.high %v172_v52, %v188_v53  ;;  %v4758_v58 = vcombine.high %v173_v18, %v189_v54 }
 0x273   :  { %4940 = vmatmul.mubr.msk.bf16.vlgmr.msra.gmra.mrb[20].mxu1 %vm1583_vm4, %v5377_v30  ;;  %4942 = vmatmul.mubr.msk.bf16.vlgmr.msra.gmra.mrb[24].mxu0 %vm1583_vm4, %v5377_v30  ;;  %v4785_v30 = vcombine.low %v203_v5, %v219_v6  ;;  %v236_v5 = vld [vmem:[#allocation2 + $0x370] sm:$0xff] }
 0x274   :  { %4033 = vmatpush1.bf16.msra.mxu1 %v4719_v62  ;;  %4076 = vmatpush1.bf16.msra.mxu0 %v4721_v63  ;;  %v221_v62 = vld [vmem:[#allocation2 + $0x2f8] sm:$0xff]  ;;  %v5442_v63 = vld [vmem:[%s5555_s1] sm:$0xff]   ;;  %v252_v6 = vld [vmem:[#allocation2 + $0x3f0] sm:$0xff] }
 0x275   :  { %4034 = vmatprep.subr.bf16.mxu1 %v4752_v0  ;;  %4077 = vmatprep.subr.bf16.mxu0 %v4754_v1  ;;  %v4755_v0 = vcombine.low %v172_v52, %v188_v53  ;;  %v4757_v1 = vcombine.low %v173_v18, %v189_v54  ;;  %v4790_v3 = vcombine.high %v205_v61, %v221_v62 }
 0x276   :  { %4064 = vmatprep.mubr.bf16.mxu1 %v5216_v4  ;;  %4107 = vmatprep.mubr.bf16.mxu0 %v5216_v4  ;;  %v4820_v11 = vcombine.high %v236_v5, %v252_v6 }
 0x278   :  { %4035 = vmatpush1.bf16.msra.mxu1 %v4751_v7  ;;  %4078 = vmatpush1.bf16.msra.mxu0 %v4753_v8  ;;  %v237_v7 = vld [vmem:[#allocation2 + $0x378] sm:$0xff] }
 0x279   :  { %4036 = vmatprep.subr.bf16.mxu1 %v4784_v9  ;;  %4079 = vmatprep.subr.bf16.mxu0 %v4786_v10  ;;  %v253_v8 = vld [vmem:[#allocation2 + $0x3f8] sm:$0xff]  ;;  %v4787_v9 = vcombine.low %v204_v59, %v220_v60  ;;  %v4789_v10 = vcombine.low %v205_v61, %v221_v62 }
 0x27a   :  { %v4822_v12 = vcombine.high %v237_v7, %v253_v8 }
 0x27c   :  { %4037 = vmatpush1.bf16.msra.mxu1 %v4783_v15  ;;  %4080 = vmatpush1.bf16.msra.mxu0 %v4785_v30  ;;  %v269_v15 = vld [vmem:[#allocation2 + $0x478] sm:$0xff] }
 0x27d   :  { %4038 = vmatprep.subr.bf16.mxu1 %v4816_v16  ;;  %4081 = vmatprep.subr.bf16.mxu0 %v4818_v17  ;;  %v285_v30 = vld [vmem:[#allocation2 + $0x4f8] sm:$0xff]  ;;  %v4819_v16 = vcombine.low %v236_v5, %v252_v6  ;;  %v4821_v17 = vcombine.low %v237_v7, %v253_v8 }
 0x280   :  { %4039 = vmatpush1.bf16.msra.mxu1 %v4815_v23  ;;  %4082 = vmatpush1.bf16.msra.mxu0 %v4817_v24  ;;  %v317_v23 = vld [vmem:[#allocation2 + $0x5f8] sm:$0xff]  ;;  %v4851_v24 = vcombine.low %v268_v13, %v284_v14 }
 0x281   :  { %4040 = vmatprep.subr.bf16.mxu1 %v4848_v25  ;;  %4083 = vmatprep.subr.bf16.mxu0 %v4850_v26  ;;  %v4853_v25 = vcombine.low %v269_v15, %v285_v30  ;;  %v4884_v26 = vcombine.high %v300_v20, %v316_v21  ;;  %v4886_v27 = vcombine.high %v301_v22, %v317_v23 }
 0x284   :  { %4041 = vmatpush1.bf16.msra.mxu1 %v4847_v32  ;;  %4084 = vmatpush1.bf16.msra.mxu0 %v4849_v33  ;;  %v4885_v32 = vcombine.low %v301_v22, %v317_v23  ;;  %v4916_v33 = vcombine.high %v332_v28, %v332_v28 }
 0x285   :  { %4042 = vmatprep.subr.bf16.mxu1 %v4880_v34  ;;  %4085 = vmatprep.subr.bf16.mxu0 %v4882_v35  ;;  %v4918_v34 = vcombine.high %v333_v29, %v333_v29  ;;  %v4915_v35 = vcombine.low %v332_v28, %v332_v28 }
 0x287   :  { %v3505_v37 = vsel %vm1587_vm3, %v4915_v35, 0 }
 0x288   :  { %4043 = vmatpush1.bf16.msra.mxu1 %v4879_v38  ;;  %4086 = vmatpush1.bf16.msra.mxu0 %v4881_v39  ;;  %v3511_v38 = vsel %vm1587_vm3, %v4917_v36, 0 }
 0x289   :  { %4943 = vmatprep.subr.msk.bf16.mxu1 %vm1587_vm3, %v4912_v40  ;;  %4945 = vmatprep.subr.msk.bf16.mxu0 %vm1587_vm3, %v4914_v41 }
 0x28c   :  { %4045 = vmatpush1.bf16.msra.mxu1 %v3493_v48  ;;  %4088 = vmatpush1.bf16.msra.mxu0 %v3499_v49 }
 0x28d   :  { %4118 = vmatprep.subr.bf16.mxu1 %v4724_v50  ;;  %4161 = vmatprep.subr.bf16.mxu0 %v4726_v51 }
 0x28f   :  { %4944 = vmatmul.mubr.msk.bf16.vlgmr.msra.gmra.mrb[24].mxu1 %vm1583_vm4, %v5442_v63  ;;  %4946 = vmatmul.mubr.msk.bf16.vlgmr.msra.gmra.mrb[28].mxu0 %vm1583_vm4, %v5442_v63 }
 0x290   :  { %4119 = vmatpush1.bf16.msra.mxu1 %v4723_v55  ;;  %4162 = vmatpush1.bf16.msra.mxu0 %v4725_v56 }
 0x291   :  { %4120 = vmatprep.subr.bf16.mxu1 %v4756_v57  ;;  %4163 = vmatprep.subr.bf16.mxu0 %v4758_v58 }
 0x292   :  { %4150 = vmatprep.mubr.bf16.mxu1 %v5216_v4  ;;  %4193 = vmatprep.mubr.bf16.mxu0 %v5216_v4  ;;  %v4854_v4 = vcombine.high %v269_v15, %v285_v30 }
 0x294   :  { %4121 = vmatpush1.bf16.msra.mxu1 %v4755_v0  ;;  %4164 = vmatpush1.bf16.msra.mxu0 %v4757_v1 }
 0x295   :  { %4122 = vmatprep.subr.bf16.mxu1 %v4788_v2  ;;  %4165 = vmatprep.subr.bf16.mxu0 %v4790_v3 }
 0x298   :  { %4123 = vmatpush1.bf16.msra.mxu1 %v4787_v9  ;;  %4166 = vmatpush1.bf16.msra.mxu0 %v4789_v10 }
 0x299   :  { %4124 = vmatprep.subr.bf16.mxu1 %v4820_v11  ;;  %4167 = vmatprep.subr.bf16.mxu0 %v4822_v12 }
 0x29c   :  { %4125 = vmatpush1.bf16.msra.mxu1 %v4819_v16  ;;  %4168 = vmatpush1.bf16.msra.mxu0 %v4821_v17 }
 0x29d   :  { %4126 = vmatprep.subr.bf16.mxu1 %v4852_v19  ;;  %4169 = vmatprep.subr.bf16.mxu0 %v4854_v4 }
 0x2a0   :  { %4127 = vmatpush1.bf16.msra.mxu1 %v4851_v24  ;;  %4170 = vmatpush1.bf16.msra.mxu0 %v4853_v25 }
 0x2a1   :  { %4128 = vmatprep.subr.bf16.mxu1 %v4884_v26  ;;  %4171 = vmatprep.subr.bf16.mxu0 %v4886_v27 }
 0x2a4   :  { %4129 = vmatpush1.bf16.msra.mxu1 %v4883_v31  ;;  %4172 = vmatpush1.bf16.msra.mxu0 %v4885_v32 }
 0x2a5   :  { %4947 = vmatprep.subr.msk.bf16.mxu1 %vm1587_vm3, %v4916_v33  ;;  %4949 = vmatprep.subr.msk.bf16.mxu0 %vm1587_vm3, %v4918_v34 }
 0x2a8   :  { %4131 = vmatpush1.bf16.msra.mxu1 %v3505_v37  ;;  %4174 = vmatpush1.bf16.msra.mxu0 %v3511_v38 }
 0x2ab   :  { %4948 = vmatmul.mubr.msk.bf16.vlgmr.msra.gmra.mrb[28].mxu1 %vm1583_vm4, %v5442_v63  ;;  %4950 = vmatmul.mubr.msk.bf16.vlgmr.msra.gmra.mrb[32].mxu0 %vm1583_vm4, %v5442_v63 }
 0x2ba   :  { %v3550_v39 = vpop.f32.mrb[0].mxu1  ;;  %v3593_v40 = vpop.f32.mrb[4].mxu0 }
 0x2bb   :  { %v3552_v41 = vpop.f32.mrb[1].mxu1  ;;  %v3595_v42 = vpop.f32.mrb[5].mxu0 }
 0x2bc   :  { %v4983_v43 = vpack.c.bf16 %v3552_v41, %v3550_v39  ;;  %v4984_v44 = vpack.c.bf16 %v3595_v42, %v3593_v40  ;;  %v3554_v45 = vpop.f32.mrb[2].mxu1  ;;  %v3597_v46 = vpop.f32.mrb[6].mxu0 }
 0x2bd   :  { %v3556_v47 = vpop.f32.mrb[3].mxu1  ;;  %v3599_v48 = vpop.f32.mrb[7].mxu0 }
 0x2be   :  { %4396 = vst [vmem:[%s5560_s6] sm:$0xff] %v4983_v43  ;;  %4397 = vst [vmem:[%s5560_s6 + $0x8] sm:$0xff] %v4984_v44  ;;  %v4999_v49 = vpack.c.bf16 %v3556_v47, %v3554_v45  ;;  %v5000_v50 = vpack.c.bf16 %v3599_v48, %v3597_v46 }
 0x2c0   :  { %4412 = vst [vmem:[%s5560_s6 + $0x80] sm:$0xff] %v4999_v49  ;;  %4413 = vst [vmem:[%s5560_s6 + $0x88] sm:$0xff] %v5000_v50 }
 0x2d6   :  { %v3636_v51 = vpop.f32.mrb[4].mxu1  ;;  %v3679_v52 = vpop.f32.mrb[8].mxu0 }
 0x2d7   :  { %v3638_v53 = vpop.f32.mrb[5].mxu1  ;;  %v3681_v18 = vpop.f32.mrb[9].mxu0 }
 0x2d8   :  { %v4985_v54 = vpack.c.bf16 %v3638_v53, %v3636_v51  ;;  %v4986_v55 = vpack.c.bf16 %v3681_v18, %v3679_v52  ;;  %v3640_v56 = vpop.f32.mrb[6].mxu1  ;;  %v3683_v57 = vpop.f32.mrb[10].mxu0 }
 0x2d9   :  { %v3642_v58 = vpop.f32.mrb[7].mxu1  ;;  %v3685_v59 = vpop.f32.mrb[11].mxu0 }
 0x2da   :  { %4398 = vst [vmem:[%s5560_s6 + $0x10] sm:$0xff] %v4985_v54  ;;  %4399 = vst [vmem:[%s5560_s6 + $0x18] sm:$0xff] %v4986_v55  ;;  %v5001_v60 = vpack.c.bf16 %v3642_v58, %v3640_v56  ;;  %v5002_v61 = vpack.c.bf16 %v3685_v59, %v3683_v57 }
 0x2dc   :  { %4414 = vst [vmem:[%s5560_s6 + $0x90] sm:$0xff] %v5001_v60  ;;  %4415 = vst [vmem:[%s5560_s6 + $0x98] sm:$0xff] %v5002_v61 }
 0x2f2   :  { %v3722_v62 = vpop.f32.mrb[8].mxu1  ;;  %v3765_v63 = vpop.f32.mrb[12].mxu0 }
 0x2f3   :  { %v3724_v0 = vpop.f32.mrb[9].mxu1  ;;  %v3767_v1 = vpop.f32.mrb[13].mxu0 }
 0x2f4   :  { %v4987_v2 = vpack.c.bf16 %v3724_v0, %v3722_v62  ;;  %v4988_v3 = vpack.c.bf16 %v3767_v1, %v3765_v63  ;;  %v3726_v5 = vpop.f32.mrb[10].mxu1  ;;  %v3769_v6 = vpop.f32.mrb[14].mxu0 }
 0x2f5   :  { %v3728_v7 = vpop.f32.mrb[11].mxu1  ;;  %v3771_v8 = vpop.f32.mrb[15].mxu0 }
 0x2f6   :  { %4400 = vst [vmem:[%s5560_s6 + $0x20] sm:$0xff] %v4987_v2  ;;  %4401 = vst [vmem:[%s5560_s6 + $0x28] sm:$0xff] %v4988_v3  ;;  %v5003_v9 = vpack.c.bf16 %v3728_v7, %v3726_v5  ;;  %v5004_v10 = vpack.c.bf16 %v3771_v8, %v3769_v6 }
 0x2f8   :  { %4416 = vst [vmem:[%s5560_s6 + $0xa0] sm:$0xff] %v5003_v9  ;;  %4417 = vst [vmem:[%s5560_s6 + $0xa8] sm:$0xff] %v5004_v10 }
 0x30e   :  { %v3808_v11 = vpop.f32.mrb[12].mxu1  ;;  %v3851_v12 = vpop.f32.mrb[16].mxu0 }
 0x30f   :  { %v3810_v13 = vpop.f32.mrb[13].mxu1  ;;  %v3853_v14 = vpop.f32.mrb[17].mxu0 }
 0x310   :  { %v4989_v15 = vpack.c.bf16 %v3810_v13, %v3808_v11  ;;  %v4990_v30 = vpack.c.bf16 %v3853_v14, %v3851_v12  ;;  %v3812_v16 = vpop.f32.mrb[14].mxu1  ;;  %v3855_v17 = vpop.f32.mrb[18].mxu0 }
 0x311   :  { %v3814_v19 = vpop.f32.mrb[15].mxu1  ;;  %v3857_v4 = vpop.f32.mrb[19].mxu0 }
 0x312   :  { %4402 = vst [vmem:[%s5560_s6 + $0x30] sm:$0xff] %v4989_v15  ;;  %4403 = vst [vmem:[%s5560_s6 + $0x38] sm:$0xff] %v4990_v30  ;;  %v5005_v20 = vpack.c.bf16 %v3814_v19, %v3812_v16  ;;  %v5006_v21 = vpack.c.bf16 %v3857_v4, %v3855_v17 }
 0x314   :  { %4418 = vst [vmem:[%s5560_s6 + $0xb0] sm:$0xff] %v5005_v20  ;;  %4419 = vst [vmem:[%s5560_s6 + $0xb8] sm:$0xff] %v5006_v21 }
 0x32a   :  { %v3894_v22 = vpop.f32.mrb[16].mxu1  ;;  %v3937_v23 = vpop.f32.mrb[20].mxu0 }
 0x32b   :  { %v3896_v24 = vpop.f32.mrb[17].mxu1  ;;  %v3939_v25 = vpop.f32.mrb[21].mxu0 }
 0x32c   :  { %v4991_v26 = vpack.c.bf16 %v3896_v24, %v3894_v22  ;;  %v4992_v27 = vpack.c.bf16 %v3939_v25, %v3937_v23  ;;  %v3898_v28 = vpop.f32.mrb[18].mxu1  ;;  %v3941_v29 = vpop.f32.mrb[22].mxu0 }
 0x32d   :  { %v3900_v31 = vpop.f32.mrb[19].mxu1  ;;  %v3943_v32 = vpop.f32.mrb[23].mxu0 }
 0x32e   :  { %4404 = vst [vmem:[%s5560_s6 + $0x40] sm:$0xff] %v4991_v26  ;;  %4405 = vst [vmem:[%s5560_s6 + $0x48] sm:$0xff] %v4992_v27  ;;  %v5007_v33 = vpack.c.bf16 %v3900_v31, %v3898_v28  ;;  %v5008_v34 = vpack.c.bf16 %v3943_v32, %v3941_v29 }
 0x330   :  { %4420 = vst [vmem:[%s5560_s6 + $0xc0] sm:$0xff] %v5007_v33  ;;  %4421 = vst [vmem:[%s5560_s6 + $0xc8] sm:$0xff] %v5008_v34 }
 0x346   :  { %v3980_v35 = vpop.f32.mrb[20].mxu1  ;;  %v4023_v36 = vpop.f32.mrb[24].mxu0 }
 0x347   :  { %v3982_v37 = vpop.f32.mrb[21].mxu1  ;;  %v4025_v38 = vpop.f32.mrb[25].mxu0 }
 0x348   :  { %v4993_v39 = vpack.c.bf16 %v3982_v37, %v3980_v35  ;;  %v4994_v40 = vpack.c.bf16 %v4025_v38, %v4023_v36  ;;  %v3984_v41 = vpop.f32.mrb[22].mxu1  ;;  %v4027_v42 = vpop.f32.mrb[26].mxu0 }
 0x349   :  { %v3986_v43 = vpop.f32.mrb[23].mxu1  ;;  %v4029_v44 = vpop.f32.mrb[27].mxu0 }
 0x34a   :  { %4406 = vst [vmem:[%s5560_s6 + $0x50] sm:$0xff] %v4993_v39  ;;  %4407 = vst [vmem:[%s5560_s6 + $0x58] sm:$0xff] %v4994_v40  ;;  %v5009_v45 = vpack.c.bf16 %v3986_v43, %v3984_v41  ;;  %v5010_v46 = vpack.c.bf16 %v4029_v44, %v4027_v42 }
 0x34c   :  { %4422 = vst [vmem:[%s5560_s6 + $0xd0] sm:$0xff] %v5009_v45  ;;  %4423 = vst [vmem:[%s5560_s6 + $0xd8] sm:$0xff] %v5010_v46 }
 0x362   :  { %v4066_v47 = vpop.f32.mrb[24].mxu1  ;;  %v4109_v48 = vpop.f32.mrb[28].mxu0 }
 0x363   :  { %v4068_v49 = vpop.f32.mrb[25].mxu1  ;;  %v4111_v50 = vpop.f32.mrb[29].mxu0 }
 0x364   :  { %v4995_v51 = vpack.c.bf16 %v4068_v49, %v4066_v47  ;;  %v4996_v52 = vpack.c.bf16 %v4111_v50, %v4109_v48  ;;  %v4070_v53 = vpop.f32.mrb[26].mxu1  ;;  %v4113_v18 = vpop.f32.mrb[30].mxu0 }
 0x365   :  { %v4072_v54 = vpop.f32.mrb[27].mxu1  ;;  %v4115_v55 = vpop.f32.mrb[31].mxu0 }
 0x366   :  { %4408 = vst [vmem:[%s5560_s6 + $0x60] sm:$0xff] %v4995_v51  ;;  %4409 = vst [vmem:[%s5560_s6 + $0x68] sm:$0xff] %v4996_v52  ;;  %v5011_v56 = vpack.c.bf16 %v4072_v54, %v4070_v53  ;;  %v5012_v57 = vpack.c.bf16 %v4115_v55, %v4113_v18 }
 0x368   :  { %4424 = vst [vmem:[%s5560_s6 + $0xe0] sm:$0xff] %v5011_v56  ;;  %4425 = vst [vmem:[%s5560_s6 + $0xe8] sm:$0xff] %v5012_v57 }
 0x37e   :  { %v4152_v58 = vpop.f32.mrb[28].mxu1  ;;  %v4195_v59 = vpop.f32.mrb[32].mxu0 }
 0x37f   :  { %v4154_v60 = vpop.f32.mrb[29].mxu1  ;;  %v4197_v61 = vpop.f32.mrb[33].mxu0 }
 0x380   :  { %v4997_v62 = vpack.c.bf16 %v4154_v60, %v4152_v58  ;;  %v4998_v63 = vpack.c.bf16 %v4197_v61, %v4195_v59  ;;  %v4156_v0 = vpop.f32.mrb[30].mxu1  ;;  %v4199_v1 = vpop.f32.mrb[34].mxu0 }
 0x381   :  { %v4158_v2 = vpop.f32.mrb[31].mxu1  ;;  %v4201_v3 = vpop.f32.mrb[35].mxu0 }
 0x382   :  { %4410 = vst [vmem:[%s5560_s6 + $0x70] sm:$0xff] %v4997_v62  ;;  %4411 = vst [vmem:[%s5560_s6 + $0x78] sm:$0xff] %v4998_v63  ;;  %v5013_v5 = vpack.c.bf16 %v4158_v2, %v4156_v0  ;;  %v5014_v6 = vpack.c.bf16 %v4201_v3, %v4199_v1 }
 0x384   :  { %4426 = vst [vmem:[%s5560_s6 + $0xf0] sm:$0xff] %v5013_v5  ;;  %4427 = vst [vmem:[%s5560_s6 + $0xf8] sm:$0xff] %v5014_v6 }
 0x385   :  { %4432 = vsyncpa [#allocation3], 1 }
 0x386   :  { %4433 = vsyncpa [#allocation5], 1 }

// kernel: mnist_generator_forward.11
= control target key start
LH: loop header
LB: loop body
LE: loop exit
PB: predicated region body
PF: predicated region fallthrough
CT: control target
= control target key end

     0   :  { %s1866_s1 = inlined_call_operand.vmem [shape: bf16[512,256], index: 1, kind: input, shape index: {}]   ;;  %s1867_s0 = inlined_call_operand.vmem [shape: bf16[176,512], index: 0, kind: input, shape index: {}]   ;;  %s1868_s2 = inlined_call_operand.vmem [shape: bf16[176,256], index: 2, kind: output, shape index: {}]  }
   0x1   :  { %v1299_v0 = vld [vmem:[%s1866_s1 + $0x4] ss:$8 sps:$4 sm:$0xff]   ;;  %v1303_v2 = vld [vmem:[%s1866_s1] ss:$8 sps:$4 sm:$0xff]   ;;  %v1305_v4 = vld [vmem:[%s1866_s1 + $0x14] ss:$8 sps:$4 sm:$0xff]  }
   0x2   :  { %v1301_v1 = vld [vmem:[%s1866_s1 + $0x104] ss:$8 sps:$4 sm:$0xff]   ;;  %659 = vmatprep.subr.bf16.mxu1 %v1299_v0  ;;  %v1304_v3 = vld [vmem:[%s1866_s1 + $0x100] ss:$8 sps:$4 sm:$0xff]   ;;  %v1307_v5 = vld [vmem:[%s1866_s1 + $0x114] ss:$8 sps:$4 sm:$0xff]  }
   0x3   :  { %802 = vmatprep.subr.bf16.mxu0 %v1301_v1  ;;  %660 = vmatpush1.bf16.msra.mxu1 %v1303_v2  ;;  %v1309_v6 = vld [vmem:[%s1866_s1 + $0x10] ss:$8 sps:$4 sm:$0xff]   ;;  %v1311_v8 = vld [vmem:[%s1866_s1 + $0x24] ss:$8 sps:$4 sm:$0xff]   ;;  %v1315_v10 = vld [vmem:[%s1866_s1 + $0x20] ss:$8 sps:$4 sm:$0xff]  }
   0x4   :  { %803 = vmatpush1.bf16.msra.mxu0 %v1304_v3  ;;  %661 = vmatprep.subr.bf16.mxu1 %v1305_v4  ;;  %v1310_v7 = vld [vmem:[%s1866_s1 + $0x110] ss:$8 sps:$4 sm:$0xff]   ;;  %v1313_v9 = vld [vmem:[%s1866_s1 + $0x124] ss:$8 sps:$4 sm:$0xff]   ;;  %v1316_v11 = vld [vmem:[%s1866_s1 + $0x120] ss:$8 sps:$4 sm:$0xff]  }
   0x5   :  { %804 = vmatprep.subr.bf16.mxu0 %v1307_v5  ;;  %v1317_v12 = vld [vmem:[%s1866_s1 + $0x34] ss:$8 sps:$4 sm:$0xff]   ;;  %v1321_v14 = vld [vmem:[%s1866_s1 + $0x30] ss:$8 sps:$4 sm:$0xff]   ;;  %v1323_v16 = vld [vmem:[%s1866_s1 + $0x44] ss:$8 sps:$4 sm:$0xff]  }
   0x6   :  { %v1319_v13 = vld [vmem:[%s1866_s1 + $0x134] ss:$8 sps:$4 sm:$0xff]   ;;  %v1322_v15 = vld [vmem:[%s1866_s1 + $0x130] ss:$8 sps:$4 sm:$0xff]   ;;  %v1325_v17 = vld [vmem:[%s1866_s1 + $0x144] ss:$8 sps:$4 sm:$0xff]  }
   0x7   :  { %662 = vmatpush1.bf16.msra.mxu1 %v1309_v6  ;;  %v1327_v18 = vld [vmem:[%s1866_s1 + $0x40] ss:$8 sps:$4 sm:$0xff]   ;;  %v1329_v20 = vld [vmem:[%s1866_s1 + $0x54] ss:$8 sps:$4 sm:$0xff]   ;;  %v1333_v22 = vld [vmem:[%s1866_s1 + $0x50] ss:$8 sps:$4 sm:$0xff]  }
   0x8   :  { %805 = vmatpush1.bf16.msra.mxu0 %v1310_v7  ;;  %663 = vmatprep.subr.bf16.mxu1 %v1311_v8  ;;  %v1328_v19 = vld [vmem:[%s1866_s1 + $0x140] ss:$8 sps:$4 sm:$0xff]   ;;  %v1331_v21 = vld [vmem:[%s1866_s1 + $0x154] ss:$8 sps:$4 sm:$0xff]   ;;  %v1334_v23 = vld [vmem:[%s1866_s1 + $0x150] ss:$8 sps:$4 sm:$0xff]  }
   0x9   :  { %806 = vmatprep.subr.bf16.mxu0 %v1313_v9  ;;  %v1335_v24 = vld [vmem:[%s1866_s1 + $0x64] ss:$8 sps:$4 sm:$0xff]   ;;  %v1339_v26 = vld [vmem:[%s1866_s1 + $0x60] ss:$8 sps:$4 sm:$0xff]   ;;  %v1341_v28 = vld [vmem:[%s1866_s1 + $0x74] ss:$8 sps:$4 sm:$0xff]  }
   0xa   :  { %v1337_v25 = vld [vmem:[%s1866_s1 + $0x164] ss:$8 sps:$4 sm:$0xff]   ;;  %v1340_v27 = vld [vmem:[%s1866_s1 + $0x160] ss:$8 sps:$4 sm:$0xff]   ;;  %v1343_v29 = vld [vmem:[%s1866_s1 + $0x174] ss:$8 sps:$4 sm:$0xff]  }
   0xb   :  { %664 = vmatpush1.bf16.msra.mxu1 %v1315_v10  ;;  %v1345_v30 = vld [vmem:[%s1866_s1 + $0x70] ss:$8 sps:$4 sm:$0xff]   ;;  %v1347_v32 = vld [vmem:[%s1866_s1 + $0x84] ss:$8 sps:$4 sm:$0xff]   ;;  %v1351_v34 = vld [vmem:[%s1866_s1 + $0x80] ss:$8 sps:$4 sm:$0xff]  }
   0xc   :  { %807 = vmatpush1.bf16.msra.mxu0 %v1316_v11  ;;  %665 = vmatprep.subr.bf16.mxu1 %v1317_v12  ;;  %v1346_v31 = vld [vmem:[%s1866_s1 + $0x170] ss:$8 sps:$4 sm:$0xff]   ;;  %v1349_v33 = vld [vmem:[%s1866_s1 + $0x184] ss:$8 sps:$4 sm:$0xff]   ;;  %v1352_v35 = vld [vmem:[%s1866_s1 + $0x180] ss:$8 sps:$4 sm:$0xff]  }
   0xd   :  { %808 = vmatprep.subr.bf16.mxu0 %v1319_v13  ;;  %v1353_v36 = vld [vmem:[%s1866_s1 + $0x94] ss:$8 sps:$4 sm:$0xff]   ;;  %v1357_v38 = vld [vmem:[%s1866_s1 + $0x90] ss:$8 sps:$4 sm:$0xff]   ;;  %v1359_v40 = vld [vmem:[%s1866_s1 + $0xa4] ss:$8 sps:$4 sm:$0xff]  }
   0xe   :  { %v1355_v37 = vld [vmem:[%s1866_s1 + $0x194] ss:$8 sps:$4 sm:$0xff]   ;;  %v1358_v39 = vld [vmem:[%s1866_s1 + $0x190] ss:$8 sps:$4 sm:$0xff]   ;;  %v1361_v41 = vld [vmem:[%s1866_s1 + $0x1a4] ss:$8 sps:$4 sm:$0xff]  }
   0xf   :  { %666 = vmatpush1.bf16.msra.mxu1 %v1321_v14  ;;  %v1363_v42 = vld [vmem:[%s1866_s1 + $0xa0] ss:$8 sps:$4 sm:$0xff]   ;;  %v1365_v44 = vld [vmem:[%s1866_s1 + $0xb4] ss:$8 sps:$4 sm:$0xff]   ;;  %v1369_v46 = vld [vmem:[%s1866_s1 + $0xb0] ss:$8 sps:$4 sm:$0xff]  }
  0x10   :  { %809 = vmatpush1.bf16.msra.mxu0 %v1322_v15  ;;  %667 = vmatprep.subr.bf16.mxu1 %v1323_v16  ;;  %v1364_v43 = vld [vmem:[%s1866_s1 + $0x1a0] ss:$8 sps:$4 sm:$0xff]   ;;  %v1367_v45 = vld [vmem:[%s1866_s1 + $0x1b4] ss:$8 sps:$4 sm:$0xff]   ;;  %v1370_v47 = vld [vmem:[%s1866_s1 + $0x1b0] ss:$8 sps:$4 sm:$0xff]  }
  0x11   :  { %810 = vmatprep.subr.bf16.mxu0 %v1325_v17  ;;  %v1371_v48 = vld [vmem:[%s1866_s1 + $0xc4] ss:$8 sps:$4 sm:$0xff]   ;;  %v1375_v52 = vld [vmem:[%s1866_s1 + $0xc0] ss:$8 sps:$4 sm:$0xff]   ;;  %v1377_v54 = vld [vmem:[%s1866_s1 + $0xd4] ss:$8 sps:$4 sm:$0xff]  }
  0x12   :  { %v1397_v49 = vld [vmem:[%s1867_s0 + $0x4] ss:$16 sps:$4 sm:$0xff]   ;;  %v1400_v51 = vld [vmem:[%s1867_s0 + $0xc] ss:$16 sps:$4 sm:$0xff]   ;;  %v1376_v53 = vld [vmem:[%s1866_s1 + $0x1c0] ss:$8 sps:$4 sm:$0xff]  }
  0x13   :  { %668 = vmatpush1.bf16.msra.mxu1 %v1327_v18  ;;  %v1373_v50 = vld [vmem:[%s1866_s1 + $0x1c4] ss:$8 sps:$4 sm:$0xff]   ;;  %691 = vmatprep.mubr.bf16.mxu1 %v1397_v49  ;;  %v1379_v55 = vld [vmem:[%s1866_s1 + $0x1d4] ss:$8 sps:$4 sm:$0xff]   ;;  %v1381_v56 = vld [vmem:[%s1866_s1 + $0xd0] ss:$8 sps:$4 sm:$0xff]  }
  0x14   :  { %811 = vmatpush1.bf16.msra.mxu0 %v1328_v19  ;;  %669 = vmatprep.subr.bf16.mxu1 %v1329_v20  ;;  %v1382_v57 = vld [vmem:[%s1866_s1 + $0x1d0] ss:$8 sps:$4 sm:$0xff]   ;;  %v1383_v58 = vld [vmem:[%s1866_s1 + $0xe4] ss:$8 sps:$4 sm:$0xff]   ;;  %v1387_v60 = vld [vmem:[%s1866_s1 + $0xe0] ss:$8 sps:$4 sm:$0xff]  }
  0x15   :  { %812 = vmatprep.subr.bf16.mxu0 %v1331_v21  ;;  %834 = vmatprep.mubr.bf16.mxu0 %v1400_v51  ;;  %v1385_v59 = vld [vmem:[%s1866_s1 + $0x1e4] ss:$8 sps:$4 sm:$0xff]   ;;  %v1388_v61 = vld [vmem:[%s1866_s1 + $0x1e0] ss:$8 sps:$4 sm:$0xff]   ;;  %v1389_v62 = vld [vmem:[%s1866_s1 + $0xf4] ss:$8 sps:$4 sm:$0xff]  }
  0x16   :  { %v1391_v63 = vld [vmem:[%s1866_s1 + $0x1f4] ss:$8 sps:$4 sm:$0xff]   ;;  %v1393_v0 = vld [vmem:[%s1866_s1 + $0xf0] ss:$8 sps:$4 sm:$0xff]  }
  0x17   :  { %670 = vmatpush1.bf16.msra.mxu1 %v1333_v22  ;;  %v1394_v1 = vld [vmem:[%s1866_s1 + $0x1f0] ss:$8 sps:$4 sm:$0xff]   ;;  %v1401_v4 = vld [vmem:[%s1867_s0 + $0x24] ss:$16 sps:$4 sm:$0xff]   ;;  %v1403_v5 = vld [vmem:[%s1867_s0 + $0x2c] ss:$16 sps:$4 sm:$0xff]  }
  0x18   :  { %813 = vmatpush1.bf16.msra.mxu0 %v1334_v23  ;;  %671 = vmatprep.subr.bf16.mxu1 %v1335_v24  ;;  %v1395_v2 = vld [vmem:[%s1867_s0] ss:$16 sps:$4 sm:$0xff]   ;;  %v1398_v3 = vld [vmem:[%s1867_s0 + $0x8] ss:$16 sps:$4 sm:$0xff]   ;;  %v1407_v8 = vld [vmem:[%s1867_s0 + $0x44] ss:$16 sps:$4 sm:$0xff]  }
  0x19   :  { %814 = vmatprep.subr.bf16.mxu0 %v1337_v25  ;;  %v1405_v6 = vld [vmem:[%s1867_s0 + $0x20] ss:$16 sps:$4 sm:$0xff]   ;;  %v1406_v7 = vld [vmem:[%s1867_s0 + $0x28] ss:$16 sps:$4 sm:$0xff]   ;;  %v1409_v9 = vld [vmem:[%s1867_s0 + $0x4c] ss:$16 sps:$4 sm:$0xff]  }
  0x1a   :  { %v1411_v10 = vld [vmem:[%s1867_s0 + $0x40] ss:$16 sps:$4 sm:$0xff]   ;;  %v1412_v11 = vld [vmem:[%s1867_s0 + $0x48] ss:$16 sps:$4 sm:$0xff]   ;;  %v1413_v12 = vld [vmem:[%s1867_s0 + $0x64] ss:$16 sps:$4 sm:$0xff]  }
  0x1b   :  { %672 = vmatpush1.bf16.msra.mxu1 %v1339_v26  ;;  %v1415_v13 = vld [vmem:[%s1867_s0 + $0x6c] ss:$16 sps:$4 sm:$0xff]   ;;  %v1417_v14 = vld [vmem:[%s1867_s0 + $0x60] ss:$16 sps:$4 sm:$0xff]   ;;  %v1418_v15 = vld [vmem:[%s1867_s0 + $0x68] ss:$16 sps:$4 sm:$0xff]  }
  0x1c   :  { %815 = vmatpush1.bf16.msra.mxu0 %v1340_v27  ;;  %673 = vmatprep.subr.bf16.mxu1 %v1341_v28  ;;  %v1419_v16 = vld [vmem:[%s1867_s0 + $0x84] ss:$16 sps:$4 sm:$0xff]   ;;  %v1421_v17 = vld [vmem:[%s1867_s0 + $0x8c] ss:$16 sps:$4 sm:$0xff]   ;;  %v1423_v18 = vld [vmem:[%s1867_s0 + $0x80] ss:$16 sps:$4 sm:$0xff]  }
  0x1d   :  { %816 = vmatprep.subr.bf16.mxu0 %v1343_v29  ;;  %v1424_v19 = vld [vmem:[%s1867_s0 + $0x88] ss:$16 sps:$4 sm:$0xff]   ;;  %v1425_v20 = vld [vmem:[%s1867_s0 + $0xa4] ss:$16 sps:$4 sm:$0xff]   ;;  %v1427_v21 = vld [vmem:[%s1867_s0 + $0xac] ss:$16 sps:$4 sm:$0xff]  }
  0x1e   :  { %v1429_v22 = vld [vmem:[%s1867_s0 + $0xa0] ss:$16 sps:$4 sm:$0xff]   ;;  %v1430_v23 = vld [vmem:[%s1867_s0 + $0xa8] ss:$16 sps:$4 sm:$0xff]   ;;  %v1431_v24 = vld [vmem:[%s1867_s0 + $0xc4] ss:$16 sps:$4 sm:$0xff]  }
  0x1f   :  { %674 = vmatpush1.bf16.msra.mxu1 %v1345_v30  ;;  %v1433_v25 = vld [vmem:[%s1867_s0 + $0xcc] ss:$16 sps:$4 sm:$0xff]   ;;  %v1435_v26 = vld [vmem:[%s1867_s0 + $0xc0] ss:$16 sps:$4 sm:$0xff]   ;;  %v1436_v27 = vld [vmem:[%s1867_s0 + $0xc8] ss:$16 sps:$4 sm:$0xff]  }
  0x20   :  { %817 = vmatpush1.bf16.msra.mxu0 %v1346_v31  ;;  %675 = vmatprep.subr.bf16.mxu1 %v1347_v32  ;;  %v1437_v28 = vld [vmem:[%s1867_s0 + $0xe4] ss:$16 sps:$4 sm:$0xff]   ;;  %v1439_v29 = vld [vmem:[%s1867_s0 + $0xec] ss:$16 sps:$4 sm:$0xff]   ;;  %v1441_v30 = vld [vmem:[%s1867_s0 + $0xe0] ss:$16 sps:$4 sm:$0xff]  }
  0x21   :  { %818 = vmatprep.subr.bf16.mxu0 %v1349_v33  ;;  %v1442_v31 = vld [vmem:[%s1867_s0 + $0xe8] ss:$16 sps:$4 sm:$0xff]   ;;  %v1443_v32 = vld [vmem:[%s1867_s0 + $0x104] ss:$16 sps:$4 sm:$0xff]   ;;  %v1445_v33 = vld [vmem:[%s1867_s0 + $0x10c] ss:$16 sps:$4 sm:$0xff]  }
  0x23   :  { %676 = vmatpush1.bf16.msra.mxu1 %v1351_v34  ;;  %v1447_v34 = vld [vmem:[%s1867_s0 + $0x100] ss:$16 sps:$4 sm:$0xff]  }
  0x24   :  { %819 = vmatpush1.bf16.msra.mxu0 %v1352_v35  ;;  %677 = vmatprep.subr.bf16.mxu1 %v1353_v36  ;;  %v1448_v35 = vld [vmem:[%s1867_s0 + $0x108] ss:$16 sps:$4 sm:$0xff]   ;;  %v1449_v36 = vld [vmem:[%s1867_s0 + $0x124] ss:$16 sps:$4 sm:$0xff]  }
  0x25   :  { %820 = vmatprep.subr.bf16.mxu0 %v1355_v37  ;;  %v1451_v37 = vld [vmem:[%s1867_s0 + $0x12c] ss:$16 sps:$4 sm:$0xff]  }
  0x27   :  { %678 = vmatpush1.bf16.msra.mxu1 %v1357_v38  ;;  %v1453_v38 = vld [vmem:[%s1867_s0 + $0x120] ss:$16 sps:$4 sm:$0xff]  }
  0x28   :  { %821 = vmatpush1.bf16.msra.mxu0 %v1358_v39  ;;  %679 = vmatprep.subr.bf16.mxu1 %v1359_v40  ;;  %v1454_v39 = vld [vmem:[%s1867_s0 + $0x128] ss:$16 sps:$4 sm:$0xff]   ;;  %v1455_v40 = vld [vmem:[%s1867_s0 + $0x144] ss:$16 sps:$4 sm:$0xff]  }
  0x29   :  { %822 = vmatprep.subr.bf16.mxu0 %v1361_v41  ;;  %v1457_v41 = vld [vmem:[%s1867_s0 + $0x14c] ss:$16 sps:$4 sm:$0xff]  }
  0x2b   :  { %680 = vmatpush1.bf16.msra.mxu1 %v1363_v42  ;;  %v1459_v42 = vld [vmem:[%s1867_s0 + $0x140] ss:$16 sps:$4 sm:$0xff]  }
  0x2c   :  { %823 = vmatpush1.bf16.msra.mxu0 %v1364_v43  ;;  %681 = vmatprep.subr.bf16.mxu1 %v1365_v44  ;;  %v1460_v43 = vld [vmem:[%s1867_s0 + $0x148] ss:$16 sps:$4 sm:$0xff]  }
  0x2d   :  { %824 = vmatprep.subr.bf16.mxu0 %v1367_v45 }
  0x2f   :  { %682 = vmatpush1.bf16.msra.mxu1 %v1369_v46 }
  0x30   :  { %825 = vmatpush1.bf16.msra.mxu0 %v1370_v47  ;;  %683 = vmatprep.subr.bf16.mxu1 %v1371_v48 }
  0x31   :  { %826 = vmatprep.subr.bf16.mxu0 %v1373_v50 }
  0x33   :  { %684 = vmatpush1.bf16.msra.mxu1 %v1375_v52 }
  0x34   :  { %827 = vmatpush1.bf16.msra.mxu0 %v1376_v53  ;;  %685 = vmatprep.subr.bf16.mxu1 %v1377_v54 }
  0x35   :  { %828 = vmatprep.subr.bf16.mxu0 %v1379_v55 }
  0x37   :  { %686 = vmatpush1.bf16.msra.mxu1 %v1381_v56 }
  0x38   :  { %829 = vmatpush1.bf16.msra.mxu0 %v1382_v57  ;;  %687 = vmatprep.subr.bf16.mxu1 %v1383_v58 }
  0x39   :  { %830 = vmatprep.subr.bf16.mxu0 %v1385_v59 }
  0x3b   :  { %688 = vmatpush1.bf16.msra.mxu1 %v1387_v60 }
  0x3c   :  { %831 = vmatpush1.bf16.msra.mxu0 %v1388_v61  ;;  %689 = vmatprep.subr.bf16.mxu1 %v1389_v62 }
  0x3d   :  { %832 = vmatprep.subr.bf16.mxu0 %v1391_v63 }
  0x3f   :  { %690 = vmatpush1.bf16.msra.mxu1 %v1393_v0 }
  0x40   :  { %833 = vmatpush1.bf16.msra.mxu0 %v1394_v1 }
  0x42   :  { %692 = vmatmul.mubr.bf16.vlgmr.msra.gmra.mrb[0].mxu1 %v1395_v2 }
  0x43   :  { %835 = vmatmul.mubr.bf16.vlgmr.msra.gmra.mrb[0].mxu0 %v1398_v3  ;;  %701 = vmatprep.mubr.bf16.mxu1 %v1401_v4 }
  0x44   :  { %844 = vmatprep.mubr.bf16.mxu0 %v1403_v5 }
  0x4a   :  { %702 = vmatmul.mubr.bf16.gmra.mrb[4].mxu1 %v1405_v6 }
  0x4b   :  { %845 = vmatmul.mubr.bf16.gmra.mrb[4].mxu0 %v1406_v7  ;;  %711 = vmatprep.mubr.bf16.mxu1 %v1407_v8 }
  0x4c   :  { %854 = vmatprep.mubr.bf16.mxu0 %v1409_v9 }
  0x52   :  { %712 = vmatmul.mubr.bf16.gmra.mrb[8].mxu1 %v1411_v10 }
  0x53   :  { %855 = vmatmul.mubr.bf16.gmra.mrb[8].mxu0 %v1412_v11  ;;  %721 = vmatprep.mubr.bf16.mxu1 %v1413_v12 }
  0x54   :  { %864 = vmatprep.mubr.bf16.mxu0 %v1415_v13 }
  0x5a   :  { %722 = vmatmul.mubr.bf16.gmra.mrb[12].mxu1 %v1417_v14 }
  0x5b   :  { %865 = vmatmul.mubr.bf16.gmra.mrb[12].mxu0 %v1418_v15  ;;  %731 = vmatprep.mubr.bf16.mxu1 %v1419_v16 }
  0x5c   :  { %874 = vmatprep.mubr.bf16.mxu0 %v1421_v17 }
  0x62   :  { %732 = vmatmul.mubr.bf16.gmra.mrb[16].mxu1 %v1423_v18 }
  0x63   :  { %875 = vmatmul.mubr.bf16.gmra.mrb[16].mxu0 %v1424_v19  ;;  %741 = vmatprep.mubr.bf16.mxu1 %v1425_v20 }
  0x64   :  { %884 = vmatprep.mubr.bf16.mxu0 %v1427_v21 }
  0x6a   :  { %742 = vmatmul.mubr.bf16.gmra.mrb[20].mxu1 %v1429_v22 }
  0x6b   :  { %885 = vmatmul.mubr.bf16.gmra.mrb[20].mxu0 %v1430_v23  ;;  %751 = vmatprep.mubr.bf16.mxu1 %v1431_v24 }
  0x6c   :  { %894 = vmatprep.mubr.bf16.mxu0 %v1433_v25 }
  0x72   :  { %752 = vmatmul.mubr.bf16.gmra.mrb[24].mxu1 %v1435_v26 }
  0x73   :  { %895 = vmatmul.mubr.bf16.gmra.mrb[24].mxu0 %v1436_v27  ;;  %761 = vmatprep.mubr.bf16.mxu1 %v1437_v28 }
  0x74   :  { %904 = vmatprep.mubr.bf16.mxu0 %v1439_v29 }
  0x7a   :  { %762 = vmatmul.mubr.bf16.gmra.mrb[28].mxu1 %v1441_v30 }
  0x7b   :  { %905 = vmatmul.mubr.bf16.gmra.mrb[28].mxu0 %v1442_v31  ;;  %771 = vmatprep.mubr.bf16.mxu1 %v1443_v32 }
  0x7c   :  { %914 = vmatprep.mubr.bf16.mxu0 %v1445_v33 }
  0x82   :  { %772 = vmatmul.mubr.bf16.gmra.mrb[32].mxu1 %v1447_v34 }
  0x83   :  { %915 = vmatmul.mubr.bf16.gmra.mrb[32].mxu0 %v1448_v35  ;;  %781 = vmatprep.mubr.bf16.mxu1 %v1449_v36 }
  0x84   :  { %924 = vmatprep.mubr.bf16.mxu0 %v1451_v37 }
  0x8a   :  { %782 = vmatmul.mubr.bf16.gmra.mrb[36].mxu1 %v1453_v38 }
  0x8b   :  { %925 = vmatmul.mubr.bf16.gmra.mrb[36].mxu0 %v1454_v39  ;;  %791 = vmatprep.mubr.bf16.mxu1 %v1455_v40 }
  0x8c   :  { %934 = vmatprep.mubr.bf16.mxu0 %v1457_v41 }
  0x92   :  { %792 = vmatmul.mubr.bf16.gmra.mrb[40].mxu1 %v1459_v42 }
  0x93   :  { %935 = vmatmul.mubr.bf16.gmra.mrb[40].mxu0 %v1460_v43 }
 0x115   :  { %v693_v44 = vpop.f32.mrb[0].mxu1 }
 0x116   :  { %v836_v45 = vpop.f32.mrb[0].mxu0  ;;  %v695_v47 = vpop.f32.mrb[1].mxu1 }
 0x117   :  { %v837_v46 = vadd.f32 %v836_v45, %v693_v44  ;;  %v838_v48 = vpop.f32.mrb[1].mxu0  ;;  %v697_v50 = vpop.f32.mrb[2].mxu1 }
 0x118   :  { %v839_v49 = vadd.f32 %v838_v48, %v695_v47  ;;  %v840_v51 = vpop.f32.mrb[2].mxu0  ;;  %v699_v53 = vpop.f32.mrb[3].mxu1 }
 0x119   :  { %v841_v52 = vadd.f32 %v840_v51, %v697_v50  ;;  %v842_v54 = vpop.f32.mrb[3].mxu0 }
 0x11a   :  { %v1233_v55 = vpack.c.bf16 %v839_v49, %v837_v46  ;;  %v843_v56 = vadd.f32 %v842_v54, %v699_v53 }
 0x11c   :  { %1077 = vst [vmem:[%s1868_s2] sm:$0xff] %v1233_v55  ;;  %v1234_v57 = vpack.c.bf16 %v843_v56, %v841_v52 }
 0x11d   :  { %v703_v58 = vpop.f32.mrb[4].mxu1 }
 0x11e   :  { %1078 = vst [vmem:[%s1868_s2 + $0x8] sm:$0xff] %v1234_v57  ;;  %v846_v59 = vpop.f32.mrb[4].mxu0  ;;  %v705_v61 = vpop.f32.mrb[5].mxu1 }
 0x11f   :  { %v847_v60 = vadd.f32 %v846_v59, %v703_v58  ;;  %v848_v62 = vpop.f32.mrb[5].mxu0  ;;  %v707_v0 = vpop.f32.mrb[6].mxu1 }
 0x120   :  { %v849_v63 = vadd.f32 %v848_v62, %v705_v61  ;;  %v850_v1 = vpop.f32.mrb[6].mxu0  ;;  %v709_v3 = vpop.f32.mrb[7].mxu1 }
 0x121   :  { %v851_v2 = vadd.f32 %v850_v1, %v707_v0  ;;  %v852_v4 = vpop.f32.mrb[7].mxu0 }
 0x122   :  { %v1235_v5 = vpack.c.bf16 %v849_v63, %v847_v60  ;;  %v853_v6 = vadd.f32 %v852_v4, %v709_v3 }
 0x124   :  { %1079 = vst [vmem:[%s1868_s2 + $0x10] sm:$0xff] %v1235_v5  ;;  %v1236_v7 = vpack.c.bf16 %v853_v6, %v851_v2 }
 0x125   :  { %v713_v8 = vpop.f32.mrb[8].mxu1 }
 0x126   :  { %1080 = vst [vmem:[%s1868_s2 + $0x18] sm:$0xff] %v1236_v7  ;;  %v856_v9 = vpop.f32.mrb[8].mxu0  ;;  %v715_v11 = vpop.f32.mrb[9].mxu1 }
 0x127   :  { %v857_v10 = vadd.f32 %v856_v9, %v713_v8  ;;  %v858_v12 = vpop.f32.mrb[9].mxu0  ;;  %v717_v14 = vpop.f32.mrb[10].mxu1 }
 0x128   :  { %v859_v13 = vadd.f32 %v858_v12, %v715_v11  ;;  %v860_v15 = vpop.f32.mrb[10].mxu0  ;;  %v719_v17 = vpop.f32.mrb[11].mxu1 }
 0x129   :  { %v861_v16 = vadd.f32 %v860_v15, %v717_v14  ;;  %v862_v18 = vpop.f32.mrb[11].mxu0 }
 0x12a   :  { %v1237_v19 = vpack.c.bf16 %v859_v13, %v857_v10  ;;  %v863_v20 = vadd.f32 %v862_v18, %v719_v17 }
 0x12c   :  { %1081 = vst [vmem:[%s1868_s2 + $0x20] sm:$0xff] %v1237_v19  ;;  %v1238_v21 = vpack.c.bf16 %v863_v20, %v861_v16 }
 0x12d   :  { %v723_v22 = vpop.f32.mrb[12].mxu1 }
 0x12e   :  { %1082 = vst [vmem:[%s1868_s2 + $0x28] sm:$0xff] %v1238_v21  ;;  %v866_v23 = vpop.f32.mrb[12].mxu0  ;;  %v725_v25 = vpop.f32.mrb[13].mxu1 }
 0x12f   :  { %v867_v24 = vadd.f32 %v866_v23, %v723_v22  ;;  %v868_v26 = vpop.f32.mrb[13].mxu0  ;;  %v727_v28 = vpop.f32.mrb[14].mxu1 }
 0x130   :  { %v869_v27 = vadd.f32 %v868_v26, %v725_v25  ;;  %v870_v29 = vpop.f32.mrb[14].mxu0  ;;  %v729_v31 = vpop.f32.mrb[15].mxu1 }
 0x131   :  { %v871_v30 = vadd.f32 %v870_v29, %v727_v28  ;;  %v872_v32 = vpop.f32.mrb[15].mxu0 }
 0x132   :  { %v1239_v33 = vpack.c.bf16 %v869_v27, %v867_v24  ;;  %v873_v34 = vadd.f32 %v872_v32, %v729_v31 }
 0x134   :  { %1083 = vst [vmem:[%s1868_s2 + $0x30] sm:$0xff] %v1239_v33  ;;  %v1240_v35 = vpack.c.bf16 %v873_v34, %v871_v30 }
 0x135   :  { %v733_v36 = vpop.f32.mrb[16].mxu1 }
 0x136   :  { %1084 = vst [vmem:[%s1868_s2 + $0x38] sm:$0xff] %v1240_v35  ;;  %v876_v37 = vpop.f32.mrb[16].mxu0  ;;  %v735_v39 = vpop.f32.mrb[17].mxu1 }
 0x137   :  { %v877_v38 = vadd.f32 %v876_v37, %v733_v36  ;;  %v878_v40 = vpop.f32.mrb[17].mxu0  ;;  %v737_v42 = vpop.f32.mrb[18].mxu1 }
 0x138   :  { %v879_v41 = vadd.f32 %v878_v40, %v735_v39  ;;  %v880_v43 = vpop.f32.mrb[18].mxu0  ;;  %v739_v45 = vpop.f32.mrb[19].mxu1 }
 0x139   :  { %v881_v44 = vadd.f32 %v880_v43, %v737_v42  ;;  %v882_v46 = vpop.f32.mrb[19].mxu0 }
 0x13a   :  { %v1241_v47 = vpack.c.bf16 %v879_v41, %v877_v38  ;;  %v883_v48 = vadd.f32 %v882_v46, %v739_v45 }
 0x13c   :  { %1085 = vst [vmem:[%s1868_s2 + $0x40] sm:$0xff] %v1241_v47  ;;  %v1242_v49 = vpack.c.bf16 %v883_v48, %v881_v44 }
 0x13d   :  { %v743_v50 = vpop.f32.mrb[20].mxu1 }
 0x13e   :  { %1086 = vst [vmem:[%s1868_s2 + $0x48] sm:$0xff] %v1242_v49  ;;  %v886_v51 = vpop.f32.mrb[20].mxu0  ;;  %v745_v53 = vpop.f32.mrb[21].mxu1 }
 0x13f   :  { %v887_v52 = vadd.f32 %v886_v51, %v743_v50  ;;  %v888_v54 = vpop.f32.mrb[21].mxu0  ;;  %v747_v56 = vpop.f32.mrb[22].mxu1 }
 0x140   :  { %v889_v55 = vadd.f32 %v888_v54, %v745_v53  ;;  %v890_v57 = vpop.f32.mrb[22].mxu0  ;;  %v749_v59 = vpop.f32.mrb[23].mxu1 }
 0x141   :  { %v891_v58 = vadd.f32 %v890_v57, %v747_v56  ;;  %v892_v60 = vpop.f32.mrb[23].mxu0 }
 0x142   :  { %v1243_v61 = vpack.c.bf16 %v889_v55, %v887_v52  ;;  %v893_v62 = vadd.f32 %v892_v60, %v749_v59 }
 0x144   :  { %1087 = vst [vmem:[%s1868_s2 + $0x50] sm:$0xff] %v1243_v61  ;;  %v1244_v63 = vpack.c.bf16 %v893_v62, %v891_v58 }
 0x145   :  { %v753_v0 = vpop.f32.mrb[24].mxu1 }
 0x146   :  { %1088 = vst [vmem:[%s1868_s2 + $0x58] sm:$0xff] %v1244_v63  ;;  %v896_v1 = vpop.f32.mrb[24].mxu0  ;;  %v755_v3 = vpop.f32.mrb[25].mxu1 }
 0x147   :  { %v897_v2 = vadd.f32 %v896_v1, %v753_v0  ;;  %v898_v4 = vpop.f32.mrb[25].mxu0  ;;  %v757_v6 = vpop.f32.mrb[26].mxu1 }
 0x148   :  { %v899_v5 = vadd.f32 %v898_v4, %v755_v3  ;;  %v900_v7 = vpop.f32.mrb[26].mxu0  ;;  %v759_v9 = vpop.f32.mrb[27].mxu1 }
 0x149   :  { %v901_v8 = vadd.f32 %v900_v7, %v757_v6  ;;  %v902_v10 = vpop.f32.mrb[27].mxu0 }
 0x14a   :  { %v1245_v11 = vpack.c.bf16 %v899_v5, %v897_v2  ;;  %v903_v12 = vadd.f32 %v902_v10, %v759_v9 }
 0x14c   :  { %1089 = vst [vmem:[%s1868_s2 + $0x60] sm:$0xff] %v1245_v11  ;;  %v1246_v13 = vpack.c.bf16 %v903_v12, %v901_v8 }
 0x14d   :  { %v763_v14 = vpop.f32.mrb[28].mxu1 }
 0x14e   :  { %1090 = vst [vmem:[%s1868_s2 + $0x68] sm:$0xff] %v1246_v13  ;;  %v906_v15 = vpop.f32.mrb[28].mxu0  ;;  %v765_v17 = vpop.f32.mrb[29].mxu1 }
 0x14f   :  { %v907_v16 = vadd.f32 %v906_v15, %v763_v14  ;;  %v908_v18 = vpop.f32.mrb[29].mxu0  ;;  %v767_v20 = vpop.f32.mrb[30].mxu1 }
 0x150   :  { %v909_v19 = vadd.f32 %v908_v18, %v765_v17  ;;  %v910_v21 = vpop.f32.mrb[30].mxu0  ;;  %v769_v23 = vpop.f32.mrb[31].mxu1 }
 0x151   :  { %v911_v22 = vadd.f32 %v910_v21, %v767_v20  ;;  %v912_v24 = vpop.f32.mrb[31].mxu0 }
 0x152   :  { %v1247_v25 = vpack.c.bf16 %v909_v19, %v907_v16  ;;  %v913_v26 = vadd.f32 %v912_v24, %v769_v23 }
 0x154   :  { %1091 = vst [vmem:[%s1868_s2 + $0x70] sm:$0xff] %v1247_v25  ;;  %v1248_v27 = vpack.c.bf16 %v913_v26, %v911_v22 }
 0x155   :  { %v773_v28 = vpop.f32.mrb[32].mxu1 }
 0x156   :  { %1092 = vst [vmem:[%s1868_s2 + $0x78] sm:$0xff] %v1248_v27  ;;  %v916_v29 = vpop.f32.mrb[32].mxu0  ;;  %v775_v31 = vpop.f32.mrb[33].mxu1 }
 0x157   :  { %v917_v30 = vadd.f32 %v916_v29, %v773_v28  ;;  %v918_v32 = vpop.f32.mrb[33].mxu0  ;;  %v777_v34 = vpop.f32.mrb[34].mxu1 }
 0x158   :  { %v919_v33 = vadd.f32 %v918_v32, %v775_v31  ;;  %v920_v35 = vpop.f32.mrb[34].mxu0  ;;  %v779_v37 = vpop.f32.mrb[35].mxu1 }
 0x159   :  { %v921_v36 = vadd.f32 %v920_v35, %v777_v34  ;;  %v922_v38 = vpop.f32.mrb[35].mxu0 }
 0x15a   :  { %v1249_v39 = vpack.c.bf16 %v919_v33, %v917_v30  ;;  %v923_v40 = vadd.f32 %v922_v38, %v779_v37 }
 0x15c   :  { %1093 = vst [vmem:[%s1868_s2 + $0x80] sm:$0xff] %v1249_v39  ;;  %v1250_v41 = vpack.c.bf16 %v923_v40, %v921_v36 }
 0x15d   :  { %v783_v42 = vpop.f32.mrb[36].mxu1 }
 0x15e   :  { %1094 = vst [vmem:[%s1868_s2 + $0x88] sm:$0xff] %v1250_v41  ;;  %v926_v43 = vpop.f32.mrb[36].mxu0  ;;  %v785_v45 = vpop.f32.mrb[37].mxu1 }
 0x15f   :  { %v927_v44 = vadd.f32 %v926_v43, %v783_v42  ;;  %v928_v46 = vpop.f32.mrb[37].mxu0  ;;  %v787_v48 = vpop.f32.mrb[38].mxu1 }
 0x160   :  { %v929_v47 = vadd.f32 %v928_v46, %v785_v45  ;;  %v930_v49 = vpop.f32.mrb[38].mxu0  ;;  %v789_v51 = vpop.f32.mrb[39].mxu1 }
 0x161   :  { %v931_v50 = vadd.f32 %v930_v49, %v787_v48  ;;  %v932_v52 = vpop.f32.mrb[39].mxu0 }
 0x162   :  { %v1251_v53 = vpack.c.bf16 %v929_v47, %v927_v44  ;;  %v933_v54 = vadd.f32 %v932_v52, %v789_v51 }
 0x164   :  { %1095 = vst [vmem:[%s1868_s2 + $0x90] sm:$0xff] %v1251_v53  ;;  %v1252_v55 = vpack.c.bf16 %v933_v54, %v931_v50 }
 0x165   :  { %v793_v56 = vpop.f32.mrb[40].mxu1 }
 0x166   :  { %1096 = vst [vmem:[%s1868_s2 + $0x98] sm:$0xff] %v1252_v55  ;;  %v936_v57 = vpop.f32.mrb[40].mxu0  ;;  %v795_v59 = vpop.f32.mrb[41].mxu1 }
 0x167   :  { %v937_v58 = vadd.f32 %v936_v57, %v793_v56  ;;  %v938_v60 = vpop.f32.mrb[41].mxu0  ;;  %v797_v62 = vpop.f32.mrb[42].mxu1 }
 0x168   :  { %v939_v61 = vadd.f32 %v938_v60, %v795_v59  ;;  %v940_v63 = vpop.f32.mrb[42].mxu0  ;;  %v799_v1 = vpop.f32.mrb[43].mxu1 }
 0x169   :  { %v941_v0 = vadd.f32 %v940_v63, %v797_v62  ;;  %v942_v2 = vpop.f32.mrb[43].mxu0 }
 0x16a   :  { %v1253_v3 = vpack.c.bf16 %v939_v61, %v937_v58  ;;  %v943_v4 = vadd.f32 %v942_v2, %v799_v1 }
 0x16c   :  { %1097 = vst [vmem:[%s1868_s2 + $0xa0] sm:$0xff] %v1253_v3  ;;  %v1254_v5 = vpack.c.bf16 %v943_v4, %v941_v0 }
 0x16e   :  { %1098 = vst [vmem:[%s1868_s2 + $0xa8] sm:$0xff] %v1254_v5 }

// kernel: mnist_generator_forward.12
= control target key start
LH: loop header
LB: loop body
LE: loop exit
PB: predicated region body
PF: predicated region fallthrough
CT: control target
= control target key end

     0   :  { %vm142_vm0 = vcmask 523264   ;;  %vm1005_vm1 = vcmask 519168   ;;  %s2772_s0 = inlined_call_operand.vmem [shape: bf16[512,64], index: 0, kind: input, shape index: {}]   ;;  %s2773_s1 = inlined_call_operand.vmem [shape: f32[1,64], index: 1, kind: input, shape index: {}]   ;;  %s2774_s2 = inlined_call_operand.vmem [shape: f32[1,64], index: 2, kind: input, shape index: {}]   ;;  %s2775_s3 = inlined_call_operand.vmem [shape: bf16[512,64], index: 3, kind: output, shape index: {}]  }
   0x1   :  { %v1387_v0 = vld [vmem:[%s2772_s0] sm:$0xff]   ;;  %v1392_v1 = vld [vmem:[%s2772_s0 + $0x8] sm:$0xff]   ;;  %v1400_v5 = vld [vmem:[%s2772_s0 + $0x10] sm:$0xff]  }
   0x2   :  { %v1205_v2 = vunpack.c.l.bf16 %v1387_v0  ;;  %v1206_v3 = vunpack.c.h.bf16 %v1387_v0  ;;  %v1209_v4 = vunpack.c.l.bf16 %v1392_v1  ;;  %v1210_v6 = vunpack.c.h.bf16 %v1392_v1  ;;  %v1416_v11 = vld [vmem:[%s2772_s0 + $0x18] sm:$0xff]   ;;  %v1429_v18 = vld [vmem:[%s2772_s0 + $0x20] sm:$0xff]   ;;  %v1442_v25 = vld [vmem:[%s2772_s0 + $0x28] sm:$0xff]  }
   0x3   :  { %v1213_v7 = vunpack.c.l.bf16 %v1400_v5  ;;  %v1214_v13 = vunpack.c.h.bf16 %v1400_v5  ;;  %v1217_v16 = vunpack.c.l.bf16 %v1416_v11  ;;  %v1218_v20 = vunpack.c.h.bf16 %v1416_v11  ;;  %v1455_v32 = vld [vmem:[%s2772_s0 + $0x30] sm:$0xff]   ;;  %v1468_v39 = vld [vmem:[%s2772_s0 + $0x38] sm:$0xff]   ;;  %v1481_v46 = vld [vmem:[%s2772_s0 + $0x40] sm:$0xff]  }
   0x4   :  { %v143_v8 = vsel %vm142_vm0, %v1205_v2, 0.0  ;;  %v144_v9 = vsel %vm142_vm0, %v1206_v3, 0.0  ;;  %v146_v10 = vsel %vm142_vm0, %v1209_v4, 0.0  ;;  %v148_v14 = vsel %vm142_vm0, %v1210_v6, 0.0  ;;  %v1494_v53 = vld [vmem:[%s2772_s0 + $0x48] sm:$0xff]   ;;  %v1507_v60 = vld [vmem:[%s2772_s0 + $0x50] sm:$0xff]  }
   0x5   :  { %v145_v12 = vadd.f32 %v144_v9, %v143_v8  ;;  %v150_v17 = vsel %vm142_vm0, %v1213_v7, 0.0  ;;  %v152_v21 = vsel %vm142_vm0, %v1214_v13, 0.0  ;;  %v1221_v23 = vunpack.c.l.bf16 %v1429_v18 }
   0x6   :  { %v154_v24 = vsel %vm142_vm0, %v1217_v16, 0.0  ;;  %v1222_v27 = vunpack.c.h.bf16 %v1429_v18  ;;  %v156_v28 = vsel %vm142_vm0, %v1218_v20, 0.0  ;;  %v1225_v30 = vunpack.c.l.bf16 %v1442_v25 }
   0x7   :  { %v147_v15 = vadd.f32 %v146_v10, %v145_v12  ;;  %v158_v31 = vsel %vm142_vm0, %v1221_v23, 0.0  ;;  %v1226_v34 = vunpack.c.h.bf16 %v1442_v25  ;;  %v1229_v37 = vunpack.c.l.bf16 %v1455_v32  ;;  %v1520_v12 = vld [vmem:[%s2772_s0 + $0x58] sm:$0xff]  }
   0x8   :  { %v160_v35 = vsel %vm142_vm0, %v1222_v27, 0.0  ;;  %v162_v38 = vsel %vm142_vm0, %v1225_v30, 0.0  ;;  %v1230_v41 = vunpack.c.h.bf16 %v1455_v32  ;;  %v1233_v44 = vunpack.c.l.bf16 %v1468_v39 }
   0x9   :  { %v149_v19 = vadd.f32 %v148_v14, %v147_v15  ;;  %v164_v42 = vsel %vm142_vm0, %v1226_v34, 0.0  ;;  %v166_v45 = vsel %vm142_vm0, %v1229_v37, 0.0  ;;  %v1234_v48 = vunpack.c.h.bf16 %v1468_v39 }
   0xa   :  { %v168_v49 = vsel %vm142_vm0, %v1230_v41, 0.0  ;;  %v2820_v51 = vunpack.c.l.bf16 %v1481_v46  ;;  %v170_v52 = vsel %vm142_vm0, %v1233_v44, 0.0  ;;  %v2819_v55 = vunpack.c.h.bf16 %v1481_v46 }
   0xb   :  { %v151_v22 = vadd.f32 %v150_v17, %v149_v19  ;;  %v172_v56 = vsel %vm142_vm0, %v1234_v48, 0.0  ;;  %v2818_v58 = vunpack.c.l.bf16 %v1494_v53  ;;  %v2814_v62 = vunpack.c.h.bf16 %v1494_v53 }
   0xc   :  { %v174_v59 = vsel %vm142_vm0, %v2820_v51, 0.0  ;;  %v176_v63 = vsel %vm142_vm0, %v2819_v55, 0.0  ;;  %v2812_v9 = vunpack.c.l.bf16 %v1507_v60  ;;  %v2809_v15 = vunpack.c.h.bf16 %v1507_v60 }
   0xd   :  { %v153_v26 = vadd.f32 %v152_v21, %v151_v22  ;;  %v178_v10 = vsel %vm142_vm0, %v2818_v58, 0.0  ;;  %v180_v17 = vsel %vm142_vm0, %v2814_v62, 0.0  ;;  %v2806_v21 = vunpack.c.l.bf16 %v1520_v12 }
   0xe   :  { %v182_v22 = vsel %vm142_vm0, %v2812_v9, 0.0  ;;  %v2847_v39 = vunpack.c.h.bf16 %v1481_v46 }
   0xf   :  { %v155_v29 = vadd.f32 %v154_v24, %v153_v26  ;;  %v1533_v24 = vld [vmem:[%s2772_s0 + $0x60] sm:$0xff]  }
  0x11   :  { %v157_v33 = vadd.f32 %v156_v28, %v155_v29  ;;  %v2803_v28 = vunpack.c.h.bf16 %v1520_v12  ;;  %v184_v29 = vsel %vm142_vm0, %v2809_v15, 0.0 }
  0x13   :  { %v159_v36 = vadd.f32 %v158_v31, %v157_v33  ;;  %v2800_v33 = vunpack.c.l.bf16 %v1533_v24 }
  0x15   :  { %v161_v40 = vadd.f32 %v160_v35, %v159_v36  ;;  %v186_v35 = vsel %vm142_vm0, %v2806_v21, 0.0  ;;  %v1546_v36 = vld [vmem:[%s2772_s0 + $0x68] sm:$0xff]  }
  0x17   :  { %v163_v43 = vadd.f32 %v162_v38, %v161_v40  ;;  %v2797_v40 = vunpack.c.h.bf16 %v1533_v24 }
  0x19   :  { %v165_v47 = vadd.f32 %v164_v42, %v163_v43  ;;  %v188_v42 = vsel %vm142_vm0, %v2803_v28, 0.0 }
  0x1b   :  { %v167_v50 = vadd.f32 %v166_v45, %v165_v47  ;;  %v2794_v45 = vunpack.c.l.bf16 %v1546_v36  ;;  %v190_v47 = vsel %vm142_vm0, %v2800_v33, 0.0 }
  0x1d   :  { %v169_v54 = vadd.f32 %v168_v49, %v167_v50  ;;  %v1559_v49 = vld [vmem:[%s2772_s0 + $0x70] sm:$0xff]  }
  0x1f   :  { %v171_v57 = vadd.f32 %v170_v52, %v169_v54  ;;  %v2791_v52 = vunpack.c.h.bf16 %v1546_v36  ;;  %v192_v54 = vsel %vm142_vm0, %v2797_v40, 0.0 }
  0x21   :  { %v173_v61 = vadd.f32 %v172_v56, %v171_v57  ;;  %v2788_v57 = vunpack.c.l.bf16 %v1559_v49 }
  0x23   :  { %v175_v8 = vadd.f32 %v174_v59, %v173_v61  ;;  %v194_v59 = vsel %vm142_vm0, %v2794_v45, 0.0  ;;  %v1572_v61 = vld [vmem:[%s2772_s0 + $0x78] sm:$0xff]  }
  0x25   :  { %v177_v14 = vadd.f32 %v176_v63, %v175_v8  ;;  %v2785_v8 = vunpack.c.h.bf16 %v1559_v49 }
  0x27   :  { %v179_v19 = vadd.f32 %v178_v10, %v177_v14  ;;  %v196_v10 = vsel %vm142_vm0, %v2791_v52, 0.0 }
  0x29   :  { %v181_v26 = vadd.f32 %v180_v17, %v179_v19  ;;  %v2782_v17 = vunpack.c.l.bf16 %v1572_v61  ;;  %v198_v19 = vsel %vm142_vm0, %v2788_v57, 0.0 }
  0x2b   :  { %v183_v31 = vadd.f32 %v182_v22, %v181_v26  ;;  %v1585_v22 = vld [vmem:[%s2772_s0 + $0x80] sm:$0xff]  }
  0x2d   :  { %v185_v38 = vadd.f32 %v184_v29, %v183_v31  ;;  %v2779_v29 = vunpack.c.h.bf16 %v1572_v61  ;;  %v200_v31 = vsel %vm142_vm0, %v2785_v8, 0.0 }
  0x2f   :  { %v187_v43 = vadd.f32 %v186_v35, %v185_v38  ;;  %v2776_v38 = vunpack.c.l.bf16 %v1585_v22 }
  0x31   :  { %v189_v50 = vadd.f32 %v188_v42, %v187_v43  ;;  %v202_v42 = vsel %vm142_vm0, %v2782_v17, 0.0  ;;  %v1598_v43 = vld [vmem:[%s2772_s0 + $0x88] sm:$0xff]  }
  0x33   :  { %v191_v56 = vadd.f32 %v190_v47, %v189_v50  ;;  %v2777_v50 = vunpack.c.h.bf16 %v1585_v22 }
  0x35   :  { %v193_v63 = vadd.f32 %v192_v54, %v191_v56  ;;  %v204_v54 = vsel %vm142_vm0, %v2779_v29, 0.0 }
  0x37   :  { %v195_v14 = vadd.f32 %v194_v59, %v193_v63  ;;  %v2778_v59 = vunpack.c.l.bf16 %v1598_v43  ;;  %v206_v63 = vsel %vm142_vm0, %v2776_v38, 0.0 }
  0x39   :  { %v197_v26 = vadd.f32 %v196_v10, %v195_v14  ;;  %v1611_v10 = vld [vmem:[%s2772_s0 + $0x90] sm:$0xff]  }
  0x3b   :  { %v199_v35 = vadd.f32 %v198_v19, %v197_v26  ;;  %v2780_v19 = vunpack.c.h.bf16 %v1598_v43  ;;  %v208_v26 = vsel %vm142_vm0, %v2777_v50, 0.0 }
  0x3d   :  { %v201_v47 = vadd.f32 %v200_v31, %v199_v35  ;;  %v2781_v35 = vunpack.c.l.bf16 %v1611_v10 }
  0x3f   :  { %v203_v56 = vadd.f32 %v202_v42, %v201_v47  ;;  %v210_v42 = vsel %vm142_vm0, %v2778_v59, 0.0  ;;  %v1624_v47 = vld [vmem:[%s2772_s0 + $0x98] sm:$0xff]   ;;  %v1637_v59 = vld [vmem:[%s2772_s0 + $0xa0] sm:$0xff]  }
  0x41   :  { %v205_v14 = vadd.f32 %v204_v54, %v203_v56  ;;  %v2783_v54 = vunpack.c.h.bf16 %v1611_v10  ;;  %v212_v56 = vsel %vm142_vm0, %v2780_v19, 0.0 }
  0x43   :  { %v207_v31 = vadd.f32 %v206_v63, %v205_v14  ;;  %v2784_v63 = vunpack.c.l.bf16 %v1624_v47  ;;  %v214_v14 = vsel %vm142_vm0, %v2781_v35, 0.0  ;;  %v1650_v35 = vld [vmem:[%s2772_s0 + $0xa8] sm:$0xff]  }
  0x45   :  { %v209_v38 = vadd.f32 %v208_v26, %v207_v31  ;;  %v2786_v26 = vunpack.c.h.bf16 %v1624_v47  ;;  %v216_v31 = vsel %vm142_vm0, %v2783_v54, 0.0 }
  0x47   :  { %v211_v50 = vadd.f32 %v210_v42, %v209_v38  ;;  %v2787_v38 = vunpack.c.l.bf16 %v1637_v59  ;;  %v218_v42 = vsel %vm142_vm0, %v2784_v63, 0.0  ;;  %v1663_v63 = vld [vmem:[%s2772_s0 + $0xb0] sm:$0xff]  }
  0x49   :  { %v213_v29 = vadd.f32 %v212_v56, %v211_v50  ;;  %v2789_v50 = vunpack.c.h.bf16 %v1637_v59  ;;  %v220_v56 = vsel %vm142_vm0, %v2786_v26, 0.0 }
  0x4b   :  { %v215_v19 = vadd.f32 %v214_v14, %v213_v29  ;;  %v2790_v29 = vunpack.c.l.bf16 %v1650_v35  ;;  %v222_v14 = vsel %vm142_vm0, %v2787_v38, 0.0  ;;  %v1676_v38 = vld [vmem:[%s2772_s0 + $0xb8] sm:$0xff]  }
  0x4d   :  { %v217_v17 = vadd.f32 %v216_v31, %v215_v19  ;;  %v2792_v19 = vunpack.c.h.bf16 %v1650_v35  ;;  %v224_v31 = vsel %vm142_vm0, %v2789_v50, 0.0 }
  0x4f   :  { %v219_v54 = vadd.f32 %v218_v42, %v217_v17  ;;  %v2793_v17 = vunpack.c.l.bf16 %v1663_v63  ;;  %v226_v42 = vsel %vm142_vm0, %v2790_v29, 0.0  ;;  %v1689_v29 = vld [vmem:[%s2772_s0 + $0xc0] sm:$0xff]  }
  0x51   :  { %v221_v8 = vadd.f32 %v220_v56, %v219_v54  ;;  %v2795_v54 = vunpack.c.h.bf16 %v1663_v63  ;;  %v228_v56 = vsel %vm142_vm0, %v2792_v19, 0.0 }
  0x53   :  { %v223_v26 = vadd.f32 %v222_v14, %v221_v8  ;;  %v2796_v8 = vunpack.c.l.bf16 %v1676_v38  ;;  %v230_v14 = vsel %vm142_vm0, %v2793_v17, 0.0  ;;  %v1702_v17 = vld [vmem:[%s2772_s0 + $0xc8] sm:$0xff]  }
  0x55   :  { %v225_v57 = vadd.f32 %v224_v31, %v223_v26  ;;  %v2798_v26 = vunpack.c.h.bf16 %v1676_v38  ;;  %v232_v31 = vsel %vm142_vm0, %v2795_v54, 0.0 }
  0x57   :  { %v227_v50 = vadd.f32 %v226_v42, %v225_v57  ;;  %v2799_v57 = vunpack.c.l.bf16 %v1689_v29  ;;  %v234_v42 = vsel %vm142_vm0, %v2796_v8, 0.0  ;;  %v1715_v8 = vld [vmem:[%s2772_s0 + $0xd0] sm:$0xff]  }
  0x59   :  { %v229_v52 = vadd.f32 %v228_v56, %v227_v50  ;;  %v2801_v50 = vunpack.c.h.bf16 %v1689_v29  ;;  %v236_v56 = vsel %vm142_vm0, %v2798_v26, 0.0 }
  0x5b   :  { %v231_v19 = vadd.f32 %v230_v14, %v229_v52  ;;  %v2802_v52 = vunpack.c.l.bf16 %v1702_v17  ;;  %v238_v14 = vsel %vm142_vm0, %v2799_v57, 0.0  ;;  %v1728_v57 = vld [vmem:[%s2772_s0 + $0xd8] sm:$0xff]  }
  0x5d   :  { %v233_v45 = vadd.f32 %v232_v31, %v231_v19  ;;  %v2804_v19 = vunpack.c.h.bf16 %v1702_v17  ;;  %v240_v31 = vsel %vm142_vm0, %v2801_v50, 0.0 }
  0x5f   :  { %v235_v54 = vadd.f32 %v234_v42, %v233_v45  ;;  %v2805_v45 = vunpack.c.l.bf16 %v1715_v8  ;;  %v242_v42 = vsel %vm142_vm0, %v2802_v52, 0.0  ;;  %v1741_v52 = vld [vmem:[%s2772_s0 + $0xe0] sm:$0xff]  }
  0x61   :  { %v237_v40 = vadd.f32 %v236_v56, %v235_v54  ;;  %v2807_v54 = vunpack.c.h.bf16 %v1715_v8  ;;  %v244_v56 = vsel %vm142_vm0, %v2804_v19, 0.0 }
  0x63   :  { %v239_v26 = vadd.f32 %v238_v14, %v237_v40  ;;  %v2808_v40 = vunpack.c.l.bf16 %v1728_v57  ;;  %v246_v14 = vsel %vm142_vm0, %v2805_v45, 0.0  ;;  %v1754_v45 = vld [vmem:[%s2772_s0 + $0xe8] sm:$0xff]  }
  0x64   :  { %v2816_v15 = vunpack.c.h.bf16 %v1754_v45 }
  0x65   :  { %v241_v33 = vadd.f32 %v240_v31, %v239_v26  ;;  %v2810_v26 = vunpack.c.h.bf16 %v1728_v57  ;;  %v248_v31 = vsel %vm142_vm0, %v2807_v54, 0.0 }
  0x67   :  { %v243_v50 = vadd.f32 %v242_v42, %v241_v33  ;;  %v2811_v33 = vunpack.c.l.bf16 %v1741_v52  ;;  %v250_v42 = vsel %vm142_vm0, %v2808_v40, 0.0 }
  0x69   :  { %v245_v28 = vadd.f32 %v244_v56, %v243_v50  ;;  %v2813_v50 = vunpack.c.h.bf16 %v1741_v52  ;;  %v252_v56 = vsel %vm142_vm0, %v2810_v26, 0.0 }
  0x6b   :  { %v247_v19 = vadd.f32 %v246_v14, %v245_v28  ;;  %v2817_v28 = vunpack.c.l.bf16 %v1754_v45  ;;  %v254_v14 = vsel %vm142_vm0, %v2811_v33, 0.0 }
  0x6d   :  { %v249_v21 = vadd.f32 %v248_v31, %v247_v19  ;;  %v256_v19 = vsel %vm142_vm0, %v2813_v50, 0.0  ;;  %v1771_v31 = vld [vmem:[%s2772_s0 + $0xf0] sm:$0xff]  }
  0x6e   :  { %v2815_v33 = vunpack.c.l.bf16 %v1771_v31  ;;  %v2821_v50 = vunpack.c.h.bf16 %v1771_v31 }
  0x6f   :  { %v251_v54 = vadd.f32 %v250_v42, %v249_v21  ;;  %v258_v21 = vsel %vm142_vm0, %v2817_v28, 0.0 }
  0x70   :  { %v262_v62 = vsel %vm142_vm0, %v2815_v33, 0.0 }
  0x71   :  { %v253_v40 = vadd.f32 %v252_v56, %v251_v54  ;;  %v260_v54 = vsel %vm142_vm0, %v2816_v15, 0.0 }
  0x73   :  { %v255_v26 = vadd.f32 %v254_v14, %v253_v40  ;;  %v1787_v40 = vld [vmem:[%s2772_s0 + $0xf8] sm:$0xff]  }
  0x74   :  { %v2823_v14 = vunpack.c.l.bf16 %v1787_v40 }
  0x75   :  { %v257_v42 = vadd.f32 %v256_v19, %v255_v26  ;;  %v264_v19 = vsel %vm142_vm0, %v2821_v50, 0.0 }
  0x77   :  { %v259_v56 = vadd.f32 %v258_v21, %v257_v42  ;;  %v2822_v42 = vunpack.c.h.bf16 %v1787_v40 }
  0x79   :  { %v261_v9 = vadd.f32 %v260_v54, %v259_v56  ;;  %v266_v54 = vsel %vm142_vm0, %v2823_v14, 0.0  ;;  %v268_v33 = vsel %vm142_vm0, %v2822_v42, 0.0 }
  0x7b   :  { %v263_v26 = vadd.f32 %v262_v62, %v261_v9 }
  0x7d   :  { %v265_v21 = vadd.f32 %v264_v19, %v263_v26 }
  0x7f   :  { %v267_v56 = vadd.f32 %v266_v54, %v265_v21 }
  0x81   :  { %v269_v15 = vadd.f32 %v268_v33, %v267_v56 }
  0x83   :  { %v270_v62 = vrot.slane %v269_v15, 4 }
  0x85   :  { %v271_v9 = vadd.f32 %v270_v62, %v269_v15 }
  0x87   :  { %v272_v28 = vrot.slane %v271_v9, 2 }
  0x89   :  { %v273_v58 = vadd.f32 %v272_v28, %v271_v9 }
  0x8b   :  { %v274_v55 = vrot.slane %v273_v58, 1 }
  0x8d   :  { %v275_v51 = vadd.f32 %v274_v55, %v273_v58 }
  0x8f   :  { %v1800_v50 = vmul.f32 0.001953125, %v275_v51 }
  0x91   :  { %v1805_v26 = vsub.f32 %v1205_v2, %v1800_v50  ;;  %v1810_v19 = vsub.f32 %v1206_v3, %v1800_v50  ;;  %v1815_v15 = vsub.f32 %v1209_v4, %v1800_v50  ;;  %v1820_v51 = vsub.f32 %v1210_v6, %v1800_v50 }
  0x92   :  { %v1825_v2 = vsub.f32 %v1213_v7, %v1800_v50  ;;  %v1836_v1 = vsub.f32 %v1214_v13, %v1800_v50  ;;  %v1843_v7 = vsub.f32 %v1217_v16, %v1800_v50  ;;  %v1853_v13 = vsub.f32 %v1218_v20, %v1800_v50 }
  0x93   :  { %v342_v0 = vmul.f32 %v1805_v26, %v1805_v26  ;;  %v343_v3 = vmul.f32 %v1810_v19, %v1810_v19  ;;  %v344_v4 = vmul.f32 %v1815_v15, %v1815_v15  ;;  %v345_v6 = vmul.f32 %v1820_v51, %v1820_v51 }
  0x94   :  { %v346_v55 = vmul.f32 %v1825_v2, %v1825_v2  ;;  %v347_v21 = vmul.f32 %v1836_v1, %v1836_v1  ;;  %v1861_v56 = vsub.f32 %v1221_v23, %v1800_v50  ;;  %v348_v62 = vmul.f32 %v1843_v7, %v1843_v7 }
  0x95   :  { %v406_v58 = vsel %vm142_vm0, %v342_v0, 0.0  ;;  %v407_v33 = vsel %vm142_vm0, %v343_v3, 0.0  ;;  %v409_v28 = vsel %vm142_vm0, %v344_v4, 0.0  ;;  %v411_v16 = vsel %vm142_vm0, %v345_v6, 0.0 }
  0x96   :  { %v408_v5 = vadd.f32 %v407_v33, %v406_v58  ;;  %v413_v9 = vsel %vm142_vm0, %v346_v55, 0.0  ;;  %v1869_v11 = vsub.f32 %v1222_v27, %v1800_v50  ;;  %v349_v20 = vmul.f32 %v1853_v13, %v1853_v13 }
  0x97   :  { %v415_v3 = vsel %vm142_vm0, %v347_v21, 0.0  ;;  %v1877_v23 = vsub.f32 %v1225_v30, %v1800_v50  ;;  %v350_v6 = vmul.f32 %v1861_v56, %v1861_v56  ;;  %v417_v55 = vsel %vm142_vm0, %v348_v62, 0.0 }
  0x98   :  { %v410_v54 = vadd.f32 %v409_v28, %v408_v5  ;;  %v1885_v18 = vsub.f32 %v1226_v34, %v1800_v50  ;;  %v351_v27 = vmul.f32 %v1869_v11, %v1869_v11  ;;  %v419_v33 = vsel %vm142_vm0, %v349_v20, 0.0 }
  0x99   :  { %v1893_v30 = vsub.f32 %v1229_v37, %v1800_v50  ;;  %v352_v5 = vmul.f32 %v1877_v23, %v1877_v23  ;;  %v421_v21 = vsel %vm142_vm0, %v350_v6, 0.0  ;;  %v1901_v25 = vsub.f32 %v1230_v41, %v1800_v50 }
  0x9a   :  { %v412_v0 = vadd.f32 %v411_v16, %v410_v54  ;;  %v353_v34 = vmul.f32 %v1885_v18, %v1885_v18  ;;  %v423_v54 = vsel %vm142_vm0, %v351_v27, 0.0  ;;  %v1909_v37 = vsub.f32 %v1233_v44, %v1800_v50 }
  0x9b   :  { %v1917_v32 = vsub.f32 %v1234_v48, %v1800_v50  ;;  %v355_v41 = vmul.f32 %v1901_v25, %v1901_v25  ;;  %v2846_v44 = vunpack.c.l.bf16 %v1481_v46  ;;  %v1933_v48 = vsub.f32 %v2847_v39, %v1800_v50 }
  0x9c   :  { %v414_v4 = vadd.f32 %v413_v9, %v412_v0  ;;  %v354_v9 = vmul.f32 %v1893_v30, %v1893_v30  ;;  %v425_v0 = vsel %vm142_vm0, %v352_v5, 0.0  ;;  %v2849_v46 = vunpack.c.h.bf16 %v1494_v53 }
  0x9d   :  { %v1925_v6 = vsub.f32 %v2846_v44, %v1800_v50 }
  0x9e   :  { %v416_v58 = vadd.f32 %v415_v3, %v414_v4  ;;  %v427_v3 = vsel %vm142_vm0, %v353_v34, 0.0 }
  0x9f   :  { %v358_v34 = vmul.f32 %v1925_v6, %v1925_v6 }
  0xa0   :  { %v418_v28 = vadd.f32 %v417_v55, %v416_v58  ;;  %v356_v55 = vmul.f32 %v1909_v37, %v1909_v37  ;;  %v429_v58 = vsel %vm142_vm0, %v354_v9, 0.0  ;;  %v1949_v9 = vsub.f32 %v2849_v46, %v1800_v50 }
  0xa2   :  { %v420_v16 = vadd.f32 %v419_v33, %v418_v28  ;;  %v357_v33 = vmul.f32 %v1917_v32, %v1917_v32  ;;  %v431_v28 = vsel %vm142_vm0, %v355_v41, 0.0  ;;  %v361_v39 = vmul.f32 %v1949_v9, %v1949_v9 }
  0xa4   :  { %v422_v62 = vadd.f32 %v421_v21, %v420_v16  ;;  %v2848_v21 = vunpack.c.l.bf16 %v1494_v53  ;;  %v2851_v53 = vunpack.c.h.bf16 %v1507_v60 }
  0xa6   :  { %v424_v20 = vadd.f32 %v423_v54, %v422_v62  ;;  %v1941_v16 = vsub.f32 %v2848_v21, %v1800_v50  ;;  %v433_v54 = vsel %vm142_vm0, %v356_v55, 0.0  ;;  %v437_v55 = vsel %vm142_vm0, %v358_v34, 0.0 }
  0xa8   :  { %v426_v4 = vadd.f32 %v425_v0, %v424_v20  ;;  %v359_v0 = vmul.f32 %v1933_v48, %v1933_v48  ;;  %v435_v20 = vsel %vm142_vm0, %v357_v33, 0.0  ;;  %v360_v44 = vmul.f32 %v1941_v16, %v1941_v16 }
  0xaa   :  { %v428_v27 = vadd.f32 %v427_v3, %v426_v4  ;;  %v2850_v3 = vunpack.c.l.bf16 %v1507_v60  ;;  %v439_v33 = vsel %vm142_vm0, %v359_v0, 0.0  ;;  %v2853_v60 = vunpack.c.h.bf16 %v1520_v12 }
  0xac   :  { %v430_v5 = vadd.f32 %v429_v58, %v428_v27  ;;  %v1957_v4 = vsub.f32 %v2850_v3, %v1800_v50  ;;  %v1965_v27 = vsub.f32 %v2851_v53, %v1800_v50  ;;  %v1981_v46 = vsub.f32 %v2853_v60, %v1800_v50 }
  0xad   :  { %v2854_v3 = vunpack.c.l.bf16 %v1533_v24 }
  0xae   :  { %v432_v62 = vadd.f32 %v431_v28, %v430_v5  ;;  %v2852_v5 = vunpack.c.l.bf16 %v1520_v12  ;;  %v362_v34 = vmul.f32 %v1957_v4, %v1957_v4  ;;  %v363_v0 = vmul.f32 %v1965_v27, %v1965_v27 }
  0xaf   :  { %v2855_v12 = vunpack.c.h.bf16 %v1533_v24  ;;  %v2857_v24 = vunpack.c.h.bf16 %v1546_v36 }
  0xb0   :  { %v434_v41 = vadd.f32 %v433_v54, %v432_v62  ;;  %v1973_v21 = vsub.f32 %v2852_v5, %v1800_v50  ;;  %v441_v54 = vsel %vm142_vm0, %v360_v44, 0.0 }
  0xb2   :  { %v436_v58 = vadd.f32 %v435_v20, %v434_v41  ;;  %v443_v20 = vsel %vm142_vm0, %v361_v39, 0.0  ;;  %v364_v44 = vmul.f32 %v1973_v21, %v1973_v21  ;;  %v365_v39 = vmul.f32 %v1981_v46, %v1981_v46 }
  0xb4   :  { %v438_v28 = vadd.f32 %v437_v55, %v436_v58  ;;  %v1989_v55 = vsub.f32 %v2854_v3, %v1800_v50  ;;  %v445_v58 = vsel %vm142_vm0, %v362_v34, 0.0  ;;  %v449_v60 = vsel %vm142_vm0, %v364_v44, 0.0 }
  0xb5   :  { %v451_v3 = vsel %vm142_vm0, %v365_v39, 0.0 }
  0xb6   :  { %v440_v62 = vadd.f32 %v439_v33, %v438_v28  ;;  %v1997_v33 = vsub.f32 %v2855_v12, %v1800_v50  ;;  %v447_v28 = vsel %vm142_vm0, %v363_v0, 0.0  ;;  %v366_v34 = vmul.f32 %v1989_v55, %v1989_v55 }
  0xb8   :  { %v442_v41 = vadd.f32 %v441_v54, %v440_v62  ;;  %v2856_v54 = vunpack.c.l.bf16 %v1546_v36  ;;  %v367_v0 = vmul.f32 %v1997_v33, %v1997_v33  ;;  %v2859_v36 = vunpack.c.h.bf16 %v1559_v49 }
  0xba   :  { %v444_v53 = vadd.f32 %v443_v20, %v442_v41  ;;  %v2005_v62 = vsub.f32 %v2856_v54, %v1800_v50  ;;  %v2013_v41 = vsub.f32 %v2857_v24, %v1800_v50  ;;  %v2029_v54 = vsub.f32 %v2859_v36, %v1800_v50 }
  0xbb   :  { %v2860_v24 = vunpack.c.l.bf16 %v1572_v61 }
  0xbc   :  { %v446_v5 = vadd.f32 %v445_v58, %v444_v53  ;;  %v2858_v53 = vunpack.c.l.bf16 %v1559_v49  ;;  %v368_v44 = vmul.f32 %v2005_v62, %v2005_v62  ;;  %v369_v39 = vmul.f32 %v2013_v41, %v2013_v41 }
  0xbd   :  { %v2861_v49 = vunpack.c.h.bf16 %v1572_v61  ;;  %v2864_v61 = vunpack.c.h.bf16 %v1585_v22 }
  0xbe   :  { %v448_v20 = vadd.f32 %v447_v28, %v446_v5  ;;  %v2021_v12 = vsub.f32 %v2858_v53, %v1800_v50  ;;  %v453_v28 = vsel %vm142_vm0, %v366_v34, 0.0  ;;  %v2037_v53 = vsub.f32 %v2860_v24, %v1800_v50 }
  0xbf   :  { %v2045_v36 = vsub.f32 %v2861_v49, %v1800_v50  ;;  %v2863_v24 = vunpack.c.l.bf16 %v1585_v22  ;;  %v2061_v49 = vsub.f32 %v2864_v61, %v1800_v50  ;;  %v2867_v22 = vunpack.c.h.bf16 %v1598_v43 }
  0xc0   :  { %v450_v58 = vadd.f32 %v449_v60, %v448_v20  ;;  %v455_v60 = vsel %vm142_vm0, %v367_v0, 0.0  ;;  %v370_v34 = vmul.f32 %v2021_v12, %v2021_v12  ;;  %v371_v0 = vmul.f32 %v2029_v54, %v2029_v54 }
  0xc1   :  { %2862 = vst [vmem:[#allocation2_spill] sm:$0xff] %v2045_v36  ;;  %v2053_v42 = vsub.f32 %v2863_v24, %v1800_v50  ;;  %2865 = vst [vmem:[#allocation3_spill] sm:$0xff] %v2061_v49  ;;  %v2866_v24 = vunpack.c.l.bf16 %v1598_v43  ;;  %v2077_v61 = vsub.f32 %v2867_v22, %v1800_v50  ;;  %v2870_v43 = vunpack.c.h.bf16 %v1611_v10 }
  0xc2   :  { %v452_v5 = vadd.f32 %v451_v3, %v450_v58  ;;  %v457_v3 = vsel %vm142_vm0, %v368_v44, 0.0  ;;  %v372_v44 = vmul.f32 %v2037_v53, %v2037_v53 }
  0xc3   :  { %v2069_v14 = vsub.f32 %v2866_v24, %v1800_v50  ;;  %2868 = vst [vmem:[#allocation4_spill] sm:$0xff] %v2077_v61  ;;  %v2869_v24 = vunpack.c.l.bf16 %v1611_v10  ;;  %v2093_v22 = vsub.f32 %v2870_v43, %v1800_v50  ;;  %v2873_v10 = vunpack.c.h.bf16 %v1624_v47 }
  0xc4   :  { %v454_v20 = vadd.f32 %v453_v28, %v452_v5  ;;  %v459_v28 = vsel %vm142_vm0, %v369_v39, 0.0  ;;  %v373_v39 = vmul.f32 %v2045_v36, %v2045_v36 }
  0xc5   :  { %v2085_v36 = vsub.f32 %v2869_v24, %v1800_v50  ;;  %2871 = vst [vmem:[#allocation5_spill] sm:$0xff] %v2093_v22  ;;  %v2872_v24 = vunpack.c.l.bf16 %v1624_v47  ;;  %v2109_v43 = vsub.f32 %v2873_v10, %v1800_v50  ;;  %v2876_v47 = vunpack.c.h.bf16 %v1637_v59 }
  0xc6   :  { %v456_v58 = vadd.f32 %v455_v60, %v454_v20  ;;  %v461_v60 = vsel %vm142_vm0, %v370_v34, 0.0  ;;  %v374_v34 = vmul.f32 %v2053_v42, %v2053_v42 }
  0xc7   :  { %2874 = vst [vmem:[#allocation6_spill] sm:$0xff] %v2109_v43  ;;  %v2125_v10 = vsub.f32 %v2876_v47, %v1800_v50 }
  0xc8   :  { %v458_v5 = vadd.f32 %v457_v3, %v456_v58  ;;  %v463_v3 = vsel %vm142_vm0, %v371_v0, 0.0  ;;  %v375_v0 = vmul.f32 %v2061_v49, %v2061_v49  ;;  %v2101_v49 = vsub.f32 %v2872_v24, %v1800_v50 }
  0xc9   :  { %v2875_v24 = vunpack.c.l.bf16 %v1637_v59  ;;  %2877 = vst [vmem:[#allocation7_spill] sm:$0xff] %v2125_v10  ;;  %v2879_v59 = vunpack.c.h.bf16 %v1650_v35 }
  0xca   :  { %v460_v20 = vadd.f32 %v459_v28, %v458_v5  ;;  %v465_v28 = vsel %vm142_vm0, %v372_v44, 0.0  ;;  %v376_v44 = vmul.f32 %v2069_v14, %v2069_v14 }
  0xcb   :  { %v2141_v47 = vsub.f32 %v2879_v59, %v1800_v50 }
  0xcc   :  { %v462_v58 = vadd.f32 %v461_v60, %v460_v20  ;;  %v467_v60 = vsel %vm142_vm0, %v373_v39, 0.0  ;;  %v377_v39 = vmul.f32 %v2077_v61, %v2077_v61  ;;  %v2117_v61 = vsub.f32 %v2875_v24, %v1800_v50 }
  0xcd   :  { %v2878_v24 = vunpack.c.l.bf16 %v1650_v35  ;;  %2880 = vst [vmem:[#allocation8_spill] sm:$0xff] %v2141_v47  ;;  %v2882_v35 = vunpack.c.h.bf16 %v1663_v63 }
  0xce   :  { %v464_v5 = vadd.f32 %v463_v3, %v462_v58  ;;  %v469_v3 = vsel %vm142_vm0, %v374_v34, 0.0  ;;  %v378_v34 = vmul.f32 %v2085_v36, %v2085_v36 }
  0xcf   :  { %v2157_v59 = vsub.f32 %v2882_v35, %v1800_v50 }
  0xd0   :  { %v466_v20 = vadd.f32 %v465_v28, %v464_v5  ;;  %v471_v28 = vsel %vm142_vm0, %v375_v0, 0.0  ;;  %v379_v0 = vmul.f32 %v2093_v22, %v2093_v22  ;;  %v2133_v22 = vsub.f32 %v2878_v24, %v1800_v50 }
  0xd1   :  { %v2881_v24 = vunpack.c.l.bf16 %v1663_v63  ;;  %2883 = vst [vmem:[#allocation9_spill] sm:$0xff] %v2157_v59  ;;  %v2885_v63 = vunpack.c.h.bf16 %v1676_v38 }
  0xd2   :  { %v468_v58 = vadd.f32 %v467_v60, %v466_v20  ;;  %v473_v60 = vsel %vm142_vm0, %v376_v44, 0.0  ;;  %v380_v44 = vmul.f32 %v2101_v49, %v2101_v49 }
  0xd3   :  { %v2173_v35 = vsub.f32 %v2885_v63, %v1800_v50 }
  0xd4   :  { %v470_v5 = vadd.f32 %v469_v3, %v468_v58  ;;  %v475_v3 = vsel %vm142_vm0, %v377_v39, 0.0  ;;  %v381_v39 = vmul.f32 %v2109_v43, %v2109_v43  ;;  %v2149_v43 = vsub.f32 %v2881_v24, %v1800_v50 }
  0xd5   :  { %v2884_v24 = vunpack.c.l.bf16 %v1676_v38  ;;  %2886 = vst [vmem:[#allocation10_spill] sm:$0xff] %v2173_v35  ;;  %v2888_v38 = vunpack.c.h.bf16 %v1689_v29 }
  0xd6   :  { %v472_v20 = vadd.f32 %v471_v28, %v470_v5  ;;  %v477_v28 = vsel %vm142_vm0, %v378_v34, 0.0  ;;  %v382_v34 = vmul.f32 %v2117_v61, %v2117_v61 }
  0xd7   :  { %v2189_v63 = vsub.f32 %v2888_v38, %v1800_v50 }
  0xd8   :  { %v474_v58 = vadd.f32 %v473_v60, %v472_v20  ;;  %v479_v60 = vsel %vm142_vm0, %v379_v0, 0.0  ;;  %v383_v0 = vmul.f32 %v2125_v10, %v2125_v10  ;;  %v2165_v10 = vsub.f32 %v2884_v24, %v1800_v50 }
  0xd9   :  { %v2887_v24 = vunpack.c.l.bf16 %v1689_v29  ;;  %2889 = vst [vmem:[#allocation11_spill] sm:$0xff] %v2189_v63  ;;  %v2891_v29 = vunpack.c.h.bf16 %v1702_v17 }
  0xda   :  { %v476_v5 = vadd.f32 %v475_v3, %v474_v58  ;;  %v481_v3 = vsel %vm142_vm0, %v380_v44, 0.0  ;;  %v384_v44 = vmul.f32 %v2133_v22, %v2133_v22 }
  0xdb   :  { %v2205_v38 = vsub.f32 %v2891_v29, %v1800_v50 }
  0xdc   :  { %v478_v20 = vadd.f32 %v477_v28, %v476_v5  ;;  %v483_v28 = vsel %vm142_vm0, %v381_v39, 0.0  ;;  %v385_v39 = vmul.f32 %v2141_v47, %v2141_v47  ;;  %v2181_v47 = vsub.f32 %v2887_v24, %v1800_v50 }
  0xdd   :  { %v2890_v24 = vunpack.c.l.bf16 %v1702_v17  ;;  %2892 = vst [vmem:[#allocation12_spill] sm:$0xff] %v2205_v38  ;;  %v2894_v17 = vunpack.c.h.bf16 %v1715_v8 }
  0xde   :  { %v480_v58 = vadd.f32 %v479_v60, %v478_v20  ;;  %v485_v60 = vsel %vm142_vm0, %v382_v34, 0.0  ;;  %v386_v34 = vmul.f32 %v2149_v43, %v2149_v43 }
  0xdf   :  { %v2221_v29 = vsub.f32 %v2894_v17, %v1800_v50 }
  0xe0   :  { %v482_v5 = vadd.f32 %v481_v3, %v480_v58  ;;  %v487_v3 = vsel %vm142_vm0, %v383_v0, 0.0  ;;  %v387_v0 = vmul.f32 %v2157_v59, %v2157_v59  ;;  %v2197_v59 = vsub.f32 %v2890_v24, %v1800_v50 }
  0xe1   :  { %v2893_v24 = vunpack.c.l.bf16 %v1715_v8  ;;  %2895 = vst [vmem:[#allocation13_spill] sm:$0xff] %v2221_v29  ;;  %v2898_v8 = vunpack.c.h.bf16 %v1728_v57 }
  0xe2   :  { %v484_v20 = vadd.f32 %v483_v28, %v482_v5  ;;  %v489_v28 = vsel %vm142_vm0, %v384_v44, 0.0  ;;  %v388_v44 = vmul.f32 %v2165_v10, %v2165_v10 }
  0xe3   :  { %v2237_v17 = vsub.f32 %v2898_v8, %v1800_v50 }
  0xe4   :  { %v486_v58 = vadd.f32 %v485_v60, %v484_v20  ;;  %v491_v60 = vsel %vm142_vm0, %v385_v39, 0.0  ;;  %v389_v39 = vmul.f32 %v2173_v35, %v2173_v35  ;;  %v2213_v35 = vsub.f32 %v2893_v24, %v1800_v50 }
  0xe5   :  { %v2896_v24 = vunpack.c.l.bf16 %v1728_v57  ;;  %2899 = vst [vmem:[#allocation15_spill] sm:$0xff] %v2237_v17  ;;  %v2902_v57 = vunpack.c.h.bf16 %v1741_v52 }
  0xe6   :  { %v488_v5 = vadd.f32 %v487_v3, %v486_v58  ;;  %v493_v3 = vsel %vm142_vm0, %v386_v34, 0.0  ;;  %v390_v34 = vmul.f32 %v2181_v47, %v2181_v47 }
  0xe7   :  { %v2253_v8 = vsub.f32 %v2902_v57, %v1800_v50 }
  0xe8   :  { %v490_v20 = vadd.f32 %v489_v28, %v488_v5  ;;  %v495_v28 = vsel %vm142_vm0, %v387_v0, 0.0  ;;  %v391_v0 = vmul.f32 %v2189_v63, %v2189_v63  ;;  %v2229_v63 = vsub.f32 %v2896_v24, %v1800_v50 }
  0xe9   :  { %v2900_v24 = vunpack.c.l.bf16 %v1741_v52  ;;  %2903 = vst [vmem:[#allocation17_spill] sm:$0xff] %v2253_v8  ;;  %v2906_v52 = vunpack.c.h.bf16 %v1754_v45 }
  0xea   :  { %v492_v58 = vadd.f32 %v491_v60, %v490_v20  ;;  %v497_v60 = vsel %vm142_vm0, %v388_v44, 0.0  ;;  %v392_v44 = vmul.f32 %v2197_v59, %v2197_v59  ;;  %2897 = vst [vmem:[#allocation14_spill] sm:$0xff] %v2229_v63 }
  0xeb   :  { %v2269_v57 = vsub.f32 %v2906_v52, %v1800_v50 }
  0xec   :  { %v494_v5 = vadd.f32 %v493_v3, %v492_v58  ;;  %v499_v3 = vsel %vm142_vm0, %v389_v39, 0.0  ;;  %v393_v39 = vmul.f32 %v2205_v38, %v2205_v38  ;;  %v2245_v38 = vsub.f32 %v2900_v24, %v1800_v50 }
  0xed   :  { %v2904_v24 = vunpack.c.l.bf16 %v1754_v45  ;;  %2907 = vst [vmem:[#allocation19_spill] sm:$0xff] %v2269_v57  ;;  %v2910_v45 = vunpack.c.h.bf16 %v1771_v31 }
  0xee   :  { %v496_v20 = vadd.f32 %v495_v28, %v494_v5  ;;  %v501_v28 = vsel %vm142_vm0, %v390_v34, 0.0  ;;  %v394_v34 = vmul.f32 %v2213_v35, %v2213_v35  ;;  %2901 = vst [vmem:[#allocation16_spill] sm:$0xff] %v2245_v38 }
  0xef   :  { %v2285_v52 = vsub.f32 %v2910_v45, %v1800_v50 }
  0xf0   :  { %v498_v58 = vadd.f32 %v497_v60, %v496_v20  ;;  %v503_v60 = vsel %vm142_vm0, %v391_v0, 0.0  ;;  %v395_v0 = vmul.f32 %v2221_v29, %v2221_v29  ;;  %v2261_v29 = vsub.f32 %v2904_v24, %v1800_v50 }
  0xf1   :  { %v2908_v24 = vunpack.c.l.bf16 %v1771_v31  ;;  %2911 = vst [vmem:[#allocation21_spill] sm:$0xff] %v2285_v52  ;;  %v2914_v31 = vunpack.c.h.bf16 %v1787_v40 }
  0xf2   :  { %v500_v5 = vadd.f32 %v499_v3, %v498_v58  ;;  %v505_v3 = vsel %vm142_vm0, %v392_v44, 0.0  ;;  %v396_v44 = vmul.f32 %v2229_v63, %v2229_v63  ;;  %2905 = vst [vmem:[#allocation18_spill] sm:$0xff] %v2261_v29 }
  0xf3   :  { %v2301_v45 = vsub.f32 %v2914_v31, %v1800_v50 }
  0xf4   :  { %v502_v20 = vadd.f32 %v501_v28, %v500_v5  ;;  %v507_v28 = vsel %vm142_vm0, %v393_v39, 0.0  ;;  %v397_v39 = vmul.f32 %v2237_v17, %v2237_v17  ;;  %v2277_v17 = vsub.f32 %v2908_v24, %v1800_v50 }
  0xf5   :  { %v2912_v24 = vunpack.c.l.bf16 %v1787_v40  ;;  %2915 = vst [vmem:[#allocation23_spill] sm:$0xff] %v2301_v45 }
  0xf6   :  { %v504_v58 = vadd.f32 %v503_v60, %v502_v20  ;;  %v509_v60 = vsel %vm142_vm0, %v394_v34, 0.0  ;;  %v398_v34 = vmul.f32 %v2245_v38, %v2245_v38  ;;  %2909 = vst [vmem:[#allocation20_spill] sm:$0xff] %v2277_v17 }
  0xf8   :  { %v506_v5 = vadd.f32 %v505_v3, %v504_v58  ;;  %v511_v3 = vsel %vm142_vm0, %v395_v0, 0.0  ;;  %v399_v0 = vmul.f32 %v2253_v8, %v2253_v8  ;;  %v2293_v8 = vsub.f32 %v2912_v24, %v1800_v50 }
  0xfa   :  { %v508_v20 = vadd.f32 %v507_v28, %v506_v5  ;;  %v513_v28 = vsel %vm142_vm0, %v396_v44, 0.0  ;;  %v400_v44 = vmul.f32 %v2261_v29, %v2261_v29  ;;  %2913 = vst [vmem:[#allocation22_spill] sm:$0xff] %v2293_v8  ;;  %v404_v24 = vmul.f32 %v2293_v8, %v2293_v8 }
  0xfc   :  { %v510_v58 = vadd.f32 %v509_v60, %v508_v20  ;;  %v515_v60 = vsel %vm142_vm0, %v397_v39, 0.0  ;;  %v401_v39 = vmul.f32 %v2269_v57, %v2269_v57  ;;  %v529_v50 = vsel %vm142_vm0, %v404_v24, 0.0 }
  0xfe   :  { %v512_v5 = vadd.f32 %v511_v3, %v510_v58  ;;  %v517_v3 = vsel %vm142_vm0, %v398_v34, 0.0  ;;  %v402_v34 = vmul.f32 %v2277_v17, %v2277_v17 }
 0x100   :  { %v514_v20 = vadd.f32 %v513_v28, %v512_v5  ;;  %v519_v28 = vsel %vm142_vm0, %v399_v0, 0.0  ;;  %v403_v0 = vmul.f32 %v2285_v52, %v2285_v52  ;;  %v525_v57 = vsel %vm142_vm0, %v402_v34, 0.0 }
 0x102   :  { %v516_v58 = vadd.f32 %v515_v60, %v514_v20  ;;  %v521_v60 = vsel %vm142_vm0, %v400_v44, 0.0  ;;  %v405_v44 = vmul.f32 %v2301_v45, %v2301_v45  ;;  %v545_v45 = vlaneseq }
 0x104   :  { %v518_v5 = vadd.f32 %v517_v3, %v516_v58  ;;  %v523_v3 = vsel %vm142_vm0, %v401_v39, 0.0  ;;  %v531_v31 = vsel %vm142_vm0, %v405_v44, 0.0  ;;  %v546_v63 = vshrl.u32 %v545_v45, 7 }
 0x106   :  { %v520_v20 = vadd.f32 %v519_v28, %v518_v5  ;;  %v527_v28 = vsel %vm142_vm0, %v403_v0, 0.0 }
 0x108   :  { %v522_v58 = vadd.f32 %v521_v60, %v520_v20 }
 0x10a   :  { %v524_v17 = vadd.f32 %v523_v3, %v522_v58 }
 0x10c   :  { %v526_v40 = vadd.f32 %v525_v57, %v524_v17  ;;  %v540_v17 = vld [vmem:[%s2773_s1] sm:$0x1]  ;;  %v547_v57 = vsub.s32 0, %v546_v63 }
 0x10e   :  { %v528_v5 = vadd.f32 %v527_v28, %v526_v40 }
 0x110   :  { %v530_v52 = vadd.f32 %v529_v50, %v528_v5 }
 0x112   :  { %v532_v39 = vadd.f32 %v531_v31, %v530_v52 }
 0x114   :  { %v533_v60 = vrot.slane %v532_v39, 4 }
 0x116   :  { %v534_v20 = vadd.f32 %v533_v60, %v532_v39 }
 0x118   :  { %v535_v29 = vrot.slane %v534_v20, 2 }
 0x11a   :  { %v536_v8 = vadd.f32 %v535_v29, %v534_v20  ;;  %v2322_v29 = vld [vmem:[%s2774_s2] ss:$0 sm:$0xff] }
 0x11c   :  { %v537_v38 = vrot.slane %v536_v8, 1 }
 0x11e   :  { %v538_v34 = vadd.f32 %v537_v38, %v536_v8 }
 0x120   :  { %v539_v3 = vmul.f32 0.001953125, %v538_v34 }
 0x122   :  { %v541_v58 = vadd.f32 1e-05, %v539_v3 }
 0x124   :  { %1362 = vrsqrt.f32 %v541_v58 }
 0x12e   :  { %v1363_v0 = vpop.eup %1362 }
 0x12f   :  { %v543_v24 = vmul.f32 %v1363_v0, %v540_v17 }
 0x131   :  { %v2317_v44 = vrot.slane %v543_v24, %v547_v57 }
 0x133   :  { %v550_v38 = vmul.f32 %v2317_v44, %v1805_v26  ;;  %v551_v8 = vmul.f32 %v2317_v44, %v1810_v19  ;;  %v552_v52 = vmul.f32 %v2317_v44, %v1815_v15  ;;  %v553_v63 = vmul.f32 %v2317_v44, %v1820_v51 }
 0x134   :  { %v554_v45 = vmul.f32 %v2317_v44, %v1825_v2  ;;  %v555_v28 = vmul.f32 %v2317_v44, %v1836_v1  ;;  %v556_v40 = vmul.f32 %v2317_v44, %v1843_v7  ;;  %v557_v26 = vmul.f32 %v2317_v44, %v1853_v13 }
 0x135   :  { %v621_v19 = vadd.f32 %v2322_v29, %v550_v38  ;;  %v622_v50 = vadd.f32 %v2322_v29, %v551_v8  ;;  %v623_v15 = vadd.f32 %v2322_v29, %v552_v52  ;;  %v624_v51 = vadd.f32 %v2322_v29, %v553_v63 }
 0x136   :  { %v625_v5 = vadd.f32 %v2322_v29, %v554_v45  ;;  %v626_v2 = vadd.f32 %v2322_v29, %v555_v28  ;;  %v627_v1 = vadd.f32 %v2322_v29, %v556_v40  ;;  %v628_v31 = vadd.f32 %v2322_v29, %v557_v26 }
 0x137   :  { %v685_v7 = vmax.f32 %v621_v19, 0.0  ;;  %v686_v39 = vmax.f32 %v622_v50, 0.0  ;;  %v687_v60 = vmax.f32 %v623_v15, 0.0  ;;  %v688_v13 = vmax.f32 %v624_v51, 0.0 }
 0x138   :  { %v689_v20 = vmax.f32 %v625_v5, 0.0  ;;  %v690_v34 = vmax.f32 %v626_v2, 0.0  ;;  %v691_v3 = vmax.f32 %v627_v1, 0.0  ;;  %v692_v58 = vmax.f32 %v628_v31, 0.0 }
 0x139   :  { %v1139_v17 = vpack.c.bf16 %v685_v7, %v685_v7  ;;  %v1140_v57 = vpack.c.bf16 %v686_v39, %v686_v39  ;;  %v1141_v0 = vpack.c.bf16 %v687_v60, %v687_v60  ;;  %v1142_v24 = vpack.c.bf16 %v688_v13, %v688_v13 }
 0x13a   :  { %v1143_v38 = vpack.c.bf16 %v689_v20, %v689_v20  ;;  %v1144_v8 = vpack.c.bf16 %v690_v34, %v690_v34  ;;  %v1145_v52 = vpack.c.bf16 %v691_v3, %v691_v3  ;;  %v1146_v63 = vpack.c.bf16 %v692_v58, %v692_v58 }
 0x13b   :  { %1006 = vst.msk [vmem:[%s2775_s3] sm:$0xf] %vm1005_vm1, %v1139_v17  ;;  %1007 = vst.msk [vmem:[%s2775_s3 + $0x4] sm:$0xf] %vm1005_vm1, %v1140_v57  ;;  %v558_v45 = vmul.f32 %v2317_v44, %v1861_v56  ;;  %v559_v28 = vmul.f32 %v2317_v44, %v1869_v11  ;;  %v560_v40 = vmul.f32 %v2317_v44, %v1877_v23 }
 0x13c   :  { %1008 = vst.msk [vmem:[%s2775_s3 + $0x8] sm:$0xf] %vm1005_vm1, %v1141_v0  ;;  %1009 = vst.msk [vmem:[%s2775_s3 + $0xc] sm:$0xf] %vm1005_vm1, %v1142_v24  ;;  %v561_v26 = vmul.f32 %v2317_v44, %v1885_v18  ;;  %v562_v56 = vmul.f32 %v2317_v44, %v1893_v30  ;;  %v563_v11 = vmul.f32 %v2317_v44, %v1901_v25 }
 0x13d   :  { %1010 = vst.msk [vmem:[%s2775_s3 + $0x10] sm:$0xf] %vm1005_vm1, %v1143_v38  ;;  %1011 = vst.msk [vmem:[%s2775_s3 + $0x14] sm:$0xf] %vm1005_vm1, %v1144_v8  ;;  %v564_v23 = vmul.f32 %v2317_v44, %v1909_v37  ;;  %v565_v18 = vmul.f32 %v2317_v44, %v1917_v32  ;;  %v629_v19 = vadd.f32 %v2322_v29, %v558_v45 }
 0x13e   :  { %1012 = vst.msk [vmem:[%s2775_s3 + $0x18] sm:$0xf] %vm1005_vm1, %v1145_v52  ;;  %1013 = vst.msk [vmem:[%s2775_s3 + $0x1c] sm:$0xf] %vm1005_vm1, %v1146_v63  ;;  %v630_v50 = vadd.f32 %v2322_v29, %v559_v28  ;;  %v631_v15 = vadd.f32 %v2322_v29, %v560_v40  ;;  %v632_v51 = vadd.f32 %v2322_v29, %v561_v26 }
 0x13f   :  { %v633_v5 = vadd.f32 %v2322_v29, %v562_v56  ;;  %v634_v30 = vadd.f32 %v2322_v29, %v563_v11  ;;  %v635_v25 = vadd.f32 %v2322_v29, %v564_v23  ;;  %v636_v2 = vadd.f32 %v2322_v29, %v565_v18 }
 0x140   :  { %v693_v37 = vmax.f32 %v629_v19, 0.0  ;;  %v694_v1 = vmax.f32 %v630_v50, 0.0  ;;  %v695_v31 = vmax.f32 %v631_v15, 0.0  ;;  %v696_v32 = vmax.f32 %v632_v51, 0.0 }
 0x141   :  { %v697_v7 = vmax.f32 %v633_v5, 0.0  ;;  %v698_v39 = vmax.f32 %v634_v30, 0.0  ;;  %v699_v60 = vmax.f32 %v635_v25, 0.0  ;;  %v700_v13 = vmax.f32 %v636_v2, 0.0 }
 0x142   :  { %v1147_v20 = vpack.c.bf16 %v693_v37, %v693_v37  ;;  %v1148_v34 = vpack.c.bf16 %v694_v1, %v694_v1  ;;  %v1149_v3 = vpack.c.bf16 %v695_v31, %v695_v31  ;;  %v1150_v58 = vpack.c.bf16 %v696_v32, %v696_v32 }
 0x143   :  { %v1151_v17 = vpack.c.bf16 %v697_v7, %v697_v7  ;;  %v1152_v57 = vpack.c.bf16 %v698_v39, %v698_v39  ;;  %v1153_v0 = vpack.c.bf16 %v699_v60, %v699_v60  ;;  %v1154_v24 = vpack.c.bf16 %v700_v13, %v700_v13 }
 0x144   :  { %1014 = vst.msk [vmem:[%s2775_s3 + $0x20] sm:$0xf] %vm1005_vm1, %v1147_v20  ;;  %1015 = vst.msk [vmem:[%s2775_s3 + $0x24] sm:$0xf] %vm1005_vm1, %v1148_v34  ;;  %v566_v38 = vmul.f32 %v2317_v44, %v1925_v6  ;;  %v567_v8 = vmul.f32 %v2317_v44, %v1933_v48  ;;  %v568_v52 = vmul.f32 %v2317_v44, %v1941_v16 }
 0x145   :  { %1016 = vst.msk [vmem:[%s2775_s3 + $0x28] sm:$0xf] %vm1005_vm1, %v1149_v3  ;;  %1017 = vst.msk [vmem:[%s2775_s3 + $0x2c] sm:$0xf] %vm1005_vm1, %v1150_v58  ;;  %v569_v63 = vmul.f32 %v2317_v44, %v1949_v9  ;;  %v570_v6 = vmul.f32 %v2317_v44, %v1957_v4  ;;  %v571_v48 = vmul.f32 %v2317_v44, %v1965_v27 }
 0x146   :  { %1018 = vst.msk [vmem:[%s2775_s3 + $0x30] sm:$0xf] %vm1005_vm1, %v1151_v17  ;;  %1019 = vst.msk [vmem:[%s2775_s3 + $0x34] sm:$0xf] %vm1005_vm1, %v1152_v57  ;;  %v572_v16 = vmul.f32 %v2317_v44, %v1973_v21  ;;  %v573_v9 = vmul.f32 %v2317_v44, %v1981_v46  ;;  %v637_v45 = vadd.f32 %v2322_v29, %v566_v38 }
 0x147   :  { %1020 = vst.msk [vmem:[%s2775_s3 + $0x38] sm:$0xf] %vm1005_vm1, %v1153_v0  ;;  %1021 = vst.msk [vmem:[%s2775_s3 + $0x3c] sm:$0xf] %vm1005_vm1, %v1154_v24  ;;  %v638_v28 = vadd.f32 %v2322_v29, %v567_v8  ;;  %v639_v40 = vadd.f32 %v2322_v29, %v568_v52  ;;  %v640_v26 = vadd.f32 %v2322_v29, %v569_v63 }
 0x148   :  { %v641_v56 = vadd.f32 %v2322_v29, %v570_v6  ;;  %v642_v4 = vadd.f32 %v2322_v29, %v571_v48  ;;  %v643_v27 = vadd.f32 %v2322_v29, %v572_v16  ;;  %v644_v11 = vadd.f32 %v2322_v29, %v573_v9 }
 0x149   :  { %v701_v21 = vmax.f32 %v637_v45, 0.0  ;;  %v702_v23 = vmax.f32 %v638_v28, 0.0  ;;  %v703_v18 = vmax.f32 %v639_v40, 0.0  ;;  %v704_v46 = vmax.f32 %v640_v26, 0.0 }
 0x14a   :  { %v705_v19 = vmax.f32 %v641_v56, 0.0  ;;  %v706_v50 = vmax.f32 %v642_v4, 0.0  ;;  %v707_v15 = vmax.f32 %v643_v27, 0.0  ;;  %v708_v51 = vmax.f32 %v644_v11, 0.0  ;;  %v2917_v11 = vld [vmem:[#allocation3_spill] sm:$0xff] }
 0x14b   :  { %v1155_v5 = vpack.c.bf16 %v701_v21, %v701_v21  ;;  %v1156_v30 = vpack.c.bf16 %v702_v23, %v702_v23  ;;  %v1157_v25 = vpack.c.bf16 %v703_v18, %v703_v18  ;;  %v1158_v2 = vpack.c.bf16 %v704_v46, %v704_v46  ;;  %v2918_v18 = vld [vmem:[#allocation4_spill] sm:$0xff] }
 0x14c   :  { %v1159_v37 = vpack.c.bf16 %v705_v19, %v705_v19  ;;  %v1160_v1 = vpack.c.bf16 %v706_v50, %v706_v50  ;;  %v1161_v31 = vpack.c.bf16 %v707_v15, %v707_v15  ;;  %v1162_v32 = vpack.c.bf16 %v708_v51, %v708_v51  ;;  %v2920_v15 = vld [vmem:[#allocation6_spill] sm:$0xff] }
 0x14d   :  { %1022 = vst.msk [vmem:[%s2775_s3 + $0x40] sm:$0xf] %vm1005_vm1, %v1155_v5  ;;  %1023 = vst.msk [vmem:[%s2775_s3 + $0x44] sm:$0xf] %vm1005_vm1, %v1156_v30  ;;  %v574_v7 = vmul.f32 %v2317_v44, %v1989_v55  ;;  %v575_v39 = vmul.f32 %v2317_v44, %v1997_v33  ;;  %v576_v60 = vmul.f32 %v2317_v44, %v2005_v62 }
 0x14e   :  { %1024 = vst.msk [vmem:[%s2775_s3 + $0x48] sm:$0xf] %vm1005_vm1, %v1157_v25  ;;  %1025 = vst.msk [vmem:[%s2775_s3 + $0x4c] sm:$0xf] %vm1005_vm1, %v1158_v2  ;;  %v577_v13 = vmul.f32 %v2317_v44, %v2013_v41  ;;  %v578_v55 = vmul.f32 %v2317_v44, %v2021_v12  ;;  %v579_v33 = vmul.f32 %v2317_v44, %v2029_v54  ;;  %v2916_v41 = vld [vmem:[#allocation2_spill] sm:$0xff] }
 0x14f   :  { %1026 = vst.msk [vmem:[%s2775_s3 + $0x50] sm:$0xf] %vm1005_vm1, %v1159_v37  ;;  %1027 = vst.msk [vmem:[%s2775_s3 + $0x54] sm:$0xf] %vm1005_vm1, %v1160_v1  ;;  %v580_v62 = vmul.f32 %v2317_v44, %v2037_v53  ;;  %v581_v20 = vmul.f32 %v2317_v44, %v2916_v41  ;;  %v645_v34 = vadd.f32 %v2322_v29, %v574_v7 }
 0x150   :  { %1028 = vst.msk [vmem:[%s2775_s3 + $0x58] sm:$0xf] %vm1005_vm1, %v1161_v31  ;;  %1029 = vst.msk [vmem:[%s2775_s3 + $0x5c] sm:$0xf] %vm1005_vm1, %v1162_v32  ;;  %v646_v3 = vadd.f32 %v2322_v29, %v575_v39  ;;  %v647_v58 = vadd.f32 %v2322_v29, %v576_v60  ;;  %v648_v17 = vadd.f32 %v2322_v29, %v577_v13 }
 0x151   :  { %v649_v57 = vadd.f32 %v2322_v29, %v578_v55  ;;  %v650_v12 = vadd.f32 %v2322_v29, %v579_v33  ;;  %v651_v54 = vadd.f32 %v2322_v29, %v580_v62  ;;  %v652_v0 = vadd.f32 %v2322_v29, %v581_v20 }
 0x152   :  { %v709_v53 = vmax.f32 %v645_v34, 0.0  ;;  %v710_v24 = vmax.f32 %v646_v3, 0.0  ;;  %v711_v38 = vmax.f32 %v647_v58, 0.0  ;;  %v712_v8 = vmax.f32 %v648_v17, 0.0 }
 0x153   :  { %v713_v52 = vmax.f32 %v649_v57, 0.0  ;;  %v714_v63 = vmax.f32 %v650_v12, 0.0  ;;  %v715_v6 = vmax.f32 %v651_v54, 0.0  ;;  %v716_v48 = vmax.f32 %v652_v0, 0.0  ;;  %v2921_v54 = vld [vmem:[#allocation7_spill] sm:$0xff] }
 0x154   :  { %v1163_v16 = vpack.c.bf16 %v709_v53, %v709_v53  ;;  %v1164_v9 = vpack.c.bf16 %v710_v24, %v710_v24  ;;  %v1165_v45 = vpack.c.bf16 %v711_v38, %v711_v38  ;;  %v1166_v28 = vpack.c.bf16 %v712_v8, %v712_v8  ;;  %v2922_v24 = vld [vmem:[#allocation8_spill] sm:$0xff] }
 0x155   :  { %v1167_v40 = vpack.c.bf16 %v713_v52, %v713_v52  ;;  %v1168_v26 = vpack.c.bf16 %v714_v63, %v714_v63  ;;  %v1169_v56 = vpack.c.bf16 %v715_v6, %v715_v6  ;;  %v1170_v4 = vpack.c.bf16 %v716_v48, %v716_v48  ;;  %v2924_v63 = vld [vmem:[#allocation10_spill] sm:$0xff] }
 0x156   :  { %1030 = vst.msk [vmem:[%s2775_s3 + $0x60] sm:$0xf] %vm1005_vm1, %v1163_v16  ;;  %1031 = vst.msk [vmem:[%s2775_s3 + $0x64] sm:$0xf] %vm1005_vm1, %v1164_v9  ;;  %v582_v27 = vmul.f32 %v2317_v44, %v2053_v42  ;;  %v583_v21 = vmul.f32 %v2317_v44, %v2917_v11  ;;  %v584_v23 = vmul.f32 %v2317_v44, %v2069_v14  ;;  %v2919_v42 = vld [vmem:[#allocation5_spill] sm:$0xff] }
 0x157   :  { %1032 = vst.msk [vmem:[%s2775_s3 + $0x68] sm:$0xf] %vm1005_vm1, %v1165_v45  ;;  %1033 = vst.msk [vmem:[%s2775_s3 + $0x6c] sm:$0xf] %vm1005_vm1, %v1166_v28  ;;  %v585_v46 = vmul.f32 %v2317_v44, %v2918_v18  ;;  %v586_v14 = vmul.f32 %v2317_v44, %v2085_v36  ;;  %v587_v19 = vmul.f32 %v2317_v44, %v2919_v42 }
 0x158   :  { %1034 = vst.msk [vmem:[%s2775_s3 + $0x70] sm:$0xf] %vm1005_vm1, %v1167_v40  ;;  %1035 = vst.msk [vmem:[%s2775_s3 + $0x74] sm:$0xf] %vm1005_vm1, %v1168_v26  ;;  %v588_v50 = vmul.f32 %v2317_v44, %v2101_v49  ;;  %v589_v51 = vmul.f32 %v2317_v44, %v2920_v15  ;;  %v653_v5 = vadd.f32 %v2322_v29, %v582_v27 }
 0x159   :  { %1036 = vst.msk [vmem:[%s2775_s3 + $0x78] sm:$0xf] %vm1005_vm1, %v1169_v56  ;;  %1037 = vst.msk [vmem:[%s2775_s3 + $0x7c] sm:$0xf] %vm1005_vm1, %v1170_v4  ;;  %v654_v30 = vadd.f32 %v2322_v29, %v583_v21  ;;  %v655_v25 = vadd.f32 %v2322_v29, %v584_v23  ;;  %v656_v2 = vadd.f32 %v2322_v29, %v585_v46 }
 0x15a   :  { %v657_v37 = vadd.f32 %v2322_v29, %v586_v14  ;;  %v658_v36 = vadd.f32 %v2322_v29, %v587_v19  ;;  %v659_v1 = vadd.f32 %v2322_v29, %v588_v50  ;;  %v660_v31 = vadd.f32 %v2322_v29, %v589_v51 }
 0x15b   :  { %v717_v49 = vmax.f32 %v653_v5, 0.0  ;;  %v718_v32 = vmax.f32 %v654_v30, 0.0  ;;  %v719_v7 = vmax.f32 %v655_v25, 0.0  ;;  %v720_v39 = vmax.f32 %v656_v2, 0.0  ;;  %v2925_v25 = vld [vmem:[#allocation11_spill] sm:$0xff] }
 0x15c   :  { %v721_v60 = vmax.f32 %v657_v37, 0.0  ;;  %v722_v13 = vmax.f32 %v658_v36, 0.0  ;;  %v723_v55 = vmax.f32 %v659_v1, 0.0  ;;  %v724_v33 = vmax.f32 %v660_v31, 0.0  ;;  %v2926_v36 = vld [vmem:[#allocation12_spill] sm:$0xff] }
 0x15d   :  { %v1171_v62 = vpack.c.bf16 %v717_v49, %v717_v49  ;;  %v1172_v41 = vpack.c.bf16 %v718_v32, %v718_v32  ;;  %v1173_v20 = vpack.c.bf16 %v719_v7, %v719_v7  ;;  %v1174_v34 = vpack.c.bf16 %v720_v39, %v720_v39  ;;  %v2928_v49 = vld [vmem:[#allocation14_spill] sm:$0xff]  ;;  %v2929_v7 = vld [vmem:[#allocation15_spill] sm:$0xff] }
 0x15e   :  { %v1175_v3 = vpack.c.bf16 %v721_v60, %v721_v60  ;;  %v1176_v58 = vpack.c.bf16 %v722_v13, %v722_v13  ;;  %v1177_v17 = vpack.c.bf16 %v723_v55, %v723_v55  ;;  %v1178_v57 = vpack.c.bf16 %v724_v33, %v724_v33 }
 0x15f   :  { %1038 = vst.msk [vmem:[%s2775_s3 + $0x80] sm:$0xf] %vm1005_vm1, %v1171_v62  ;;  %1039 = vst.msk [vmem:[%s2775_s3 + $0x84] sm:$0xf] %vm1005_vm1, %v1172_v41  ;;  %v590_v12 = vmul.f32 %v2317_v44, %v2117_v61  ;;  %v591_v0 = vmul.f32 %v2317_v44, %v2921_v54  ;;  %v592_v53 = vmul.f32 %v2317_v44, %v2133_v22  ;;  %v2923_v22 = vld [vmem:[#allocation9_spill] sm:$0xff] }
 0x160   :  { %1040 = vst.msk [vmem:[%s2775_s3 + $0x88] sm:$0xf] %vm1005_vm1, %v1173_v20  ;;  %1041 = vst.msk [vmem:[%s2775_s3 + $0x8c] sm:$0xf] %vm1005_vm1, %v1174_v34  ;;  %v593_v38 = vmul.f32 %v2317_v44, %v2922_v24  ;;  %v594_v61 = vmul.f32 %v2317_v44, %v2149_v43  ;;  %v595_v8 = vmul.f32 %v2317_v44, %v2923_v22 }
 0x161   :  { %1042 = vst.msk [vmem:[%s2775_s3 + $0x90] sm:$0xf] %vm1005_vm1, %v1175_v3  ;;  %1043 = vst.msk [vmem:[%s2775_s3 + $0x94] sm:$0xf] %vm1005_vm1, %v1176_v58  ;;  %v596_v52 = vmul.f32 %v2317_v44, %v2165_v10  ;;  %v597_v6 = vmul.f32 %v2317_v44, %v2924_v63  ;;  %v661_v48 = vadd.f32 %v2322_v29, %v590_v12 }
 0x162   :  { %1044 = vst.msk [vmem:[%s2775_s3 + $0x98] sm:$0xf] %vm1005_vm1, %v1177_v17  ;;  %1045 = vst.msk [vmem:[%s2775_s3 + $0x9c] sm:$0xf] %vm1005_vm1, %v1178_v57  ;;  %v662_v16 = vadd.f32 %v2322_v29, %v591_v0  ;;  %v663_v9 = vadd.f32 %v2322_v29, %v592_v53  ;;  %v664_v45 = vadd.f32 %v2322_v29, %v593_v38 }
 0x163   :  { %v665_v28 = vadd.f32 %v2322_v29, %v594_v61  ;;  %v666_v43 = vadd.f32 %v2322_v29, %v595_v8  ;;  %v667_v40 = vadd.f32 %v2322_v29, %v596_v52  ;;  %v668_v26 = vadd.f32 %v2322_v29, %v597_v6  ;;  %v2930_v6 = vld [vmem:[#allocation16_spill] sm:$0xff] }
 0x164   :  { %v725_v10 = vmax.f32 %v661_v48, 0.0  ;;  %v726_v56 = vmax.f32 %v662_v16, 0.0  ;;  %v727_v4 = vmax.f32 %v663_v9, 0.0  ;;  %v728_v27 = vmax.f32 %v664_v45, 0.0  ;;  %v2931_v16 = vld [vmem:[#allocation17_spill] sm:$0xff]  ;;  %v2932_v45 = vld [vmem:[#allocation18_spill] sm:$0xff] }
 0x165   :  { %v729_v11 = vmax.f32 %v665_v28, 0.0  ;;  %v730_v21 = vmax.f32 %v666_v43, 0.0  ;;  %v731_v23 = vmax.f32 %v667_v40, 0.0  ;;  %v732_v18 = vmax.f32 %v668_v26, 0.0  ;;  %v2933_v43 = vld [vmem:[#allocation19_spill] sm:$0xff]  ;;  %v2934_v26 = vld [vmem:[#allocation20_spill] sm:$0xff] }
 0x166   :  { %v1179_v46 = vpack.c.bf16 %v725_v10, %v725_v10  ;;  %v1180_v14 = vpack.c.bf16 %v726_v56, %v726_v56  ;;  %v1181_v42 = vpack.c.bf16 %v727_v4, %v727_v4  ;;  %v1182_v19 = vpack.c.bf16 %v728_v27, %v728_v27  ;;  %v2935_v56 = vld [vmem:[#allocation21_spill] sm:$0xff]  ;;  %v2936_v27 = vld [vmem:[#allocation22_spill] sm:$0xff] }
 0x167   :  { %v1183_v50 = vpack.c.bf16 %v729_v11, %v729_v11  ;;  %v1184_v15 = vpack.c.bf16 %v730_v21, %v730_v21  ;;  %v1185_v51 = vpack.c.bf16 %v731_v23, %v731_v23  ;;  %v1186_v5 = vpack.c.bf16 %v732_v18, %v732_v18  ;;  %v2937_v21 = vld [vmem:[#allocation23_spill] sm:$0xff] }
 0x168   :  { %1046 = vst.msk [vmem:[%s2775_s3 + $0xa0] sm:$0xf] %vm1005_vm1, %v1179_v46  ;;  %1047 = vst.msk [vmem:[%s2775_s3 + $0xa4] sm:$0xf] %vm1005_vm1, %v1180_v14  ;;  %v598_v30 = vmul.f32 %v2317_v44, %v2181_v47  ;;  %v599_v2 = vmul.f32 %v2317_v44, %v2925_v25  ;;  %v600_v37 = vmul.f32 %v2317_v44, %v2197_v59  ;;  %v2927_v59 = vld [vmem:[#allocation13_spill] sm:$0xff] }
 0x169   :  { %1048 = vst.msk [vmem:[%s2775_s3 + $0xa8] sm:$0xf] %vm1005_vm1, %v1181_v42  ;;  %1049 = vst.msk [vmem:[%s2775_s3 + $0xac] sm:$0xf] %vm1005_vm1, %v1182_v19  ;;  %v601_v1 = vmul.f32 %v2317_v44, %v2926_v36  ;;  %v602_v47 = vmul.f32 %v2317_v44, %v2213_v35  ;;  %v603_v31 = vmul.f32 %v2317_v44, %v2927_v59 }
 0x16a   :  { %1050 = vst.msk [vmem:[%s2775_s3 + $0xb0] sm:$0xf] %vm1005_vm1, %v1183_v50  ;;  %1051 = vst.msk [vmem:[%s2775_s3 + $0xb4] sm:$0xf] %vm1005_vm1, %v1184_v15  ;;  %v604_v32 = vmul.f32 %v2317_v44, %v2928_v49  ;;  %v605_v39 = vmul.f32 %v2317_v44, %v2929_v7  ;;  %v669_v60 = vadd.f32 %v2322_v29, %v598_v30 }
 0x16b   :  { %1052 = vst.msk [vmem:[%s2775_s3 + $0xb8] sm:$0xf] %vm1005_vm1, %v1185_v51  ;;  %1053 = vst.msk [vmem:[%s2775_s3 + $0xbc] sm:$0xf] %vm1005_vm1, %v1186_v5  ;;  %v670_v13 = vadd.f32 %v2322_v29, %v599_v2  ;;  %v671_v55 = vadd.f32 %v2322_v29, %v600_v37  ;;  %v672_v33 = vadd.f32 %v2322_v29, %v601_v1 }
 0x16c   :  { %v673_v62 = vadd.f32 %v2322_v29, %v602_v47  ;;  %v674_v35 = vadd.f32 %v2322_v29, %v603_v31  ;;  %v675_v41 = vadd.f32 %v2322_v29, %v604_v32  ;;  %v676_v20 = vadd.f32 %v2322_v29, %v605_v39 }
 0x16d   :  { %v733_v34 = vmax.f32 %v669_v60, 0.0  ;;  %v734_v3 = vmax.f32 %v670_v13, 0.0  ;;  %v735_v58 = vmax.f32 %v671_v55, 0.0  ;;  %v736_v17 = vmax.f32 %v672_v33, 0.0 }
 0x16e   :  { %v737_v57 = vmax.f32 %v673_v62, 0.0  ;;  %v738_v12 = vmax.f32 %v674_v35, 0.0  ;;  %v739_v54 = vmax.f32 %v675_v41, 0.0  ;;  %v740_v0 = vmax.f32 %v676_v20, 0.0 }
 0x16f   :  { %v1187_v53 = vpack.c.bf16 %v733_v34, %v733_v34  ;;  %v1188_v24 = vpack.c.bf16 %v734_v3, %v734_v3  ;;  %v1189_v38 = vpack.c.bf16 %v735_v58, %v735_v58  ;;  %v1190_v61 = vpack.c.bf16 %v736_v17, %v736_v17 }
 0x170   :  { %v1191_v22 = vpack.c.bf16 %v737_v57, %v737_v57  ;;  %v1192_v8 = vpack.c.bf16 %v738_v12, %v738_v12  ;;  %v1193_v52 = vpack.c.bf16 %v739_v54, %v739_v54  ;;  %v1194_v63 = vpack.c.bf16 %v740_v0, %v740_v0 }
 0x171   :  { %1054 = vst.msk [vmem:[%s2775_s3 + $0xc0] sm:$0xf] %vm1005_vm1, %v1187_v53  ;;  %1055 = vst.msk [vmem:[%s2775_s3 + $0xc4] sm:$0xf] %vm1005_vm1, %v1188_v24  ;;  %v606_v48 = vmul.f32 %v2317_v44, %v2930_v6  ;;  %v607_v9 = vmul.f32 %v2317_v44, %v2931_v16  ;;  %v608_v28 = vmul.f32 %v2317_v44, %v2932_v45 }
 0x172   :  { %1056 = vst.msk [vmem:[%s2775_s3 + $0xc8] sm:$0xf] %vm1005_vm1, %v1189_v38  ;;  %1057 = vst.msk [vmem:[%s2775_s3 + $0xcc] sm:$0xf] %vm1005_vm1, %v1190_v61  ;;  %v609_v40 = vmul.f32 %v2317_v44, %v2933_v43  ;;  %v610_v10 = vmul.f32 %v2317_v44, %v2934_v26  ;;  %v611_v4 = vmul.f32 %v2317_v44, %v2935_v56 }
 0x173   :  { %1058 = vst.msk [vmem:[%s2775_s3 + $0xd0] sm:$0xf] %vm1005_vm1, %v1191_v22  ;;  %1059 = vst.msk [vmem:[%s2775_s3 + $0xd4] sm:$0xf] %vm1005_vm1, %v1192_v8  ;;  %v612_v11 = vmul.f32 %v2317_v44, %v2936_v27  ;;  %v613_v23 = vmul.f32 %v2317_v44, %v2937_v21  ;;  %v677_v18 = vadd.f32 %v2322_v29, %v606_v48 }
 0x174   :  { %1060 = vst.msk [vmem:[%s2775_s3 + $0xd8] sm:$0xf] %vm1005_vm1, %v1193_v52  ;;  %1061 = vst.msk [vmem:[%s2775_s3 + $0xdc] sm:$0xf] %vm1005_vm1, %v1194_v63  ;;  %v678_v46 = vadd.f32 %v2322_v29, %v607_v9  ;;  %v679_v14 = vadd.f32 %v2322_v29, %v608_v28  ;;  %v680_v42 = vadd.f32 %v2322_v29, %v609_v40 }
 0x175   :  { %v681_v19 = vadd.f32 %v2322_v29, %v610_v10  ;;  %v682_v50 = vadd.f32 %v2322_v29, %v611_v4  ;;  %v683_v15 = vadd.f32 %v2322_v29, %v612_v11  ;;  %v684_v51 = vadd.f32 %v2322_v29, %v613_v23 }
 0x176   :  { %v741_v5 = vmax.f32 %v677_v18, 0.0  ;;  %v742_v30 = vmax.f32 %v678_v46, 0.0  ;;  %v743_v25 = vmax.f32 %v679_v14, 0.0  ;;  %v744_v44 = vmax.f32 %v680_v42, 0.0 }
 0x177   :  { %v745_v2 = vmax.f32 %v681_v19, 0.0  ;;  %v746_v37 = vmax.f32 %v682_v50, 0.0  ;;  %v747_v36 = vmax.f32 %v683_v15, 0.0  ;;  %v748_v1 = vmax.f32 %v684_v51, 0.0 }
 0x178   :  { %v1195_v47 = vpack.c.bf16 %v741_v5, %v741_v5  ;;  %v1196_v59 = vpack.c.bf16 %v742_v30, %v742_v30  ;;  %v1197_v31 = vpack.c.bf16 %v743_v25, %v743_v25  ;;  %v1198_v49 = vpack.c.bf16 %v744_v44, %v744_v44 }
 0x179   :  { %v1199_v32 = vpack.c.bf16 %v745_v2, %v745_v2  ;;  %v1200_v7 = vpack.c.bf16 %v746_v37, %v746_v37  ;;  %v1201_v39 = vpack.c.bf16 %v747_v36, %v747_v36  ;;  %v1202_v60 = vpack.c.bf16 %v748_v1, %v748_v1 }
 0x17a   :  { %1062 = vst.msk [vmem:[%s2775_s3 + $0xe0] sm:$0xf] %vm1005_vm1, %v1195_v47  ;;  %1063 = vst.msk [vmem:[%s2775_s3 + $0xe4] sm:$0xf] %vm1005_vm1, %v1196_v59 }
 0x17b   :  { %1064 = vst.msk [vmem:[%s2775_s3 + $0xe8] sm:$0xf] %vm1005_vm1, %v1197_v31  ;;  %1065 = vst.msk [vmem:[%s2775_s3 + $0xec] sm:$0xf] %vm1005_vm1, %v1198_v49 }
 0x17c   :  { %1066 = vst.msk [vmem:[%s2775_s3 + $0xf0] sm:$0xf] %vm1005_vm1, %v1199_v32  ;;  %1067 = vst.msk [vmem:[%s2775_s3 + $0xf4] sm:$0xf] %vm1005_vm1, %v1200_v7 }
 0x17d   :  { %1068 = vst.msk [vmem:[%s2775_s3 + $0xf8] sm:$0xf] %vm1005_vm1, %v1201_v39  ;;  %1069 = vst.msk [vmem:[%s2775_s3 + $0xfc] sm:$0xf] %vm1005_vm1, %v1202_v60 }

// kernel: mnist_generator_forward.13
= control target key start
LH: loop header
LB: loop body
LE: loop exit
PB: predicated region body
PF: predicated region fallthrough
CT: control target
= control target key end

     0   :  { %v1464_v0 = vmov 0   ;;  %vm987_vm0 = vcmask 31744   ;;  %s2078_s1 = inlined_call_operand.vmem [shape: bf16[256,4], index: 1, kind: input, shape index: {}]   ;;  %s2079_s0 = inlined_call_operand.vmem [shape: bf16[592,256], index: 0, kind: input, shape index: {}]   ;;  %s2080_s2 = inlined_call_operand.vmem [shape: f32[592,4], index: 2, kind: output, shape index: {}]  }
   0x1   :  { %584 = vmatprep.subr.bf16.mxu0 %v1464_v0  ;;  %v1189_v1 = vld [vmem:[%s2078_s1] sm:$0xff]   ;;  %1156 = vmatprep.subr.bf16.mxu1 %v1464_v0  ;;  %v1190_v2 = vld [vmem:[%s2078_s1 + $0x8] sm:$0xff]   ;;  %v1191_v3 = vld [vmem:[%s2078_s1 + $0x10] sm:$0xff]  }
   0x2   :  { %585 = vmatpush1.bf16.msra.mxu0 %v1189_v1  ;;  %1172 = vmatpush1.bf16.msra.mxu1 %v1189_v1  ;;  %v1192_v4 = vld [vmem:[%s2078_s1 + $0x18] sm:$0xff]   ;;  %v1193_v5 = vld [vmem:[%s2078_s1 + $0x20] sm:$0xff]   ;;  %v1194_v7 = vld [vmem:[%s2078_s1 + $0x28] sm:$0xff]  }
   0x3   :  { %586 = vmatprep.subr.bf16.mxu0 %v1464_v0  ;;  %1157 = vmatprep.subr.bf16.mxu1 %v1464_v0  ;;  %v1207_v6 = vld [vmem:[%s2079_s0 + $0x4] ss:$8 sps:$4 sm:$0xff]   ;;  %v1210_v8 = vld [vmem:[%s2079_s0 + $0x134] ss:$8 sps:$4 sm:$0xff]   ;;  %v1205_v19 = vld [vmem:[%s2079_s0] ss:$8 sps:$4 sm:$0xff]  }
   0x4   :  { %616 = vmatprep.mubr.bf16.mxu0 %v1207_v6  ;;  %768 = vmatprep.mubr.bf16.mxu1 %v1210_v8  ;;  %v1195_v9 = vld [vmem:[%s2078_s1 + $0x30] sm:$0xff]   ;;  %v1196_v10 = vld [vmem:[%s2078_s1 + $0x38] sm:$0xff]   ;;  %v1197_v11 = vld [vmem:[%s2078_s1 + $0x40] sm:$0xff]  }
   0x5   :  { %v1198_v12 = vld [vmem:[%s2078_s1 + $0x48] sm:$0xff]   ;;  %v1199_v13 = vld [vmem:[%s2078_s1 + $0x50] sm:$0xff]   ;;  %v1200_v14 = vld [vmem:[%s2078_s1 + $0x58] sm:$0xff]  }
   0x6   :  { %587 = vmatpush1.bf16.msra.mxu0 %v1190_v2  ;;  %1173 = vmatpush1.bf16.msra.mxu1 %v1190_v2  ;;  %v1201_v15 = vld [vmem:[%s2078_s1 + $0x60] sm:$0xff]   ;;  %v1202_v16 = vld [vmem:[%s2078_s1 + $0x68] sm:$0xff]   ;;  %v1203_v17 = vld [vmem:[%s2078_s1 + $0x70] sm:$0xff]  }
   0x7   :  { %588 = vmatprep.subr.bf16.mxu0 %v1464_v0  ;;  %1158 = vmatprep.subr.bf16.mxu1 %v1464_v0  ;;  %v1204_v18 = vld [vmem:[%s2078_s1 + $0x78] sm:$0xff]   ;;  %v1214_v22 = vld [vmem:[%s2079_s0 + $0x144] ss:$8 sps:$4 sm:$0xff]   ;;  %v1216_v24 = vld [vmem:[%s2079_s0 + $0x140] ss:$8 sps:$4 sm:$0xff]  }
   0x8   :  { %v1208_v20 = vld [vmem:[%s2079_s0 + $0x130] ss:$8 sps:$4 sm:$0xff]   ;;  %v1211_v21 = vld [vmem:[%s2079_s0 + $0x14] ss:$8 sps:$4 sm:$0xff]   ;;  %v1217_v25 = vld [vmem:[%s2079_s0 + $0x24] ss:$8 sps:$4 sm:$0xff]  }
   0x9   :  { %v1213_v23 = vld [vmem:[%s2079_s0 + $0x10] ss:$8 sps:$4 sm:$0xff]   ;;  %v1220_v26 = vld [vmem:[%s2079_s0 + $0x154] ss:$8 sps:$4 sm:$0xff]   ;;  %v1219_v27 = vld [vmem:[%s2079_s0 + $0x20] ss:$8 sps:$4 sm:$0xff]  }
   0xa   :  { %589 = vmatpush1.bf16.msra.mxu0 %v1191_v3  ;;  %1174 = vmatpush1.bf16.msra.mxu1 %v1191_v3  ;;  %v1222_v28 = vld [vmem:[%s2079_s0 + $0x150] ss:$8 sps:$4 sm:$0xff]   ;;  %v1223_v29 = vld [vmem:[%s2079_s0 + $0x34] ss:$8 sps:$4 sm:$0xff]   ;;  %v1226_v30 = vld [vmem:[%s2079_s0 + $0x164] ss:$8 sps:$4 sm:$0xff]  }
   0xb   :  { %590 = vmatprep.subr.bf16.mxu0 %v1464_v0  ;;  %1159 = vmatprep.subr.bf16.mxu1 %v1464_v0  ;;  %v1225_v31 = vld [vmem:[%s2079_s0 + $0x30] ss:$8 sps:$4 sm:$0xff]   ;;  %v1228_v32 = vld [vmem:[%s2079_s0 + $0x160] ss:$8 sps:$4 sm:$0xff]   ;;  %v1229_v33 = vld [vmem:[%s2079_s0 + $0x44] ss:$8 sps:$4 sm:$0xff]  }
   0xc   :  { %v1232_v34 = vld [vmem:[%s2079_s0 + $0x174] ss:$8 sps:$4 sm:$0xff]   ;;  %v1231_v35 = vld [vmem:[%s2079_s0 + $0x40] ss:$8 sps:$4 sm:$0xff]   ;;  %v1234_v36 = vld [vmem:[%s2079_s0 + $0x170] ss:$8 sps:$4 sm:$0xff]  }
   0xd   :  { %v1235_v37 = vld [vmem:[%s2079_s0 + $0x54] ss:$8 sps:$4 sm:$0xff]   ;;  %v1238_v38 = vld [vmem:[%s2079_s0 + $0x184] ss:$8 sps:$4 sm:$0xff]   ;;  %v1237_v39 = vld [vmem:[%s2079_s0 + $0x50] ss:$8 sps:$4 sm:$0xff]  }
   0xe   :  { %591 = vmatpush1.bf16.msra.mxu0 %v1192_v4  ;;  %1175 = vmatpush1.bf16.msra.mxu1 %v1192_v4  ;;  %v1240_v40 = vld [vmem:[%s2079_s0 + $0x180] ss:$8 sps:$4 sm:$0xff]   ;;  %v1241_v41 = vld [vmem:[%s2079_s0 + $0x64] ss:$8 sps:$4 sm:$0xff]   ;;  %v1244_v42 = vld [vmem:[%s2079_s0 + $0x194] ss:$8 sps:$4 sm:$0xff]  }
   0xf   :  { %592 = vmatprep.subr.bf16.mxu0 %v1464_v0  ;;  %1160 = vmatprep.subr.bf16.mxu1 %v1464_v0  ;;  %v1243_v43 = vld [vmem:[%s2079_s0 + $0x60] ss:$8 sps:$4 sm:$0xff]   ;;  %v1246_v44 = vld [vmem:[%s2079_s0 + $0x190] ss:$8 sps:$4 sm:$0xff]   ;;  %v1247_v45 = vld [vmem:[%s2079_s0 + $0x74] ss:$8 sps:$4 sm:$0xff]  }
  0x10   :  { %v1250_v46 = vld [vmem:[%s2079_s0 + $0x1a4] ss:$8 sps:$4 sm:$0xff]   ;;  %v1249_v47 = vld [vmem:[%s2079_s0 + $0x70] ss:$8 sps:$4 sm:$0xff]   ;;  %v1252_v48 = vld [vmem:[%s2079_s0 + $0x1a0] ss:$8 sps:$4 sm:$0xff]  }
  0x11   :  { %v1253_v49 = vld [vmem:[%s2079_s0 + $0x84] ss:$8 sps:$4 sm:$0xff]   ;;  %v1256_v50 = vld [vmem:[%s2079_s0 + $0x1b4] ss:$8 sps:$4 sm:$0xff]   ;;  %v1255_v51 = vld [vmem:[%s2079_s0 + $0x80] ss:$8 sps:$4 sm:$0xff]  }
  0x12   :  { %593 = vmatpush1.bf16.msra.mxu0 %v1193_v5  ;;  %1176 = vmatpush1.bf16.msra.mxu1 %v1193_v5  ;;  %v1258_v52 = vld [vmem:[%s2079_s0 + $0x1b0] ss:$8 sps:$4 sm:$0xff]   ;;  %v1259_v53 = vld [vmem:[%s2079_s0 + $0x94] ss:$8 sps:$4 sm:$0xff]   ;;  %v1262_v54 = vld [vmem:[%s2079_s0 + $0x1c4] ss:$8 sps:$4 sm:$0xff]  }
  0x13   :  { %594 = vmatprep.subr.bf16.mxu0 %v1464_v0  ;;  %1161 = vmatprep.subr.bf16.mxu1 %v1464_v0  ;;  %v1261_v55 = vld [vmem:[%s2079_s0 + $0x90] ss:$8 sps:$4 sm:$0xff]   ;;  %v1264_v56 = vld [vmem:[%s2079_s0 + $0x1c0] ss:$8 sps:$4 sm:$0xff]   ;;  %v1265_v57 = vld [vmem:[%s2079_s0 + $0xa4] ss:$8 sps:$4 sm:$0xff]  }
  0x14   :  { %v1268_v58 = vld [vmem:[%s2079_s0 + $0x1d4] ss:$8 sps:$4 sm:$0xff]   ;;  %v1267_v59 = vld [vmem:[%s2079_s0 + $0xa0] ss:$8 sps:$4 sm:$0xff]   ;;  %v1270_v60 = vld [vmem:[%s2079_s0 + $0x1d0] ss:$8 sps:$4 sm:$0xff]  }
  0x15   :  { %v1271_v61 = vld [vmem:[%s2079_s0 + $0xb4] ss:$8 sps:$4 sm:$0xff]   ;;  %v1274_v62 = vld [vmem:[%s2079_s0 + $0x1e4] ss:$8 sps:$4 sm:$0xff]   ;;  %v1273_v63 = vld [vmem:[%s2079_s0 + $0xb0] ss:$8 sps:$4 sm:$0xff]  }
  0x16   :  { %595 = vmatpush1.bf16.msra.mxu0 %v1194_v7  ;;  %1177 = vmatpush1.bf16.msra.mxu1 %v1194_v7  ;;  %v1277_v1 = vld [vmem:[%s2079_s0 + $0xc4] ss:$8 sps:$4 sm:$0xff]   ;;  %v1280_v2 = vld [vmem:[%s2079_s0 + $0x1f4] ss:$8 sps:$4 sm:$0xff]   ;;  %v1279_v3 = vld [vmem:[%s2079_s0 + $0xc0] ss:$8 sps:$4 sm:$0xff]  }
  0x17   :  { %596 = vmatprep.subr.bf16.mxu0 %v1464_v0  ;;  %1162 = vmatprep.subr.bf16.mxu1 %v1464_v0  ;;  %v1282_v4 = vld [vmem:[%s2079_s0 + $0x1f0] ss:$8 sps:$4 sm:$0xff]   ;;  %v1283_v5 = vld [vmem:[%s2079_s0 + $0xd4] ss:$8 sps:$4 sm:$0xff]   ;;  %v1286_v6 = vld [vmem:[%s2079_s0 + $0x204] ss:$8 sps:$4 sm:$0xff]  }
  0x18   :  { %v1285_v7 = vld [vmem:[%s2079_s0 + $0xd0] ss:$8 sps:$4 sm:$0xff]   ;;  %v1288_v8 = vld [vmem:[%s2079_s0 + $0x200] ss:$8 sps:$4 sm:$0xff]  }
  0x1a   :  { %597 = vmatpush1.bf16.msra.mxu0 %v1195_v9  ;;  %1178 = vmatpush1.bf16.msra.mxu1 %v1195_v9  ;;  %v1289_v9 = vld [vmem:[%s2079_s0 + $0xe4] ss:$8 sps:$4 sm:$0xff]  }
  0x1b   :  { %598 = vmatprep.subr.bf16.mxu0 %v1464_v0  ;;  %1163 = vmatprep.subr.bf16.mxu1 %v1464_v0 }
  0x1e   :  { %599 = vmatpush1.bf16.msra.mxu0 %v1196_v10  ;;  %1179 = vmatpush1.bf16.msra.mxu1 %v1196_v10  ;;  %v1292_v10 = vld [vmem:[%s2079_s0 + $0x214] ss:$8 sps:$4 sm:$0xff]  }
  0x1f   :  { %600 = vmatprep.subr.bf16.mxu0 %v1464_v0  ;;  %1164 = vmatprep.subr.bf16.mxu1 %v1464_v0 }
  0x22   :  { %601 = vmatpush1.bf16.msra.mxu0 %v1197_v11  ;;  %1180 = vmatpush1.bf16.msra.mxu1 %v1197_v11  ;;  %v1291_v11 = vld [vmem:[%s2079_s0 + $0xe0] ss:$8 sps:$4 sm:$0xff]  }
  0x23   :  { %602 = vmatprep.subr.bf16.mxu0 %v1464_v0  ;;  %1165 = vmatprep.subr.bf16.mxu1 %v1464_v0 }
  0x26   :  { %603 = vmatpush1.bf16.msra.mxu0 %v1198_v12  ;;  %1181 = vmatpush1.bf16.msra.mxu1 %v1198_v12  ;;  %v1294_v12 = vld [vmem:[%s2079_s0 + $0x210] ss:$8 sps:$4 sm:$0xff]  }
  0x27   :  { %604 = vmatprep.subr.bf16.mxu0 %v1464_v0  ;;  %1166 = vmatprep.subr.bf16.mxu1 %v1464_v0 }
  0x2a   :  { %605 = vmatpush1.bf16.msra.mxu0 %v1199_v13  ;;  %1182 = vmatpush1.bf16.msra.mxu1 %v1199_v13  ;;  %v1295_v13 = vld [vmem:[%s2079_s0 + $0xf4] ss:$8 sps:$4 sm:$0xff]  }
  0x2b   :  { %606 = vmatprep.subr.bf16.mxu0 %v1464_v0  ;;  %1167 = vmatprep.subr.bf16.mxu1 %v1464_v0 }
  0x2e   :  { %607 = vmatpush1.bf16.msra.mxu0 %v1200_v14  ;;  %1183 = vmatpush1.bf16.msra.mxu1 %v1200_v14  ;;  %v1298_v14 = vld [vmem:[%s2079_s0 + $0x224] ss:$8 sps:$4 sm:$0xff]  }
  0x2f   :  { %608 = vmatprep.subr.bf16.mxu0 %v1464_v0  ;;  %1168 = vmatprep.subr.bf16.mxu1 %v1464_v0 }
  0x32   :  { %609 = vmatpush1.bf16.msra.mxu0 %v1201_v15  ;;  %1184 = vmatpush1.bf16.msra.mxu1 %v1201_v15  ;;  %v1297_v15 = vld [vmem:[%s2079_s0 + $0xf0] ss:$8 sps:$4 sm:$0xff]  }
  0x33   :  { %610 = vmatprep.subr.bf16.mxu0 %v1464_v0  ;;  %1169 = vmatprep.subr.bf16.mxu1 %v1464_v0 }
  0x36   :  { %611 = vmatpush1.bf16.msra.mxu0 %v1202_v16  ;;  %1185 = vmatpush1.bf16.msra.mxu1 %v1202_v16  ;;  %v1300_v16 = vld [vmem:[%s2079_s0 + $0x220] ss:$8 sps:$4 sm:$0xff]  }
  0x37   :  { %612 = vmatprep.subr.bf16.mxu0 %v1464_v0  ;;  %1170 = vmatprep.subr.bf16.mxu1 %v1464_v0 }
  0x3a   :  { %613 = vmatpush1.bf16.msra.mxu0 %v1203_v17  ;;  %1186 = vmatpush1.bf16.msra.mxu1 %v1203_v17  ;;  %v1301_v17 = vld [vmem:[%s2079_s0 + $0x104] ss:$8 sps:$4 sm:$0xff]  }
  0x3b   :  { %614 = vmatprep.subr.bf16.mxu0 %v1464_v0  ;;  %1171 = vmatprep.subr.bf16.mxu1 %v1464_v0  ;;  %v1276_v0 = vld [vmem:[%s2079_s0 + $0x1e0] ss:$8 sps:$4 sm:$0xff]  }
  0x3e   :  { %615 = vmatpush1.bf16.msra.mxu0 %v1204_v18  ;;  %1187 = vmatpush1.bf16.msra.mxu1 %v1204_v18  ;;  %v1304_v18 = vld [vmem:[%s2079_s0 + $0x234] ss:$8 sps:$4 sm:$0xff]  }
  0x41   :  { %617 = vmatmul.mubr.bf16.vlgmr.msra.gmra.mrb[0].mxu0 %v1205_v19  ;;  %769 = vmatmul.mubr.bf16.vlgmr.msra.gmra.mrb[0].mxu1 %v1208_v20  ;;  %v1303_v19 = vld [vmem:[%s2079_s0 + $0x100] ss:$8 sps:$4 sm:$0xff]   ;;  %v1306_v20 = vld [vmem:[%s2079_s0 + $0x230] ss:$8 sps:$4 sm:$0xff]  }
  0x42   :  { %624 = vmatprep.mubr.bf16.mxu0 %v1211_v21  ;;  %776 = vmatprep.mubr.bf16.mxu1 %v1214_v22  ;;  %v1307_v21 = vld [vmem:[%s2079_s0 + $0x114] ss:$8 sps:$4 sm:$0xff]   ;;  %v1310_v22 = vld [vmem:[%s2079_s0 + $0x244] ss:$8 sps:$4 sm:$0xff]  }
  0x49   :  { %625 = vmatmul.mubr.bf16.gmra.mrb[4].mxu0 %v1213_v23  ;;  %777 = vmatmul.mubr.bf16.gmra.mrb[4].mxu1 %v1216_v24  ;;  %v1309_v23 = vld [vmem:[%s2079_s0 + $0x110] ss:$8 sps:$4 sm:$0xff]   ;;  %v1312_v24 = vld [vmem:[%s2079_s0 + $0x240] ss:$8 sps:$4 sm:$0xff]  }
  0x4a   :  { %632 = vmatprep.mubr.bf16.mxu0 %v1217_v25  ;;  %784 = vmatprep.mubr.bf16.mxu1 %v1220_v26  ;;  %v1313_v25 = vld [vmem:[%s2079_s0 + $0x124] ss:$8 sps:$4 sm:$0xff]   ;;  %v1315_v26 = vld [vmem:[%s2079_s0 + $0x120] ss:$8 sps:$4 sm:$0xff]  }
  0x51   :  { %633 = vmatmul.mubr.bf16.gmra.mrb[8].mxu0 %v1219_v27  ;;  %785 = vmatmul.mubr.bf16.gmra.mrb[8].mxu1 %v1222_v28 }
  0x52   :  { %640 = vmatprep.mubr.bf16.mxu0 %v1223_v29  ;;  %792 = vmatprep.mubr.bf16.mxu1 %v1226_v30 }
  0x59   :  { %641 = vmatmul.mubr.bf16.gmra.mrb[12].mxu0 %v1225_v31  ;;  %793 = vmatmul.mubr.bf16.gmra.mrb[12].mxu1 %v1228_v32 }
  0x5a   :  { %648 = vmatprep.mubr.bf16.mxu0 %v1229_v33  ;;  %800 = vmatprep.mubr.bf16.mxu1 %v1232_v34 }
  0x61   :  { %649 = vmatmul.mubr.bf16.gmra.mrb[16].mxu0 %v1231_v35  ;;  %801 = vmatmul.mubr.bf16.gmra.mrb[16].mxu1 %v1234_v36 }
  0x62   :  { %656 = vmatprep.mubr.bf16.mxu0 %v1235_v37  ;;  %808 = vmatprep.mubr.bf16.mxu1 %v1238_v38 }
  0x69   :  { %657 = vmatmul.mubr.bf16.gmra.mrb[20].mxu0 %v1237_v39  ;;  %809 = vmatmul.mubr.bf16.gmra.mrb[20].mxu1 %v1240_v40 }
  0x6a   :  { %664 = vmatprep.mubr.bf16.mxu0 %v1241_v41  ;;  %816 = vmatprep.mubr.bf16.mxu1 %v1244_v42 }
  0x71   :  { %665 = vmatmul.mubr.bf16.gmra.mrb[24].mxu0 %v1243_v43  ;;  %817 = vmatmul.mubr.bf16.gmra.mrb[24].mxu1 %v1246_v44 }
  0x72   :  { %672 = vmatprep.mubr.bf16.mxu0 %v1247_v45  ;;  %824 = vmatprep.mubr.bf16.mxu1 %v1250_v46 }
  0x79   :  { %673 = vmatmul.mubr.bf16.gmra.mrb[28].mxu0 %v1249_v47  ;;  %825 = vmatmul.mubr.bf16.gmra.mrb[28].mxu1 %v1252_v48 }
  0x7a   :  { %680 = vmatprep.mubr.bf16.mxu0 %v1253_v49  ;;  %832 = vmatprep.mubr.bf16.mxu1 %v1256_v50 }
  0x81   :  { %681 = vmatmul.mubr.bf16.gmra.mrb[32].mxu0 %v1255_v51  ;;  %833 = vmatmul.mubr.bf16.gmra.mrb[32].mxu1 %v1258_v52 }
  0x82   :  { %688 = vmatprep.mubr.bf16.mxu0 %v1259_v53  ;;  %840 = vmatprep.mubr.bf16.mxu1 %v1262_v54 }
  0x89   :  { %689 = vmatmul.mubr.bf16.gmra.mrb[36].mxu0 %v1261_v55  ;;  %841 = vmatmul.mubr.bf16.gmra.mrb[36].mxu1 %v1264_v56 }
  0x8a   :  { %696 = vmatprep.mubr.bf16.mxu0 %v1265_v57  ;;  %848 = vmatprep.mubr.bf16.mxu1 %v1268_v58 }
  0x91   :  { %697 = vmatmul.mubr.bf16.gmra.mrb[40].mxu0 %v1267_v59  ;;  %849 = vmatmul.mubr.bf16.gmra.mrb[40].mxu1 %v1270_v60 }
  0x92   :  { %704 = vmatprep.mubr.bf16.mxu0 %v1271_v61  ;;  %856 = vmatprep.mubr.bf16.mxu1 %v1274_v62 }
  0x99   :  { %705 = vmatmul.mubr.bf16.gmra.mrb[44].mxu0 %v1273_v63  ;;  %857 = vmatmul.mubr.bf16.gmra.mrb[44].mxu1 %v1276_v0 }
  0x9a   :  { %712 = vmatprep.mubr.bf16.mxu0 %v1277_v1  ;;  %864 = vmatprep.mubr.bf16.mxu1 %v1280_v2 }
  0xa1   :  { %713 = vmatmul.mubr.bf16.gmra.mrb[48].mxu0 %v1279_v3  ;;  %865 = vmatmul.mubr.bf16.gmra.mrb[48].mxu1 %v1282_v4 }
  0xa2   :  { %720 = vmatprep.mubr.bf16.mxu0 %v1283_v5  ;;  %872 = vmatprep.mubr.bf16.mxu1 %v1286_v6 }
  0xa9   :  { %721 = vmatmul.mubr.bf16.gmra.mrb[52].mxu0 %v1285_v7  ;;  %873 = vmatmul.mubr.bf16.gmra.mrb[52].mxu1 %v1288_v8 }
  0xaa   :  { %728 = vmatprep.mubr.bf16.mxu0 %v1289_v9  ;;  %880 = vmatprep.mubr.bf16.mxu1 %v1292_v10 }
  0xb1   :  { %729 = vmatmul.mubr.bf16.gmra.mrb[56].mxu0 %v1291_v11  ;;  %881 = vmatmul.mubr.bf16.gmra.mrb[56].mxu1 %v1294_v12 }
  0xb2   :  { %736 = vmatprep.mubr.bf16.mxu0 %v1295_v13  ;;  %888 = vmatprep.mubr.bf16.mxu1 %v1298_v14 }
  0xb9   :  { %737 = vmatmul.mubr.bf16.gmra.mrb[60].mxu0 %v1297_v15  ;;  %889 = vmatmul.mubr.bf16.gmra.mrb[60].mxu1 %v1300_v16 }
  0xba   :  { %744 = vmatprep.mubr.bf16.mxu0 %v1301_v17  ;;  %896 = vmatprep.mubr.bf16.mxu1 %v1304_v18 }
  0xc1   :  { %745 = vmatmul.mubr.bf16.gmra.mrb[64].mxu0 %v1303_v19  ;;  %897 = vmatmul.mubr.bf16.gmra.mrb[64].mxu1 %v1306_v20 }
  0xc2   :  { %752 = vmatprep.mubr.bf16.mxu0 %v1307_v21  ;;  %904 = vmatprep.mubr.bf16.mxu1 %v1310_v22 }
  0xc9   :  { %753 = vmatmul.mubr.bf16.gmra.mrb[68].mxu0 %v1309_v23  ;;  %905 = vmatmul.mubr.bf16.gmra.mrb[68].mxu1 %v1312_v24 }
  0xca   :  { %760 = vmatprep.mubr.bf16.mxu0 %v1313_v25 }
  0xd1   :  { %761 = vmatmul.mubr.bf16.gmra.mrb[72].mxu0 %v1315_v26 }
 0x114   :  { %v618_v27 = vpop.f32.mrb[0].mxu0  ;;  %v770_v28 = vpop.f32.mrb[0].mxu1 }
 0x115   :  { %1316 = vtanh.f32 %v618_v27  ;;  %v620_v29 = vpop.f32.mrb[1].mxu0  ;;  %v772_v30 = vpop.f32.mrb[1].mxu1 }
 0x116   :  { %v621_v31 = vpop.f32.mrb[2].mxu0  ;;  %1318 = vtanh.f32 %v770_v28  ;;  %v773_v32 = vpop.f32.mrb[2].mxu1 }
 0x117   :  { %1320 = vtanh.f32 %v621_v31  ;;  %v623_v33 = vpop.f32.mrb[3].mxu0  ;;  %v775_v34 = vpop.f32.mrb[3].mxu1 }
 0x118   :  { %1322 = vtanh.f32 %v773_v32 }
 0x11c   :  { %v626_v35 = vpop.f32.mrb[4].mxu0  ;;  %v778_v36 = vpop.f32.mrb[4].mxu1 }
 0x11d   :  { %1324 = vtanh.f32 %v626_v35  ;;  %v628_v37 = vpop.f32.mrb[5].mxu0  ;;  %v780_v38 = vpop.f32.mrb[5].mxu1 }
 0x11e   :  { %v629_v39 = vpop.f32.mrb[6].mxu0  ;;  %1326 = vtanh.f32 %v778_v36  ;;  %v781_v40 = vpop.f32.mrb[6].mxu1 }
 0x11f   :  { %v1317_v41 = vpop.eup %1316  ;;  %1328 = vtanh.f32 %v629_v39  ;;  %v631_v42 = vpop.f32.mrb[7].mxu0 }
 0x120   :  { %v783_v43 = vpop.f32.mrb[7].mxu1  ;;  %v1319_v44 = vpop.eup %1318  ;;  %988 = vst.msk [vmem:[%s2080_s2] sm:$0xff] %vm987_vm0, %v1317_v41  ;;  %1330 = vtanh.f32 %v781_v40 }
 0x121   :  { %v1321_v45 = vpop.eup %1320  ;;  %1026 = vst.msk [vmem:[%s2080_s2 + $0x130] sm:$0xff] %vm987_vm0, %v1319_v44 }
 0x122   :  { %v1323_v46 = vpop.eup %1322  ;;  %989 = vst.msk [vmem:[%s2080_s2 + $0x8] sm:$0xff] %vm987_vm0, %v1321_v45 }
 0x123   :  { %1027 = vst.msk [vmem:[%s2080_s2 + $0x138] sm:$0xff] %vm987_vm0, %v1323_v46 }
 0x124   :  { %v634_v47 = vpop.f32.mrb[8].mxu0  ;;  %v786_v48 = vpop.f32.mrb[8].mxu1 }
 0x125   :  { %1332 = vtanh.f32 %v634_v47  ;;  %v636_v49 = vpop.f32.mrb[9].mxu0  ;;  %v788_v50 = vpop.f32.mrb[9].mxu1 }
 0x126   :  { %v637_v51 = vpop.f32.mrb[10].mxu0  ;;  %1334 = vtanh.f32 %v786_v48  ;;  %v789_v52 = vpop.f32.mrb[10].mxu1 }
 0x127   :  { %v1325_v53 = vpop.eup %1324  ;;  %1336 = vtanh.f32 %v637_v51  ;;  %v639_v54 = vpop.f32.mrb[11].mxu0 }
 0x128   :  { %v791_v55 = vpop.f32.mrb[11].mxu1  ;;  %v1327_v56 = vpop.eup %1326  ;;  %990 = vst.msk [vmem:[%s2080_s2 + $0x10] sm:$0xff] %vm987_vm0, %v1325_v53  ;;  %1338 = vtanh.f32 %v789_v52 }
 0x129   :  { %v1329_v57 = vpop.eup %1328  ;;  %1028 = vst.msk [vmem:[%s2080_s2 + $0x140] sm:$0xff] %vm987_vm0, %v1327_v56 }
 0x12a   :  { %v1331_v58 = vpop.eup %1330  ;;  %991 = vst.msk [vmem:[%s2080_s2 + $0x18] sm:$0xff] %vm987_vm0, %v1329_v57 }
 0x12b   :  { %1029 = vst.msk [vmem:[%s2080_s2 + $0x148] sm:$0xff] %vm987_vm0, %v1331_v58 }
 0x12c   :  { %v642_v59 = vpop.f32.mrb[12].mxu0  ;;  %v794_v60 = vpop.f32.mrb[12].mxu1 }
 0x12d   :  { %1340 = vtanh.f32 %v642_v59  ;;  %v644_v61 = vpop.f32.mrb[13].mxu0  ;;  %v796_v62 = vpop.f32.mrb[13].mxu1 }
 0x12e   :  { %v645_v63 = vpop.f32.mrb[14].mxu0  ;;  %1342 = vtanh.f32 %v794_v60  ;;  %v797_v0 = vpop.f32.mrb[14].mxu1 }
 0x12f   :  { %v1333_v1 = vpop.eup %1332  ;;  %1344 = vtanh.f32 %v645_v63  ;;  %v647_v2 = vpop.f32.mrb[15].mxu0 }
 0x130   :  { %v799_v3 = vpop.f32.mrb[15].mxu1  ;;  %v1335_v4 = vpop.eup %1334  ;;  %992 = vst.msk [vmem:[%s2080_s2 + $0x20] sm:$0xff] %vm987_vm0, %v1333_v1  ;;  %1346 = vtanh.f32 %v797_v0 }
 0x131   :  { %v1337_v5 = vpop.eup %1336  ;;  %1030 = vst.msk [vmem:[%s2080_s2 + $0x150] sm:$0xff] %vm987_vm0, %v1335_v4 }
 0x132   :  { %v1339_v6 = vpop.eup %1338  ;;  %993 = vst.msk [vmem:[%s2080_s2 + $0x28] sm:$0xff] %vm987_vm0, %v1337_v5 }
 0x133   :  { %1031 = vst.msk [vmem:[%s2080_s2 + $0x158] sm:$0xff] %vm987_vm0, %v1339_v6 }
 0x134   :  { %v650_v7 = vpop.f32.mrb[16].mxu0  ;;  %v802_v8 = vpop.f32.mrb[16].mxu1 }
 0x135   :  { %1348 = vtanh.f32 %v650_v7  ;;  %v652_v9 = vpop.f32.mrb[17].mxu0  ;;  %v804_v10 = vpop.f32.mrb[17].mxu1 }
 0x136   :  { %v653_v11 = vpop.f32.mrb[18].mxu0  ;;  %1350 = vtanh.f32 %v802_v8  ;;  %v805_v12 = vpop.f32.mrb[18].mxu1 }
 0x137   :  { %v1341_v13 = vpop.eup %1340  ;;  %1352 = vtanh.f32 %v653_v11  ;;  %v655_v14 = vpop.f32.mrb[19].mxu0 }
 0x138   :  { %v807_v15 = vpop.f32.mrb[19].mxu1  ;;  %v1343_v16 = vpop.eup %1342  ;;  %994 = vst.msk [vmem:[%s2080_s2 + $0x30] sm:$0xff] %vm987_vm0, %v1341_v13  ;;  %1354 = vtanh.f32 %v805_v12 }
 0x139   :  { %v1345_v17 = vpop.eup %1344  ;;  %1032 = vst.msk [vmem:[%s2080_s2 + $0x160] sm:$0xff] %vm987_vm0, %v1343_v16 }
 0x13a   :  { %v1347_v18 = vpop.eup %1346  ;;  %995 = vst.msk [vmem:[%s2080_s2 + $0x38] sm:$0xff] %vm987_vm0, %v1345_v17 }
 0x13b   :  { %1033 = vst.msk [vmem:[%s2080_s2 + $0x168] sm:$0xff] %vm987_vm0, %v1347_v18 }
 0x13c   :  { %v658_v19 = vpop.f32.mrb[20].mxu0  ;;  %v810_v20 = vpop.f32.mrb[20].mxu1 }
 0x13d   :  { %1356 = vtanh.f32 %v658_v19  ;;  %v660_v21 = vpop.f32.mrb[21].mxu0  ;;  %v812_v22 = vpop.f32.mrb[21].mxu1 }
 0x13e   :  { %v661_v23 = vpop.f32.mrb[22].mxu0  ;;  %1358 = vtanh.f32 %v810_v20  ;;  %v813_v24 = vpop.f32.mrb[22].mxu1 }
 0x13f   :  { %v1349_v25 = vpop.eup %1348  ;;  %1360 = vtanh.f32 %v661_v23  ;;  %v663_v26 = vpop.f32.mrb[23].mxu0 }
 0x140   :  { %v815_v27 = vpop.f32.mrb[23].mxu1  ;;  %v1351_v28 = vpop.eup %1350  ;;  %996 = vst.msk [vmem:[%s2080_s2 + $0x40] sm:$0xff] %vm987_vm0, %v1349_v25  ;;  %1362 = vtanh.f32 %v813_v24 }
 0x141   :  { %v1353_v29 = vpop.eup %1352  ;;  %1034 = vst.msk [vmem:[%s2080_s2 + $0x170] sm:$0xff] %vm987_vm0, %v1351_v28 }
 0x142   :  { %v1355_v30 = vpop.eup %1354  ;;  %997 = vst.msk [vmem:[%s2080_s2 + $0x48] sm:$0xff] %vm987_vm0, %v1353_v29 }
 0x143   :  { %1035 = vst.msk [vmem:[%s2080_s2 + $0x178] sm:$0xff] %vm987_vm0, %v1355_v30 }
 0x144   :  { %v666_v31 = vpop.f32.mrb[24].mxu0  ;;  %v818_v32 = vpop.f32.mrb[24].mxu1 }
 0x145   :  { %1364 = vtanh.f32 %v666_v31  ;;  %v668_v33 = vpop.f32.mrb[25].mxu0  ;;  %v820_v34 = vpop.f32.mrb[25].mxu1 }
 0x146   :  { %v669_v35 = vpop.f32.mrb[26].mxu0  ;;  %1366 = vtanh.f32 %v818_v32  ;;  %v821_v36 = vpop.f32.mrb[26].mxu1 }
 0x147   :  { %v1357_v37 = vpop.eup %1356  ;;  %1368 = vtanh.f32 %v669_v35  ;;  %v671_v38 = vpop.f32.mrb[27].mxu0 }
 0x148   :  { %v823_v39 = vpop.f32.mrb[27].mxu1  ;;  %v1359_v40 = vpop.eup %1358  ;;  %998 = vst.msk [vmem:[%s2080_s2 + $0x50] sm:$0xff] %vm987_vm0, %v1357_v37  ;;  %1370 = vtanh.f32 %v821_v36 }
 0x149   :  { %v1361_v41 = vpop.eup %1360  ;;  %1036 = vst.msk [vmem:[%s2080_s2 + $0x180] sm:$0xff] %vm987_vm0, %v1359_v40 }
 0x14a   :  { %v1363_v42 = vpop.eup %1362  ;;  %999 = vst.msk [vmem:[%s2080_s2 + $0x58] sm:$0xff] %vm987_vm0, %v1361_v41 }
 0x14b   :  { %1037 = vst.msk [vmem:[%s2080_s2 + $0x188] sm:$0xff] %vm987_vm0, %v1363_v42 }
 0x14c   :  { %v674_v43 = vpop.f32.mrb[28].mxu0  ;;  %v826_v44 = vpop.f32.mrb[28].mxu1 }
 0x14d   :  { %1372 = vtanh.f32 %v674_v43  ;;  %v676_v45 = vpop.f32.mrb[29].mxu0  ;;  %v828_v46 = vpop.f32.mrb[29].mxu1 }
 0x14e   :  { %v677_v47 = vpop.f32.mrb[30].mxu0  ;;  %1374 = vtanh.f32 %v826_v44  ;;  %v829_v48 = vpop.f32.mrb[30].mxu1 }
 0x14f   :  { %v1365_v49 = vpop.eup %1364  ;;  %1376 = vtanh.f32 %v677_v47  ;;  %v679_v50 = vpop.f32.mrb[31].mxu0 }
 0x150   :  { %v831_v51 = vpop.f32.mrb[31].mxu1  ;;  %v1367_v52 = vpop.eup %1366  ;;  %1000 = vst.msk [vmem:[%s2080_s2 + $0x60] sm:$0xff] %vm987_vm0, %v1365_v49  ;;  %1378 = vtanh.f32 %v829_v48 }
 0x151   :  { %v1369_v53 = vpop.eup %1368  ;;  %1038 = vst.msk [vmem:[%s2080_s2 + $0x190] sm:$0xff] %vm987_vm0, %v1367_v52 }
 0x152   :  { %v1371_v54 = vpop.eup %1370  ;;  %1001 = vst.msk [vmem:[%s2080_s2 + $0x68] sm:$0xff] %vm987_vm0, %v1369_v53 }
 0x153   :  { %1039 = vst.msk [vmem:[%s2080_s2 + $0x198] sm:$0xff] %vm987_vm0, %v1371_v54 }
 0x154   :  { %v682_v55 = vpop.f32.mrb[32].mxu0  ;;  %v834_v56 = vpop.f32.mrb[32].mxu1 }
 0x155   :  { %1380 = vtanh.f32 %v682_v55  ;;  %v684_v57 = vpop.f32.mrb[33].mxu0  ;;  %v836_v58 = vpop.f32.mrb[33].mxu1 }
 0x156   :  { %v685_v59 = vpop.f32.mrb[34].mxu0  ;;  %1382 = vtanh.f32 %v834_v56  ;;  %v837_v60 = vpop.f32.mrb[34].mxu1 }
 0x157   :  { %v1373_v61 = vpop.eup %1372  ;;  %1384 = vtanh.f32 %v685_v59  ;;  %v687_v62 = vpop.f32.mrb[35].mxu0 }
 0x158   :  { %v839_v63 = vpop.f32.mrb[35].mxu1  ;;  %v1375_v0 = vpop.eup %1374  ;;  %1002 = vst.msk [vmem:[%s2080_s2 + $0x70] sm:$0xff] %vm987_vm0, %v1373_v61  ;;  %1386 = vtanh.f32 %v837_v60 }
 0x159   :  { %v1377_v1 = vpop.eup %1376  ;;  %1040 = vst.msk [vmem:[%s2080_s2 + $0x1a0] sm:$0xff] %vm987_vm0, %v1375_v0 }
 0x15a   :  { %v1379_v2 = vpop.eup %1378  ;;  %1003 = vst.msk [vmem:[%s2080_s2 + $0x78] sm:$0xff] %vm987_vm0, %v1377_v1 }
 0x15b   :  { %1041 = vst.msk [vmem:[%s2080_s2 + $0x1a8] sm:$0xff] %vm987_vm0, %v1379_v2 }
 0x15c   :  { %v690_v3 = vpop.f32.mrb[36].mxu0  ;;  %v842_v4 = vpop.f32.mrb[36].mxu1 }
 0x15d   :  { %1388 = vtanh.f32 %v690_v3  ;;  %v692_v5 = vpop.f32.mrb[37].mxu0  ;;  %v844_v6 = vpop.f32.mrb[37].mxu1 }
 0x15e   :  { %v693_v7 = vpop.f32.mrb[38].mxu0  ;;  %1390 = vtanh.f32 %v842_v4  ;;  %v845_v8 = vpop.f32.mrb[38].mxu1 }
 0x15f   :  { %v1381_v9 = vpop.eup %1380  ;;  %1392 = vtanh.f32 %v693_v7  ;;  %v695_v10 = vpop.f32.mrb[39].mxu0 }
 0x160   :  { %v847_v11 = vpop.f32.mrb[39].mxu1  ;;  %v1383_v12 = vpop.eup %1382  ;;  %1004 = vst.msk [vmem:[%s2080_s2 + $0x80] sm:$0xff] %vm987_vm0, %v1381_v9  ;;  %1394 = vtanh.f32 %v845_v8 }
 0x161   :  { %v1385_v13 = vpop.eup %1384  ;;  %1042 = vst.msk [vmem:[%s2080_s2 + $0x1b0] sm:$0xff] %vm987_vm0, %v1383_v12 }
 0x162   :  { %v1387_v14 = vpop.eup %1386  ;;  %1005 = vst.msk [vmem:[%s2080_s2 + $0x88] sm:$0xff] %vm987_vm0, %v1385_v13 }
 0x163   :  { %1043 = vst.msk [vmem:[%s2080_s2 + $0x1b8] sm:$0xff] %vm987_vm0, %v1387_v14 }
 0x164   :  { %v698_v15 = vpop.f32.mrb[40].mxu0  ;;  %v850_v16 = vpop.f32.mrb[40].mxu1 }
 0x165   :  { %1396 = vtanh.f32 %v698_v15  ;;  %v700_v17 = vpop.f32.mrb[41].mxu0  ;;  %v852_v18 = vpop.f32.mrb[41].mxu1 }
 0x166   :  { %v701_v19 = vpop.f32.mrb[42].mxu0  ;;  %1398 = vtanh.f32 %v850_v16  ;;  %v853_v20 = vpop.f32.mrb[42].mxu1 }
 0x167   :  { %v1389_v21 = vpop.eup %1388  ;;  %1400 = vtanh.f32 %v701_v19  ;;  %v703_v22 = vpop.f32.mrb[43].mxu0 }
 0x168   :  { %v855_v23 = vpop.f32.mrb[43].mxu1  ;;  %v1391_v24 = vpop.eup %1390  ;;  %1006 = vst.msk [vmem:[%s2080_s2 + $0x90] sm:$0xff] %vm987_vm0, %v1389_v21  ;;  %1402 = vtanh.f32 %v853_v20 }
 0x169   :  { %v1393_v25 = vpop.eup %1392  ;;  %1044 = vst.msk [vmem:[%s2080_s2 + $0x1c0] sm:$0xff] %vm987_vm0, %v1391_v24 }
 0x16a   :  { %v1395_v26 = vpop.eup %1394  ;;  %1007 = vst.msk [vmem:[%s2080_s2 + $0x98] sm:$0xff] %vm987_vm0, %v1393_v25 }
 0x16b   :  { %1045 = vst.msk [vmem:[%s2080_s2 + $0x1c8] sm:$0xff] %vm987_vm0, %v1395_v26 }
 0x16c   :  { %v706_v27 = vpop.f32.mrb[44].mxu0  ;;  %v858_v28 = vpop.f32.mrb[44].mxu1 }
 0x16d   :  { %1404 = vtanh.f32 %v706_v27  ;;  %v708_v29 = vpop.f32.mrb[45].mxu0  ;;  %v860_v30 = vpop.f32.mrb[45].mxu1 }
 0x16e   :  { %v709_v31 = vpop.f32.mrb[46].mxu0  ;;  %1406 = vtanh.f32 %v858_v28  ;;  %v861_v32 = vpop.f32.mrb[46].mxu1 }
 0x16f   :  { %v1397_v33 = vpop.eup %1396  ;;  %1408 = vtanh.f32 %v709_v31  ;;  %v711_v34 = vpop.f32.mrb[47].mxu0 }
 0x170   :  { %v863_v35 = vpop.f32.mrb[47].mxu1  ;;  %v1399_v36 = vpop.eup %1398  ;;  %1008 = vst.msk [vmem:[%s2080_s2 + $0xa0] sm:$0xff] %vm987_vm0, %v1397_v33  ;;  %1410 = vtanh.f32 %v861_v32 }
 0x171   :  { %v1401_v37 = vpop.eup %1400  ;;  %1046 = vst.msk [vmem:[%s2080_s2 + $0x1d0] sm:$0xff] %vm987_vm0, %v1399_v36 }
 0x172   :  { %v1403_v38 = vpop.eup %1402  ;;  %1009 = vst.msk [vmem:[%s2080_s2 + $0xa8] sm:$0xff] %vm987_vm0, %v1401_v37 }
 0x173   :  { %1047 = vst.msk [vmem:[%s2080_s2 + $0x1d8] sm:$0xff] %vm987_vm0, %v1403_v38 }
 0x174   :  { %v714_v39 = vpop.f32.mrb[48].mxu0  ;;  %v866_v40 = vpop.f32.mrb[48].mxu1 }
 0x175   :  { %1412 = vtanh.f32 %v714_v39  ;;  %v716_v41 = vpop.f32.mrb[49].mxu0  ;;  %v868_v42 = vpop.f32.mrb[49].mxu1 }
 0x176   :  { %v717_v43 = vpop.f32.mrb[50].mxu0  ;;  %1414 = vtanh.f32 %v866_v40  ;;  %v869_v44 = vpop.f32.mrb[50].mxu1 }
 0x177   :  { %v1405_v45 = vpop.eup %1404  ;;  %1416 = vtanh.f32 %v717_v43  ;;  %v719_v46 = vpop.f32.mrb[51].mxu0 }
 0x178   :  { %v871_v47 = vpop.f32.mrb[51].mxu1  ;;  %v1407_v48 = vpop.eup %1406  ;;  %1010 = vst.msk [vmem:[%s2080_s2 + $0xb0] sm:$0xff] %vm987_vm0, %v1405_v45  ;;  %1418 = vtanh.f32 %v869_v44 }
 0x179   :  { %v1409_v49 = vpop.eup %1408  ;;  %1048 = vst.msk [vmem:[%s2080_s2 + $0x1e0] sm:$0xff] %vm987_vm0, %v1407_v48 }
 0x17a   :  { %v1411_v50 = vpop.eup %1410  ;;  %1011 = vst.msk [vmem:[%s2080_s2 + $0xb8] sm:$0xff] %vm987_vm0, %v1409_v49 }
 0x17b   :  { %1049 = vst.msk [vmem:[%s2080_s2 + $0x1e8] sm:$0xff] %vm987_vm0, %v1411_v50 }
 0x17c   :  { %v722_v51 = vpop.f32.mrb[52].mxu0  ;;  %v874_v52 = vpop.f32.mrb[52].mxu1 }
 0x17d   :  { %1420 = vtanh.f32 %v722_v51  ;;  %v724_v53 = vpop.f32.mrb[53].mxu0  ;;  %v876_v54 = vpop.f32.mrb[53].mxu1 }
 0x17e   :  { %v725_v55 = vpop.f32.mrb[54].mxu0  ;;  %1422 = vtanh.f32 %v874_v52  ;;  %v877_v56 = vpop.f32.mrb[54].mxu1 }
 0x17f   :  { %v1413_v57 = vpop.eup %1412  ;;  %1424 = vtanh.f32 %v725_v55  ;;  %v727_v58 = vpop.f32.mrb[55].mxu0 }
 0x180   :  { %v879_v59 = vpop.f32.mrb[55].mxu1  ;;  %v1415_v60 = vpop.eup %1414  ;;  %1012 = vst.msk [vmem:[%s2080_s2 + $0xc0] sm:$0xff] %vm987_vm0, %v1413_v57  ;;  %1426 = vtanh.f32 %v877_v56 }
 0x181   :  { %v1417_v61 = vpop.eup %1416  ;;  %1050 = vst.msk [vmem:[%s2080_s2 + $0x1f0] sm:$0xff] %vm987_vm0, %v1415_v60 }
 0x182   :  { %v1419_v62 = vpop.eup %1418  ;;  %1013 = vst.msk [vmem:[%s2080_s2 + $0xc8] sm:$0xff] %vm987_vm0, %v1417_v61 }
 0x183   :  { %1051 = vst.msk [vmem:[%s2080_s2 + $0x1f8] sm:$0xff] %vm987_vm0, %v1419_v62 }
 0x184   :  { %v730_v63 = vpop.f32.mrb[56].mxu0  ;;  %v882_v0 = vpop.f32.mrb[56].mxu1 }
 0x185   :  { %1428 = vtanh.f32 %v730_v63  ;;  %v732_v1 = vpop.f32.mrb[57].mxu0  ;;  %v884_v2 = vpop.f32.mrb[57].mxu1 }
 0x186   :  { %v733_v3 = vpop.f32.mrb[58].mxu0  ;;  %1430 = vtanh.f32 %v882_v0  ;;  %v885_v4 = vpop.f32.mrb[58].mxu1 }
 0x187   :  { %v1421_v5 = vpop.eup %1420  ;;  %1432 = vtanh.f32 %v733_v3  ;;  %v735_v6 = vpop.f32.mrb[59].mxu0 }
 0x188   :  { %v887_v7 = vpop.f32.mrb[59].mxu1  ;;  %v1423_v8 = vpop.eup %1422  ;;  %1014 = vst.msk [vmem:[%s2080_s2 + $0xd0] sm:$0xff] %vm987_vm0, %v1421_v5  ;;  %1434 = vtanh.f32 %v885_v4 }
 0x189   :  { %v1425_v9 = vpop.eup %1424  ;;  %1052 = vst.msk [vmem:[%s2080_s2 + $0x200] sm:$0xff] %vm987_vm0, %v1423_v8 }
 0x18a   :  { %v1427_v10 = vpop.eup %1426  ;;  %1015 = vst.msk [vmem:[%s2080_s2 + $0xd8] sm:$0xff] %vm987_vm0, %v1425_v9 }
 0x18b   :  { %1053 = vst.msk [vmem:[%s2080_s2 + $0x208] sm:$0xff] %vm987_vm0, %v1427_v10 }
 0x18c   :  { %v738_v11 = vpop.f32.mrb[60].mxu0  ;;  %v890_v12 = vpop.f32.mrb[60].mxu1 }
 0x18d   :  { %1436 = vtanh.f32 %v738_v11  ;;  %v740_v13 = vpop.f32.mrb[61].mxu0  ;;  %v892_v14 = vpop.f32.mrb[61].mxu1 }
 0x18e   :  { %v741_v15 = vpop.f32.mrb[62].mxu0  ;;  %1438 = vtanh.f32 %v890_v12  ;;  %v893_v16 = vpop.f32.mrb[62].mxu1 }
 0x18f   :  { %v1429_v17 = vpop.eup %1428  ;;  %1440 = vtanh.f32 %v741_v15  ;;  %v743_v18 = vpop.f32.mrb[63].mxu0 }
 0x190   :  { %v895_v19 = vpop.f32.mrb[63].mxu1  ;;  %v1431_v20 = vpop.eup %1430  ;;  %1016 = vst.msk [vmem:[%s2080_s2 + $0xe0] sm:$0xff] %vm987_vm0, %v1429_v17  ;;  %1442 = vtanh.f32 %v893_v16 }
 0x191   :  { %v1433_v21 = vpop.eup %1432  ;;  %1054 = vst.msk [vmem:[%s2080_s2 + $0x210] sm:$0xff] %vm987_vm0, %v1431_v20 }
 0x192   :  { %v1435_v22 = vpop.eup %1434  ;;  %1017 = vst.msk [vmem:[%s2080_s2 + $0xe8] sm:$0xff] %vm987_vm0, %v1433_v21 }
 0x193   :  { %1055 = vst.msk [vmem:[%s2080_s2 + $0x218] sm:$0xff] %vm987_vm0, %v1435_v22 }
 0x194   :  { %v746_v23 = vpop.f32.mrb[64].mxu0  ;;  %v898_v24 = vpop.f32.mrb[64].mxu1 }
 0x195   :  { %1444 = vtanh.f32 %v746_v23  ;;  %v748_v25 = vpop.f32.mrb[65].mxu0  ;;  %v900_v26 = vpop.f32.mrb[65].mxu1 }
 0x196   :  { %v749_v27 = vpop.f32.mrb[66].mxu0  ;;  %1446 = vtanh.f32 %v898_v24  ;;  %v901_v28 = vpop.f32.mrb[66].mxu1 }
 0x197   :  { %v1437_v29 = vpop.eup %1436  ;;  %1448 = vtanh.f32 %v749_v27  ;;  %v751_v30 = vpop.f32.mrb[67].mxu0 }
 0x198   :  { %v903_v31 = vpop.f32.mrb[67].mxu1  ;;  %v1439_v32 = vpop.eup %1438  ;;  %1018 = vst.msk [vmem:[%s2080_s2 + $0xf0] sm:$0xff] %vm987_vm0, %v1437_v29  ;;  %1450 = vtanh.f32 %v901_v28 }
 0x199   :  { %v1441_v33 = vpop.eup %1440  ;;  %1056 = vst.msk [vmem:[%s2080_s2 + $0x220] sm:$0xff] %vm987_vm0, %v1439_v32 }
 0x19a   :  { %v1443_v34 = vpop.eup %1442  ;;  %1019 = vst.msk [vmem:[%s2080_s2 + $0xf8] sm:$0xff] %vm987_vm0, %v1441_v33 }
 0x19b   :  { %1057 = vst.msk [vmem:[%s2080_s2 + $0x228] sm:$0xff] %vm987_vm0, %v1443_v34 }
 0x19c   :  { %v754_v35 = vpop.f32.mrb[68].mxu0  ;;  %v906_v36 = vpop.f32.mrb[68].mxu1 }
 0x19d   :  { %1452 = vtanh.f32 %v754_v35  ;;  %v756_v37 = vpop.f32.mrb[69].mxu0  ;;  %v908_v38 = vpop.f32.mrb[69].mxu1 }
 0x19e   :  { %v757_v39 = vpop.f32.mrb[70].mxu0  ;;  %1454 = vtanh.f32 %v906_v36  ;;  %v909_v40 = vpop.f32.mrb[70].mxu1 }
 0x19f   :  { %v1445_v41 = vpop.eup %1444  ;;  %1456 = vtanh.f32 %v757_v39  ;;  %v759_v42 = vpop.f32.mrb[71].mxu0 }
 0x1a0   :  { %v911_v43 = vpop.f32.mrb[71].mxu1  ;;  %v1447_v44 = vpop.eup %1446  ;;  %1020 = vst.msk [vmem:[%s2080_s2 + $0x100] sm:$0xff] %vm987_vm0, %v1445_v41  ;;  %1458 = vtanh.f32 %v909_v40 }
 0x1a1   :  { %v1449_v45 = vpop.eup %1448  ;;  %1058 = vst.msk [vmem:[%s2080_s2 + $0x230] sm:$0xff] %vm987_vm0, %v1447_v44 }
 0x1a2   :  { %v1451_v46 = vpop.eup %1450  ;;  %1021 = vst.msk [vmem:[%s2080_s2 + $0x108] sm:$0xff] %vm987_vm0, %v1449_v45 }
 0x1a3   :  { %1059 = vst.msk [vmem:[%s2080_s2 + $0x238] sm:$0xff] %vm987_vm0, %v1451_v46 }
 0x1a4   :  { %v762_v47 = vpop.f32.mrb[72].mxu0 }
 0x1a5   :  { %1460 = vtanh.f32 %v762_v47  ;;  %v764_v48 = vpop.f32.mrb[73].mxu0 }
 0x1a6   :  { %v765_v49 = vpop.f32.mrb[74].mxu0 }
 0x1a7   :  { %v1453_v50 = vpop.eup %1452  ;;  %1462 = vtanh.f32 %v765_v49  ;;  %v767_v51 = vpop.f32.mrb[75].mxu0 }
 0x1a8   :  { %v1455_v52 = vpop.eup %1454  ;;  %1022 = vst.msk [vmem:[%s2080_s2 + $0x110] sm:$0xff] %vm987_vm0, %v1453_v50 }
 0x1a9   :  { %v1457_v53 = vpop.eup %1456  ;;  %1060 = vst.msk [vmem:[%s2080_s2 + $0x240] sm:$0xff] %vm987_vm0, %v1455_v52 }
 0x1aa   :  { %v1459_v54 = vpop.eup %1458  ;;  %1023 = vst.msk [vmem:[%s2080_s2 + $0x118] sm:$0xff] %vm987_vm0, %v1457_v53 }
 0x1ab   :  { %1061 = vst.msk [vmem:[%s2080_s2 + $0x248] sm:$0xff] %vm987_vm0, %v1459_v54 }
 0x1af   :  { %v1461_v55 = vpop.eup %1460 }
 0x1b0   :  { %1024 = vst.msk [vmem:[%s2080_s2 + $0x120] sm:$0xff] %vm987_vm0, %v1461_v55 }
 0x1b1   :  { %v1463_v56 = vpop.eup %1462 }
 0x1b2   :  { %1025 = vst.msk [vmem:[%s2080_s2 + $0x128] sm:$0xff] %vm987_vm0, %v1463_v56 }

</bundles_post_ra>
